<compile_context>
chip_gen: v7x
topology: tpu7x:2x2x1
jax: 0.10.0
libtpu: 0.0.40
codegen_flags: <defaults>
</compile_context>

<pallas_src>
import functools

import jax
import jax.numpy as jnp
import numpy as np
from jax.experimental import pallas as pl
from jax.experimental.pallas import tpu as pltpu

CPAD = 128      # channel lanes (zero-padded)
NCLS = 10       # output classes
C1 = 10         # conv1 out channels
C2 = 10         # conv2 out channels
KT = 3          # conv kernel size


# ----------------------------------------------------------------------------
# Fused kernel: conv1+ReLU -> conv2+ReLU -> flatten+FC, one batch sample/step
# ----------------------------------------------------------------------------
def _network_kernel(x_ref, w1_ref, b1_ref, w2_ref, b2_ref, wfc_ref, bfc_ref,
                    o_ref, h1_scr, h2_scr, *, W, R, PADR):
    f32 = jnp.float32

    # ---- conv1 + ReLU : Cin=1 -> 9 shifted VPU multiply-adds (no MXU) ------
    acc1 = jnp.zeros((R, CPAD), f32)
    for dy in range(KT):
        for dx in range(KT):
            t = dy * KT + dx
            s = dy * W + dx
            # (R,1) input column * (1,128) per-tap weight row -> (R,128)
            acc1 = acc1 + x_ref[0, s:s + R, :] * w1_ref[t:t + 1, :]
    h1_scr[0:R, :] = jnp.maximum(acc1 + b1_ref[...], 0.0)
    # keep the shift-slack rows finite (they only feed invalid output rows)
    h1_scr[R:R + PADR, :] = jnp.zeros((PADR, CPAD), f32)

    # ---- conv2 + ReLU : 9 shifted (R,128)x(128,128) MXU matmuls ------------
    acc2 = jnp.zeros((R, CPAD), f32)
    for dy in range(KT):
        for dx in range(KT):
            t = dy * KT + dx
            s = dy * W + dx
            acc2 = acc2 + jnp.dot(h1_scr[s:s + R, :], w2_ref[t],
                                  preferred_element_type=f32)
    h2_scr[...] = jnp.maximum(acc2 + b2_ref[...], 0.0)

    # ---- flatten + FC : flatten order folded into the weight canvas --------
    lane = jax.lax.broadcasted_iota(jnp.int32, (1, CPAD), 1)
    row = bfc_ref[...]                                    # (1,128), zero-padded
    for n in range(NCLS):
        s_n = jnp.sum(h2_scr[...] * wfc_ref[n])           # scalar logit n
        row = row + jnp.where(lane == n, s_n, 0.0)

    # lane-dense (8,128) output block, logits in sublane 0
    row_idx = jax.lax.broadcasted_iota(jnp.int32, (8, CPAD), 0)
    o_ref[0] = jnp.where(row_idx == 0, jnp.broadcast_to(row, (8, CPAD)), 0.0)


# ----------------------------------------------------------------------------
# One-time weight prep: pad to lane-dense canvases, fold flatten order into wfc
# ----------------------------------------------------------------------------
def prepare_params(params, H, W):
    Ho2, Wo2 = H - 4, W - 4
    R = H * W
    f32 = jnp.float32

    w1 = params["w1"].reshape(KT * KT, C1)                 # (9, 10)
    w1p = jnp.zeros((KT * KT, CPAD), f32).at[:, :C1].set(w1)
    b1p = jnp.zeros((1, CPAD), f32).at[0, :C1].set(params["b1"])

    w2 = params["w2"].reshape(KT * KT, C1, C2)             # (9, 10, 10)
    w2p = jnp.zeros((KT * KT, CPAD, CPAD), f32).at[:, :C1, :C2].set(w2)
    b2p = jnp.zeros((1, CPAD), f32).at[0, :C2].set(params["b2"])

    # wfc rows are in PyTorch NCHW flatten order (c, h, w).  Re-lay-out to a
    # per-class canvas wcan[n, h*W + w, c]; zero elsewhere.
    wfc = params["wfc"].reshape(C2, Ho2, Wo2, NCLS)        # (c, h, w, n)
    wfc = jnp.transpose(wfc, (3, 1, 2, 0))                 # (n, h, w, c)
    wfc = jnp.pad(wfc, ((0, 0), (0, H - Ho2), (0, W - Wo2), (0, CPAD - C2)))
    wfcp = wfc.reshape(NCLS, R, CPAD).astype(f32)
    bfcp = jnp.zeros((1, CPAD), f32).at[0, :NCLS].set(params["bfc"])

    return {"w1": w1p, "b1": b1p, "w2": w2p, "b2": b2p,
            "wfc": wfcp, "bfc": bfcp}


# ----------------------------------------------------------------------------
# Forward pass: one fused pallas_call, grid over the batch
# ----------------------------------------------------------------------------
def network_forward(x_nchw, prep):
    B, _, H, W = x_nchw.shape
    R = H * W
    PADR = ((2 * W + 2) + 7) // 8 * 8                      # shift slack rows

    # input canvas: row = h*W + w, single channel column, zero slack rows
    x_can = x_nchw.reshape(B, R, 1).astype(jnp.float32)
    x_can = jnp.pad(x_can, ((0, 0), (0, PADR), (0, 0)))

    kernel = functools.partial(_network_kernel, W=W, R=R, PADR=PADR)
    out = pl.pallas_call(
        kernel,
        out_shape=jax.ShapeDtypeStruct((B, 8, CPAD), jnp.float32),
        grid_spec=pltpu.PrefetchScalarGridSpec(
            num_scalar_prefetch=0,
            grid=(B,),
            in_specs=[
                pl.BlockSpec((1, R + PADR, 1), lambda b: (b, 0, 0)),
                pl.BlockSpec((KT * KT, CPAD), lambda b: (0, 0)),
                pl.BlockSpec((1, CPAD), lambda b: (0, 0)),
                pl.BlockSpec((KT * KT, CPAD, CPAD), lambda b: (0, 0, 0)),
                pl.BlockSpec((1, CPAD), lambda b: (0, 0)),
                pl.BlockSpec((NCLS, R, CPAD), lambda b: (0, 0, 0)),
                pl.BlockSpec((1, CPAD), lambda b: (0, 0)),
            ],
            out_specs=pl.BlockSpec((1, 8, CPAD), lambda b: (b, 0, 0)),
            scratch_shapes=[
                pltpu.VMEM((R + PADR, CPAD), jnp.float32),   # h1 canvas
                pltpu.VMEM((R, CPAD), jnp.float32),          # h2 canvas
            ],
        ),
        compiler_params=pltpu.CompilerParams(
            dimension_semantics=("parallel",),
            vmem_limit_bytes=32 * 1024 * 1024,
        ),
    )(x_can, prep["w1"], prep["b1"], prep["w2"], prep["b2"],
      prep["wfc"], prep["bfc"])

    return out[:, 0, :NCLS]                                # (B, 10)


# ----------------------------------------------------------------------------
# Deterministic parameter init (PyTorch-style uniform(-1/sqrt(fan_in), ...))
# Conv weights stored HWIO; FC weight stored (in_features, out) with rows in
# PyTorch NCHW flatten order.
# ----------------------------------------------------------------------------
def init_params(key, in_h, in_w):
    k1, k2, k3, k4, k5, k6 = jax.random.split(key, 6)

    def uni(k, shape, fan_in):
        bound = 1.0 / np.sqrt(fan_in)
        return jax.random.uniform(k, shape, jnp.float32, -bound, bound)

    fc_in = C2 * (in_h - 4) * (in_w - 4)
    return {
        "w1": uni(k1, (KT, KT, 1, C1), 1 * KT * KT),
        "b1": uni(k2, (C1,), 1 * KT * KT),
        "w2": uni(k3, (KT, KT, C1, C2), C1 * KT * KT),
        "b2": uni(k4, (C2,), C1 * KT * KT),
        "wfc": uni(k5, (fc_in, NCLS), fc_in),
        "bfc": uni(k6, (NCLS,), fc_in),
    }


# ----------------------------------------------------------------------------
# Pure-JAX reference (correctness check)
# ----------------------------------------------------------------------------
def reference_forward(x_nchw, params):
    hp = jax.lax.Precision.HIGHEST
    x = jnp.transpose(x_nchw, (0, 2, 3, 1))
    dn = ("NHWC", "HWIO", "NHWC")
    x = jax.lax.conv_general_dilated(x, params["w1"], (1, 1), "VALID",
                                     dimension_numbers=dn,
                                     precision=hp) + params["b1"]
    x = jnp.maximum(x, 0.0)
    x = jax.lax.conv_general_dilated(x, params["w2"], (1, 1), "VALID",
                                     dimension_numbers=dn,
                                     precision=hp) + params["b2"]
    x = jnp.maximum(x, 0.0)
    flat = jnp.transpose(x, (0, 3, 1, 2)).reshape(x.shape[0], -1)  # NCHW flatten
    return jnp.dot(flat, params["wfc"], precision=hp) + params["bfc"]


if __name__ == "__main__":
    key = jax.random.PRNGKey(0)
    k_x, k_p = jax.random.split(key)

    B, C, H, W = 2, 1, 16, 16                  # small MNIST-like input
    x = jax.random.normal(k_x, (B, C, H, W), jnp.float32)
    params = init_params(k_p, H, W)
    prep = jax.tree_util.tree_map(jnp.asarray, prepare_params(params, H, W))

    fwd = jax.jit(network_forward)
    logits = jax.block_until_ready(fwd(x, prep))
    assert logits.shape == (B, NCLS), logits.shape

    ref = jax.block_until_ready(reference_forward(x, params))
    np.testing.assert_allclose(np.asarray(logits), np.asarray(ref),
                               rtol=1e-3, atol=1e-3)

    print("KERNEL_OK")
</pallas_src>

<mosaic_0001>
module attributes {stable_mosaic.version = 11 : i64} {
  func.func @_network_kernel(%arg0: i32, %arg1: memref<1x296x1xf32, #tpu.memory_space<vmem>>, %arg2: memref<9x128xf32, #tpu.memory_space<vmem>>, %arg3: memref<1x128xf32, #tpu.memory_space<vmem>>, %arg4: memref<9x128x128xf32, #tpu.memory_space<vmem>>, %arg5: memref<1x128xf32, #tpu.memory_space<vmem>>, %arg6: memref<10x256x128xf32, #tpu.memory_space<vmem>>, %arg7: memref<1x128xf32, #tpu.memory_space<vmem>>, %arg8: memref<1x8x128xf32, #tpu.memory_space<vmem>>, %arg9: memref<296x128xf32, #tpu.memory_space<vmem>>, %arg10: memref<256x128xf32, #tpu.memory_space<vmem>>) attributes {dimension_semantics = [#tpu.dimension_semantics<parallel>], iteration_bounds = array<i64: 2>, scalar_prefetch = 0 : i64, scratch_operands = 2 : i64, tpu.core_type = #tpu.core_type<tc>, window_params = [{transform_indices = @transform_0, window_bounds = array<i64: 1, 296, 1>}, {pipeline_mode = #tpu.pipeline_mode<synchronous>, transform_indices = @transform_1, window_bounds = array<i64: 9, 128>}, {pipeline_mode = #tpu.pipeline_mode<synchronous>, transform_indices = @transform_2, window_bounds = array<i64: 1, 128>}, {pipeline_mode = #tpu.pipeline_mode<synchronous>, transform_indices = @transform_3, window_bounds = array<i64: 9, 128, 128>}, {pipeline_mode = #tpu.pipeline_mode<synchronous>, transform_indices = @transform_4, window_bounds = array<i64: 1, 128>}, {pipeline_mode = #tpu.pipeline_mode<synchronous>, transform_indices = @transform_5, window_bounds = array<i64: 10, 256, 128>}, {pipeline_mode = #tpu.pipeline_mode<synchronous>, transform_indices = @transform_6, window_bounds = array<i64: 1, 128>}, {transform_indices = @transform_7, window_bounds = array<i64: 1, 8, 128>}]} {
    %cst = arith.constant 0.000000e+00 : f32
    %0 = vector.broadcast %cst : f32 to vector<256x128xf32>
    %c0 = arith.constant 0 : index
    %c0_0 = arith.constant 0 : index
    %c0_1 = arith.constant 0 : index
    %1 = vector.load %arg1[%c0, %c0_0, %c0_1] : memref<1x296x1xf32, #tpu.memory_space<vmem>>, vector<1x256x1xf32>
    %2 = vector.shape_cast %1 : vector<1x256x1xf32> to vector<256x1xf32>
    %c0_2 = arith.constant 0 : index
    %c0_3 = arith.constant 0 : index
    %3 = vector.load %arg2[%c0_2, %c0_3] : memref<9x128xf32, #tpu.memory_space<vmem>>, vector<1x128xf32>
    %4 = vector.broadcast %2 : vector<256x1xf32> to vector<256x128xf32>
    %5 = vector.broadcast %3 : vector<1x128xf32> to vector<256x128xf32>
    %6 = arith.mulf %4, %5 : vector<256x128xf32>
    %7 = arith.addf %0, %6 : vector<256x128xf32>
    %c0_4 = arith.constant 0 : index
    %c1 = arith.constant 1 : index
    %c0_5 = arith.constant 0 : index
    %8 = vector.load %arg1[%c0_4, %c1, %c0_5] : memref<1x296x1xf32, #tpu.memory_space<vmem>>, vector<1x256x1xf32>
    %9 = vector.shape_cast %8 : vector<1x256x1xf32> to vector<256x1xf32>
    %c1_6 = arith.constant 1 : index
    %c0_7 = arith.constant 0 : index
    %10 = vector.load %arg2[%c1_6, %c0_7] : memref<9x128xf32, #tpu.memory_space<vmem>>, vector<1x128xf32>
    %11 = vector.broadcast %9 : vector<256x1xf32> to vector<256x128xf32>
    %12 = vector.broadcast %10 : vector<1x128xf32> to vector<256x128xf32>
    %13 = arith.mulf %11, %12 : vector<256x128xf32>
    %14 = arith.addf %7, %13 : vector<256x128xf32>
    %c0_8 = arith.constant 0 : index
    %c2 = arith.constant 2 : index
    %c0_9 = arith.constant 0 : index
    %15 = vector.load %arg1[%c0_8, %c2, %c0_9] : memref<1x296x1xf32, #tpu.memory_space<vmem>>, vector<1x256x1xf32>
    %16 = vector.shape_cast %15 : vector<1x256x1xf32> to vector<256x1xf32>
    %c2_10 = arith.constant 2 : index
    %c0_11 = arith.constant 0 : index
    %17 = vector.load %arg2[%c2_10, %c0_11] : memref<9x128xf32, #tpu.memory_space<vmem>>, vector<1x128xf32>
    %18 = vector.broadcast %16 : vector<256x1xf32> to vector<256x128xf32>
    %19 = vector.broadcast %17 : vector<1x128xf32> to vector<256x128xf32>
    %20 = arith.mulf %18, %19 : vector<256x128xf32>
    %21 = arith.addf %14, %20 : vector<256x128xf32>
    %c0_12 = arith.constant 0 : index
    %c16 = arith.constant 16 : index
    %c0_13 = arith.constant 0 : index
    %22 = vector.load %arg1[%c0_12, %c16, %c0_13] : memref<1x296x1xf32, #tpu.memory_space<vmem>>, vector<1x256x1xf32>
    %23 = vector.shape_cast %22 : vector<1x256x1xf32> to vector<256x1xf32>
    %c3 = arith.constant 3 : index
    %c0_14 = arith.constant 0 : index
    %24 = vector.load %arg2[%c3, %c0_14] : memref<9x128xf32, #tpu.memory_space<vmem>>, vector<1x128xf32>
    %25 = vector.broadcast %23 : vector<256x1xf32> to vector<256x128xf32>
    %26 = vector.broadcast %24 : vector<1x128xf32> to vector<256x128xf32>
    %27 = arith.mulf %25, %26 : vector<256x128xf32>
    %28 = arith.addf %21, %27 : vector<256x128xf32>
    %c0_15 = arith.constant 0 : index
    %c17 = arith.constant 17 : index
    %c0_16 = arith.constant 0 : index
    %29 = vector.load %arg1[%c0_15, %c17, %c0_16] : memref<1x296x1xf32, #tpu.memory_space<vmem>>, vector<1x256x1xf32>
    %30 = vector.shape_cast %29 : vector<1x256x1xf32> to vector<256x1xf32>
    %c4 = arith.constant 4 : index
    %c0_17 = arith.constant 0 : index
    %31 = vector.load %arg2[%c4, %c0_17] : memref<9x128xf32, #tpu.memory_space<vmem>>, vector<1x128xf32>
    %32 = vector.broadcast %30 : vector<256x1xf32> to vector<256x128xf32>
    %33 = vector.broadcast %31 : vector<1x128xf32> to vector<256x128xf32>
    %34 = arith.mulf %32, %33 : vector<256x128xf32>
    %35 = arith.addf %28, %34 : vector<256x128xf32>
    %c0_18 = arith.constant 0 : index
    %c18 = arith.constant 18 : index
    %c0_19 = arith.constant 0 : index
    %36 = vector.load %arg1[%c0_18, %c18, %c0_19] : memref<1x296x1xf32, #tpu.memory_space<vmem>>, vector<1x256x1xf32>
    %37 = vector.shape_cast %36 : vector<1x256x1xf32> to vector<256x1xf32>
    %c5 = arith.constant 5 : index
    %c0_20 = arith.constant 0 : index
    %38 = vector.load %arg2[%c5, %c0_20] : memref<9x128xf32, #tpu.memory_space<vmem>>, vector<1x128xf32>
    %39 = vector.broadcast %37 : vector<256x1xf32> to vector<256x128xf32>
    %40 = vector.broadcast %38 : vector<1x128xf32> to vector<256x128xf32>
    %41 = arith.mulf %39, %40 : vector<256x128xf32>
    %42 = arith.addf %35, %41 : vector<256x128xf32>
    %c0_21 = arith.constant 0 : index
    %c32 = arith.constant 32 : index
    %c0_22 = arith.constant 0 : index
    %43 = vector.load %arg1[%c0_21, %c32, %c0_22] : memref<1x296x1xf32, #tpu.memory_space<vmem>>, vector<1x256x1xf32>
    %44 = vector.shape_cast %43 : vector<1x256x1xf32> to vector<256x1xf32>
    %c6 = arith.constant 6 : index
    %c0_23 = arith.constant 0 : index
    %45 = vector.load %arg2[%c6, %c0_23] : memref<9x128xf32, #tpu.memory_space<vmem>>, vector<1x128xf32>
    %46 = vector.broadcast %44 : vector<256x1xf32> to vector<256x128xf32>
    %47 = vector.broadcast %45 : vector<1x128xf32> to vector<256x128xf32>
    %48 = arith.mulf %46, %47 : vector<256x128xf32>
    %49 = arith.addf %42, %48 : vector<256x128xf32>
    %c0_24 = arith.constant 0 : index
    %c33 = arith.constant 33 : index
    %c0_25 = arith.constant 0 : index
    %50 = vector.load %arg1[%c0_24, %c33, %c0_25] : memref<1x296x1xf32, #tpu.memory_space<vmem>>, vector<1x256x1xf32>
    %51 = vector.shape_cast %50 : vector<1x256x1xf32> to vector<256x1xf32>
    %c7 = arith.constant 7 : index
    %c0_26 = arith.constant 0 : index
    %52 = vector.load %arg2[%c7, %c0_26] : memref<9x128xf32, #tpu.memory_space<vmem>>, vector<1x128xf32>
    %53 = vector.broadcast %51 : vector<256x1xf32> to vector<256x128xf32>
    %54 = vector.broadcast %52 : vector<1x128xf32> to vector<256x128xf32>
    %55 = arith.mulf %53, %54 : vector<256x128xf32>
    %56 = arith.addf %49, %55 : vector<256x128xf32>
    %c0_27 = arith.constant 0 : index
    %c34 = arith.constant 34 : index
    %c0_28 = arith.constant 0 : index
    %57 = vector.load %arg1[%c0_27, %c34, %c0_28] : memref<1x296x1xf32, #tpu.memory_space<vmem>>, vector<1x256x1xf32>
    %58 = vector.shape_cast %57 : vector<1x256x1xf32> to vector<256x1xf32>
    %c8 = arith.constant 8 : index
    %c0_29 = arith.constant 0 : index
    %59 = vector.load %arg2[%c8, %c0_29] : memref<9x128xf32, #tpu.memory_space<vmem>>, vector<1x128xf32>
    %60 = vector.broadcast %58 : vector<256x1xf32> to vector<256x128xf32>
    %61 = vector.broadcast %59 : vector<1x128xf32> to vector<256x128xf32>
    %62 = arith.mulf %60, %61 : vector<256x128xf32>
    %63 = arith.addf %56, %62 : vector<256x128xf32>
    %c0_30 = arith.constant 0 : index
    %c0_31 = arith.constant 0 : index
    %64 = vector.load %arg3[%c0_30, %c0_31] : memref<1x128xf32, #tpu.memory_space<vmem>>, vector<1x128xf32>
    %65 = vector.broadcast %64 : vector<1x128xf32> to vector<256x128xf32>
    %66 = arith.addf %63, %65 : vector<256x128xf32>
    %cst_32 = arith.constant 0.000000e+00 : f32
    %67 = vector.broadcast %cst_32 : f32 to vector<256x128xf32>
    %68 = arith.maximumf %66, %67 : vector<256x128xf32>
    %c0_33 = arith.constant 0 : index
    %c0_34 = arith.constant 0 : index
    %69 = vector.load %arg9[%c0_33, %c0_34] : memref<296x128xf32, #tpu.memory_space<vmem>>, vector<256x128xf32>
    tpu.vector_store %arg9[%c0_33, %c0_34], %68 {strides = array<i32>} : memref<296x128xf32, #tpu.memory_space<vmem>>, vector<256x128xf32>,
    %cst_35 = arith.constant 0.000000e+00 : f32
    %70 = vector.broadcast %cst_35 : f32 to vector<40x128xf32>
    %c256 = arith.constant 256 : index
    %c0_36 = arith.constant 0 : index
    %71 = vector.load %arg9[%c256, %c0_36] : memref<296x128xf32, #tpu.memory_space<vmem>>, vector<40x128xf32>
    tpu.vector_store %arg9[%c256, %c0_36], %70 {strides = array<i32>} : memref<296x128xf32, #tpu.memory_space<vmem>>, vector<40x128xf32>,
    %cst_37 = arith.constant 0.000000e+00 : f32
    %72 = vector.broadcast %cst_37 : f32 to vector<256x128xf32>
    %c0_38 = arith.constant 0 : index
    %c0_39 = arith.constant 0 : index
    %73 = vector.load %arg9[%c0_38, %c0_39] : memref<296x128xf32, #tpu.memory_space<vmem>>, vector<256x128xf32>
    %c0_40 = arith.constant 0 : index
    %c0_41 = arith.constant 0 : index
    %c0_42 = arith.constant 0 : index
    %74 = vector.load %arg4[%c0_40, %c0_41, %c0_42] : memref<9x128x128xf32, #tpu.memory_space<vmem>>, vector<1x128x128xf32>
    %75 = vector.shape_cast %74 : vector<1x128x128xf32> to vector<128x128xf32>
    %cst_43 = arith.constant dense<0.000000e+00> : vector<256x128xf32>
    %76 = tpu.matmul %73, %75, %cst_43 {dimension_numbers = #tpu.dot_dimension_numbers<[1], [0], [0], [1], [0, 0, 1, 1], [], []>} : vector<256x128xf32>, vector<128x128xf32>, vector<256x128xf32> -> vector<256x128xf32>
    %77 = arith.addf %72, %76 : vector<256x128xf32>
    %c1_44 = arith.constant 1 : index
    %c0_45 = arith.constant 0 : index
    %78 = vector.load %arg9[%c1_44, %c0_45] : memref<296x128xf32, #tpu.memory_space<vmem>>, vector<256x128xf32>
    %c1_46 = arith.constant 1 : index
    %c0_47 = arith.constant 0 : index
    %c0_48 = arith.constant 0 : index
    %79 = vector.load %arg4[%c1_46, %c0_47, %c0_48] : memref<9x128x128xf32, #tpu.memory_space<vmem>>, vector<1x128x128xf32>
    %80 = vector.shape_cast %79 : vector<1x128x128xf32> to vector<128x128xf32>
    %cst_49 = arith.constant dense<0.000000e+00> : vector<256x128xf32>
    %81 = tpu.matmul %78, %80, %cst_49 {dimension_numbers = #tpu.dot_dimension_numbers<[1], [0], [0], [1], [0, 0, 1, 1], [], []>} : vector<256x128xf32>, vector<128x128xf32>, vector<256x128xf32> -> vector<256x128xf32>
    %82 = arith.addf %77, %81 : vector<256x128xf32>
    %c2_50 = arith.constant 2 : index
    %c0_51 = arith.constant 0 : index
    %83 = vector.load %arg9[%c2_50, %c0_51] : memref<296x128xf32, #tpu.memory_space<vmem>>, vector<256x128xf32>
    %c2_52 = arith.constant 2 : index
    %c0_53 = arith.constant 0 : index
    %c0_54 = arith.constant 0 : index
    %84 = vector.load %arg4[%c2_52, %c0_53, %c0_54] : memref<9x128x128xf32, #tpu.memory_space<vmem>>, vector<1x128x128xf32>
    %85 = vector.shape_cast %84 : vector<1x128x128xf32> to vector<128x128xf32>
    %cst_55 = arith.constant dense<0.000000e+00> : vector<256x128xf32>
    %86 = tpu.matmul %83, %85, %cst_55 {dimension_numbers = #tpu.dot_dimension_numbers<[1], [0], [0], [1], [0, 0, 1, 1], [], []>} : vector<256x128xf32>, vector<128x128xf32>, vector<256x128xf32> -> vector<256x128xf32>
    %87 = arith.addf %82, %86 : vector<256x128xf32>
    %c16_56 = arith.constant 16 : index
    %c0_57 = arith.constant 0 : index
    %88 = vector.load %arg9[%c16_56, %c0_57] : memref<296x128xf32, #tpu.memory_space<vmem>>, vector<256x128xf32>
    %c3_58 = arith.constant 3 : index
    %c0_59 = arith.constant 0 : index
    %c0_60 = arith.constant 0 : index
    %89 = vector.load %arg4[%c3_58, %c0_59, %c0_60] : memref<9x128x128xf32, #tpu.memory_space<vmem>>, vector<1x128x128xf32>
    %90 = vector.shape_cast %89 : vector<1x128x128xf32> to vector<128x128xf32>
    %cst_61 = arith.constant dense<0.000000e+00> : vector<256x128xf32>
    %91 = tpu.matmul %88, %90, %cst_61 {dimension_numbers = #tpu.dot_dimension_numbers<[1], [0], [0], [1], [0, 0, 1, 1], [], []>} : vector<256x128xf32>, vector<128x128xf32>, vector<256x128xf32> -> vector<256x128xf32>
    %92 = arith.addf %87, %91 : vector<256x128xf32>
    %c17_62 = arith.constant 17 : index
    %c0_63 = arith.constant 0 : index
    %93 = vector.load %arg9[%c17_62, %c0_63] : memref<296x128xf32, #tpu.memory_space<vmem>>, vector<256x128xf32>
    %c4_64 = arith.constant 4 : index
    %c0_65 = arith.constant 0 : index
    %c0_66 = arith.constant 0 : index
    %94 = vector.load %arg4[%c4_64, %c0_65, %c0_66] : memref<9x128x128xf32, #tpu.memory_space<vmem>>, vector<1x128x128xf32>
    %95 = vector.shape_cast %94 : vector<1x128x128xf32> to vector<128x128xf32>
    %cst_67 = arith.constant dense<0.000000e+00> : vector<256x128xf32>
    %96 = tpu.matmul %93, %95, %cst_67 {dimension_numbers = #tpu.dot_dimension_numbers<[1], [0], [0], [1], [0, 0, 1, 1], [], []>} : vector<256x128xf32>, vector<128x128xf32>, vector<256x128xf32> -> vector<256x128xf32>
    %97 = arith.addf %92, %96 : vector<256x128xf32>
    %c18_68 = arith.constant 18 : index
    %c0_69 = arith.constant 0 : index
    %98 = vector.load %arg9[%c18_68, %c0_69] : memref<296x128xf32, #tpu.memory_space<vmem>>, vector<256x128xf32>
    %c5_70 = arith.constant 5 : index
    %c0_71 = arith.constant 0 : index
    %c0_72 = arith.constant 0 : index
    %99 = vector.load %arg4[%c5_70, %c0_71, %c0_72] : memref<9x128x128xf32, #tpu.memory_space<vmem>>, vector<1x128x128xf32>
    %100 = vector.shape_cast %99 : vector<1x128x128xf32> to vector<128x128xf32>
    %cst_73 = arith.constant dense<0.000000e+00> : vector<256x128xf32>
    %101 = tpu.matmul %98, %100, %cst_73 {dimension_numbers = #tpu.dot_dimension_numbers<[1], [0], [0], [1], [0, 0, 1, 1], [], []>} : vector<256x128xf32>, vector<128x128xf32>, vector<256x128xf32> -> vector<256x128xf32>
    %102 = arith.addf %97, %101 : vector<256x128xf32>
    %c32_74 = arith.constant 32 : index
    %c0_75 = arith.constant 0 : index
    %103 = vector.load %arg9[%c32_74, %c0_75] : memref<296x128xf32, #tpu.memory_space<vmem>>, vector<256x128xf32>
    %c6_76 = arith.constant 6 : index
    %c0_77 = arith.constant 0 : index
    %c0_78 = arith.constant 0 : index
    %104 = vector.load %arg4[%c6_76, %c0_77, %c0_78] : memref<9x128x128xf32, #tpu.memory_space<vmem>>, vector<1x128x128xf32>
    %105 = vector.shape_cast %104 : vector<1x128x128xf32> to vector<128x128xf32>
    %cst_79 = arith.constant dense<0.000000e+00> : vector<256x128xf32>
    %106 = tpu.matmul %103, %105, %cst_79 {dimension_numbers = #tpu.dot_dimension_numbers<[1], [0], [0], [1], [0, 0, 1, 1], [], []>} : vector<256x128xf32>, vector<128x128xf32>, vector<256x128xf32> -> vector<256x128xf32>
    %107 = arith.addf %102, %106 : vector<256x128xf32>
    %c33_80 = arith.constant 33 : index
    %c0_81 = arith.constant 0 : index
    %108 = vector.load %arg9[%c33_80, %c0_81] : memref<296x128xf32, #tpu.memory_space<vmem>>, vector<256x128xf32>
    %c7_82 = arith.constant 7 : index
    %c0_83 = arith.constant 0 : index
    %c0_84 = arith.constant 0 : index
    %109 = vector.load %arg4[%c7_82, %c0_83, %c0_84] : memref<9x128x128xf32, #tpu.memory_space<vmem>>, vector<1x128x128xf32>
    %110 = vector.shape_cast %109 : vector<1x128x128xf32> to vector<128x128xf32>
    %cst_85 = arith.constant dense<0.000000e+00> : vector<256x128xf32>
    %111 = tpu.matmul %108, %110, %cst_85 {dimension_numbers = #tpu.dot_dimension_numbers<[1], [0], [0], [1], [0, 0, 1, 1], [], []>} : vector<256x128xf32>, vector<128x128xf32>, vector<256x128xf32> -> vector<256x128xf32>
    %112 = arith.addf %107, %111 : vector<256x128xf32>
    %c34_86 = arith.constant 34 : index
    %c0_87 = arith.constant 0 : index
    %113 = vector.load %arg9[%c34_86, %c0_87] : memref<296x128xf32, #tpu.memory_space<vmem>>, vector<256x128xf32>
    %c8_88 = arith.constant 8 : index
    %c0_89 = arith.constant 0 : index
    %c0_90 = arith.constant 0 : index
    %114 = vector.load %arg4[%c8_88, %c0_89, %c0_90] : memref<9x128x128xf32, #tpu.memory_space<vmem>>, vector<1x128x128xf32>
    %115 = vector.shape_cast %114 : vector<1x128x128xf32> to vector<128x128xf32>
    %cst_91 = arith.constant dense<0.000000e+00> : vector<256x128xf32>
    %116 = tpu.matmul %113, %115, %cst_91 {dimension_numbers = #tpu.dot_dimension_numbers<[1], [0], [0], [1], [0, 0, 1, 1], [], []>} : vector<256x128xf32>, vector<128x128xf32>, vector<256x128xf32> -> vector<256x128xf32>
    %117 = arith.addf %112, %116 : vector<256x128xf32>
    %c0_92 = arith.constant 0 : index
    %c0_93 = arith.constant 0 : index
    %118 = vector.load %arg5[%c0_92, %c0_93] : memref<1x128xf32, #tpu.memory_space<vmem>>, vector<1x128xf32>
    %119 = vector.broadcast %118 : vector<1x128xf32> to vector<256x128xf32>
    %120 = arith.addf %117, %119 : vector<256x128xf32>
    %cst_94 = arith.constant 0.000000e+00 : f32
    %121 = vector.broadcast %cst_94 : f32 to vector<256x128xf32>
    %122 = arith.maximumf %120, %121 : vector<256x128xf32>
    %c0_95 = arith.constant 0 : index
    %c0_96 = arith.constant 0 : index
    %123 = vector.load %arg10[%c0_95, %c0_96] : memref<256x128xf32, #tpu.memory_space<vmem>>, vector<256x128xf32>
    tpu.vector_store %arg10[%c0_95, %c0_96], %122 {strides = array<i32>} : memref<256x128xf32, #tpu.memory_space<vmem>>, vector<256x128xf32>,
    %124 = tpu.iota {dimensions = array<i32: 1>} : vector<1x128xi32>
    %c0_97 = arith.constant 0 : index
    %c0_98 = arith.constant 0 : index
    %125 = vector.load %arg7[%c0_97, %c0_98] : memref<1x128xf32, #tpu.memory_space<vmem>>, vector<1x128xf32>
    %c0_99 = arith.constant 0 : index
    %c0_100 = arith.constant 0 : index
    %126 = vector.load %arg10[%c0_99, %c0_100] : memref<256x128xf32, #tpu.memory_space<vmem>>, vector<256x128xf32>
    %c0_101 = arith.constant 0 : index
    %c0_102 = arith.constant 0 : index
    %c0_103 = arith.constant 0 : index
    %127 = vector.load %arg6[%c0_101, %c0_102, %c0_103] : memref<10x256x128xf32, #tpu.memory_space<vmem>>, vector<1x256x128xf32>
    %128 = vector.shape_cast %127 : vector<1x256x128xf32> to vector<256x128xf32>
    %129 = arith.mulf %126, %128 : vector<256x128xf32>
    %130 = vector.shape_cast %129 : vector<256x128xf32> to vector<1x256x128xf32>
    %cst_104 = arith.constant dense<0.000000e+00> : vector<1xf32>
    %131 = vector.multi_reduction <add>, %130, %cst_104 [1, 2] : vector<1x256x128xf32> to vector<1xf32>
    %132 = vector.shape_cast %131 : vector<1xf32> to vector<1x1x1xf32>
    %133 = vector.extract %132[0, 0, 0] : f32 from vector<1x1x1xf32>
    %c0_i32 = arith.constant 0 : i32
    %134 = vector.broadcast %c0_i32 : i32 to vector<1x128xi32>
    %135 = arith.cmpi eq, %124, %134 : vector<1x128xi32>
    %cst_105 = arith.constant 0.000000e+00 : f32
    %136 = vector.broadcast %133 : f32 to vector<1x128xf32>
    %137 = vector.broadcast %cst_105 : f32 to vector<1x128xf32>
    %138 = arith.select %135, %136, %137 : vector<1x128xi1>, vector<1x128xf32>
    %139 = arith.addf %125, %138 : vector<1x128xf32>
    %c0_106 = arith.constant 0 : index
    %c0_107 = arith.constant 0 : index
    %140 = vector.load %arg10[%c0_106, %c0_107] : memref<256x128xf32, #tpu.memory_space<vmem>>, vector<256x128xf32>
    %c1_108 = arith.constant 1 : index
    %c0_109 = arith.constant 0 : index
    %c0_110 = arith.constant 0 : index
    %141 = vector.load %arg6[%c1_108, %c0_109, %c0_110] : memref<10x256x128xf32, #tpu.memory_space<vmem>>, vector<1x256x128xf32>
    %142 = vector.shape_cast %141 : vector<1x256x128xf32> to vector<256x128xf32>
    %143 = arith.mulf %140, %142 : vector<256x128xf32>
    %144 = vector.shape_cast %143 : vector<256x128xf32> to vector<1x256x128xf32>
    %cst_111 = arith.constant dense<0.000000e+00> : vector<1xf32>
    %145 = vector.multi_reduction <add>, %144, %cst_111 [1, 2] : vector<1x256x128xf32> to vector<1xf32>
    %146 = vector.shape_cast %145 : vector<1xf32> to vector<1x1x1xf32>
    %147 = vector.extract %146[0, 0, 0] : f32 from vector<1x1x1xf32>
    %c1_i32 = arith.constant 1 : i32
    %148 = vector.broadcast %c1_i32 : i32 to vector<1x128xi32>
    %149 = arith.cmpi eq, %124, %148 : vector<1x128xi32>
    %cst_112 = arith.constant 0.000000e+00 : f32
    %150 = vector.broadcast %147 : f32 to vector<1x128xf32>
    %151 = vector.broadcast %cst_112 : f32 to vector<1x128xf32>
    %152 = arith.select %149, %150, %151 : vector<1x128xi1>, vector<1x128xf32>
    %153 = arith.addf %139, %152 : vector<1x128xf32>
    %c0_113 = arith.constant 0 : index
    %c0_114 = arith.constant 0 : index
    %154 = vector.load %arg10[%c0_113, %c0_114] : memref<256x128xf32, #tpu.memory_space<vmem>>, vector<256x128xf32>
    %c2_115 = arith.constant 2 : index
    %c0_116 = arith.constant 0 : index
    %c0_117 = arith.constant 0 : index
    %155 = vector.load %arg6[%c2_115, %c0_116, %c0_117] : memref<10x256x128xf32, #tpu.memory_space<vmem>>, vector<1x256x128xf32>
    %156 = vector.shape_cast %155 : vector<1x256x128xf32> to vector<256x128xf32>
    %157 = arith.mulf %154, %156 : vector<256x128xf32>
    %158 = vector.shape_cast %157 : vector<256x128xf32> to vector<1x256x128xf32>
    %cst_118 = arith.constant dense<0.000000e+00> : vector<1xf32>
    %159 = vector.multi_reduction <add>, %158, %cst_118 [1, 2] : vector<1x256x128xf32> to vector<1xf32>
    %160 = vector.shape_cast %159 : vector<1xf32> to vector<1x1x1xf32>
    %161 = vector.extract %160[0, 0, 0] : f32 from vector<1x1x1xf32>
    %c2_i32 = arith.constant 2 : i32
    %162 = vector.broadcast %c2_i32 : i32 to vector<1x128xi32>
    %163 = arith.cmpi eq, %124, %162 : vector<1x128xi32>
    %cst_119 = arith.constant 0.000000e+00 : f32
    %164 = vector.broadcast %161 : f32 to vector<1x128xf32>
    %165 = vector.broadcast %cst_119 : f32 to vector<1x128xf32>
    %166 = arith.select %163, %164, %165 : vector<1x128xi1>, vector<1x128xf32>
    %167 = arith.addf %153, %166 : vector<1x128xf32>
    %c0_120 = arith.constant 0 : index
    %c0_121 = arith.constant 0 : index
    %168 = vector.load %arg10[%c0_120, %c0_121] : memref<256x128xf32, #tpu.memory_space<vmem>>, vector<256x128xf32>
    %c3_122 = arith.constant 3 : index
    %c0_123 = arith.constant 0 : index
    %c0_124 = arith.constant 0 : index
    %169 = vector.load %arg6[%c3_122, %c0_123, %c0_124] : memref<10x256x128xf32, #tpu.memory_space<vmem>>, vector<1x256x128xf32>
    %170 = vector.shape_cast %169 : vector<1x256x128xf32> to vector<256x128xf32>
    %171 = arith.mulf %168, %170 : vector<256x128xf32>
    %172 = vector.shape_cast %171 : vector<256x128xf32> to vector<1x256x128xf32>
    %cst_125 = arith.constant dense<0.000000e+00> : vector<1xf32>
    %173 = vector.multi_reduction <add>, %172, %cst_125 [1, 2] : vector<1x256x128xf32> to vector<1xf32>
    %174 = vector.shape_cast %173 : vector<1xf32> to vector<1x1x1xf32>
    %175 = vector.extract %174[0, 0, 0] : f32 from vector<1x1x1xf32>
    %c3_i32 = arith.constant 3 : i32
    %176 = vector.broadcast %c3_i32 : i32 to vector<1x128xi32>
    %177 = arith.cmpi eq, %124, %176 : vector<1x128xi32>
    %cst_126 = arith.constant 0.000000e+00 : f32
    %178 = vector.broadcast %175 : f32 to vector<1x128xf32>
    %179 = vector.broadcast %cst_126 : f32 to vector<1x128xf32>
    %180 = arith.select %177, %178, %179 : vector<1x128xi1>, vector<1x128xf32>
    %181 = arith.addf %167, %180 : vector<1x128xf32>
    %c0_127 = arith.constant 0 : index
    %c0_128 = arith.constant 0 : index
    %182 = vector.load %arg10[%c0_127, %c0_128] : memref<256x128xf32, #tpu.memory_space<vmem>>, vector<256x128xf32>
    %c4_129 = arith.constant 4 : index
    %c0_130 = arith.constant 0 : index
    %c0_131 = arith.constant 0 : index
    %183 = vector.load %arg6[%c4_129, %c0_130, %c0_131] : memref<10x256x128xf32, #tpu.memory_space<vmem>>, vector<1x256x128xf32>
    %184 = vector.shape_cast %183 : vector<1x256x128xf32> to vector<256x128xf32>
    %185 = arith.mulf %182, %184 : vector<256x128xf32>
    %186 = vector.shape_cast %185 : vector<256x128xf32> to vector<1x256x128xf32>
    %cst_132 = arith.constant dense<0.000000e+00> : vector<1xf32>
    %187 = vector.multi_reduction <add>, %186, %cst_132 [1, 2] : vector<1x256x128xf32> to vector<1xf32>
    %188 = vector.shape_cast %187 : vector<1xf32> to vector<1x1x1xf32>
    %189 = vector.extract %188[0, 0, 0] : f32 from vector<1x1x1xf32>
    %c4_i32 = arith.constant 4 : i32
    %190 = vector.broadcast %c4_i32 : i32 to vector<1x128xi32>
    %191 = arith.cmpi eq, %124, %190 : vector<1x128xi32>
    %cst_133 = arith.constant 0.000000e+00 : f32
    %192 = vector.broadcast %189 : f32 to vector<1x128xf32>
    %193 = vector.broadcast %cst_133 : f32 to vector<1x128xf32>
    %194 = arith.select %191, %192, %193 : vector<1x128xi1>, vector<1x128xf32>
    %195 = arith.addf %181, %194 : vector<1x128xf32>
    %c0_134 = arith.constant 0 : index
    %c0_135 = arith.constant 0 : index
    %196 = vector.load %arg10[%c0_134, %c0_135] : memref<256x128xf32, #tpu.memory_space<vmem>>, vector<256x128xf32>
    %c5_136 = arith.constant 5 : index
    %c0_137 = arith.constant 0 : index
    %c0_138 = arith.constant 0 : index
    %197 = vector.load %arg6[%c5_136, %c0_137, %c0_138] : memref<10x256x128xf32, #tpu.memory_space<vmem>>, vector<1x256x128xf32>
    %198 = vector.shape_cast %197 : vector<1x256x128xf32> to vector<256x128xf32>
    %199 = arith.mulf %196, %198 : vector<256x128xf32>
    %200 = vector.shape_cast %199 : vector<256x128xf32> to vector<1x256x128xf32>
    %cst_139 = arith.constant dense<0.000000e+00> : vector<1xf32>
    %201 = vector.multi_reduction <add>, %200, %cst_139 [1, 2] : vector<1x256x128xf32> to vector<1xf32>
    %202 = vector.shape_cast %201 : vector<1xf32> to vector<1x1x1xf32>
    %203 = vector.extract %202[0, 0, 0] : f32 from vector<1x1x1xf32>
    %c5_i32 = arith.constant 5 : i32
    %204 = vector.broadcast %c5_i32 : i32 to vector<1x128xi32>
    %205 = arith.cmpi eq, %124, %204 : vector<1x128xi32>
    %cst_140 = arith.constant 0.000000e+00 : f32
    %206 = vector.broadcast %203 : f32 to vector<1x128xf32>
    %207 = vector.broadcast %cst_140 : f32 to vector<1x128xf32>
    %208 = arith.select %205, %206, %207 : vector<1x128xi1>, vector<1x128xf32>
    %209 = arith.addf %195, %208 : vector<1x128xf32>
    %c0_141 = arith.constant 0 : index
    %c0_142 = arith.constant 0 : index
    %210 = vector.load %arg10[%c0_141, %c0_142] : memref<256x128xf32, #tpu.memory_space<vmem>>, vector<256x128xf32>
    %c6_143 = arith.constant 6 : index
    %c0_144 = arith.constant 0 : index
    %c0_145 = arith.constant 0 : index
    %211 = vector.load %arg6[%c6_143, %c0_144, %c0_145] : memref<10x256x128xf32, #tpu.memory_space<vmem>>, vector<1x256x128xf32>
    %212 = vector.shape_cast %211 : vector<1x256x128xf32> to vector<256x128xf32>
    %213 = arith.mulf %210, %212 : vector<256x128xf32>
    %214 = vector.shape_cast %213 : vector<256x128xf32> to vector<1x256x128xf32>
    %cst_146 = arith.constant dense<0.000000e+00> : vector<1xf32>
    %215 = vector.multi_reduction <add>, %214, %cst_146 [1, 2] : vector<1x256x128xf32> to vector<1xf32>
    %216 = vector.shape_cast %215 : vector<1xf32> to vector<1x1x1xf32>
    %217 = vector.extract %216[0, 0, 0] : f32 from vector<1x1x1xf32>
    %c6_i32 = arith.constant 6 : i32
    %218 = vector.broadcast %c6_i32 : i32 to vector<1x128xi32>
    %219 = arith.cmpi eq, %124, %218 : vector<1x128xi32>
    %cst_147 = arith.constant 0.000000e+00 : f32
    %220 = vector.broadcast %217 : f32 to vector<1x128xf32>
    %221 = vector.broadcast %cst_147 : f32 to vector<1x128xf32>
    %222 = arith.select %219, %220, %221 : vector<1x128xi1>, vector<1x128xf32>
    %223 = arith.addf %209, %222 : vector<1x128xf32>
    %c0_148 = arith.constant 0 : index
    %c0_149 = arith.constant 0 : index
    %224 = vector.load %arg10[%c0_148, %c0_149] : memref<256x128xf32, #tpu.memory_space<vmem>>, vector<256x128xf32>
    %c7_150 = arith.constant 7 : index
    %c0_151 = arith.constant 0 : index
    %c0_152 = arith.constant 0 : index
    %225 = vector.load %arg6[%c7_150, %c0_151, %c0_152] : memref<10x256x128xf32, #tpu.memory_space<vmem>>, vector<1x256x128xf32>
    %226 = vector.shape_cast %225 : vector<1x256x128xf32> to vector<256x128xf32>
    %227 = arith.mulf %224, %226 : vector<256x128xf32>
    %228 = vector.shape_cast %227 : vector<256x128xf32> to vector<1x256x128xf32>
    %cst_153 = arith.constant dense<0.000000e+00> : vector<1xf32>
    %229 = vector.multi_reduction <add>, %228, %cst_153 [1, 2] : vector<1x256x128xf32> to vector<1xf32>
    %230 = vector.shape_cast %229 : vector<1xf32> to vector<1x1x1xf32>
    %231 = vector.extract %230[0, 0, 0] : f32 from vector<1x1x1xf32>
    %c7_i32 = arith.constant 7 : i32
    %232 = vector.broadcast %c7_i32 : i32 to vector<1x128xi32>
    %233 = arith.cmpi eq, %124, %232 : vector<1x128xi32>
    %cst_154 = arith.constant 0.000000e+00 : f32
    %234 = vector.broadcast %231 : f32 to vector<1x128xf32>
    %235 = vector.broadcast %cst_154 : f32 to vector<1x128xf32>
    %236 = arith.select %233, %234, %235 : vector<1x128xi1>, vector<1x128xf32>
    %237 = arith.addf %223, %236 : vector<1x128xf32>
    %c0_155 = arith.constant 0 : index
    %c0_156 = arith.constant 0 : index
    %238 = vector.load %arg10[%c0_155, %c0_156] : memref<256x128xf32, #tpu.memory_space<vmem>>, vector<256x128xf32>
    %c8_157 = arith.constant 8 : index
    %c0_158 = arith.constant 0 : index
    %c0_159 = arith.constant 0 : index
    %239 = vector.load %arg6[%c8_157, %c0_158, %c0_159] : memref<10x256x128xf32, #tpu.memory_space<vmem>>, vector<1x256x128xf32>
    %240 = vector.shape_cast %239 : vector<1x256x128xf32> to vector<256x128xf32>
    %241 = arith.mulf %238, %240 : vector<256x128xf32>
    %242 = vector.shape_cast %241 : vector<256x128xf32> to vector<1x256x128xf32>
    %cst_160 = arith.constant dense<0.000000e+00> : vector<1xf32>
    %243 = vector.multi_reduction <add>, %242, %cst_160 [1, 2] : vector<1x256x128xf32> to vector<1xf32>
    %244 = vector.shape_cast %243 : vector<1xf32> to vector<1x1x1xf32>
    %245 = vector.extract %244[0, 0, 0] : f32 from vector<1x1x1xf32>
    %c8_i32 = arith.constant 8 : i32
    %246 = vector.broadcast %c8_i32 : i32 to vector<1x128xi32>
    %247 = arith.cmpi eq, %124, %246 : vector<1x128xi32>
    %cst_161 = arith.constant 0.000000e+00 : f32
    %248 = vector.broadcast %245 : f32 to vector<1x128xf32>
    %249 = vector.broadcast %cst_161 : f32 to vector<1x128xf32>
    %250 = arith.select %247, %248, %249 : vector<1x128xi1>, vector<1x128xf32>
    %251 = arith.addf %237, %250 : vector<1x128xf32>
    %c0_162 = arith.constant 0 : index
    %c0_163 = arith.constant 0 : index
    %252 = vector.load %arg10[%c0_162, %c0_163] : memref<256x128xf32, #tpu.memory_space<vmem>>, vector<256x128xf32>
    %c9 = arith.constant 9 : index
    %c0_164 = arith.constant 0 : index
    %c0_165 = arith.constant 0 : index
    %253 = vector.load %arg6[%c9, %c0_164, %c0_165] : memref<10x256x128xf32, #tpu.memory_space<vmem>>, vector<1x256x128xf32>
    %254 = vector.shape_cast %253 : vector<1x256x128xf32> to vector<256x128xf32>
    %255 = arith.mulf %252, %254 : vector<256x128xf32>
    %256 = vector.shape_cast %255 : vector<256x128xf32> to vector<1x256x128xf32>
    %cst_166 = arith.constant dense<0.000000e+00> : vector<1xf32>
    %257 = vector.multi_reduction <add>, %256, %cst_166 [1, 2] : vector<1x256x128xf32> to vector<1xf32>
    %258 = vector.shape_cast %257 : vector<1xf32> to vector<1x1x1xf32>
    %259 = vector.extract %258[0, 0, 0] : f32 from vector<1x1x1xf32>
    %c9_i32 = arith.constant 9 : i32
    %260 = vector.broadcast %c9_i32 : i32 to vector<1x128xi32>
    %261 = arith.cmpi eq, %124, %260 : vector<1x128xi32>
    %cst_167 = arith.constant 0.000000e+00 : f32
    %262 = vector.broadcast %259 : f32 to vector<1x128xf32>
    %263 = vector.broadcast %cst_167 : f32 to vector<1x128xf32>
    %264 = arith.select %261, %262, %263 : vector<1x128xi1>, vector<1x128xf32>
    %265 = arith.addf %251, %264 : vector<1x128xf32>
    %266 = tpu.iota {dimensions = array<i32: 0>} : vector<8x128xi32>
    %c0_i32_168 = arith.constant 0 : i32
    %267 = vector.broadcast %c0_i32_168 : i32 to vector<8x128xi32>
    %268 = arith.cmpi eq, %266, %267 : vector<8x128xi32>
    %269 = vector.shape_cast %265 : vector<1x128xf32> to vector<1x128xf32>
    %270 = vector.broadcast %269 : vector<1x128xf32> to vector<8x128xf32>
    %cst_169 = arith.constant 0.000000e+00 : f32
    %271 = vector.broadcast %cst_169 : f32 to vector<8x128xf32>
    %272 = arith.select %268, %270, %271 : vector<8x128xi1>, vector<8x128xf32>
    %c0_170 = arith.constant 0 : index
    %c0_171 = arith.constant 0 : index
    %c0_172 = arith.constant 0 : index
    %273 = vector.load %arg8[%c0_170, %c0_171, %c0_172] : memref<1x8x128xf32, #tpu.memory_space<vmem>>, vector<1x8x128xf32>
    %274 = vector.shape_cast %273 : vector<1x8x128xf32> to vector<8x128xf32>
    %275 = vector.shape_cast %272 : vector<8x128xf32> to vector<1x8x128xf32>
    tpu.vector_store %arg8[%c0_170, %c0_171, %c0_172], %275 {strides = array<i32>} : memref<1x8x128xf32, #tpu.memory_space<vmem>>, vector<1x8x128xf32>,
    return
  }
  func.func @transform_0(%arg0: i32) -> (i32, i32, i32) {
    %c0_i32 = arith.constant 0 : i32
    %c0_i32_0 = arith.constant 0 : i32
    %c0_i32_1 = arith.constant 0 : i32
    return %arg0, %c0_i32, %c0_i32_0 : i32, i32, i32
  }
  func.func @transform_1(%arg0: i32) -> (i32, i32) {
    %c0_i32 = arith.constant 0 : i32
    %c0_i32_0 = arith.constant 0 : i32
    %c0_i32_1 = arith.constant 0 : i32
    return %c0_i32, %c0_i32_0 : i32, i32
  }
  func.func @transform_2(%arg0: i32) -> (i32, i32) {
    %c0_i32 = arith.constant 0 : i32
    %c0_i32_0 = arith.constant 0 : i32
    %c0_i32_1 = arith.constant 0 : i32
    return %c0_i32, %c0_i32_0 : i32, i32
  }
  func.func @transform_3(%arg0: i32) -> (i32, i32, i32) {
    %c0_i32 = arith.constant 0 : i32
    %c0_i32_0 = arith.constant 0 : i32
    %c0_i32_1 = arith.constant 0 : i32
    %c0_i32_2 = arith.constant 0 : i32
    return %c0_i32, %c0_i32_0, %c0_i32_1 : i32, i32, i32
  }
  func.func @transform_4(%arg0: i32) -> (i32, i32) {
    %c0_i32 = arith.constant 0 : i32
    %c0_i32_0 = arith.constant 0 : i32
    %c0_i32_1 = arith.constant 0 : i32
    return %c0_i32, %c0_i32_0 : i32, i32
  }
  func.func @transform_5(%arg0: i32) -> (i32, i32, i32) {
    %c0_i32 = arith.constant 0 : i32
    %c0_i32_0 = arith.constant 0 : i32
    %c0_i32_1 = arith.constant 0 : i32
    %c0_i32_2 = arith.constant 0 : i32
    return %c0_i32, %c0_i32_0, %c0_i32_1 : i32, i32, i32
  }
  func.func @transform_6(%arg0: i32) -> (i32, i32) {
    %c0_i32 = arith.constant 0 : i32
    %c0_i32_0 = arith.constant 0 : i32
    %c0_i32_1 = arith.constant 0 : i32
    return %c0_i32, %c0_i32_0 : i32, i32
  }
  func.func @transform_7(%arg0: i32) -> (i32, i32, i32) {
    %c0_i32 = arith.constant 0 : i32
    %c0_i32_0 = arith.constant 0 : i32
    %c0_i32_1 = arith.constant 0 : i32
    return %arg0, %c0_i32, %c0_i32_0 : i32, i32, i32
  }
}

</mosaic_0001>

<bundles_post_ra>
// kernel: network_forward.1
= control target key start
LH: loop header
LB: loop body
LE: loop exit
PB: predicated region body
PF: predicated region fallthrough
CT: control target
= control target key end

     0   :  { %12 = vsyncpa [#allocation5], 0  ;;  %s11451_s0 = inlined_call_operand.vmem [shape: f32[2,296,1], index: 0, kind: input, shape index: {}]   ;;  %s11452_s1 = inlined_call_operand.hbm [shape: f32[9,128], index: 1, kind: input, shape index: {}]   ;;  %s11453_s2 = inlined_call_operand.hbm [shape: f32[1,128], index: 2, kind: input, shape index: {}]   ;;  %s11454_s3 = inlined_call_operand.hbm [shape: f32[9,128,128], index: 3, kind: input, shape index: {}]   ;;  %s11455_s4 = inlined_call_operand.hbm [shape: f32[1,128], index: 4, kind: input, shape index: {}]   ;;  %s11456_s5 = inlined_call_operand.hbm [shape: f32[10,256,128], index: 5, kind: input, shape index: {}]   ;;  %s11457_s6 = inlined_call_operand.hbm [shape: f32[1,128], index: 6, kind: input, shape index: {}]   ;;  %s11458_s7 = inlined_call_operand.vmem [shape: f32[2,8,128], index: 7, kind: output, shape index: {}]  }
   0x1   :  { %13 = vsyncpa [#allocation7], 0 }
   0x2   :  { %14 = vsyncpa [#allocation10], 0 }
   0x3   :  { %15 = vsyncpa [#allocation13], 0  ;;  %s8954_s24 = smov 0  }
   0x4 LB: > { %s8904_s25 = smov [#allocation6]   ;;  %s8960_s27 = sadd.s32 4294967295, %s8902_s24   ;;  %s8902_s24 = sphi %s8954_s24, %s21_s24  }
   0x5   : > { %s230_s26 = sshll.u32 %s8904_s25, 4  ;;  %p6858_p0 = scmp.ge.s32.totalorder %s8902_s24, 1  ;;  %s8965_s26 = int_to_ptr.vmem [resolvable:$true] %s230_s26 }
   0x6   : > { %p204_p1 = scmp.lt.s32.totalorder %s8902_s24, 3  ;;  %p11459_p2 = scmp.eq.s32.totalorder %s8960_s27, 0 }
   0x7   : > { %s8905_s29 = smov [#allocation9]   ;;  %s8906_s8 = smov [#allocation4]  }
   0x8   : > { %p8967_p3 = pnand %p6858_p0, %p204_p1  ;;  %s254_s30 = sshll.u32 %s8905_s29, 4  ;;  %s8973_s30 = int_to_ptr.vmem [resolvable:$true] %s254_s30 }
   0x9   : > { %s216_s9 = sshll.u32 %s8906_s8, 4  ;;  %s8907_s11 = smov [#allocation8]   ;;  %s8981_s9 = int_to_ptr.vmem [resolvable:$true] %s216_s9 }
   0xa   : > { %s11492_s28 = scalar_select %p8967_p3, 1, 0 }
   0xb   : > { %p8645_p4 = pneg %p8967_p3  ;;  %s8983_s12 = sshll.u32 %s8907_s11, 4  ;;  %s241_s12 = int_to_ptr.vmem [resolvable:$true] %s8983_s12 }
   0xc   : > { %s8712_s15 = scalar_lea.hbm %s11453_s2, 16 }
   0xd   : > { %p8977_p5 = pnand %p11459_p2, %p8645_p4  ;;  %p8713_p6 = scmp.ne.s32.totalorder %s11453_s2, %s8712_s15 }
   0xe   : > { %p8719_p10 = scmp.lt.u32.totalorder %s8712_s15, %s11453_s2 }
   0xf   : > { %p8993_p7 = pneg %p8977_p5 }
  0x11   : > { %p8715_p8 = pnand %p8993_p7, %p8713_p6 }
  0x13   : > { %p8716_p9 = pneg %p8715_p8 }
  0x15   : > { %p8721_p11 = pnand %p8719_p10, %p8716_p9 }
  0x17   : > { %8724 = shalt.err (!%p8721_p11)
}
  0x18   : > { %s8725_s21 = scalar_lea.vmem %s8965_s26, 16  ;;  %s8732_s22 = scalar_lea.vmem %s8965_s26, 32 }
  0x19   : > { %p8726_p12 = scmp.ne.s32.totalorder %s8965_s26, %s8725_s21  ;;  %p8733_p1 = scmp.lt.s32.totalorder %s8965_s26, %s8965_s26 }
  0x1a   : > { %p8734_p4 = scmp.lt.s32.totalorder %s8732_s22, %s8725_s21 }
  0x1b   : > { %p8728_p13 = pnand %p8726_p12, %p8993_p7 }
  0x1c   : > { %p8735_p6 = por %p8734_p4, %p8733_p1 }
  0x1d   : > { %p8729_p0 = pneg %p8728_p13 }
  0x1f   : > { %p8736_p8 = pnand %p8735_p6, %p8729_p0 }
  0x21   : > { %8739 = shalt.err (!%p8736_p8)
}
  0x22   : > { %8651 = dma.hbm_to_vmem [thread:$0]  (!%p8977_p5), %s11453_s2, 16, %s8965_s26, [#allocation7]  }
  0x23   : > { %s8740_s11 = scalar_lea.hbm %s11455_s4, 16 }
  0x24   : > { %p8741_p9 = scmp.ne.s32.totalorder %s11455_s4, %s8740_s11  ;;  %p8747_p12 = scmp.lt.u32.totalorder %s8740_s11, %s11455_s4 }
  0x26   : > { %p8743_p10 = pnand %p8741_p9, %p8993_p7 }
  0x28   : > { %p8744_p11 = pneg %p8743_p10 }
  0x2a   : > { %p8749_p13 = pnand %p8747_p12, %p8744_p11 }
  0x2c   : > { %8752 = shalt.err (!%p8749_p13)
}
  0x2d   : > { %s8753_s26 = scalar_lea.vmem %s8973_s30, 16  ;;  %s8760_s17 = scalar_lea.vmem %s8973_s30, 32 }
  0x2e   : > { %p8754_p0 = scmp.ne.s32.totalorder %s8973_s30, %s8753_s26  ;;  %p8761_p6 = scmp.lt.s32.totalorder %s8973_s30, %s8973_s30 }
  0x2f   : > { %p8762_p8 = scmp.lt.s32.totalorder %s8760_s17, %s8753_s26 }
  0x30   : > { %p8756_p1 = pnand %p8754_p0, %p8993_p7 }
  0x31   : > { %p8763_p9 = por %p8762_p8, %p8761_p6 }
  0x32   : > { %p8757_p4 = pneg %p8756_p1 }
  0x34   : > { %p8764_p10 = pnand %p8763_p9, %p8757_p4 }
  0x36   : > { %8767 = shalt.err (!%p8764_p10)
}
  0x37   : > { %8657 = dma.hbm_to_vmem [thread:$0]  (!%p8977_p5), %s11455_s4, 16, %s8973_s30, [#allocation10]  }
  0x38   : > { %s8768_s23 = scalar_lea.hbm %s11452_s1, 256 }
  0x39   : > { %p8769_p11 = scmp.ne.s32.totalorder %s11452_s1, %s8768_s23  ;;  %p8775_p0 = scmp.lt.u32.totalorder %s8768_s23, %s11452_s1 }
  0x3b   : > { %p8771_p12 = pnand %p8769_p11, %p8993_p7 }
  0x3d   : > { %p8772_p13 = pneg %p8771_p12 }
  0x3f   : > { %p8777_p1 = pnand %p8775_p0, %p8772_p13 }
  0x41   : > { %8780 = shalt.err (!%p8777_p1)
}
  0x42   : > { %s8781_s30 = scalar_lea.vmem %s8981_s9, 256  ;;  %p8789_p9 = scmp.lt.s32.totalorder %s8981_s9, %s8981_s9 }
  0x43   : > { %p8782_p4 = scmp.ne.s32.totalorder %s8981_s9, %s8781_s30  ;;  %p8790_p10 = scmp.lt.s32.totalorder %s8781_s30, %s8781_s30 }
  0x45   : > { %p8784_p6 = pnand %p8782_p4, %p8993_p7  ;;  %p8791_p11 = por %p8790_p10, %p8789_p9 }
  0x47   : > { %p8785_p8 = pneg %p8784_p6 }
  0x49   : > { %p8792_p12 = pnand %p8791_p11, %p8785_p8 }
  0x4b   : > { %8795 = shalt.err (!%p8792_p12)
}
  0x4c   : > { %s8908_s13 = smov 128   ;;  %s8909_s14 = smov 8  }
  0x4d   : > { %8648 = dma.hbm_to_vmem [thread:$0]  (!%p8977_p5), %s11452_s1, 256, %s8981_s9, [#allocation5], %s8908_s13, %s8908_s13, %s8909_s14  }
  0x4e   : > { %s8796_s19 = scalar_lea.hbm %s11454_s3, 18432 }
  0x4f   : > { %p8797_p13 = scmp.ne.s32.totalorder %s11454_s3, %s8796_s19  ;;  %p8803_p4 = scmp.lt.u32.totalorder %s8796_s19, %s11454_s3 }
  0x51   : > { %p8799_p0 = pnand %p8797_p13, %p8993_p7 }
  0x53   : > { %p8800_p1 = pneg %p8799_p0 }
  0x55   : > { %p8805_p6 = pnand %p8803_p4, %p8800_p1 }
  0x57   : > { %8808 = shalt.err (!%p8805_p6)
}
  0x58   : > { %s8809_s25 = scalar_lea.vmem %s241_s12, 18432  ;;  %p8817_p11 = scmp.lt.s32.totalorder %s241_s12, %s241_s12 }
  0x59   : > { %p8810_p8 = scmp.ne.s32.totalorder %s241_s12, %s8809_s25  ;;  %p8818_p12 = scmp.lt.s32.totalorder %s8809_s25, %s8809_s25 }
  0x5b   : > { %p8812_p9 = pnand %p8810_p8, %p8993_p7  ;;  %p8819_p2 = por %p8818_p12, %p8817_p11 }
  0x5d   : > { %p8813_p10 = pneg %p8812_p9 }
  0x5f   : > { %p8820_p3 = pnand %p8819_p2, %p8813_p10 }
  0x61   : > { %8823 = shalt.err (!%p8820_p3)
}
  0x62   : > { %8654 = dma.hbm_to_vmem [thread:$0]  (!%p8977_p5), %s11454_s3, 18432, %s241_s12, [#allocation7], %s8908_s13, %s8908_s13, %s8909_s14  }
  0x63   : > { %s8910_s8 = smov [#allocation11]   ;;  %s8911_s30 = smov [#allocation12]  }
  0x64   : > { %s264_s11 = sshll.u32 %s8910_s8, 4  ;;  %s278_s15 = sshll.u32 %s8911_s30, 4  ;;  %s265_s11 = int_to_ptr.vmem [resolvable:$true] %s264_s11  ;;  %s279_s15 = int_to_ptr.vmem [resolvable:$true] %s278_s15 }
  0x65   : > { %s8824_s17 = scalar_lea.hbm %s11456_s5, 40960 }
  0x66   : > { %p8825_p2 = scmp.ne.s32.totalorder %s11456_s5, %s8824_s17  ;;  %p8831_p0 = scmp.lt.u32.totalorder %s8824_s17, %s11456_s5 }
  0x68   : > { %p8827_p3 = pnand %p8825_p2, %p8993_p7 }
  0x6a   : > { %p8828_p13 = pneg %p8827_p3 }
  0x6c   : > { %p8833_p1 = pnand %p8831_p0, %p8828_p13 }
  0x6e   : > { %8836 = shalt.err (!%p8833_p1)
}
  0x6f   : > { %s8837_s12 = scalar_lea.vmem %s265_s11, 40960  ;;  %p8845_p9 = scmp.lt.s32.totalorder %s265_s11, %s265_s11 }
  0x70   : > { %p8838_p4 = scmp.ne.s32.totalorder %s265_s11, %s8837_s12  ;;  %p8846_p10 = scmp.lt.s32.totalorder %s8837_s12, %s8837_s12 }
  0x72   : > { %p8840_p6 = pnand %p8838_p4, %p8993_p7  ;;  %p8847_p11 = por %p8846_p10, %p8845_p9 }
  0x74   : > { %p8841_p8 = pneg %p8840_p6 }
  0x76   : > { %p8848_p12 = pnand %p8847_p11, %p8841_p8 }
  0x78   : > { %8851 = shalt.err (!%p8848_p12)
}
  0x79   : > { %8660 = dma.hbm_to_vmem [thread:$0]  (!%p8977_p5), %s11456_s5, 40960, %s265_s11, [#allocation10], %s8908_s13, %s8908_s13, %s8909_s14  }
  0x7a   : > { %s8852_s8 = scalar_lea.hbm %s11457_s6, 16 }
  0x7b   : > { %p8853_p2 = scmp.ne.s32.totalorder %s11457_s6, %s8852_s8  ;;  %p8859_p0 = scmp.lt.u32.totalorder %s8852_s8, %s11457_s6 }
  0x7d   : > { %p8855_p3 = pnand %p8853_p2, %p8993_p7 }
  0x7f   : > { %p8856_p13 = pneg %p8855_p3 }
  0x81   : > { %p8861_p1 = pnand %p8859_p0, %p8856_p13 }
  0x83   : > { %8864 = shalt.err (!%p8861_p1)
}
  0x84   : > { %s8865_s19 = scalar_lea.vmem %s279_s15, 16  ;;  %s8872_s13 = scalar_lea.vmem %s279_s15, 32 }
  0x85   : > { %p8866_p4 = scmp.ne.s32.totalorder %s279_s15, %s8865_s19  ;;  %p8873_p9 = scmp.lt.s32.totalorder %s279_s15, %s279_s15 }
  0x86   : > { %p8874_p10 = scmp.lt.s32.totalorder %s8872_s13, %s8865_s19 }
  0x87   : > { %p8868_p6 = pnand %p8866_p4, %p8993_p7 }
  0x88   : > { %p8875_p11 = por %p8874_p10, %p8873_p9 }
  0x89   : > { %p8869_p8 = pneg %p8868_p6 }
  0x8b   : > { %p8876_p12 = pnand %p8875_p11, %p8869_p8 }
  0x8d   : > { %8879 = shalt.err (!%p8876_p12)
}
  0x8e   : > { %8663 = dma.hbm_to_vmem [thread:$0]  (!%p8977_p5), %s11457_s6, 16, %s279_s15, [#allocation13]  }
  0x8f   : > { %p11495_p2 = scmp.ne.s32.totalorder %s11492_s28, 0 }
  0x91   : > { %299 = sbr.rel (%p11495_p2) target bundleno = 1672 (0x688), region = 48 }
  0x98   : > { %p11496_p3 = scmp.eq.s32.totalorder %s8960_s27, 0 }
  0x9a   : > { %8885 = dma.done.wait (%p11496_p3), [#allocation5], 256   ;;  %p11497_p7 = pmov %p11496_p3 }
  0x9b   : > { %p11498_p13 = pmov %p11496_p3 }
  0x9c   : > { %8887 = vsyncadd (%p11497_p7), [#allocation5], 4294967040 }
  0x9d   : > { %8889 = dma.done.wait (%p11498_p13), [#allocation7], 18448   ;;  %p11499_p0 = pmov %p11496_p3 }
  0x9f   : > { %8891 = vsyncadd (%p11499_p0), [#allocation7], 4294948848  ;;  %p11500_p1 = pmov %p11499_p0 }
  0xa0   : > { %p11501_p5 = pmov %p11499_p0 }
  0xa1   : > { %8893 = dma.done.wait (%p11500_p1), [#allocation10], 40976  }
  0xa2   : > { %8895 = vsyncadd (%p11501_p5), [#allocation10], 4294926320  ;;  %p11502_p4 = pmov %p11499_p0 }
  0xa3   : > { %p11503_p6 = pmov %p11499_p0 }
  0xa4   : > { %8897 = dma.done.wait (%p11502_p4), [#allocation13], 16  }
  0xa5   : > { %8899 = vsyncadd (%p11503_p6), [#allocation13], 4294967280  ;;  %p350_p8 = scmp.lt.s32.totalorder %s8960_s27, 1  ;;  %v8912_v0 = vmov 0  }
  0xa6   : > { %8695 = vset.pattern.permute.xlu1 %v8912_v0  ;;  %8694 = vset.pattern.permute.xlu0 %v8912_v0 }
  0xa7   : > { %s11651_s27 = smov (!%p350_p8, %s8960_s27), 1 }
  0xa8   : > { %s8600_s28 = smul.u32 296, %s11651_s27  ;;  %s6874_s16 = sshll.u32 %s11651_s27, 3 }
  0xa9   : > { %s358_s19 = scalar_lea.vmem %s11458_s7, %s6874_s16 }
  0xaa   : > { %s9152_s15 = scalar_lea.vmem %s11451_s0, %s8600_s28 }
  0xab   : > { %v9155_v1 = vld [vmem:[%s9152_s15 + $0x10] sm:$0xff]  ;;  %v359_v2 = vld [vmem:[%s9152_s15] sm:$0xff]  ;;  %v9160_v3 = vld [vmem:[%s9152_s15 + $0x18] sm:$0xff] }
  0xac   : > { %404 = vperm.xlu1 %8695, %v9155_v1   ;;  %394 = vperm.xlu0 %8694, %v359_v2   ;;  %v360_v4 = vld [vmem:[%s9152_s15 + $0x8] sm:$0xff]  ;;  %v9168_v6 = vld [vmem:[%s9152_s15 + $0x20] sm:$0xff]  ;;  %v9173_v7 = vld [vmem:[%s9152_s15 + $0x38] sm:$0xff] }
  0xad   : > { %v9165_v5 = vld [vmem:[%s9152_s15 + $0x28] sm:$0xff]  ;;  %v9176_v8 = vld [vmem:[%s9152_s15 + $0x30] sm:$0xff]  ;;  %v9184_v10 = vld [vmem:[%s9152_s15 + $0x40] sm:$0xff] }
  0xae   : > { %v9181_v9 = vld [vmem:[%s9152_s15 + $0x48] sm:$0xff]  ;;  %v9189_v11 = vld [vmem:[%s9152_s15 + $0x58] sm:$0xff]  ;;  %v9192_v12 = vld [vmem:[%s9152_s15 + $0x50] sm:$0xff] }
  0xaf   : > { %v372_v13 = vld [vmem:[%s9152_s15 + $0x68] sm:$0xff]  ;;  %v9198_v14 = vld [vmem:[%s9152_s15 + $0x60] sm:$0xff]  ;;  %v374_v15 = vld [vmem:[%s9152_s15 + $0x78] sm:$0xff] }
  0xb0   : > { %409 = vperm.xlu1 %8695, %v9160_v3   ;;  %399 = vperm.xlu0 %8694, %v360_v4   ;;  %v373_v16 = vld [vmem:[%s9152_s15 + $0x70] sm:$0xff]  ;;  %v376_v17 = vld [vmem:[%s9152_s15 + $0x88] sm:$0xff]  ;;  %v375_v18 = vld [vmem:[%s9152_s15 + $0x80] sm:$0xff] }
  0xb1   : > { %v378_v19 = vld [vmem:[%s9152_s15 + $0x98] sm:$0xff]  ;;  %v377_v20 = vld [vmem:[%s9152_s15 + $0x90] sm:$0xff]  ;;  %v380_v21 = vld [vmem:[%s9152_s15 + $0xa8] sm:$0xff] }
  0xb2   : > { %v379_v22 = vld [vmem:[%s9152_s15 + $0xa0] sm:$0xff]  ;;  %v382_v23 = vld [vmem:[%s9152_s15 + $0xb8] sm:$0xff]  ;;  %v381_v24 = vld [vmem:[%s9152_s15 + $0xb0] sm:$0xff] }
  0xb3   : > { %v384_v25 = vld [vmem:[%s9152_s15 + $0xc8] sm:$0xff]  ;;  %v383_v26 = vld [vmem:[%s9152_s15 + $0xc0] sm:$0xff]  ;;  %v386_v27 = vld [vmem:[%s9152_s15 + $0xd8] sm:$0xff] }
  0xb4   : > { %419 = vperm.xlu1 %8695, %v9165_v5   ;;  %414 = vperm.xlu0 %8694, %v9168_v6   ;;  %v385_v28 = vld [vmem:[%s9152_s15 + $0xd0] sm:$0xff]  ;;  %v388_v29 = vld [vmem:[%s9152_s15 + $0xe8] sm:$0xff]  ;;  %v387_v30 = vld [vmem:[%s9152_s15 + $0xe0] sm:$0xff] }
  0xb5   : > { %v390_v31 = vld [vmem:[%s9152_s15 + $0xf8] sm:$0xff]  ;;  %v389_v32 = vld [vmem:[%s9152_s15 + $0xf0] sm:$0xff]  ;;  %v620_v34 = vld [vmem:[%s9152_s15 + $0x1] sm:$0xff] }
  0xb6   : > { %v621_v33 = vld [vmem:[%s9152_s15 + $0x9] sm:$0xff]  ;;  %v9222_v35 = vld [vmem:[%s9152_s15 + $0x19] sm:$0xff]  ;;  %v9225_v36 = vld [vmem:[%s9152_s15 + $0x11] sm:$0xff] }
  0xb7   : > { %v9230_v37 = vld [vmem:[%s9152_s15 + $0x29] sm:$0xff]  ;;  %v9233_v38 = vld [vmem:[%s9152_s15 + $0x21] sm:$0xff]  ;;  %v9238_v39 = vld [vmem:[%s9152_s15 + $0x39] sm:$0xff] }
  0xb8   : > { %429 = vperm.xlu1 %8695, %v9173_v7   ;;  %424 = vperm.xlu0 %8694, %v9176_v8   ;;  %v9241_v40 = vld [vmem:[%s9152_s15 + $0x31] sm:$0xff]  ;;  %v9246_v41 = vld [vmem:[%s9152_s15 + $0x49] sm:$0xff]  ;;  %v9249_v42 = vld [vmem:[%s9152_s15 + $0x41] sm:$0xff] }
  0xb9   : > { %v9254_v43 = vld [vmem:[%s9152_s15 + $0x59] sm:$0xff]  ;;  %v9257_v44 = vld [vmem:[%s9152_s15 + $0x51] sm:$0xff]  ;;  %v9262_v45 = vld [vmem:[%s9152_s15 + $0x69] sm:$0xff] }
  0xba   : > { %11504 = vst [vmem:[#allocation18_spill] sm:$0xff] %v9262_v45  ;;  %v9265_v46 = vld [vmem:[%s9152_s15 + $0x61] sm:$0xff]  ;;  %v635_v47 = vld [vmem:[%s9152_s15 + $0x79] sm:$0xff]  ;;  %v9271_v48 = vld [vmem:[%s9152_s15 + $0x71] sm:$0xff] }
  0xbb   : > { %11505 = vst [vmem:[#allocation19_spill] sm:$0xff] %v9271_v48  ;;  %v637_v49 = vld [vmem:[%s9152_s15 + $0x89] sm:$0xff]  ;;  %v636_v50 = vld [vmem:[%s9152_s15 + $0x81] sm:$0xff]  ;;  %v639_v51 = vld [vmem:[%s9152_s15 + $0x99] sm:$0xff] }
  0xbc   : > { %439 = vperm.xlu1 %8695, %v9181_v9   ;;  %434 = vperm.xlu0 %8694, %v9184_v10   ;;  %v638_v52 = vld [vmem:[%s9152_s15 + $0x91] sm:$0xff]  ;;  %v641_v53 = vld [vmem:[%s9152_s15 + $0xa9] sm:$0xff]  ;;  %v640_v54 = vld [vmem:[%s9152_s15 + $0xa1] sm:$0xff] }
  0xbd   : > { %v643_v55 = vld [vmem:[%s9152_s15 + $0xb9] sm:$0xff]  ;;  %v642_v56 = vld [vmem:[%s9152_s15 + $0xb1] sm:$0xff]  ;;  %v645_v57 = vld [vmem:[%s9152_s15 + $0xc9] sm:$0xff] }
  0xbe   : > { %v644_v58 = vld [vmem:[%s9152_s15 + $0xc1] sm:$0xff]  ;;  %v647_v59 = vld [vmem:[%s9152_s15 + $0xd9] sm:$0xff]  ;;  %v646_v60 = vld [vmem:[%s9152_s15 + $0xd1] sm:$0xff] }
  0xbf   : > { %v649_v61 = vld [vmem:[%s9152_s15 + $0xe9] sm:$0xff]  ;;  %v648_v62 = vld [vmem:[%s9152_s15 + $0xe1] sm:$0xff]  ;;  %v651_v63 = vld [vmem:[%s9152_s15 + $0xf9] sm:$0xff] }
  0xc0   : > { %449 = vperm.xlu1 %8695, %v9189_v11   ;;  %444 = vperm.xlu0 %8694, %v9192_v12   ;;  %v650_v0 = vld [vmem:[%s9152_s15 + $0xf1] sm:$0xff]  ;;  %v881_v4 = vld [vmem:[%s9152_s15 + $0x2] sm:$0xff] }
  0xc1   : > { %v882_v2 = vld [vmem:[%s9152_s15 + $0xa] sm:$0xff] }
  0xc4   : > { %459 = vperm.xlu1 %8695, %v372_v13   ;;  %454 = vperm.xlu0 %8694, %v9198_v14  }
  0xc8   : > { %469 = vperm.xlu1 %8695, %v374_v15   ;;  %464 = vperm.xlu0 %8694, %v373_v16   ;;  %v9297_v16 = vld [vmem:[%s9152_s15 + $0x1a] sm:$0xff] }
  0xcc   : > { %479 = vperm.xlu1 %8695, %v376_v17   ;;  %474 = vperm.xlu0 %8694, %v375_v18   ;;  %v9300_v17 = vld [vmem:[%s9152_s15 + $0x12] sm:$0xff] }
  0xd0   : > { %489 = vperm.xlu1 %8695, %v378_v19   ;;  %484 = vperm.xlu0 %8694, %v377_v20   ;;  %v9309_v20 = vld [vmem:[%s9152_s15 + $0x2a] sm:$0xff] }
  0xd4   : > { %499 = vperm.xlu1 %8695, %v380_v21   ;;  %494 = vperm.xlu0 %8694, %v379_v22   ;;  %v9312_v21 = vld [vmem:[%s9152_s15 + $0x22] sm:$0xff] }
  0xd8   : > { %509 = vperm.xlu1 %8695, %v382_v23   ;;  %504 = vperm.xlu0 %8694, %v381_v24   ;;  %v9321_v24 = vld [vmem:[%s9152_s15 + $0x3a] sm:$0xff] }
  0xdc   : > { %519 = vperm.xlu1 %8695, %v384_v25   ;;  %514 = vperm.xlu0 %8694, %v383_v26   ;;  %v9324_v25 = vld [vmem:[%s9152_s15 + $0x32] sm:$0xff] }
  0xe0   : > { %529 = vperm.xlu1 %8695, %v386_v27   ;;  %524 = vperm.xlu0 %8694, %v385_v28   ;;  %v9333_v28 = vld [vmem:[%s9152_s15 + $0x4a] sm:$0xff] }
  0xe4   : > { %539 = vperm.xlu1 %8695, %v388_v29   ;;  %534 = vperm.xlu0 %8694, %v387_v30   ;;  %v9336_v29 = vld [vmem:[%s9152_s15 + $0x42] sm:$0xff] }
  0xe8   : > { %549 = vperm.xlu1 %8695, %v390_v31   ;;  %544 = vperm.xlu0 %8694, %v389_v32   ;;  %v9345_v32 = vld [vmem:[%s9152_s15 + $0x5a] sm:$0xff] }
  0xe9   : > { %11515 = vst [vmem:[#allocation29_spill] sm:$0xff] %v9345_v32 }
  0xec   : > { %660 = vperm.xlu1 %8695, %v621_v33   ;;  %655 = vperm.xlu0 %8694, %v620_v34   ;;  %v9348_v33 = vld [vmem:[%s9152_s15 + $0x52] sm:$0xff] }
  0xf0   : > { %670 = vperm.xlu1 %8695, %v9222_v35   ;;  %665 = vperm.xlu0 %8694, %v9225_v36  }
  0xf4   : > { %680 = vperm.xlu1 %8695, %v9230_v37   ;;  %675 = vperm.xlu0 %8694, %v9233_v38  }
  0xf8   : > { %690 = vperm.xlu1 %8695, %v9238_v39   ;;  %685 = vperm.xlu0 %8694, %v9241_v40  }
  0xfc   : > { %700 = vperm.xlu1 %8695, %v9246_v41   ;;  %695 = vperm.xlu0 %8694, %v9249_v42  }
 0x100   : > { %710 = vperm.xlu1 %8695, %v9254_v43   ;;  %705 = vperm.xlu0 %8694, %v9257_v44  }
 0x104   : > { %720 = vperm.xlu1 %8695, %v9262_v45   ;;  %715 = vperm.xlu0 %8694, %v9265_v46  }
 0x108   : > { %730 = vperm.xlu1 %8695, %v635_v47   ;;  %725 = vperm.xlu0 %8694, %v9271_v48  }
 0x10c   : > { %740 = vperm.xlu1 %8695, %v637_v49   ;;  %735 = vperm.xlu0 %8694, %v636_v50   ;;  %v9357_v49 = vld [vmem:[%s9152_s15 + $0x6a] sm:$0xff]  ;;  %v9360_v50 = vld [vmem:[%s9152_s15 + $0x62] sm:$0xff] }
 0x10d   : > { %11516 = vst [vmem:[#allocation30_spill] sm:$0xff] %v9357_v49  ;;  %11517 = vst [vmem:[#allocation31_spill] sm:$0xff] %v9360_v50 }
 0x110   : > { %750 = vperm.xlu1 %8695, %v639_v51   ;;  %745 = vperm.xlu0 %8694, %v638_v52  }
 0x114   : > { %760 = vperm.xlu1 %8695, %v641_v53   ;;  %755 = vperm.xlu0 %8694, %v640_v54   ;;  %v9369_v53 = vld [vmem:[%s9152_s15 + $0x7a] sm:$0xff]  ;;  %v9372_v54 = vld [vmem:[%s9152_s15 + $0x72] sm:$0xff] }
 0x115   : > { %11518 = vst [vmem:[#allocation32_spill] sm:$0xff] %v9369_v53  ;;  %11519 = vst [vmem:[#allocation33_spill] sm:$0xff] %v9372_v54 }
 0x118   : > { %770 = vperm.xlu1 %8695, %v643_v55   ;;  %765 = vperm.xlu0 %8694, %v642_v56  }
 0x11c   : > { %780 = vperm.xlu1 %8695, %v645_v57   ;;  %775 = vperm.xlu0 %8694, %v644_v58   ;;  %v898_v57 = vld [vmem:[%s9152_s15 + $0x8a] sm:$0xff]  ;;  %v9382_v58 = vld [vmem:[%s9152_s15 + $0x82] sm:$0xff] }
 0x11d   : > { %11520 = vst [vmem:[#allocation34_spill] sm:$0xff] %v9382_v58 }
 0x120   : > { %790 = vperm.xlu1 %8695, %v647_v59   ;;  %785 = vperm.xlu0 %8694, %v646_v60  }
 0x124   : > { %800 = vperm.xlu1 %8695, %v649_v61   ;;  %795 = vperm.xlu0 %8694, %v648_v62   ;;  %v900_v61 = vld [vmem:[%s9152_s15 + $0x9a] sm:$0xff]  ;;  %v899_v62 = vld [vmem:[%s9152_s15 + $0x92] sm:$0xff] }
 0x128   : > { %810 = vperm.xlu1 %8695, %v651_v63   ;;  %805 = vperm.xlu0 %8694, %v650_v0  }
 0x12b   : > { %v9292_v13 = vpop.permute.xlu1 %404  ;;  %v9294_v15 = vpop.permute.xlu0 %394 }
 0x12c   : > { %11506 = vst [vmem:[#allocation20_spill] sm:$0xff] %v9292_v13  ;;  %11507 = vst [vmem:[#allocation21_spill] sm:$0xff] %v9294_v15  ;;  %921 = vperm.xlu1 %8695, %v882_v2   ;;  %916 = vperm.xlu0 %8694, %v881_v4   ;;  %v902_v2 = vld [vmem:[%s9152_s15 + $0xaa] sm:$0xff]  ;;  %v901_v4 = vld [vmem:[%s9152_s15 + $0xa2] sm:$0xff] }
 0x12f   : > { %v9302_v18 = vpop.permute.xlu1 %409  ;;  %v9304_v19 = vpop.permute.xlu0 %399 }
 0x130   : > { %11508 = vst [vmem:[#allocation22_spill] sm:$0xff] %v9302_v18  ;;  %11509 = vst [vmem:[#allocation23_spill] sm:$0xff] %v9304_v19  ;;  %931 = vperm.xlu1 %8695, %v9297_v16   ;;  %926 = vperm.xlu0 %8694, %v9300_v17  }
 0x133   : > { %v9314_v22 = vpop.permute.xlu1 %419  ;;  %v9316_v23 = vpop.permute.xlu0 %414 }
 0x134   : > { %11510 = vst [vmem:[#allocation24_spill] sm:$0xff] %v9314_v22  ;;  %11511 = vst [vmem:[#allocation25_spill] sm:$0xff] %v9316_v23  ;;  %941 = vperm.xlu1 %8695, %v9309_v20   ;;  %936 = vperm.xlu0 %8694, %v9312_v21  }
 0x137   : > { %v9326_v26 = vpop.permute.xlu1 %429  ;;  %v9328_v27 = vpop.permute.xlu0 %424 }
 0x138   : > { %11512 = vst [vmem:[#allocation26_spill] sm:$0xff] %v9326_v26  ;;  %11513 = vst [vmem:[#allocation27_spill] sm:$0xff] %v9328_v27  ;;  %951 = vperm.xlu1 %8695, %v9321_v24   ;;  %946 = vperm.xlu0 %8694, %v9324_v25   ;;  %v903_v27 = vld [vmem:[%s9152_s15 + $0xb2] sm:$0xff] }
 0x13b   : > { %v9338_v30 = vpop.permute.xlu1 %439  ;;  %v9340_v31 = vpop.permute.xlu0 %434 }
 0x13c   : > { %11514 = vst [vmem:[#allocation28_spill] sm:$0xff] %v9340_v31  ;;  %961 = vperm.xlu1 %8695, %v9333_v28   ;;  %956 = vperm.xlu0 %8694, %v9336_v29  }
 0x13f   : > { %v9350_v34 = vpop.permute.xlu1 %449  ;;  %v9352_v47 = vpop.permute.xlu0 %444 }
 0x140   : > { %971 = vperm.xlu1 %8695, %v9345_v32   ;;  %966 = vperm.xlu0 %8694, %v9348_v33  }
 0x143   : > { %v9362_v51 = vpop.permute.xlu1 %459  ;;  %v9364_v52 = vpop.permute.xlu0 %454 }
 0x144   : > { %981 = vperm.xlu1 %8695, %v9357_v49   ;;  %976 = vperm.xlu0 %8694, %v9360_v50   ;;  %v911_v49 = vld [vmem:[%s9152_s15 + $0xf2] sm:$0xff] }
 0x147   : > { %v9374_v55 = vpop.permute.xlu1 %469  ;;  %v9376_v56 = vpop.permute.xlu0 %464 }
 0x148   : > { %991 = vperm.xlu1 %8695, %v9369_v53   ;;  %986 = vperm.xlu0 %8694, %v9372_v54   ;;  %v912_v54 = vld [vmem:[%s9152_s15 + $0xfa] sm:$0xff] }
 0x14b   : > { %v9384_v59 = vpop.permute.xlu1 %479  ;;  %v9386_v60 = vpop.permute.xlu0 %474 }
 0x14c   : > { %1001 = vperm.xlu1 %8695, %v898_v57   ;;  %996 = vperm.xlu0 %8694, %v9382_v58   ;;  %v904_v57 = vld [vmem:[%s9152_s15 + $0xba] sm:$0xff] }
 0x14f   : > { %v9391_v63 = vpop.permute.xlu1 %489  ;;  %v9393_v0 = vpop.permute.xlu0 %484 }
 0x150   : > { %1011 = vperm.xlu1 %8695, %v900_v61   ;;  %1006 = vperm.xlu0 %8694, %v899_v62   ;;  %v906_v61 = vld [vmem:[%s9152_s15 + $0xca] sm:$0xff]  ;;  %v905_v62 = vld [vmem:[%s9152_s15 + $0xc2] sm:$0xff] }
 0x153   : > { %v9397_v31 = vpop.permute.xlu1 %499  ;;  %v9399_v26 = vpop.permute.xlu0 %494 }
 0x154   : > { %1021 = vperm.xlu1 %8695, %v902_v2   ;;  %1016 = vperm.xlu0 %8694, %v901_v4   ;;  %v908_v2 = vld [vmem:[%s9152_s15 + $0xda] sm:$0xff]  ;;  %v907_v4 = vld [vmem:[%s9152_s15 + $0xd2] sm:$0xff] }
 0x157   : > { %v9403_v22 = vpop.permute.xlu1 %509  ;;  %v9405_v23 = vpop.permute.xlu0 %504 }
 0x158   : > { %1031 = vperm.xlu1 %8695, %v904_v57   ;;  %1026 = vperm.xlu0 %8694, %v903_v27   ;;  %v910_v57 = vld [vmem:[%s9152_s15 + $0xea] sm:$0xff]  ;;  %v909_v27 = vld [vmem:[%s9152_s15 + $0xe2] sm:$0xff] }
 0x15b   : > { %v9409_v19 = vpop.permute.xlu1 %519  ;;  %v9411_v18 = vpop.permute.xlu0 %514 }
 0x15c   : > { %1041 = vperm.xlu1 %8695, %v906_v61   ;;  %1036 = vperm.xlu0 %8694, %v905_v62  }
 0x15f   : > { %v9415_v15 = vpop.permute.xlu1 %529  ;;  %v9417_v13 = vpop.permute.xlu0 %524 }
 0x160   : > { %1051 = vperm.xlu1 %8695, %v908_v2   ;;  %1046 = vperm.xlu0 %8694, %v907_v4  }
 0x163   : > { %v9421_v58 = vpop.permute.xlu1 %539  ;;  %v9423_v53 = vpop.permute.xlu0 %534 }
 0x164   : > { %1061 = vperm.xlu1 %8695, %v910_v57   ;;  %1056 = vperm.xlu0 %8694, %v909_v27  }
 0x167   : > { %v9427_v61 = vpop.permute.xlu1 %549  ;;  %v9429_v62 = vpop.permute.xlu0 %544 }
 0x168   : > { %1071 = vperm.xlu1 %8695, %v912_v54   ;;  %1066 = vperm.xlu0 %8694, %v911_v49  }
 0x16b   : > { %v9431_v48 = vpop.permute.xlu1 %660  ;;  %v9433_v2 = vpop.permute.xlu0 %655 }
 0x16c   : > { %11521 = vst [vmem:[#allocation35_spill] sm:$0xff] %v9431_v48  ;;  %11522 = vst [vmem:[#allocation36_spill] sm:$0xff] %v9433_v2  ;;  %1182 = vperm.xlu1 %8695, %v9160_v3   ;;  %1177 = vperm.xlu0 %8694, %v9155_v1   ;;  %v9455_v1 = vld [vmem:[#allocation4] ss:$0 sm:$0xff] }
 0x16d   : > { %v566_v50 = vmul.f32 %v9455_v1, %v9352_v47  ;;  %v568_v47 = vmul.f32 %v9455_v1, %v9364_v52  ;;  %v570_v52 = vmul.f32 %v9455_v1, %v9376_v56  ;;  %v572_v56 = vmul.f32 %v9455_v1, %v9386_v60 }
 0x16e   : > { %v574_v60 = vmul.f32 %v9455_v1, %v9393_v0  ;;  %v576_v0 = vmul.f32 %v9455_v1, %v9399_v26  ;;  %v578_v26 = vmul.f32 %v9455_v1, %v9405_v23  ;;  %v580_v23 = vmul.f32 %v9455_v1, %v9411_v18 }
 0x16f   : > { %v9437_v4 = vpop.permute.xlu1 %670  ;;  %v9439_v57 = vpop.permute.xlu0 %665  ;;  %v582_v18 = vmul.f32 %v9455_v1, %v9417_v13  ;;  %v584_v13 = vmul.f32 %v9455_v1, %v9423_v53 }
 0x170   : > { %11523 = vst [vmem:[#allocation37_spill] sm:$0xff] %v9437_v4  ;;  %11524 = vst [vmem:[#allocation38_spill] sm:$0xff] %v9439_v57  ;;  %1192 = vperm.xlu1 %8695, %v9165_v5   ;;  %1187 = vperm.xlu0 %8694, %v9168_v6   ;;  %v9457_v57 = vld [vmem:[#allocation4 + $0x1] ss:$0 sm:$0xff] }
 0x173   : > { %v9443_v27 = vpop.permute.xlu1 %680  ;;  %v9445_v54 = vpop.permute.xlu0 %675 }
 0x174   : > { %11525 = vst [vmem:[#allocation39_spill] sm:$0xff] %v9443_v27  ;;  %11526 = vst [vmem:[#allocation40_spill] sm:$0xff] %v9445_v54  ;;  %1202 = vperm.xlu1 %8695, %v9173_v7   ;;  %1197 = vperm.xlu0 %8694, %v9176_v8   ;;  %v565_v54 = vmul.f32 %v9455_v1, %v9338_v30 }
 0x177   : > { %v9449_v49 = vpop.permute.xlu1 %690  ;;  %v9451_v3 = vpop.permute.xlu0 %685 }
 0x178   : > { %11527 = vst [vmem:[#allocation41_spill] sm:$0xff] %v9449_v49  ;;  %11528 = vst [vmem:[#allocation42_spill] sm:$0xff] %v9451_v3  ;;  %1212 = vperm.xlu1 %8695, %v9181_v9   ;;  %1207 = vperm.xlu0 %8694, %v9184_v10   ;;  %v567_v3 = vmul.f32 %v9455_v1, %v9350_v34  ;;  %v569_v34 = vmul.f32 %v9455_v1, %v9362_v51 }
 0x179   : > { %v571_v51 = vmul.f32 %v9455_v1, %v9374_v55  ;;  %v573_v55 = vmul.f32 %v9455_v1, %v9384_v59  ;;  %v575_v59 = vmul.f32 %v9455_v1, %v9391_v63  ;;  %v577_v63 = vmul.f32 %v9455_v1, %v9397_v31 }
 0x17a   : > { %v579_v31 = vmul.f32 %v9455_v1, %v9403_v22  ;;  %v581_v22 = vmul.f32 %v9455_v1, %v9409_v19  ;;  %v583_v19 = vmul.f32 %v9455_v1, %v9415_v15  ;;  %v585_v15 = vmul.f32 %v9455_v1, %v9421_v58 }
 0x17b   : > { %v701_v4 = vpop.permute.xlu1 %700  ;;  %v9459_v27 = vpop.permute.xlu0 %695  ;;  %v587_v58 = vmul.f32 %v9455_v1, %v9427_v61  ;;  %v2899_v61 = vld [vmem:[#allocation8 + $0x90] sm:$0xff] }
 0x17c   : > { %11529 = vst [vmem:[#allocation43_spill] sm:$0xff] %v9459_v27  ;;  %v826_v48 = vmul.f32 %v9457_v57, %v701_v4  ;;  %1222 = vperm.xlu1 %8695, %v9189_v11   ;;  %1217 = vperm.xlu0 %8694, %v9192_v12  }
 0x17e   : > { %v9466_v49 = vadd.f32 %v826_v48, %v565_v54 }
 0x17f   : > { %v711_v2 = vpop.permute.xlu1 %710  ;;  %v706_v45 = vpop.permute.xlu0 %705 }
 0x180   : > { %v828_v27 = vmul.f32 %v9457_v57, %v711_v2  ;;  %v827_v30 = vmul.f32 %v9457_v57, %v706_v45  ;;  %1438 = vperm.xlu1 %8695, %v9225_v36   ;;  %1227 = vperm.xlu0 %8694, %v9198_v14  }
 0x182   : > { %v9476_v4 = vadd.f32 %v828_v27, %v567_v3  ;;  %v9478_v48 = vadd.f32 %v827_v30, %v566_v50 }
 0x183   : > { %v721_v54 = vpop.permute.xlu1 %720  ;;  %v716_v32 = vpop.permute.xlu0 %715 }
 0x184   : > { %v830_v2 = vmul.f32 %v9457_v57, %v721_v54  ;;  %v829_v45 = vmul.f32 %v9457_v57, %v716_v32  ;;  %1448 = vperm.xlu1 %8695, %v9233_v38   ;;  %1443 = vperm.xlu0 %8694, %v9222_v35  }
 0x186   : > { %v9488_v36 = vadd.f32 %v830_v2, %v569_v34  ;;  %v9490_v50 = vadd.f32 %v829_v45, %v568_v47 }
 0x187   : > { %v731_v27 = vpop.permute.xlu1 %730  ;;  %v726_v3 = vpop.permute.xlu0 %725 }
 0x188   : > { %v832_v30 = vmul.f32 %v9457_v57, %v731_v27  ;;  %v831_v32 = vmul.f32 %v9457_v57, %v726_v3  ;;  %1458 = vperm.xlu1 %8695, %v9241_v40   ;;  %1453 = vperm.xlu0 %8694, %v9230_v37  }
 0x18a   : > { %v9500_v35 = vadd.f32 %v832_v30, %v571_v51  ;;  %v9502_v34 = vadd.f32 %v831_v32, %v570_v52 }
 0x18b   : > { %v741_v54 = vpop.permute.xlu1 %740  ;;  %v736_v47 = vpop.permute.xlu0 %735 }
 0x18c   : > { %v834_v2 = vmul.f32 %v9457_v57, %v741_v54  ;;  %v833_v45 = vmul.f32 %v9457_v57, %v736_v47  ;;  %1704 = vperm.xlu1 %8695, %v9297_v16   ;;  %1699 = vperm.xlu0 %8694, %v9300_v17  }
 0x18e   : > { %v9512_v51 = vadd.f32 %v834_v2, %v573_v55  ;;  %v9514_v27 = vadd.f32 %v833_v45, %v572_v56 }
 0x18f   : > { %v751_v3 = vpop.permute.xlu1 %750  ;;  %v746_v52 = vpop.permute.xlu0 %745 }
 0x190   : > { %v836_v30 = vmul.f32 %v9457_v57, %v751_v3  ;;  %v835_v32 = vmul.f32 %v9457_v57, %v746_v52  ;;  %1714 = vperm.xlu1 %8695, %v9309_v20   ;;  %1709 = vperm.xlu0 %8694, %v9312_v21  }
 0x192   : > { %v9524_v16 = vadd.f32 %v836_v30, %v575_v59  ;;  %v9526_v17 = vadd.f32 %v835_v32, %v574_v60 }
 0x193   : > { %v761_v55 = vpop.permute.xlu1 %760  ;;  %v756_v54 = vpop.permute.xlu0 %755 }
 0x194   : > { %v838_v47 = vmul.f32 %v9457_v57, %v761_v55  ;;  %v837_v56 = vmul.f32 %v9457_v57, %v756_v54  ;;  %1463 = vperm.xlu1 %8695, %v9238_v39   ;;  %1719 = vperm.xlu0 %8694, %v9324_v25  }
 0x196   : > { %v9536_v2 = vadd.f32 %v838_v47, %v577_v63  ;;  %v9538_v45 = vadd.f32 %v837_v56, %v576_v0 }
 0x197   : > { %v771_v59 = vpop.permute.xlu1 %770  ;;  %v766_v3 = vpop.permute.xlu0 %765 }
 0x198   : > { %v840_v52 = vmul.f32 %v9457_v57, %v771_v59  ;;  %v839_v60 = vmul.f32 %v9457_v57, %v766_v3  ;;  %1965 = vperm.xlu1 %8695, %v9165_v5   ;;  %1960 = vperm.xlu0 %8694, %v9168_v6  }
 0x19a   : > { %v9548_v30 = vadd.f32 %v840_v52, %v579_v31  ;;  %v9550_v32 = vadd.f32 %v839_v60, %v578_v26 }
 0x19b   : > { %v781_v63 = vpop.permute.xlu1 %780  ;;  %v776_v55 = vpop.permute.xlu0 %775 }
 0x19c   : > { %v842_v54 = vmul.f32 %v9457_v57, %v781_v63  ;;  %v841_v0 = vmul.f32 %v9457_v57, %v776_v55  ;;  %1975 = vperm.xlu1 %8695, %v9173_v7   ;;  %1970 = vperm.xlu0 %8694, %v9176_v8   ;;  %v2897_v63 = vld [vmem:[#allocation8 + $0x80] sm:$0xff]  ;;  %v2898_v55 = vld [vmem:[#allocation8 + $0x88] sm:$0xff] }
 0x19d   : > { %v8040_v53 = vpack.c.bf16 %v2898_v55, %v2897_v63  ;;  %v4011_v63 = vld [vmem:[#allocation8 + $0x218] sm:$0xff] }
 0x19e   : > { %v9560_v5 = vadd.f32 %v842_v54, %v581_v22  ;;  %v9562_v6 = vadd.f32 %v841_v0, %v580_v23  ;;  %v586_v0 = vmul.f32 %v9455_v1, %v9429_v62 }
 0x19f   : > { %v791_v47 = vpop.permute.xlu1 %790  ;;  %v786_v56 = vpop.permute.xlu0 %785  ;;  %8041 = vmatprep.subr.bf16.mxu1 %v8040_v53 }
 0x1a0   : > { %v844_v31 = vmul.f32 %v9457_v57, %v791_v47  ;;  %v843_v59 = vmul.f32 %v9457_v57, %v786_v56  ;;  %1980 = vperm.xlu1 %8695, %v9184_v10   ;;  %1468 = vperm.xlu0 %8694, %v9249_v42  }
 0x1a1   : > { %8043 = vmatpush3.bf16.msra.mxu1 %v8040_v53  ;;  %v2904_v53 = vld [vmem:[#allocation8 + $0xb8] sm:$0xff] }
 0x1a2   : > { %v9572_v7 = vadd.f32 %v844_v31, %v583_v19  ;;  %v9574_v8 = vadd.f32 %v843_v59, %v582_v18  ;;  %v2900_v18 = vld [vmem:[#allocation8 + $0x98] sm:$0xff] }
 0x1a3   : > { %v801_v3 = vpop.permute.xlu1 %800  ;;  %v796_v26 = vpop.permute.xlu0 %795  ;;  %v8044_v62 = vpack.c.bf16 %v2900_v18, %v2899_v61  ;;  %v2905_v61 = vld [vmem:[#allocation8 + $0xc0] sm:$0xff]  ;;  %v2906_v18 = vld [vmem:[#allocation8 + $0xc8] sm:$0xff] }
 0x1a4   : > { %v846_v52 = vmul.f32 %v9457_v57, %v801_v3  ;;  %v845_v60 = vmul.f32 %v9457_v57, %v796_v26  ;;  %2221 = vperm.xlu1 %8695, %v9233_v38   ;;  %1724 = vperm.xlu0 %8694, %v9321_v24   ;;  %v2901_v3 = vld [vmem:[#allocation8 + $0xa0] sm:$0xff]  ;;  %v2902_v26 = vld [vmem:[#allocation8 + $0xa8] sm:$0xff] }
 0x1a5   : > { %8045 = vmatprep.subr.bf16.mxu1 %v8044_v62 }
 0x1a6   : > { %v9584_v10 = vadd.f32 %v846_v52, %v585_v15  ;;  %v9586_v22 = vadd.f32 %v845_v60, %v584_v13  ;;  %8047 = vmatpush3.bf16.msra.mxu1 %v8044_v62  ;;  %v8048_v60 = vpack.c.bf16 %v2902_v26, %v2901_v3  ;;  %v9638_v26 = vld [vmem:[#allocation4 + $0x2] ss:$0 sm:$0xff] }
 0x1a7   : > { %v811_v23 = vpop.permute.xlu1 %810  ;;  %v806_v54 = vpop.permute.xlu0 %805 }
 0x1a8   : > { %v848_v19 = vmul.f32 %v9457_v57, %v811_v23  ;;  %v847_v38 = vmul.f32 %v9457_v57, %v806_v54  ;;  %2231 = vperm.xlu1 %8695, %v9241_v40   ;;  %2226 = vperm.xlu0 %8694, %v9230_v37   ;;  %v4008_v40 = vld [vmem:[#allocation8 + $0x200] sm:$0xff]  ;;  %v4009_v37 = vld [vmem:[#allocation8 + $0x208] sm:$0xff] }
 0x1a9   : > { %v9606_v15 = vpack.c.bf16 %v4009_v37, %v4008_v40  ;;  %8049 = vmatprep.subr.bf16.mxu1 %v8048_v60  ;;  %v4015_v37 = vld [vmem:[#allocation8 + $0x238] sm:$0xff] }
 0x1aa   : > { %v9596_v47 = vadd.f32 %v848_v19, %v587_v58  ;;  %v9598_v56 = vadd.f32 %v847_v38, %v586_v0  ;;  %8051 = vmatpush3.bf16.msra.mxu1 %v8048_v60  ;;  %v2903_v58 = vld [vmem:[#allocation8 + $0xb0] sm:$0xff]  ;;  %v4012_v0 = vld [vmem:[#allocation8 + $0x220] sm:$0xff]  ;;  %v4013_v19 = vld [vmem:[#allocation8 + $0x228] sm:$0xff] }
 0x1ab   : > { %v9600_v31 = vpop.permute.xlu1 %921  ;;  %v9602_v59 = vpop.permute.xlu0 %916  ;;  %11530 = vst [vmem:[#allocation44_spill] sm:$0xff] %v9606_v15  ;;  %8169 = vmatprep.subr.bf16.mxu0 %v9606_v15  ;;  %v9626_v38 = vpack.c.bf16 %v4013_v19, %v4012_v0  ;;  %v4017_v0 = vld [vmem:[#allocation8 + $0x248] sm:$0xff] }
 0x1ac   : > { %1729 = vperm.xlu1 %8695, %v9336_v29   ;;  %2236 = vperm.xlu0 %8694, %v9238_v39   ;;  %v4010_v39 = vld [vmem:[#allocation8 + $0x210] sm:$0xff] }
 0x1ad   : > { %8171 = vmatpush3.bf16.msra.mxu0 %v9606_v15  ;;  %v9616_v55 = vpack.c.bf16 %v4011_v63, %v4010_v39  ;;  %11532 = vst [vmem:[#allocation46_spill] sm:$0xff] %v9626_v38  ;;  %v2907_v63 = vld [vmem:[#allocation8 + $0xd0] sm:$0xff] }
 0x1af   : > { %v9608_v13 = vpop.permute.xlu1 %931  ;;  %v9610_v52 = vpop.permute.xlu0 %926  ;;  %11531 = vst [vmem:[#allocation45_spill] sm:$0xff] %v9616_v55  ;;  %8173 = vmatprep.subr.bf16.mxu0 %v9616_v55 }
 0x1b0   : > { %1473 = vperm.xlu1 %8695, %v9246_v41   ;;  %2241 = vperm.xlu0 %8694, %v9249_v42   ;;  %v8052_v42 = vpack.c.bf16 %v2904_v53, %v2903_v58  ;;  %v2908_v58 = vld [vmem:[#allocation8 + $0xd8] sm:$0xff] }
 0x1b1   : > { %8175 = vmatpush3.bf16.msra.mxu0 %v9616_v55 }
 0x1b2   : > { %8053 = vmatprep.subr.bf16.mxu1 %v8052_v42  ;;  %8177 = vmatprep.subr.bf16.mxu0 %v9626_v38 }
 0x1b3   : > { %v9618_v23 = vpop.permute.xlu1 %941  ;;  %v9620_v54 = vpop.permute.xlu0 %936  ;;  %8055 = vmatpush3.bf16.msra.mxu1 %v8052_v42  ;;  %v4016_v42 = vld [vmem:[#allocation8 + $0x240] sm:$0xff] }
 0x1b4   : > { %2482 = vperm.xlu1 %8695, %v9312_v21   ;;  %1985 = vperm.xlu0 %8694, %v9181_v9   ;;  %v8056_v21 = vpack.c.bf16 %v2906_v18, %v2905_v61  ;;  %v4014_v9 = vld [vmem:[#allocation8 + $0x230] sm:$0xff]  ;;  %v9650_v18 = vpack.c.bf16 %v4017_v0, %v4016_v42  ;;  %v2912_v0 = vld [vmem:[#allocation8 + $0xf8] sm:$0xff] }
 0x1b5   : > { %8179 = vmatpush3.bf16.msra.mxu0 %v9626_v38  ;;  %v9636_v3 = vpack.c.bf16 %v4015_v37, %v4014_v9  ;;  %v2910_v9 = vld [vmem:[#allocation8 + $0xe8] sm:$0xff] }
 0x1b6   : > { %8057 = vmatprep.subr.bf16.mxu1 %v8056_v21  ;;  %11536 = vst [vmem:[#allocation50_spill] sm:$0xff] %v9650_v18  ;;  %v1418_v38 = vld [vmem:[%s9152_s15 + $0x89] sm:$0xff] }
 0x1b7   : > { %v9628_v62 = vpop.permute.xlu1 %951  ;;  %v9630_v40 = vpop.permute.xlu0 %946  ;;  %11533 = vst [vmem:[#allocation47_spill] sm:$0xff] %v9636_v3  ;;  %8059 = vmatpush3.bf16.msra.mxu1 %v8056_v21  ;;  %8181 = vmatprep.subr.bf16.mxu0 %v9636_v3  ;;  %v2909_v21 = vld [vmem:[#allocation8 + $0xe0] sm:$0xff] }
 0x1b8   : > { %2492 = vperm.xlu1 %8695, %v9324_v25   ;;  %2487 = vperm.xlu0 %8694, %v9309_v20   ;;  %v8060_v20 = vpack.c.bf16 %v2908_v58, %v2907_v63  ;;  %v4018_v58 = vld [vmem:[#allocation8 + $0x250] sm:$0xff] }
 0x1b9   : > { %8183 = vmatpush3.bf16.msra.mxu0 %v9636_v3 }
 0x1ba   : > { %8061 = vmatprep.subr.bf16.mxu1 %v8060_v20  ;;  %8185 = vmatprep.subr.bf16.mxu0 %v9650_v18 }
 0x1bb   : > { %v962_v60 = vpop.permute.xlu1 %961  ;;  %v9640_v39 = vpop.permute.xlu0 %956  ;;  %8063 = vmatpush3.bf16.msra.mxu1 %v8060_v20 }
 0x1bc   : > { %11534 = vst [vmem:[#allocation48_spill] sm:$0xff] %v9640_v39  ;;  %v1087_v25 = vmul.f32 %v9638_v26, %v962_v60  ;;  %1478 = vperm.xlu1 %8695, %v9257_v44   ;;  %2497 = vperm.xlu0 %8694, %v9321_v24  }
 0x1bd   : > { %8187 = vmatpush3.bf16.msra.mxu0 %v9650_v18 }
 0x1be   : > { %v9647_v53 = vadd.f32 %v1087_v25, %v9466_v49  ;;  %v8064_v49 = vpack.c.bf16 %v2910_v9, %v2909_v21  ;;  %v4019_v25 = vld [vmem:[#allocation8 + $0x258] sm:$0xff]  ;;  %v4020_v9 = vld [vmem:[#allocation8 + $0x260] sm:$0xff] }
 0x1bf   : > { %v972_v19 = vpop.permute.xlu1 %971  ;;  %v967_v61 = vpop.permute.xlu0 %966 }
 0x1c0   : > { %11535 = vst [vmem:[#allocation49_spill] sm:$0xff] %v9647_v53  ;;  %v1089_v24 = vmul.f32 %v9638_v26, %v972_v19  ;;  %v1088_v37 = vmul.f32 %v9638_v26, %v967_v61  ;;  %2502 = vperm.xlu1 %8695, %v9336_v29   ;;  %1990 = vperm.xlu0 %8694, %v9192_v12   ;;  %v2911_v12 = vld [vmem:[#allocation8 + $0xf0] sm:$0xff] }
 0x1c1   : > { %8065 = vmatprep.subr.bf16.mxu1 %v8064_v49  ;;  %v9664_v29 = vpack.c.bf16 %v4019_v25, %v4018_v58 }
 0x1c2   : > { %v9658_v60 = vadd.f32 %v1089_v24, %v9476_v4  ;;  %v9661_v63 = vadd.f32 %v1088_v37, %v9478_v48  ;;  %8067 = vmatpush3.bf16.msra.mxu1 %v8064_v49  ;;  %v8068_v48 = vpack.c.bf16 %v2912_v0, %v2911_v12  ;;  %v4021_v24 = vld [vmem:[#allocation8 + $0x268] sm:$0xff] }
 0x1c3   : > { %v982_v20 = vpop.permute.xlu1 %981  ;;  %v977_v42 = vpop.permute.xlu0 %976  ;;  %11539 = vst [vmem:[#allocation53_spill] sm:$0xff] %v9664_v29  ;;  %8189 = vmatprep.subr.bf16.mxu0 %v9664_v29 }
 0x1c4   : > { %11537 = vst [vmem:[#allocation51_spill] sm:$0xff] %v9658_v60  ;;  %11538 = vst [vmem:[#allocation52_spill] sm:$0xff] %v9661_v63  ;;  %v1091_v19 = vmul.f32 %v9638_v26, %v982_v20  ;;  %v1090_v4 = vmul.f32 %v9638_v26, %v977_v42  ;;  %2246 = vperm.xlu1 %8695, %v9246_v41   ;;  %1734 = vperm.xlu0 %8694, %v9333_v28   ;;  %v4022_v20 = vld [vmem:[#allocation8 + $0x270] sm:$0xff]  ;;  %v4023_v42 = vld [vmem:[#allocation8 + $0x278] sm:$0xff] }
 0x1c5   : > { %8069 = vmatprep.subr.bf16.mxu1 %v8068_v48  ;;  %8191 = vmatpush3.bf16.msra.mxu0 %v9664_v29  ;;  %v9678_v41 = vpack.c.bf16 %v4021_v24, %v4020_v9  ;;  %v1158_v29 = vld [vmem:[%s9152_s15 + $0x90] sm:$0xff]  ;;  %v11580_v60 = vld [vmem:[#allocation38_spill] sm:$0xff] }
 0x1c6   : > { %v9672_v61 = vadd.f32 %v1091_v19, %v9488_v36  ;;  %v9675_v21 = vadd.f32 %v1090_v4, %v9490_v50  ;;  %8071 = vmatpush3.bf16.msra.mxu1 %v8068_v48  ;;  %v9692_v19 = vpack.c.bf16 %v4023_v42, %v4022_v20  ;;  %v1153_v20 = vld [vmem:[%s9152_s15 + $0x68] sm:$0xff]  ;;  %v819_v63 = vmul.f32 %v9457_v57, %v11580_v60 }
 0x1c7   : > { %v992_v37 = vpop.permute.xlu1 %991  ;;  %v987_v49 = vpop.permute.xlu0 %986  ;;  %11542 = vst [vmem:[#allocation56_spill] sm:$0xff] %v9678_v41  ;;  %8193 = vmatprep.subr.bf16.mxu0 %v9678_v41 }
 0x1c8   : > { %11540 = vst [vmem:[#allocation54_spill] sm:$0xff] %v9672_v61  ;;  %11541 = vst [vmem:[#allocation55_spill] sm:$0xff] %v9675_v21  ;;  %v1093_v58 = vmul.f32 %v9638_v26, %v992_v37  ;;  %v1092_v25 = vmul.f32 %v9638_v26, %v987_v49  ;;  %2251 = vperm.xlu1 %8695, %v9257_v44   ;;  %1739 = vperm.xlu0 %8694, %v9348_v33  }
 0x1c9   : > { %8195 = vmatpush3.bf16.msra.mxu0 %v9678_v41  ;;  %11545 = vst [vmem:[#allocation59_spill] sm:$0xff] %v9692_v19  ;;  %v11571_v41 = vld [vmem:[#allocation32_spill] sm:$0xff] }
 0x1ca   : > { %v9686_v36 = vadd.f32 %v1093_v58, %v9500_v35  ;;  %v9689_v50 = vadd.f32 %v1092_v25, %v9502_v34  ;;  %8197 = vmatprep.subr.bf16.mxu0 %v9692_v19 }
 0x1cb   : > { %v1002_v12 = vpop.permute.xlu1 %1001  ;;  %v997_v0 = vpop.permute.xlu0 %996 }
 0x1cc   : > { %11543 = vst [vmem:[#allocation57_spill] sm:$0xff] %v9686_v36  ;;  %11544 = vst [vmem:[#allocation58_spill] sm:$0xff] %v9689_v50  ;;  %v1095_v44 = vmul.f32 %v9638_v26, %v1002_v12  ;;  %v1094_v4 = vmul.f32 %v9638_v26, %v997_v0  ;;  %1995 = vperm.xlu1 %8695, %v9189_v11   ;;  %1483 = vperm.xlu0 %8694, %v9254_v43   ;;  %v11577_v36 = vld [vmem:[#allocation37_spill] sm:$0xff] }
 0x1cd   : > { %8199 = vmatpush3.bf16.msra.mxu0 %v9692_v19  ;;  %v820_v50 = vmul.f32 %v9457_v57, %v11577_v36 }
 0x1ce   : > { %v9700_v35 = vadd.f32 %v1095_v44, %v9512_v51  ;;  %v9703_v34 = vadd.f32 %v1094_v4, %v9514_v27  ;;  %v11552_v44 = vld [vmem:[#allocation29_spill] sm:$0xff] }
 0x1cf   : > { %v1012_v48 = vpop.permute.xlu1 %1011  ;;  %v1007_v9 = vpop.permute.xlu0 %1006  ;;  %v1154_v4 = vld [vmem:[%s9152_s15 + $0x70] sm:$0xff] }
 0x1d0   : > { %11546 = vst [vmem:[#allocation60_spill] sm:$0xff] %v9700_v35  ;;  %11547 = vst [vmem:[#allocation61_spill] sm:$0xff] %v9703_v34  ;;  %v1097_v24 = vmul.f32 %v9638_v26, %v1012_v48  ;;  %v1096_v37 = vmul.f32 %v9638_v26, %v1007_v9  ;;  %1488 = vperm.xlu1 %8695, %v9265_v46   ;;  %2507 = vperm.xlu0 %8694, %v9333_v28   ;;  %v11576_v35 = vld [vmem:[#allocation21_spill] sm:$0xff] }
 0x1d1   : > { %v556_v34 = vmul.f32 %v9455_v1, %v11576_v35  ;;  %v9888_v35 = vld [vmem:[#allocation4 + $0x4] ss:$0 sm:$0xff] }
 0x1d2   : > { %v9711_v11 = vadd.f32 %v1097_v24, %v9524_v16  ;;  %v9714_v51 = vadd.f32 %v1096_v37, %v9526_v17 }
 0x1d3   : > { %v1022_v27 = vpop.permute.xlu1 %1021  ;;  %v1017_v49 = vpop.permute.xlu0 %1016 }
 0x1d4   : > { %11548 = vst [vmem:[#allocation62_spill] sm:$0xff] %v9711_v11  ;;  %11549 = vst [vmem:[#allocation63_spill] sm:$0xff] %v9714_v51  ;;  %v1099_v58 = vmul.f32 %v9638_v26, %v1022_v27  ;;  %v1098_v25 = vmul.f32 %v9638_v26, %v1017_v49  ;;  %2512 = vperm.xlu1 %8695, %v9348_v33   ;;  %2000 = vperm.xlu0 %8694, %v9198_v14   ;;  %v11575_v11 = vld [vmem:[#allocation20_spill] sm:$0xff] }
 0x1d5   : > { %v558_v51 = vmul.f32 %v9455_v1, %v11575_v11  ;;  %v11581_v11 = vld [vmem:[#allocation40_spill] sm:$0xff] }
 0x1d6   : > { %v9722_v28 = vadd.f32 %v1099_v58, %v9536_v2  ;;  %v9725_v16 = vadd.f32 %v1098_v25, %v9538_v45  ;;  %v11557_v58 = vld [vmem:[#allocation31_spill] sm:$0xff]  ;;  %v821_v53 = vmul.f32 %v9457_v57, %v11581_v11  ;;  %v1080_v11 = vmul.f32 %v9638_v26, %v9610_v52 }
 0x1d7   : > { %v1032_v17 = vpop.permute.xlu1 %1031  ;;  %v1027_v42 = vpop.permute.xlu0 %1026 }
 0x1d8   : > { %11550 = vst [vmem:[#allocation64_spill] sm:$0xff] %v9722_v28  ;;  %11551 = vst [vmem:[#allocation65_spill] sm:$0xff] %v9725_v16  ;;  %v1101_v12 = vmul.f32 %v9638_v26, %v1032_v17  ;;  %v1100_v0 = vmul.f32 %v9638_v26, %v1027_v42  ;;  %1744 = vperm.xlu1 %8695, %v11552_v44   ;;  %1232 = vperm.xlu0 %8694, %v1153_v20   ;;  %v9867_v28 = vld [vmem:[#allocation4 + $0x3] ss:$0 sm:$0xff]  ;;  %v9870_v16 = vld [vmem:[%s9152_s15 + $0x92] sm:$0xff] }
 0x1da   : > { %v9732_v33 = vadd.f32 %v1101_v12, %v9548_v30  ;;  %v9735_v14 = vadd.f32 %v1100_v0, %v9550_v32  ;;  %v11560_v12 = vld [vmem:[#allocation18_spill] sm:$0xff] }
 0x1db   : > { %v1042_v2 = vpop.permute.xlu1 %1041  ;;  %v1037_v48 = vpop.permute.xlu0 %1036 }
 0x1dc   : > { %11553 = vst [vmem:[#allocation29_spill] sm:$0xff] %v9732_v33  ;;  %11554 = vst [vmem:[#allocation66_spill] sm:$0xff] %v9735_v14  ;;  %v1103_v45 = vmul.f32 %v9638_v26, %v1042_v2  ;;  %v1102_v9 = vmul.f32 %v9638_v26, %v1037_v48  ;;  %1237 = vperm.xlu1 %8695, %v1154_v4   ;;  %2256 = vperm.xlu0 %8694, %v9254_v43   ;;  %v11573_v33 = vld [vmem:[#allocation36_spill] sm:$0xff] }
 0x1de   : > { %v9741_v24 = vadd.f32 %v1103_v45, %v9560_v5  ;;  %v9744_v37 = vadd.f32 %v1102_v9, %v9562_v6  ;;  %v11563_v45 = vld [vmem:[#allocation19_spill] sm:$0xff] }
 0x1df   : > { %v1052_v30 = vpop.permute.xlu1 %1051  ;;  %v1047_v27 = vpop.permute.xlu0 %1046 }
 0x1e0   : > { %11555 = vst [vmem:[#allocation67_spill] sm:$0xff] %v9741_v24  ;;  %11556 = vst [vmem:[#allocation68_spill] sm:$0xff] %v9744_v37  ;;  %v1105_v32 = vmul.f32 %v9638_v26, %v1052_v30  ;;  %v1104_v49 = vmul.f32 %v9638_v26, %v1047_v27  ;;  %2261 = vperm.xlu1 %8695, %v9265_v46   ;;  %1749 = vperm.xlu0 %8694, %v11557_v58   ;;  %v1155_v30 = vld [vmem:[%s9152_s15 + $0x78] sm:$0xff]  ;;  %v9856_v24 = vld [vmem:[%s9152_s15 + $0xa0] sm:$0xff] }
 0x1e2   : > { %v9751_v25 = vadd.f32 %v1105_v32, %v9572_v7  ;;  %v9754_v43 = vadd.f32 %v1104_v49, %v9574_v8 }
 0x1e3   : > { %v1062_v5 = vpop.permute.xlu1 %1061  ;;  %v1057_v17 = vpop.permute.xlu0 %1056 }
 0x1e4   : > { %11558 = vst [vmem:[#allocation31_spill] sm:$0xff] %v9751_v25  ;;  %11559 = vst [vmem:[#allocation69_spill] sm:$0xff] %v9754_v43  ;;  %v1107_v6 = vmul.f32 %v9638_v26, %v1062_v5  ;;  %v1106_v42 = vmul.f32 %v9638_v26, %v1057_v17  ;;  %2005 = vperm.xlu1 %8695, %v1153_v20   ;;  %1493 = vperm.xlu0 %8694, %v11560_v12  }
 0x1e6   : > { %v9760_v46 = vadd.f32 %v1107_v6, %v9584_v10  ;;  %v9763_v0 = vadd.f32 %v1106_v42, %v9586_v22  ;;  %v11567_v6 = vld [vmem:[#allocation33_spill] sm:$0xff] }
 0x1e7   : > { %v1072_v7 = vpop.permute.xlu1 %1071  ;;  %v1067_v2 = vpop.permute.xlu0 %1066  ;;  %v1416_v42 = vld [vmem:[%s9152_s15 + $0x79] sm:$0xff] }
 0x1e8   : > { %11561 = vst [vmem:[#allocation18_spill] sm:$0xff] %v9760_v46  ;;  %11562 = vst [vmem:[#allocation70_spill] sm:$0xff] %v9763_v0  ;;  %v1109_v8 = vmul.f32 %v9638_v26, %v1072_v7  ;;  %v1108_v48 = vmul.f32 %v9638_v26, %v1067_v2  ;;  %1498 = vperm.xlu1 %8695, %v11563_v45   ;;  %2517 = vperm.xlu0 %8694, %v11552_v44   ;;  %v11566_v44 = vld [vmem:[#allocation30_spill] sm:$0xff]  ;;  %v9847_v0 = vld [vmem:[%s9152_s15 + $0x8a] sm:$0xff] }
 0x1e9   : > { %v1417_v2 = vld [vmem:[%s9152_s15 + $0x81] sm:$0xff] }
 0x1ea   : > { %v9770_v20 = vadd.f32 %v1109_v8, %v9596_v47  ;;  %v9773_v10 = vadd.f32 %v1108_v48, %v9598_v56  ;;  %v1156_v47 = vld [vmem:[%s9152_s15 + $0x80] sm:$0xff]  ;;  %v2195_v56 = vld [vmem:[%s9152_s15 + $0x69] sm:$0xff] }
 0x1eb   : > { %v9775_v22 = vpop.permute.xlu1 %1182  ;;  %v9777_v9 = vpop.permute.xlu0 %1177 }
 0x1ec   : > { %11564 = vst [vmem:[#allocation19_spill] sm:$0xff] %v9770_v20  ;;  %11565 = vst [vmem:[#allocation71_spill] sm:$0xff] %v9773_v10  ;;  %2522 = vperm.xlu1 %8695, %v11557_v58   ;;  %2010 = vperm.xlu0 %8694, %v1154_v4   ;;  %v2196_v58 = vld [vmem:[%s9152_s15 + $0x71] sm:$0xff] }
 0x1ed   : > { %v1419_v20 = vld [vmem:[%s9152_s15 + $0x91] sm:$0xff] }
 0x1ef   : > { %v9781_v27 = vpop.permute.xlu1 %1192  ;;  %v9783_v32 = vpop.permute.xlu0 %1187 }
 0x1f0   : > { %1754 = vperm.xlu1 %8695, %v11566_v44   ;;  %1242 = vperm.xlu0 %8694, %v1155_v30   ;;  %v1341_v52 = vmul.f32 %v9867_v28, %v9783_v32  ;;  %v9925_v32 = vld [vmem:[#allocation4 + $0x7] ss:$0 sm:$0xff] }
 0x1f3   : > { %v9788_v49 = vpop.permute.xlu1 %1202  ;;  %v9790_v5 = vpop.permute.xlu0 %1197 }
 0x1f4   : > { %1247 = vperm.xlu1 %8695, %v1156_v47   ;;  %2266 = vperm.xlu0 %8694, %v2195_v56  }
 0x1f7   : > { %v9793_v4 = vpop.permute.xlu1 %1212  ;;  %v9795_v17 = vpop.permute.xlu0 %1207 }
 0x1f8   : > { %2271 = vperm.xlu1 %8695, %v2196_v58   ;;  %1759 = vperm.xlu0 %8694, %v11567_v6   ;;  %v1157_v58 = vld [vmem:[%s9152_s15 + $0x88] sm:$0xff] }
 0x1fb   : > { %v9799_v12 = vpop.permute.xlu1 %1222  ;;  %v9801_v7 = vpop.permute.xlu0 %1217 }
 0x1fc   : > { %11568 = vst [vmem:[#allocation30_spill] sm:$0xff] %v9799_v12  ;;  %11569 = vst [vmem:[#allocation33_spill] sm:$0xff] %v9801_v7  ;;  %2015 = vperm.xlu1 %8695, %v1155_v30   ;;  %1503 = vperm.xlu0 %8694, %v1416_v42  }
 0x1ff   : > { %v9804_v8 = vpop.permute.xlu1 %1438  ;;  %v9806_v48 = vpop.permute.xlu0 %1227 }
 0x200   : > { %11570 = vst [vmem:[#allocation72_spill] sm:$0xff] %v9806_v48  ;;  %1508 = vperm.xlu1 %8695, %v1417_v2   ;;  %2527 = vperm.xlu0 %8694, %v11566_v44  }
 0x203   : > { %v9809_v45 = vpop.permute.xlu1 %1448  ;;  %v9811_v56 = vpop.permute.xlu0 %1443 }
 0x204   : > { %2532 = vperm.xlu1 %8695, %v11567_v6   ;;  %2020 = vperm.xlu0 %8694, %v1156_v47   ;;  %v11572_v47 = vld [vmem:[#allocation34_spill] sm:$0xff] }
 0x207   : > { %v9815_v30 = vpop.permute.xlu1 %1458  ;;  %v9817_v19 = vpop.permute.xlu0 %1453 }
 0x208   : > { %1764 = vperm.xlu1 %8695, %v11571_v41   ;;  %1252 = vperm.xlu0 %8694, %v1157_v58  }
 0x20b   : > { %v9821_v18 = vpop.permute.xlu1 %1704  ;;  %v9823_v44 = vpop.permute.xlu0 %1699 }
 0x20c   : > { %1257 = vperm.xlu1 %8695, %v1158_v29   ;;  %2276 = vperm.xlu0 %8694, %v1416_v42  }
 0x20f   : > { %v9825_v3 = vpop.permute.xlu1 %1714  ;;  %v9827_v6 = vpop.permute.xlu0 %1709 }
 0x210   : > { %2281 = vperm.xlu1 %8695, %v1417_v2   ;;  %1769 = vperm.xlu0 %8694, %v11572_v47  }
 0x213   : > { %v9831_v55 = vpop.permute.xlu1 %1463  ;;  %v9833_v15 = vpop.permute.xlu0 %1719 }
 0x214   : > { %2025 = vperm.xlu1 %8695, %v1157_v58   ;;  %1513 = vperm.xlu0 %8694, %v1418_v38   ;;  %v1159_v58 = vld [vmem:[%s9152_s15 + $0x98] sm:$0xff] }
 0x217   : > { %v9836_v46 = vpop.permute.xlu1 %1965  ;;  %v9838_v42 = vpop.permute.xlu0 %1960 }
 0x218   : > { %1518 = vperm.xlu1 %8695, %v1419_v20   ;;  %2537 = vperm.xlu0 %8694, %v11571_v41  }
 0x21b   : > { %v9841_v2 = vpop.permute.xlu1 %1975  ;;  %v9843_v10 = vpop.permute.xlu0 %1970 }
 0x21c   : > { %2542 = vperm.xlu1 %8695, %v11572_v47   ;;  %2030 = vperm.xlu0 %8694, %v1158_v29   ;;  %v817_v47 = vmul.f32 %v9457_v57, %v11573_v33  ;;  %v11574_v29 = vld [vmem:[#allocation35_spill] sm:$0xff]  ;;  %v1078_v33 = vmul.f32 %v9638_v26, %v9602_v59  ;;  %v1079_v59 = vmul.f32 %v9638_v26, %v9600_v31 }
 0x21d   : > { %v818_v14 = vmul.f32 %v9457_v57, %v11574_v29  ;;  %v11579_v29 = vld [vmem:[#allocation23_spill] sm:$0xff]  ;;  %v1081_v57 = vmul.f32 %v9638_v26, %v9608_v13  ;;  %v1340_v13 = vmul.f32 %v9867_v28, %v9775_v22  ;;  %v1601_v22 = vmul.f32 %v9888_v35, %v9811_v56 }
 0x21e   : > { %v557_v21 = vmul.f32 %v9455_v1, %v11579_v29  ;;  %v849_v12 = vadd.f32 %v817_v47, %v556_v34  ;;  %v11582_v29 = vld [vmem:[#allocation25_spill] sm:$0xff]  ;;  %v9901_v34 = vld [vmem:[#allocation4 + $0x5] ss:$0 sm:$0xff] }
 0x21f   : > { %v9850_v25 = vpop.permute.xlu1 %1980  ;;  %v9852_v43 = vpop.permute.xlu0 %1468  ;;  %v560_v60 = vmul.f32 %v9455_v1, %v11582_v29  ;;  %v9904_v47 = vld [vmem:[%s9152_s15 + $0x99] sm:$0xff]  ;;  %v1863_v56 = vmul.f32 %v9901_v34, %v9827_v6 }
 0x220   : > { %1774 = vperm.xlu1 %8695, %v9847_v0   ;;  %1262 = vperm.xlu0 %8694, %v1159_v58   ;;  %v850_v7 = vadd.f32 %v818_v14, %v557_v21  ;;  %v1110_v39 = vadd.f32 %v1078_v33, %v849_v12  ;;  %v9914_v14 = vld [vmem:[#allocation4 + $0x6] ss:$0 sm:$0xff] }
 0x221   : > { %v853_v21 = vadd.f32 %v821_v53, %v560_v60  ;;  %v2124_v6 = vmul.f32 %v9914_v14, %v9843_v10 }
 0x223   : > { %v9858_v41 = vpop.permute.xlu1 %2221  ;;  %v9860_v37 = vpop.permute.xlu0 %1724 }
 0x224   : > { %1267 = vperm.xlu1 %8695, %v9856_v24   ;;  %2286 = vperm.xlu0 %8694, %v1418_v38   ;;  %v11578_v38 = vld [vmem:[#allocation22_spill] sm:$0xff] }
 0x225   : > { %v559_v61 = vmul.f32 %v9455_v1, %v11578_v38  ;;  %v1339_v38 = vmul.f32 %v9867_v28, %v9777_v9  ;;  %v1600_v9 = vmul.f32 %v9888_v35, %v9804_v8  ;;  %v851_v1 = vadd.f32 %v819_v63, %v558_v51  ;;  %v9928_v8 = vld [vmem:[%s9152_s15 + $0xa1] sm:$0xff] }
 0x226   : > { %v1602_v51 = vmul.f32 %v9888_v35, %v9809_v45  ;;  %v1862_v45 = vmul.f32 %v9901_v34, %v9821_v18  ;;  %v2123_v18 = vmul.f32 %v9914_v14, %v9836_v46 }
 0x227   : > { %v2232_v48 = vpop.permute.xlu1 %2231  ;;  %v2227_v36 = vpop.permute.xlu0 %2226  ;;  %v852_v31 = vadd.f32 %v820_v50, %v559_v61  ;;  %v1111_v50 = vadd.f32 %v1079_v59, %v850_v7  ;;  %v1371_v12 = vadd.f32 %v1339_v38, %v1110_v39  ;;  %v1112_v63 = vadd.f32 %v1080_v11, %v851_v1 }
 0x228   : > { %2291 = vperm.xlu1 %8695, %v1419_v20   ;;  %1779 = vperm.xlu0 %8694, %v9870_v16   ;;  %v1082_v20 = vmul.f32 %v9638_v26, %v9620_v54  ;;  %v1861_v54 = vmul.f32 %v9901_v34, %v9823_v44  ;;  %v1342_v39 = vmul.f32 %v9867_v28, %v9781_v27 }
 0x229   : > { %v1113_v53 = vadd.f32 %v1081_v57, %v852_v31  ;;  %v1632_v44 = vadd.f32 %v1600_v9, %v1371_v12  ;;  %v1372_v33 = vadd.f32 %v1340_v13, %v1111_v50  ;;  %v1373_v59 = vadd.f32 %v1341_v52, %v1112_v63  ;;  %v1681_v63 = vld [vmem:[%s9152_s15 + $0x9a] sm:$0xff] }
 0x22a   : > { %v1114_v7 = vadd.f32 %v1082_v20, %v853_v21  ;;  %v1603_v57 = vmul.f32 %v9888_v35, %v9817_v19  ;;  %v2383_v27 = vmul.f32 %v9925_v32, %v9858_v41  ;;  %v9950_v20 = vld [vmem:[#allocation4 + $0x8] ss:$0 sm:$0xff]  ;;  %v1343_v19 = vmul.f32 %v9867_v28, %v9790_v5 }
 0x22b   : > { %v9916_v29 = vpop.permute.xlu1 %1729  ;;  %v2237_v61 = vpop.permute.xlu0 %2236  ;;  %v1893_v11 = vadd.f32 %v1861_v54, %v1632_v44  ;;  %v1633_v31 = vadd.f32 %v1601_v22, %v1372_v33  ;;  %v1374_v9 = vadd.f32 %v1342_v39, %v1113_v53  ;;  %v1864_v41 = vmul.f32 %v9901_v34, %v9825_v3 }
 0x22c   : > { %2035 = vperm.xlu1 %8695, %v1159_v58   ;;  %1523 = vperm.xlu0 %8694, %v9904_v47   ;;  %v2122_v58 = vmul.f32 %v9914_v14, %v9838_v42  ;;  %v1634_v42 = vadd.f32 %v1602_v51, %v1373_v59  ;;  %v2385_v13 = vmul.f32 %v9925_v32, %v2232_v48 }
 0x22d   : > { %v1894_v21 = vadd.f32 %v1862_v45, %v1633_v31  ;;  %v2384_v46 = vmul.f32 %v9925_v32, %v2227_v36  ;;  %v1635_v10 = vadd.f32 %v1603_v57, %v1374_v9  ;;  %v1604_v3 = vmul.f32 %v9888_v35, %v9815_v30  ;;  %v9967_v36 = vld [vmem:[#allocation6] ss:$0 sm:$0xff] }
 0x22e   : > { %v2154_v1 = vadd.f32 %v2122_v58, %v1893_v11  ;;  %v2125_v48 = vmul.f32 %v9914_v14, %v9841_v2  ;;  %v1375_v51 = vadd.f32 %v1343_v19, %v1114_v7  ;;  %v1865_v44 = vmul.f32 %v9901_v34, %v9833_v15 }
 0x22f   : > { %v9938_v38 = vpop.permute.xlu1 %1473  ;;  %v2242_v60 = vpop.permute.xlu0 %2241  ;;  %v2155_v5 = vadd.f32 %v2123_v18, %v1894_v21  ;;  %v1896_v22 = vadd.f32 %v1864_v41, %v1635_v10  ;;  %v2386_v58 = vmul.f32 %v9925_v32, %v2237_v61  ;;  %v2126_v15 = vmul.f32 %v9914_v14, %v9850_v25  ;;  %v1682_v61 = vld [vmem:[%s9152_s15 + $0xa2] sm:$0xff] }
 0x230   : > { %1528 = vperm.xlu1 %8695, %v9928_v8   ;;  %2547 = vperm.xlu0 %8694, %v9847_v0   ;;  %v1895_v0 = vadd.f32 %v1863_v56, %v1634_v42  ;;  %v2415_v12 = vadd.f32 %v2383_v27, %v2154_v1  ;;  %v1636_v7 = vadd.f32 %v1604_v3, %v1375_v51  ;;  %v11583_v10 = vld [vmem:[#allocation39_spill] sm:$0xff] }
 0x231   : > { %v2157_v56 = vadd.f32 %v2125_v48, %v1896_v22  ;;  %v2387_v9 = vmul.f32 %v9925_v32, %v2242_v60  ;;  %v9990_v60 = vld [vmem:[#allocation4 + $0x1] ss:$0 sm:$0xff]  ;;  %v11584_v48 = vld [vmem:[#allocation24_spill] sm:$0xff]  ;;  %v1083_v51 = vmul.f32 %v9638_v26, %v9618_v23 }
 0x232   : > { %v2156_v53 = vadd.f32 %v2124_v6, %v1895_v0  ;;  %v1897_v42 = vadd.f32 %v1865_v44, %v1636_v7  ;;  %v1943_v44 = vld [vmem:[%s9152_s15 + $0xb0] sm:$0xff] }
 0x233   : > { %v2483_v52 = vpop.permute.xlu1 %2482  ;;  %v9958_v50 = vpop.permute.xlu0 %1985  ;;  %v2418_v31 = vadd.f32 %v2386_v58, %v2157_v56  ;;  %v2203_v7 = vld [vmem:[%s9152_s15 + $0xa9] sm:$0xff] }
 0x234   : > { %v2644_v54 = vmul.f32 %v9950_v20, %v2483_v52  ;;  %2552 = vperm.xlu1 %8695, %v9870_v16   ;;  %2040 = vperm.xlu0 %8694, %v9856_v24   ;;  %v2417_v16 = vadd.f32 %v2385_v13, %v2156_v53  ;;  %v2416_v24 = vadd.f32 %v2384_v46, %v2155_v5  ;;  %v1942_v13 = vld [vmem:[%s9152_s15 + $0xa8] sm:$0xff] }
 0x235   : > { %v2158_v25 = vadd.f32 %v2126_v15, %v1897_v42  ;;  %v9996_v5 = vld [vmem:[#allocation4] ss:$0 sm:$0xff]  ;;  %v1605_v15 = vmul.f32 %v9888_v35, %v9831_v55 }
 0x236   : > { %v2676_v39 = vadd.f32 %v2644_v54, %v2415_v12  ;;  %v822_v12 = vmul.f32 %v9990_v60, %v11583_v10  ;;  %v561_v53 = vmul.f32 %v9996_v5, %v11584_v48 }
 0x237   : > { %v2493_v30 = vpop.permute.xlu1 %2492  ;;  %v2488_v33 = vpop.permute.xlu0 %2487  ;;  %v2419_v54 = vadd.f32 %v2387_v9, %v2158_v25 }
 0x238   : > { %v2715_v59 = vadd.f32 %v9967_v36, %v2676_v39  ;;  %v2646_v2 = vmul.f32 %v9950_v20, %v2493_v30  ;;  %v2645_v45 = vmul.f32 %v9950_v20, %v2488_v33  ;;  %2296 = vperm.xlu1 %8695, %v9904_v47   ;;  %1784 = vperm.xlu0 %8694, %v1681_v63  }
 0x239   : > { %v1344_v33 = vmul.f32 %v9867_v28, %v9788_v49 }
 0x23a   : > { %v2747_v57 = vmax.f32 %v2715_v59, 0.0  ;;  %v2678_v11 = vadd.f32 %v2646_v2, %v2417_v16  ;;  %v2677_v27 = vadd.f32 %v2645_v45, %v2416_v24  ;;  %v11585_v16 = vld [vmem:[#allocation42_spill] sm:$0xff]  ;;  %v11586_v2 = vld [vmem:[#allocation27_spill] sm:$0xff]  ;;  %v1084_v45 = vmul.f32 %v9638_v26, %v9630_v40 }
 0x23b   : > { %v9980_v18 = vpop.permute.xlu1 %1478  ;;  %v2498_v6 = vpop.permute.xlu0 %2497  ;;  %v823_v24 = vmul.f32 %v9990_v60, %v11585_v16  ;;  %v562_v23 = vmul.f32 %v9996_v5, %v11586_v2 }
 0x23c   : > { %2779 = vst [vmem:[#allocation2] sm:$0xff] %v2747_v57  ;;  %v2717_v47 = vadd.f32 %v9967_v36, %v2678_v11  ;;  %v2716_v19 = vadd.f32 %v9967_v36, %v2677_v27  ;;  %v2647_v41 = vmul.f32 %v9950_v20, %v2498_v6  ;;  %2301 = vperm.xlu1 %8695, %v9928_v8   ;;  %v4314_v11 = vld [vmem:[#allocation8 + $0x280] sm:$0xff]  ;;  %v4315_v27 = vld [vmem:[#allocation8 + $0x288] sm:$0xff] }
 0x23d   : > { %1789 = vperm.xlu0 %8694, %v1682_v61   ;;  %v855_v49 = vadd.f32 %v823_v24, %v562_v23  ;;  %v8200_v40 = vpack.c.bf16 %v4315_v27, %v4314_v11  ;;  %v4320_v11 = vld [vmem:[#allocation8 + $0x2b0] sm:$0xff]  ;;  %v4321_v27 = vld [vmem:[#allocation8 + $0x2b8] sm:$0xff] }
 0x23e   : > { %v2749_v1 = vmax.f32 %v2717_v47, 0.0  ;;  %v2748_v21 = vmax.f32 %v2716_v19, 0.0  ;;  %v2679_v0 = vadd.f32 %v2647_v41, %v2418_v31  ;;  %v1866_v19 = vmul.f32 %v9901_v34, %v9860_v37 }
 0x23f   : > { %v2503_v46 = vpop.permute.xlu1 %2502  ;;  %v9988_v52 = vpop.permute.xlu0 %1990  ;;  %v1116_v55 = vadd.f32 %v1084_v45, %v855_v49  ;;  %v1606_v41 = vmul.f32 %v9888_v35, %v9852_v43  ;;  %8201 = vmatprep.subr.bf16.mxu0 %v8200_v40  ;;  %v1867_v37 = vmul.f32 %v9901_v34, %v9916_v29 }
 0x240   : > { %2781 = vst [vmem:[#allocation2 + $0x10] sm:$0xff] %v2749_v1  ;;  %2780 = vst [vmem:[#allocation2 + $0x8] sm:$0xff] %v2748_v21  ;;  %v2718_v8 = vadd.f32 %v9967_v36, %v2679_v0  ;;  %v2648_v3 = vmul.f32 %v9950_v20, %v2503_v46  ;;  %2557 = vperm.xlu1 %8695, %v1681_v63   ;;  %v854_v63 = vadd.f32 %v822_v12, %v561_v53 }
 0x241   : > { %2045 = vperm.xlu0 %8694, %v1942_v13   ;;  %v2127_v1 = vmul.f32 %v9914_v14, %v9958_v50  ;;  %v2464_v50 = vld [vmem:[%s9152_s15 + $0xaa] sm:$0xff]  ;;  %v2128_v29 = vmul.f32 %v9914_v14, %v9988_v52 }
 0x242   : > { %v2750_v22 = vmax.f32 %v2718_v8, 0.0  ;;  %v2680_v39 = vadd.f32 %v2648_v3, %v2419_v54  ;;  %v1115_v56 = vadd.f32 %v1083_v51, %v854_v63  ;;  %v4317_v54 = vld [vmem:[#allocation8 + $0x298] sm:$0xff]  ;;  %v4319_v63 = vld [vmem:[#allocation8 + $0x2a8] sm:$0xff] }
 0x243   : > { %v2247_v58 = vpop.permute.xlu1 %2246  ;;  %v10005_v30 = vpop.permute.xlu0 %1734 }
 0x244   : > { %2782 = vst [vmem:[#allocation2 + $0x18] sm:$0xff] %v2750_v22  ;;  %v2719_v59 = vadd.f32 %v9967_v36, %v2680_v39  ;;  %2562 = vperm.xlu1 %8695, %v1682_v61   ;;  %v1345_v61 = vmul.f32 %v9867_v28, %v9795_v17  ;;  %v1376_v47 = vadd.f32 %v1344_v33, %v1115_v56  ;;  %v2204_v17 = vld [vmem:[%s9152_s15 + $0xb1] sm:$0xff] }
 0x245   : > { %2050 = vperm.xlu0 %8694, %v1943_v44   ;;  %v2388_v43 = vmul.f32 %v9925_v32, %v2247_v58  ;;  %v2465_v33 = vld [vmem:[%s9152_s15 + $0xb2] sm:$0xff] }
 0x246   : > { %v2751_v57 = vmax.f32 %v2719_v59, 0.0  ;;  %v1637_v25 = vadd.f32 %v1605_v15, %v1376_v47  ;;  %v1377_v21 = vadd.f32 %v1345_v61, %v1116_v55  ;;  %v1163_v61 = vld [vmem:[%s9152_s15 + $0xb8] sm:$0xff] }
 0x247   : > { %v2252_v42 = vpop.permute.xlu1 %2251  ;;  %v10019_v31 = vpop.permute.xlu0 %1739  ;;  %v2864_v6 = vld [vmem:[#allocation2 + $0x1] sm:$0xff]  ;;  %v2865_v9 = vld [vmem:[#allocation2 + $0x9] sm:$0xff] }
 0x248   : > { %2783 = vst [vmem:[#allocation2 + $0x20] sm:$0xff] %v2751_v57  ;;  %2306 = vperm.xlu1 %8695, %v2203_v7   ;;  %7352 = vmatprep.mubr.f32.mxu1 %v2864_v6  ;;  %v1898_v12 = vadd.f32 %v1866_v19, %v1637_v25  ;;  %v1638_v8 = vadd.f32 %v1606_v41, %v1377_v21  ;;  %v4322_v55 = vld [vmem:[#allocation8 + $0x2c0] sm:$0xff]  ;;  %v4323_v41 = vld [vmem:[#allocation8 + $0x2c8] sm:$0xff] }
 0x249   : > { %1272 = vperm.xlu0 %8694, %v1942_v13   ;;  %7353 = vmatmul.mubr.f32.vlgmr.msra.gmra.mrb[0].mxu1 %v2865_v9  ;;  %v4316_v13 = vld [vmem:[#allocation8 + $0x290] sm:$0xff]  ;;  %v2389_v24 = vmul.f32 %v9925_v32, %v2252_v42  ;;  %v8212_v9 = vpack.c.bf16 %v4321_v27, %v4320_v11 }
 0x24a   : > { %v2159_v3 = vadd.f32 %v2127_v1, %v1898_v12  ;;  %v1899_v48 = vadd.f32 %v1867_v37, %v1638_v8  ;;  %v8204_v39 = vpack.c.bf16 %v4317_v54, %v4316_v13  ;;  %v1085_v1 = vmul.f32 %v9638_v26, %v9628_v62  ;;  %v1164_v37 = vld [vmem:[%s9152_s15 + $0xc0] sm:$0xff]  ;;  %v4325_v62 = vld [vmem:[#allocation8 + $0x2d8] sm:$0xff] }
 0x24b   : > { %v10030_v0 = vpop.permute.xlu1 %1995  ;;  %v10032_v46 = vpop.permute.xlu0 %1483  ;;  %v2866_v10 = vld [vmem:[#allocation2 + $0x11] sm:$0xff]  ;;  %v8216_v54 = vpack.c.bf16 %v4323_v41, %v4322_v55 }
 0x24c   : > { %2311 = vperm.xlu1 %8695, %v2204_v17   ;;  %7355 = vmatprep.mubr.f32.mxu1 %v2866_v10  ;;  %v2420_v16 = vadd.f32 %v2388_v43, %v2159_v3  ;;  %v2160_v59 = vadd.f32 %v2128_v29, %v1899_v48  ;;  %v4324_v3 = vld [vmem:[#allocation8 + $0x2d0] sm:$0xff] }
 0x24d   : > { %1277 = vperm.xlu0 %8694, %v1943_v44   ;;  %7672 = vmatprep.mubr.f32.mxu0 %v2866_v10  ;;  %v4318_v44 = vld [vmem:[#allocation8 + $0x2a0] sm:$0xff]  ;;  %v11589_v10 = vld [vmem:[#allocation43_spill] sm:$0xff]  ;;  %v11590_v29 = vld [vmem:[#allocation28_spill] sm:$0xff] }
 0x24e   : > { %v8208_v45 = vpack.c.bf16 %v4319_v63, %v4318_v44  ;;  %v2421_v56 = vadd.f32 %v2389_v24, %v2160_v59  ;;  %v825_v12 = vmul.f32 %v9990_v60, %v11589_v10  ;;  %v564_v48 = vmul.f32 %v9996_v5, %v11590_v29 }
 0x24f   : > { %v10038_v53 = vpop.permute.xlu1 %1488  ;;  %v2508_v51 = vpop.permute.xlu0 %2507  ;;  %v2867_v22 = vld [vmem:[#allocation2 + $0x19] sm:$0xff]  ;;  %v1868_v59 = vmul.f32 %v9901_v34, %v10005_v30 }
 0x250   : > { %v2649_v58 = vmul.f32 %v9950_v20, %v2508_v51  ;;  %2567 = vperm.xlu1 %8695, %v2464_v50   ;;  %7356 = vmatmul.mubr.f32.gmra.mrb[2].mxu1 %v2867_v22  ;;  %v11591_v51 = vld [vmem:[#allocation48_spill] sm:$0xff]  ;;  %v857_v24 = vadd.f32 %v825_v12, %v564_v48 }
 0x251   : > { %1533 = vperm.xlu0 %8694, %v2203_v7   ;;  %7673 = vmatmul.mubr.f32.vlgmr.msra.gmra.mrb[0].mxu0 %v2867_v22 }
 0x252   : > { %v2681_v52 = vadd.f32 %v2649_v58, %v2420_v16  ;;  %8203 = vmatpush3.bf16.msra.mxu0 %v8200_v40  ;;  %v11587_v40 = vld [vmem:[#allocation41_spill] sm:$0xff] }
 0x253   : > { %v2513_v2 = vpop.permute.xlu1 %2512  ;;  %v10043_v23 = vpop.permute.xlu0 %2000  ;;  %8205 = vmatprep.subr.bf16.mxu0 %v8204_v39  ;;  %v824_v47 = vmul.f32 %v9990_v60, %v11587_v40  ;;  %v1086_v60 = vmul.f32 %v9638_v26, %v11591_v51  ;;  %v10073_v16 = vld [vmem:[%s9152_s15 + $0xb9] sm:$0xff] }
 0x254   : > { %v2720_v15 = vadd.f32 %v9967_v36, %v2681_v52  ;;  %v2650_v57 = vmul.f32 %v9950_v20, %v2513_v2  ;;  %2572 = vperm.xlu1 %8695, %v2465_v33   ;;  %v4327_v52 = vld [vmem:[#allocation8 + $0x2e8] sm:$0xff]  ;;  %v4329_v40 = vld [vmem:[#allocation8 + $0x2f8] sm:$0xff]  ;;  %v2130_v41 = vmul.f32 %v9914_v14, %v10043_v23 }
 0x255   : > { %1538 = vperm.xlu0 %8694, %v2204_v17   ;;  %v11588_v17 = vld [vmem:[#allocation26_spill] sm:$0xff]  ;;  %v1118_v2 = vadd.f32 %v1086_v60, %v857_v24 }
 0x256   : > { %v2752_v7 = vmax.f32 %v2720_v15, 0.0  ;;  %v2682_v49 = vadd.f32 %v2650_v57, %v2421_v56  ;;  %8207 = vmatpush3.bf16.msra.mxu0 %v8204_v39  ;;  %v563_v25 = vmul.f32 %v9996_v5, %v11588_v17  ;;  %v1607_v39 = vmul.f32 %v9888_v35, %v9938_v38  ;;  %v4326_v38 = vld [vmem:[#allocation8 + $0x2e0] sm:$0xff]  ;;  %v1165_v17 = vld [vmem:[%s9152_s15 + $0xc8] sm:$0xff] }
 0x257   : > { %v10048_v42 = vpop.permute.xlu1 %1744  ;;  %v10050_v6 = vpop.permute.xlu0 %1232  ;;  %8209 = vmatprep.subr.bf16.mxu0 %v8208_v45  ;;  %v1608_v56 = vmul.f32 %v9888_v35, %v9980_v18  ;;  %v2129_v15 = vmul.f32 %v9914_v14, %v10030_v0  ;;  %v1425_v57 = vld [vmem:[%s9152_s15 + $0xc1] sm:$0xff]  ;;  %v4328_v0 = vld [vmem:[#allocation8 + $0x2f0] sm:$0xff] }
 0x258   : > { %2784 = vst [vmem:[#allocation2 + $0x28] sm:$0xff] %v2752_v7  ;;  %v2721_v19 = vadd.f32 %v9967_v36, %v2682_v49  ;;  %1794 = vperm.xlu1 %8695, %v2464_v50   ;;  %v856_v8 = vadd.f32 %v824_v47, %v563_v25  ;;  %v1346_v50 = vmul.f32 %v9867_v28, %v9793_v4  ;;  %v11592_v4 = vld [vmem:[#allocation33_spill] sm:$0xff]  ;;  %v1686_v60 = vld [vmem:[%s9152_s15 + $0xc2] sm:$0xff] }
 0x259   : > { %1282 = vperm.xlu0 %8694, %v1163_v61   ;;  %v1347_v58 = vmul.f32 %v9867_v28, %v11592_v4  ;;  %v8224_v49 = vpack.c.bf16 %v4327_v52, %v4326_v38  ;;  %v1685_v47 = vld [vmem:[%s9152_s15 + $0xba] sm:$0xff]  ;;  %v11594_v38 = vld [vmem:[#allocation72_spill] sm:$0xff] }
 0x25a   : > { %v2753_v21 = vmax.f32 %v2721_v19, 0.0  ;;  %8211 = vmatpush3.bf16.msra.mxu0 %v8208_v45  ;;  %v1117_v22 = vadd.f32 %v1085_v1, %v856_v8  ;;  %v8228_v1 = vpack.c.bf16 %v4329_v40, %v4328_v0  ;;  %v1349_v52 = vmul.f32 %v9867_v28, %v11594_v38  ;;  %v1429_v38 = vld [vmem:[%s9152_s15 + $0xe1] sm:$0xff] }
 0x25b   : > { %v10062_v43 = vpop.permute.xlu1 %1237  ;;  %v2257_v13 = vpop.permute.xlu0 %2256  ;;  %8213 = vmatprep.subr.bf16.mxu0 %v8212_v9  ;;  %v1379_v11 = vadd.f32 %v1347_v58, %v1118_v2  ;;  %v1426_v58 = vld [vmem:[%s9152_s15 + $0xc9] sm:$0xff] }
 0x25c   : > { %2785 = vst [vmem:[#allocation2 + $0x30] sm:$0xff] %v2753_v21  ;;  %1799 = vperm.xlu1 %8695, %v2465_v33   ;;  %v8220_v33 = vpack.c.bf16 %v4325_v62, %v4324_v3  ;;  %v1378_v26 = vadd.f32 %v1346_v50, %v1117_v22  ;;  %v2390_v18 = vmul.f32 %v9925_v32, %v2257_v13  ;;  %v1166_v13 = vld [vmem:[%s9152_s15 + $0xd0] sm:$0xff] }
 0x25d   : > { %1287 = vperm.xlu0 %8694, %v1164_v37   ;;  %v1640_v19 = vadd.f32 %v1608_v56, %v1379_v11  ;;  %v1870_v11 = vmul.f32 %v9901_v34, %v10048_v42 }
 0x25e   : > { %8215 = vmatpush3.bf16.msra.mxu0 %v8212_v9  ;;  %v1639_v45 = vadd.f32 %v1607_v39, %v1378_v26  ;;  %v1869_v9 = vmul.f32 %v9901_v34, %v10019_v31  ;;  %v1427_v26 = vld [vmem:[%s9152_s15 + $0xd1] sm:$0xff] }
 0x25f   : > { %v2262_v44 = vpop.permute.xlu1 %2261  ;;  %v10077_v63 = vpop.permute.xlu0 %1749  ;;  %v2868_v5 = vld [vmem:[#allocation2 + $0x21] sm:$0xff]  ;;  %8217 = vmatprep.subr.bf16.mxu0 %v8216_v54 }
 0x260   : > { %2055 = vperm.xlu1 %8695, %v1163_v61   ;;  %7358 = vmatprep.mubr.f32.mxu1 %v2868_v5  ;;  %v1900_v61 = vadd.f32 %v1868_v59, %v1639_v45  ;;  %v1901_v21 = vadd.f32 %v1869_v9, %v1640_v19  ;;  %v2391_v10 = vmul.f32 %v9925_v32, %v2262_v44 }
 0x261   : > { %1543 = vperm.xlu0 %8694, %v10073_v16   ;;  %7675 = vmatprep.mubr.f32.mxu0 %v2868_v5  ;;  %v1609_v59 = vmul.f32 %v9888_v35, %v10032_v46  ;;  %v1610_v46 = vmul.f32 %v9888_v35, %v10038_v53  ;;  %v1687_v53 = vld [vmem:[%s9152_s15 + $0xca] sm:$0xff] }
 0x262   : > { %8219 = vmatpush3.bf16.msra.mxu0 %v8216_v54  ;;  %v2161_v55 = vadd.f32 %v2129_v15, %v1900_v61  ;;  %v2162_v54 = vadd.f32 %v2130_v41, %v1901_v21  ;;  %v11595_v15 = vld [vmem:[#allocation49_spill] sm:$0xff]  ;;  %v11596_v61 = vld [vmem:[#allocation52_spill] sm:$0xff] }
 0x263   : > { %v10087_v30 = vpop.permute.xlu1 %2005  ;;  %v10089_v27 = vpop.permute.xlu0 %1493  ;;  %v2869_v7 = vld [vmem:[#allocation2 + $0x29] sm:$0xff]  ;;  %8221 = vmatprep.subr.bf16.mxu0 %v8220_v33  ;;  %v1381_v9 = vadd.f32 %v1349_v52, %v11596_v61 }
 0x264   : > { %2060 = vperm.xlu1 %8695, %v1164_v37   ;;  %7359 = vmatmul.mubr.f32.gmra.mrb[4].mxu1 %v2869_v7  ;;  %v2422_v37 = vadd.f32 %v2390_v18, %v2161_v55  ;;  %v2423_v3 = vadd.f32 %v2391_v10, %v2162_v54  ;;  %v1611_v52 = vmul.f32 %v9888_v35, %v10089_v27 }
 0x265   : > { %1548 = vperm.xlu0 %8694, %v1425_v57   ;;  %7676 = vmatmul.mubr.f32.gmra.mrb[2].mxu0 %v2869_v7 }
 0x266   : > { %8223 = vmatpush3.bf16.msra.mxu0 %v8220_v33 }
 0x267   : > { %v10098_v25 = vpop.permute.xlu1 %1498  ;;  %v2518_v31 = vpop.permute.xlu0 %2517  ;;  %8225 = vmatprep.subr.bf16.mxu0 %v8224_v49 }
 0x268   : > { %v2651_v12 = vmul.f32 %v9950_v20, %v2518_v31  ;;  %1804 = vperm.xlu1 %8695, %v1685_v47   ;;  %v1612_v27 = vmul.f32 %v9888_v35, %v10098_v25  ;;  %v1689_v25 = vld [vmem:[%s9152_s15 + $0xda] sm:$0xff] }
 0x269   : > { %1292 = vperm.xlu0 %8694, %v1165_v17  }
 0x26a   : > { %v2683_v8 = vadd.f32 %v2651_v12, %v2422_v37  ;;  %8227 = vmatpush3.bf16.msra.mxu0 %v8224_v49  ;;  %v2131_v49 = vmul.f32 %v9914_v14, %v10087_v30  ;;  %v1642_v30 = vadd.f32 %v1610_v46, %v1381_v9  ;;  %v1168_v12 = vld [vmem:[%s9152_s15 + $0xe0] sm:$0xff] }
 0x26b   : > { %v2523_v23 = vpop.permute.xlu1 %2522  ;;  %v2011_v50 = vpop.permute.xlu0 %2010  ;;  %8229 = vmatprep.subr.bf16.mxu0 %v8228_v1  ;;  %v11598_v46 = vld [vmem:[#allocation55_spill] sm:$0xff] }
 0x26c   : > { %v2722_v62 = vadd.f32 %v9967_v36, %v2683_v8  ;;  %v2652_v29 = vmul.f32 %v9950_v20, %v2523_v23  ;;  %1297 = vperm.xlu1 %8695, %v1166_v13   ;;  %v2132_v41 = vmul.f32 %v9914_v14, %v2011_v50 }
 0x26d   : > { %2316 = vperm.xlu0 %8694, %v10073_v16   ;;  %v11593_v16 = vld [vmem:[#allocation30_spill] sm:$0xff] }
 0x26e   : > { %v2754_v48 = vmax.f32 %v2722_v62, 0.0  ;;  %v2684_v51 = vadd.f32 %v2652_v29, %v2423_v3  ;;  %8231 = vmatpush3.bf16.msra.mxu0 %v8228_v1  ;;  %v1348_v33 = vmul.f32 %v9867_v28, %v11593_v16  ;;  %v1428_v16 = vld [vmem:[%s9152_s15 + $0xd9] sm:$0xff] }
 0x26f   : > { %v10107_v22 = vpop.permute.xlu1 %1754  ;;  %v10109_v39 = vpop.permute.xlu0 %1242 }
 0x270   : > { %2786 = vst [vmem:[#allocation2 + $0x38] sm:$0xff] %v2754_v48  ;;  %v2723_v24 = vadd.f32 %v9967_v36, %v2684_v51  ;;  %2321 = vperm.xlu1 %8695, %v1425_v57   ;;  %v1380_v57 = vadd.f32 %v1348_v33, %v11595_v15  ;;  %v1688_v51 = vld [vmem:[%s9152_s15 + $0xd2] sm:$0xff] }
 0x271   : > { %1809 = vperm.xlu0 %8694, %v1686_v60  }
 0x272   : > { %v2755_v4 = vmax.f32 %v2723_v24, 0.0  ;;  %v1641_v7 = vadd.f32 %v1609_v59, %v1380_v57  ;;  %v11597_v57 = vld [vmem:[#allocation51_spill] sm:$0xff] }
 0x273   : > { %v10113_v44 = vpop.permute.xlu1 %1247  ;;  %v2267_v5 = vpop.permute.xlu0 %2266 }
 0x274   : > { %2787 = vst [vmem:[#allocation2 + $0x40] sm:$0xff] %v2755_v4  ;;  %2065 = vperm.xlu1 %8695, %v1165_v17   ;;  %v1902_v40 = vadd.f32 %v1870_v11, %v1641_v7  ;;  %v2392_v19 = vmul.f32 %v9925_v32, %v2267_v5  ;;  %v1167_v17 = vld [vmem:[%s9152_s15 + $0xd8] sm:$0xff]  ;;  %v1872_v7 = vmul.f32 %v9901_v34, %v10107_v22 }
 0x275   : > { %1553 = vperm.xlu0 %8694, %v1426_v58  }
 0x276   : > { %v2163_v55 = vadd.f32 %v2131_v49, %v1902_v40 }
 0x277   : > { %v2272_v2 = vpop.permute.xlu1 %2271  ;;  %v10122_v45 = vpop.permute.xlu0 %1759  ;;  %v2870_v56 = vld [vmem:[#allocation2 + $0x31] sm:$0xff] }
 0x278   : > { %1558 = vperm.xlu1 %8695, %v1427_v26   ;;  %7361 = vmatprep.mubr.f32.mxu1 %v2870_v56  ;;  %v2424_v37 = vadd.f32 %v2392_v19, %v2163_v55  ;;  %v1873_v40 = vmul.f32 %v9901_v34, %v10122_v45 }
 0x279   : > { %2577 = vperm.xlu0 %8694, %v1685_v47   ;;  %7678 = vmatprep.mubr.f32.mxu0 %v2870_v56  ;;  %v1871_v47 = vmul.f32 %v9901_v34, %v10077_v63  ;;  %v2393_v63 = vmul.f32 %v9925_v32, %v2272_v2  ;;  %v1351_v2 = vmul.f32 %v9867_v28, %v10062_v43 }
 0x27b   : > { %v10132_v18 = vpop.permute.xlu1 %2015  ;;  %v10134_v0 = vpop.permute.xlu0 %1503  ;;  %v2871_v42 = vld [vmem:[#allocation2 + $0x39] sm:$0xff]  ;;  %v1903_v21 = vadd.f32 %v1871_v47, %v1642_v30  ;;  %v1383_v49 = vadd.f32 %v1351_v2, %v11598_v46  ;;  %v1169_v30 = vld [vmem:[%s9152_s15 + $0xe8] sm:$0xff] }
 0x27c   : > { %2582 = vperm.xlu1 %8695, %v1686_v60   ;;  %7362 = vmatmul.mubr.f32.gmra.mrb[6].mxu1 %v2871_v42  ;;  %v2133_v43 = vmul.f32 %v9914_v14, %v10132_v18  ;;  %v1613_v2 = vmul.f32 %v9888_v35, %v10134_v0 }
 0x27d   : > { %2070 = vperm.xlu0 %8694, %v1166_v13   ;;  %7679 = vmatmul.mubr.f32.gmra.mrb[4].mxu0 %v2871_v42  ;;  %v2164_v13 = vadd.f32 %v2132_v41, %v1903_v21  ;;  %v1644_v18 = vadd.f32 %v1612_v27, %v1383_v49 }
 0x27f   : > { %v10142_v31 = vpop.permute.xlu1 %1508  ;;  %v2528_v1 = vpop.permute.xlu0 %2527  ;;  %v2425_v50 = vadd.f32 %v2393_v63, %v2164_v13 }
 0x280   : > { %v2653_v10 = vmul.f32 %v9950_v20, %v2528_v1  ;;  %1814 = vperm.xlu1 %8695, %v1687_v53   ;;  %v1614_v0 = vmul.f32 %v9888_v35, %v10142_v31  ;;  %v10227_v35 = vld [vmem:[%s9152_s15 + $0xea] sm:$0xff] }
 0x281   : > { %1302 = vperm.xlu0 %8694, %v1167_v17  }
 0x282   : > { %v2685_v54 = vadd.f32 %v2653_v10, %v2424_v37  ;;  %v1170_v37 = vld [vmem:[%s9152_s15 + $0xf0] sm:$0xff] }
 0x283   : > { %v2533_v8 = vpop.permute.xlu1 %2532  ;;  %v2021_v23 = vpop.permute.xlu0 %2020 }
 0x284   : > { %v2724_v3 = vadd.f32 %v9967_v36, %v2685_v54  ;;  %v2654_v62 = vmul.f32 %v9950_v20, %v2533_v8  ;;  %1307 = vperm.xlu1 %8695, %v1168_v12  }
 0x285   : > { %2326 = vperm.xlu0 %8694, %v1426_v58   ;;  %v1350_v58 = vmul.f32 %v9867_v28, %v10050_v6 }
 0x286   : > { %v2756_v29 = vmax.f32 %v2724_v3, 0.0  ;;  %v2686_v48 = vadd.f32 %v2654_v62, %v2425_v50  ;;  %v1690_v62 = vld [vmem:[%s9152_s15 + $0xe2] sm:$0xff] }
 0x287   : > { %v10150_v60 = vpop.permute.xlu1 %1764  ;;  %v10152_v24 = vpop.permute.xlu0 %1252  ;;  %v1382_v11 = vadd.f32 %v1350_v58, %v11597_v57 }
 0x288   : > { %2788 = vst [vmem:[#allocation2 + $0x48] sm:$0xff] %v2756_v29  ;;  %v2725_v4 = vadd.f32 %v9967_v36, %v2686_v48  ;;  %2331 = vperm.xlu1 %8695, %v1427_v26  }
 0x289   : > { %1819 = vperm.xlu0 %8694, %v1688_v51   ;;  %v1643_v6 = vadd.f32 %v1611_v52, %v1382_v11  ;;  %v10204_v52 = vld [vmem:[%s9152_s15 + $0xf1] sm:$0xff]  ;;  %v11599_v11 = vld [vmem:[#allocation54_spill] sm:$0xff] }
 0x28a   : > { %v2757_v5 = vmax.f32 %v2725_v4, 0.0 }
 0x28b   : > { %v10156_v33 = vpop.permute.xlu1 %1257  ;;  %v2277_v59 = vpop.permute.xlu0 %2276  ;;  %v1904_v42 = vadd.f32 %v1872_v7, %v1643_v6 }
 0x28c   : > { %2789 = vst [vmem:[#allocation2 + $0x50] sm:$0xff] %v2757_v5  ;;  %2075 = vperm.xlu1 %8695, %v1167_v17   ;;  %v2394_v47 = vmul.f32 %v9925_v32, %v2277_v59  ;;  %v1905_v17 = vadd.f32 %v1873_v40, %v1644_v18  ;;  %v1430_v5 = vld [vmem:[%s9152_s15 + $0xe9] sm:$0xff] }
 0x28d   : > { %1563 = vperm.xlu0 %8694, %v1428_v16   ;;  %v2165_v19 = vadd.f32 %v2133_v43, %v1904_v42 }
 0x28f   : > { %v2282_v26 = vpop.permute.xlu1 %2281  ;;  %v10165_v56 = vpop.permute.xlu0 %1769  ;;  %v2872_v15 = vld [vmem:[#allocation2 + $0x41] sm:$0xff]  ;;  %v2426_v1 = vadd.f32 %v2394_v47, %v2165_v19  ;;  %v1171_v47 = vld [vmem:[%s9152_s15 + $0xf8] sm:$0xff] }
 0x290   : > { %1568 = vperm.xlu1 %8695, %v1429_v38   ;;  %7364 = vmatprep.mubr.f32.mxu1 %v2872_v15  ;;  %v2395_v45 = vmul.f32 %v9925_v32, %v2282_v26 }
 0x291   : > { %2587 = vperm.xlu0 %8694, %v1687_v53   ;;  %7681 = vmatprep.mubr.f32.mxu0 %v2872_v15  ;;  %v2134_v53 = vmul.f32 %v9914_v14, %v2021_v23 }
 0x293   : > { %v10175_v61 = vpop.permute.xlu1 %2025  ;;  %v10177_v9 = vpop.permute.xlu0 %1513  ;;  %v2873_v22 = vld [vmem:[#allocation2 + $0x49] sm:$0xff]  ;;  %v2166_v63 = vadd.f32 %v2134_v53, %v1905_v17 }
 0x294   : > { %2592 = vperm.xlu1 %8695, %v1688_v51   ;;  %7365 = vmatmul.mubr.f32.gmra.mrb[8].mxu1 %v2873_v22 }
 0x295   : > { %2080 = vperm.xlu0 %8694, %v1168_v12   ;;  %7682 = vmatmul.mubr.f32.gmra.mrb[6].mxu0 %v2873_v22  ;;  %v2427_v54 = vadd.f32 %v2395_v45, %v2166_v63  ;;  %v1875_v22 = vmul.f32 %v9901_v34, %v10165_v56 }
 0x297   : > { %v10185_v55 = vpop.permute.xlu1 %1518  ;;  %v2538_v41 = vpop.permute.xlu0 %2537 }
 0x298   : > { %v2655_v21 = vmul.f32 %v9950_v20, %v2538_v41  ;;  %1824 = vperm.xlu1 %8695, %v1689_v25   ;;  %v10237_v41 = vld [vmem:[%s9152_s15 + $0x100] sm:$0xff] }
 0x299   : > { %1312 = vperm.xlu0 %8694, %v1169_v30  }
 0x29a   : > { %v2687_v10 = vadd.f32 %v2655_v21, %v2426_v1 }
 0x29b   : > { %v2543_v12 = vpop.permute.xlu1 %2542  ;;  %v2031_v13 = vpop.permute.xlu0 %2030 }
 0x29c   : > { %v2726_v8 = vadd.f32 %v9967_v36, %v2687_v10  ;;  %v2656_v23 = vmul.f32 %v9950_v20, %v2543_v12  ;;  %1317 = vperm.xlu1 %8695, %v1170_v37   ;;  %v2136_v40 = vmul.f32 %v9914_v14, %v2031_v13 }
 0x29d   : > { %2336 = vperm.xlu0 %8694, %v1428_v16   ;;  %v1352_v16 = vmul.f32 %v9867_v28, %v10109_v39  ;;  %v1874_v39 = vmul.f32 %v9901_v34, %v10150_v60 }
 0x29e   : > { %v2758_v50 = vmax.f32 %v2726_v8, 0.0  ;;  %v2688_v3 = vadd.f32 %v2656_v23, %v2427_v54  ;;  %v10246_v54 = vld [vmem:[#allocation4 + $0x4] ss:$0 sm:$0xff] }
 0x29f   : > { %v10193_v29 = vpop.permute.xlu1 %1774  ;;  %v10195_v48 = vpop.permute.xlu0 %1262  ;;  %v1384_v7 = vadd.f32 %v1352_v16, %v11599_v11  ;;  %v1615_v8 = vmul.f32 %v10246_v54, %v10177_v9  ;;  %v1616_v9 = vmul.f32 %v10246_v54, %v10185_v55 }
 0x2a0   : > { %2790 = vst [vmem:[#allocation2 + $0x58] sm:$0xff] %v2758_v50  ;;  %v2727_v51 = vadd.f32 %v9967_v36, %v2688_v3  ;;  %2341 = vperm.xlu1 %8695, %v1429_v38   ;;  %v1353_v38 = vmul.f32 %v9867_v28, %v10113_v44  ;;  %v2135_v28 = vmul.f32 %v9914_v14, %v10175_v61  ;;  %v11600_v44 = vld [vmem:[#allocation58_spill] sm:$0xff]  ;;  %v1692_v3 = vld [vmem:[%s9152_s15 + $0xf2] sm:$0xff] }
 0x2a1   : > { %1829 = vperm.xlu0 %8694, %v1690_v62   ;;  %v1645_v6 = vadd.f32 %v1613_v2, %v1384_v7  ;;  %v10267_v7 = vld [vmem:[#allocation4 + $0x5] ss:$0 sm:$0xff] }
 0x2a2   : > { %v2759_v4 = vmax.f32 %v2727_v51, 0.0  ;;  %v1385_v27 = vadd.f32 %v1353_v38, %v11600_v44 }
 0x2a3   : > { %v10199_v59 = vpop.permute.xlu1 %1267  ;;  %v2287_v58 = vpop.permute.xlu0 %2286  ;;  %v1906_v49 = vadd.f32 %v1874_v39, %v1645_v6 }
 0x2a4   : > { %2791 = vst [vmem:[#allocation2 + $0x60] sm:$0xff] %v2759_v4  ;;  %2085 = vperm.xlu1 %8695, %v1169_v30   ;;  %v2396_v42 = vmul.f32 %v9925_v32, %v2287_v58  ;;  %v1646_v31 = vadd.f32 %v1614_v0, %v1385_v27  ;;  %v11601_v4 = vld [vmem:[#allocation57_spill] sm:$0xff] }
 0x2a5   : > { %1573 = vperm.xlu0 %8694, %v1430_v5   ;;  %v2167_v61 = vadd.f32 %v2135_v28, %v1906_v49  ;;  %v10276_v28 = vld [vmem:[#allocation4 + $0x6] ss:$0 sm:$0xff] }
 0x2a6   : > { %v1907_v19 = vadd.f32 %v1875_v22, %v1646_v31  ;;  %v10279_v22 = vld [vmem:[#allocation4 + $0x7] ss:$0 sm:$0xff] }
 0x2a7   : > { %v2292_v26 = vpop.permute.xlu1 %2291  ;;  %v10210_v15 = vpop.permute.xlu0 %1779  ;;  %v2874_v57 = vld [vmem:[#allocation2 + $0x51] sm:$0xff]  ;;  %v2428_v53 = vadd.f32 %v2396_v42, %v2167_v61  ;;  %v2849_v61 = vld [vmem:[#allocation8 + $0x8] sm:$0xff] }
 0x2a8   : > { %1578 = vperm.xlu1 %8695, %v10204_v52   ;;  %7367 = vmatprep.mubr.f32.mxu1 %v2874_v57  ;;  %v2397_v56 = vmul.f32 %v9925_v32, %v2292_v26  ;;  %v2168_v17 = vadd.f32 %v2136_v40, %v1907_v19  ;;  %v10264_v26 = vld [vmem:[%s9152_s15 + $0xf9] sm:$0xff] }
 0x2a9   : > { %2597 = vperm.xlu0 %8694, %v1689_v25   ;;  %7684 = vmatprep.mubr.f32.mxu0 %v2874_v57  ;;  %v11602_v57 = vld [vmem:[#allocation61_spill] sm:$0xff] }
 0x2aa   : > { %v2429_v10 = vadd.f32 %v2397_v56, %v2168_v17  ;;  %v10288_v17 = vld [vmem:[#allocation4 + $0x8] ss:$0 sm:$0xff] }
 0x2ab   : > { %v2036_v43 = vpop.permute.xlu1 %2035  ;;  %v10221_v46 = vpop.permute.xlu0 %1523  ;;  %v2875_v60 = vld [vmem:[#allocation2 + $0x59] sm:$0xff] }
 0x2ac   : > { %2602 = vperm.xlu1 %8695, %v1690_v62   ;;  %7368 = vmatmul.mubr.f32.gmra.mrb[10].mxu1 %v2875_v60 }
 0x2ad   : > { %2090 = vperm.xlu0 %8694, %v1170_v37   ;;  %7685 = vmatmul.mubr.f32.gmra.mrb[8].mxu0 %v2875_v60  ;;  %v10239_v37 = vld [vmem:[#allocation4 + $0x3] ss:$0 sm:$0xff]  ;;  %v2848_v60 = vld [vmem:[#allocation8] sm:$0xff] }
 0x2ae   : > { %v1354_v63 = vmul.f32 %v10239_v37, %v10152_v24  ;;  %v1355_v24 = vmul.f32 %v10239_v37, %v10156_v33  ;;  %v2137_v33 = vmul.f32 %v9914_v14, %v2036_v43  ;;  %v10274_v14 = vld [vmem:[%s9152_s15 + $0x101] sm:$0xff]  ;;  %v8072_v40 = vpack.c.bf16 %v2849_v61, %v2848_v60  ;;  %v10321_v61 = vld [vmem:[#allocation6] ss:$0 sm:$0xff] }
 0x2af   : > { %v10231_v25 = vpop.permute.xlu1 %1528  ;;  %v2548_v18 = vpop.permute.xlu0 %2547  ;;  %v1356_v19 = vmul.f32 %v10239_v37, %v10195_v48  ;;  %v1617_v48 = vmul.f32 %v10246_v54, %v10221_v46 }
 0x2b0   : > { %v2657_v30 = vmul.f32 %v9950_v20, %v2548_v18  ;;  %1834 = vperm.xlu1 %8695, %v10227_v35   ;;  %v1386_v58 = vadd.f32 %v1354_v63, %v11601_v4  ;;  %v1387_v11 = vadd.f32 %v1355_v24, %v11602_v57  ;;  %8073 = vmatprep.subr.bf16.mxu1 %v8072_v40  ;;  %v1694_v24 = vld [vmem:[%s9152_s15 + $0x102] sm:$0xff] }
 0x2b1   : > { %1322 = vperm.xlu0 %8694, %v1171_v47   ;;  %8075 = vmatpush3.bf16.msra.mxu1 %v8072_v40  ;;  %v1618_v46 = vmul.f32 %v10246_v54, %v10231_v25  ;;  %v2850_v25 = vld [vmem:[#allocation8 + $0x10] sm:$0xff] }
 0x2b2   : > { %v2689_v1 = vadd.f32 %v2657_v30, %v2428_v53  ;;  %v1647_v2 = vadd.f32 %v1615_v8, %v1386_v58  ;;  %v1648_v6 = vadd.f32 %v1616_v9, %v1387_v11  ;;  %v11603_v8 = vld [vmem:[#allocation60_spill] sm:$0xff]  ;;  %v11604_v58 = vld [vmem:[#allocation63_spill] sm:$0xff] }
 0x2b3   : > { %v2553_v45 = vpop.permute.xlu1 %2552  ;;  %v2041_v21 = vpop.permute.xlu0 %2040  ;;  %v1434_v57 = vld [vmem:[%s9152_s15 + $0x109] sm:$0xff] }
 0x2b4   : > { %v2728_v12 = vadd.f32 %v9967_v36, %v2689_v1  ;;  %v2658_v13 = vmul.f32 %v9950_v20, %v2553_v45  ;;  %1327 = vperm.xlu1 %8695, %v10237_v41   ;;  %v2138_v44 = vmul.f32 %v10276_v28, %v2041_v21  ;;  %v1693_v45 = vld [vmem:[%s9152_s15 + $0xfa] sm:$0xff] }
 0x2b5   : > { %2346 = vperm.xlu0 %8694, %v1430_v5   ;;  %v1876_v5 = vmul.f32 %v9901_v34, %v10193_v29  ;;  %v1877_v34 = vmul.f32 %v10267_v7, %v10210_v15 }
 0x2b6   : > { %v2760_v23 = vmax.f32 %v2728_v12, 0.0  ;;  %v2690_v50 = vadd.f32 %v2658_v13, %v2429_v10  ;;  %v1173_v10 = vld [vmem:[%s9152_s15 + $0x108] sm:$0xff]  ;;  %v1357_v12 = vmul.f32 %v10239_v37, %v10199_v59 }
 0x2b7   : > { %v2297_v62 = vpop.permute.xlu1 %2296  ;;  %v10253_v51 = vpop.permute.xlu0 %1784  ;;  %v1909_v27 = vadd.f32 %v1877_v34, %v1648_v6  ;;  %v2852_v6 = vld [vmem:[#allocation8 + $0x20] sm:$0xff] }
 0x2b8   : > { %2792 = vst [vmem:[#allocation2 + $0x68] sm:$0xff] %v2760_v23  ;;  %v2729_v16 = vadd.f32 %v9967_v36, %v2690_v50  ;;  %2351 = vperm.xlu1 %8695, %v10204_v52   ;;  %v1908_v52 = vadd.f32 %v1876_v5, %v1647_v2  ;;  %v2398_v55 = vmul.f32 %v9925_v32, %v2297_v62 }
 0x2b9   : > { %1839 = vperm.xlu0 %8694, %v1692_v3   ;;  %v1388_v23 = vadd.f32 %v1356_v19, %v11603_v8  ;;  %v1878_v50 = vmul.f32 %v10267_v7, %v10253_v51  ;;  %v1389_v5 = vadd.f32 %v1357_v12, %v11604_v58 }
 0x2ba   : > { %v2761_v38 = vmax.f32 %v2729_v16, 0.0  ;;  %v2169_v0 = vadd.f32 %v2137_v33, %v1908_v52  ;;  %v2851_v33 = vld [vmem:[#allocation8 + $0x18] sm:$0xff] }
 0x2bb   : > { %v2302_v29 = vpop.permute.xlu1 %2301  ;;  %v1649_v62 = vadd.f32 %v1617_v48, %v1388_v23  ;;  %v8076_v11 = vpack.c.bf16 %v2851_v33, %v2850_v25  ;;  %v4622_v25 = vld [vmem:[#allocation8 + $0x310] sm:$0xff]  ;;  %v4623_v33 = vld [vmem:[#allocation8 + $0x318] sm:$0xff] }
 0x2bc   : > { %2793 = vst [vmem:[#allocation2 + $0x70] sm:$0xff] %v2761_v38  ;;  %v1790_v39 = vpop.permute.xlu0 %1789  ;;  %2095 = vperm.xlu1 %8695, %v1171_v47   ;;  %v2430_v49 = vadd.f32 %v2398_v55, %v2169_v0  ;;  %v2399_v32 = vmul.f32 %v10279_v22, %v2302_v29  ;;  %v2170_v47 = vadd.f32 %v2138_v44, %v1909_v27 }
 0x2bd   : > { %1583 = vperm.xlu0 %8694, %v10264_v26   ;;  %v1879_v51 = vmul.f32 %v10267_v7, %v1790_v39  ;;  %v1910_v9 = vadd.f32 %v1878_v50, %v1649_v62  ;;  %v1650_v38 = vadd.f32 %v1618_v46, %v1389_v5  ;;  %8077 = vmatprep.subr.bf16.mxu1 %v8076_v11  ;;  %v2857_v46 = vld [vmem:[#allocation8 + $0x48] sm:$0xff]  ;;  %v2477_v62 = vld [vmem:[%s9152_s15 + $0x112] sm:$0xff] }
 0x2be   : > { %8079 = vmatpush3.bf16.msra.mxu1 %v8076_v11  ;;  %v8236_v11 = vpack.c.bf16 %v4623_v33, %v4622_v25  ;;  %v2862_v25 = vld [vmem:[#allocation8 + $0x70] sm:$0xff]  ;;  %v2863_v33 = vld [vmem:[#allocation8 + $0x78] sm:$0xff] }
 0x2bf   : > { %v2558_v43 = vpop.permute.xlu1 %2557  ;;  %v2876_v15 = vld [vmem:[#allocation2 + $0x61] sm:$0xff]  ;;  %v1911_v52 = vadd.f32 %v1879_v51, %v1650_v38  ;;  %v2217_v38 = vld [vmem:[%s9152_s15 + $0x119] sm:$0xff] }
 0x2c0   : > { %v2659_v42 = vmul.f32 %v9950_v20, %v2558_v43  ;;  %v2046_v31 = vpop.permute.xlu0 %2045  ;;  %1588 = vperm.xlu1 %8695, %v10274_v14   ;;  %7370 = vmatprep.mubr.f32.mxu1 %v2876_v15  ;;  %v2431_v20 = vadd.f32 %v2399_v32, %v2170_v47 }
 0x2c1   : > { %2607 = vperm.xlu0 %8694, %v10227_v35   ;;  %7687 = vmatprep.mubr.f32.mxu0 %v2876_v15  ;;  %v2139_v59 = vmul.f32 %v10276_v28, %v2046_v31 }
 0x2c2   : > { %v2691_v18 = vadd.f32 %v2659_v42, %v2430_v49 }
 0x2c3   : > { %v2563_v53 = vpop.permute.xlu1 %2562  ;;  %v2877_v56 = vld [vmem:[#allocation2 + $0x69] sm:$0xff]  ;;  %v2171_v34 = vadd.f32 %v2139_v59, %v1910_v9  ;;  %v4281_v9 = vld [vmem:[#allocation2 + $0x12] sm:$0xff] }
 0x2c4   : > { %v2730_v30 = vadd.f32 %v9967_v36, %v2691_v18  ;;  %v2660_v1 = vmul.f32 %v10288_v17, %v2563_v53  ;;  %v2051_v35 = vpop.permute.xlu0 %2050  ;;  %2612 = vperm.xlu1 %8695, %v1692_v3   ;;  %7371 = vmatmul.mubr.f32.gmra.mrb[12].mxu1 %v2877_v56  ;;  %v1955_v53 = vld [vmem:[%s9152_s15 + $0x110] sm:$0xff] }
 0x2c5   : > { %2100 = vperm.xlu0 %8694, %v10237_v41   ;;  %7688 = vmatmul.mubr.f32.gmra.mrb[10].mxu0 %v2877_v56  ;;  %v2140_v29 = vmul.f32 %v10276_v28, %v2051_v35  ;;  %v1695_v35 = vld [vmem:[%s9152_s15 + $0x10a] sm:$0xff] }
 0x2c6   : > { %v2762_v21 = vmax.f32 %v2730_v30, 0.0  ;;  %v2692_v63 = vadd.f32 %v2660_v1, %v2431_v20 }
 0x2c7   : > { %v2307_v13 = vpop.permute.xlu1 %2306  ;;  %v2172_v60 = vadd.f32 %v2140_v29, %v1911_v52  ;;  %v4282_v29 = vld [vmem:[#allocation2 + $0x1a] sm:$0xff]  ;;  %v4283_v52 = vld [vmem:[#allocation2 + $0x22] sm:$0xff] }
 0x2c8   : > { %2794 = vst [vmem:[#allocation2 + $0x78] sm:$0xff] %v2762_v21  ;;  %v2731_v41 = vadd.f32 %v9967_v36, %v2692_v63  ;;  %v10302_v3 = vpop.permute.xlu0 %1272  ;;  %1844 = vperm.xlu1 %8695, %v1693_v45   ;;  %v2400_v36 = vmul.f32 %v10279_v22, %v2307_v13  ;;  %v2854_v21 = vld [vmem:[#allocation8 + $0x30] sm:$0xff]  ;;  %v2855_v63 = vld [vmem:[#allocation8 + $0x38] sm:$0xff] }
 0x2c9   : > { %1332 = vperm.xlu0 %8694, %v1173_v10   ;;  %v8084_v12 = vpack.c.bf16 %v2855_v63, %v2854_v21  ;;  %v2216_v13 = vld [vmem:[%s9152_s15 + $0x111] sm:$0xff]  ;;  %v4287_v21 = vld [vmem:[#allocation2 + $0x42] sm:$0xff]  ;;  %v4628_v63 = vld [vmem:[#allocation8 + $0x340] sm:$0xff] }
 0x2ca   : > { %v2763_v4 = vmax.f32 %v2731_v41, 0.0  ;;  %v2432_v0 = vadd.f32 %v2400_v36, %v2171_v34  ;;  %v2856_v41 = vld [vmem:[#allocation8 + $0x40] sm:$0xff] }
 0x2cb   : > { %v2312_v16 = vpop.permute.xlu1 %2311  ;;  %v8088_v59 = vpack.c.bf16 %v2857_v46, %v2856_v41  ;;  %v2478_v36 = vld [vmem:[%s9152_s15 + $0x11a] sm:$0xff]  ;;  %v2861_v41 = vld [vmem:[#allocation8 + $0x68] sm:$0xff] }
 0x2cc   : > { %2795 = vst [vmem:[#allocation2 + $0x80] sm:$0xff] %v2763_v4  ;;  %v10311_v2 = vpop.permute.xlu0 %1277  ;;  %1849 = vperm.xlu1 %8695, %v1694_v24   ;;  %v2401_v44 = vmul.f32 %v10279_v22, %v2312_v16  ;;  %v4621_v4 = vld [vmem:[#allocation8 + $0x308] sm:$0xff] }
 0x2cd   : > { %2356 = vperm.xlu0 %8694, %v10264_v26   ;;  %v2853_v26 = vld [vmem:[#allocation8 + $0x28] sm:$0xff] }
 0x2ce   : > { %v8080_v15 = vpack.c.bf16 %v2853_v26, %v2852_v6  ;;  %v2433_v31 = vadd.f32 %v2401_v44, %v2172_v60  ;;  %v4285_v26 = vld [vmem:[#allocation2 + $0x32] sm:$0xff]  ;;  %v2858_v60 = vld [vmem:[#allocation8 + $0x50] sm:$0xff] }
 0x2cf   : > { %v2568_v55 = vpop.permute.xlu1 %2567  ;;  %v2878_v39 = vld [vmem:[#allocation2 + $0x71] sm:$0xff] }
 0x2d0   : > { %v2661_v27 = vmul.f32 %v10288_v17, %v2568_v55  ;;  %v10318_v43 = vpop.permute.xlu0 %1533  ;;  %1593 = vperm.xlu1 %8695, %v1434_v57   ;;  %7373 = vmatprep.mubr.f32.mxu1 %v2878_v39  ;;  %v4624_v55 = vld [vmem:[#allocation8 + $0x320] sm:$0xff] }
 0x2d1   : > { %2361 = vperm.xlu0 %8694, %v10274_v14   ;;  %7690 = vmatprep.mubr.f32.mxu0 %v2878_v39  ;;  %v4625_v39 = vld [vmem:[#allocation8 + $0x328] sm:$0xff] }
 0x2d2   : > { %v2693_v49 = vadd.f32 %v2661_v27, %v2432_v0  ;;  %8081 = vmatprep.subr.bf16.mxu1 %v8080_v15  ;;  %v8240_v0 = vpack.c.bf16 %v4625_v39, %v4624_v55  ;;  %v4284_v27 = vld [vmem:[#allocation2 + $0x2a] sm:$0xff]  ;;  %v4631_v55 = vld [vmem:[#allocation8 + $0x358] sm:$0xff] }
 0x2d3   : > { %v2573_v32 = vpop.permute.xlu1 %2572  ;;  %v2879_v42 = vld [vmem:[#allocation2 + $0x79] sm:$0xff]  ;;  %8083 = vmatpush3.bf16.msra.mxu1 %v8080_v15  ;;  %v1358_v15 = vmul.f32 %v10239_v37, %v10302_v3 }
 0x2d4   : > { %v2732_v40 = vadd.f32 %v10321_v61, %v2693_v49  ;;  %v2662_v47 = vmul.f32 %v10288_v17, %v2573_v32  ;;  %v10325_v18 = vpop.permute.xlu0 %1538  ;;  %2617 = vperm.xlu1 %8695, %v1693_v45   ;;  %7374 = vmatmul.mubr.f32.gmra.mrb[14].mxu1 %v2879_v42  ;;  %v2859_v49 = vld [vmem:[#allocation8 + $0x58] sm:$0xff]  ;;  %v4626_v32 = vld [vmem:[#allocation8 + $0x330] sm:$0xff]  ;;  %v4286_v3 = vld [vmem:[#allocation2 + $0x3a] sm:$0xff] }
 0x2d5   : > { %2105 = vperm.xlu0 %8694, %v1173_v10   ;;  %7691 = vmatmul.mubr.f32.gmra.mrb[12].mxu0 %v2879_v42  ;;  %v1956_v10 = vld [vmem:[%s9152_s15 + $0x118] sm:$0xff]  ;;  %v8092_v42 = vpack.c.bf16 %v2859_v49, %v2858_v60  ;;  %v4291_v60 = vld [vmem:[#allocation2 + $0x62] sm:$0xff] }
 0x2d6   : > { %v2764_v14 = vmax.f32 %v2732_v40, 0.0  ;;  %v2694_v19 = vadd.f32 %v2662_v47, %v2433_v31  ;;  %8085 = vmatprep.subr.bf16.mxu1 %v8084_v12  ;;  %v4627_v31 = vld [vmem:[#allocation8 + $0x338] sm:$0xff]  ;;  %v1619_v40 = vmul.f32 %v10246_v54, %v10318_v43  ;;  %v4629_v43 = vld [vmem:[#allocation8 + $0x348] sm:$0xff] }
 0x2d7   : > { %v10328_v56 = vpop.permute.xlu1 %1794  ;;  %8087 = vmatpush3.bf16.msra.mxu1 %v8084_v12 }
 0x2d8   : > { %2796 = vst [vmem:[#allocation2 + $0x88] sm:$0xff] %v2764_v14  ;;  %v2733_v20 = vadd.f32 %v10321_v61, %v2694_v19  ;;  %v10331_v30 = vpop.permute.xlu0 %1282  ;;  %2622 = vperm.xlu1 %8695, %v1694_v24   ;;  %v4620_v24 = vld [vmem:[#allocation8 + $0x300] sm:$0xff]  ;;  %8089 = vmatprep.subr.bf16.mxu1 %v8088_v59  ;;  %v8244_v14 = vpack.c.bf16 %v4627_v31, %v4626_v32 }
 0x2d9   : > { %2110 = vperm.xlu0 %8694, %v1955_v53   ;;  %v8232_v58 = vpack.c.bf16 %v4621_v4, %v4620_v24  ;;  %v1359_v19 = vmul.f32 %v10239_v37, %v10311_v2  ;;  %v8248_v4 = vpack.c.bf16 %v4629_v43, %v4628_v63  ;;  %v4632_v32 = vld [vmem:[#allocation8 + $0x360] sm:$0xff]  ;;  %v3397_v63 = vld [vmem:[#allocation8 + $0x108] sm:$0xff] }
 0x2da   : > { %v2765_v1 = vmax.f32 %v2733_v20, 0.0  ;;  %v11605_v20 = vld [vmem:[#allocation62_spill] sm:$0xff] }
 0x2db   : > { %v10334_v45 = vpop.permute.xlu1 %1799  ;;  %8233 = vmatprep.subr.bf16.mxu0 %v8232_v58  ;;  %8091 = vmatpush3.bf16.msra.mxu1 %v8088_v59  ;;  %v4288_v59 = vld [vmem:[#allocation2 + $0x4a] sm:$0xff] }
 0x2dc   : > { %2797 = vst [vmem:[#allocation2 + $0x90] sm:$0xff] %v2765_v1  ;;  %v10336_v48 = vpop.permute.xlu0 %1287  ;;  %2366 = vperm.xlu1 %8695, %v1434_v57   ;;  %8093 = vmatprep.subr.bf16.mxu1 %v8092_v42  ;;  %v1390_v1 = vadd.f32 %v1358_v15, %v11605_v20  ;;  %v1881_v24 = vmul.f32 %v10267_v7, %v10334_v45 }
 0x2dd   : > { %1854 = vperm.xlu0 %8694, %v1695_v35  }
 0x2de   : > { %v1651_v2 = vadd.f32 %v1619_v40, %v1390_v1 }
 0x2df   : > { %v10340_v8 = vpop.permute.xlu1 %2055  ;;  %v2880_v23 = vld [vmem:[#allocation2 + $0x81] sm:$0xff]  ;;  %8095 = vmatpush3.bf16.msra.mxu1 %v8092_v42 }
 0x2e0   : > { %v10342_v50 = vpop.permute.xlu0 %1543  ;;  %2115 = vperm.xlu1 %8695, %v1956_v10   ;;  %7376 = vmatprep.mubr.f32.mxu1 %v2880_v23  ;;  %v1620_v10 = vmul.f32 %v10246_v54, %v10325_v18  ;;  %v2141_v12 = vmul.f32 %v10276_v28, %v10340_v8  ;;  %v4633_v42 = vld [vmem:[#allocation8 + $0x368] sm:$0xff] }
 0x2e1   : > { %2371 = vperm.xlu0 %8694, %v2216_v13   ;;  %7693 = vmatprep.mubr.f32.mxu0 %v2880_v23  ;;  %v2860_v23 = vld [vmem:[#allocation8 + $0x60] sm:$0xff]  ;;  %v8256_v20 = vpack.c.bf16 %v4633_v42, %v4632_v32 }
 0x2e2   : > { %v8096_v18 = vpack.c.bf16 %v2861_v41, %v2860_v23 }
 0x2e3   : > { %v10345_v5 = vpop.permute.xlu1 %2060  ;;  %v2881_v51 = vld [vmem:[#allocation2 + $0x89] sm:$0xff] }
 0x2e4   : > { %v10347_v16 = vpop.permute.xlu0 %1548  ;;  %2632 = vperm.xlu1 %8695, %v2477_v62   ;;  %7377 = vmatmul.mubr.f32.gmra.mrb[16].mxu1 %v2881_v51  ;;  %v2142_v45 = vmul.f32 %v10276_v28, %v10345_v5 }
 0x2e5   : > { %2627 = vperm.xlu0 %8694, %v1695_v35   ;;  %7694 = vmatmul.mubr.f32.gmra.mrb[14].mxu0 %v2881_v51  ;;  %v1880_v35 = vmul.f32 %v10267_v7, %v10328_v56  ;;  %v11606_v56 = vld [vmem:[#allocation65_spill] sm:$0xff] }
 0x2e6   : > { %7752 = vmatprep.mubr.f32.mxu0 %v4281_v9  ;;  %v1391_v46 = vadd.f32 %v1359_v19, %v11606_v56  ;;  %v4289_v9 = vld [vmem:[#allocation2 + $0x52] sm:$0xff]  ;;  %8097 = vmatprep.subr.bf16.mxu1 %v8096_v18 }
 0x2e7   : > { %v10351_v57 = vpop.permute.xlu1 %1804  ;;  %v1912_v8 = vadd.f32 %v1880_v35, %v1651_v2  ;;  %8099 = vmatpush3.bf16.msra.mxu1 %v8096_v18  ;;  %v4293_v35 = vld [vmem:[#allocation2 + $0x72] sm:$0xff]  ;;  %v4634_v2 = vld [vmem:[#allocation8 + $0x370] sm:$0xff]  ;;  %v4295_v18 = vld [vmem:[#allocation2 + $0x82] sm:$0xff] }
 0x2e8   : > { %v10353_v34 = vpop.permute.xlu0 %1292  ;;  %2637 = vperm.xlu1 %8695, %v2478_v36   ;;  %v1652_v36 = vadd.f32 %v1620_v10, %v1391_v46 }
 0x2e9   : > { %2376 = vperm.xlu0 %8694, %v2217_v38   ;;  %7753 = vmatmul.mubr.f32.vlgmr.msra.gmra.mrb[0].mxu0 %v4282_v29  ;;  %v4630_v38 = vld [vmem:[#allocation8 + $0x350] sm:$0xff] }
 0x2ea   : > { %7755 = vmatprep.mubr.f32.mxu0 %v4283_v52  ;;  %8235 = vmatpush3.bf16.msra.mxu0 %v8232_v58  ;;  %v8913_v58 = vmov 0.0   ;;  %v8100_v52 = vpack.c.bf16 %v2863_v33, %v2862_v25  ;;  %v1913_v39 = vadd.f32 %v1881_v24, %v1652_v36  ;;  %v4294_v24 = vld [vmem:[#allocation2 + $0x7a] sm:$0xff]  ;;  %v1621_v36 = vmul.f32 %v10246_v54, %v10342_v50 }
 0x2eb   : > { %v10355_v6 = vpop.permute.xlu1 %1297  ;;  %8237 = vmatprep.subr.bf16.mxu0 %v8236_v11  ;;  %2811 = vst [vmem:[#allocation2 + $0x100] sm:$0xff] %v8913_v58  ;;  %2812 = vst [vmem:[#allocation2 + $0x108] sm:$0xff] %v8913_v58  ;;  %v1361_v25 = vmul.f32 %v10239_v37, %v10336_v48 }
 0x2ec   : > { %v2317_v44 = vpop.permute.xlu0 %2316  ;;  %2813 = vst [vmem:[#allocation2 + $0x110] sm:$0xff] %v8913_v58  ;;  %2814 = vst [vmem:[#allocation2 + $0x118] sm:$0xff] %v8913_v58  ;;  %8101 = vmatprep.subr.bf16.mxu1 %v8100_v52  ;;  %v2174_v49 = vadd.f32 %v2142_v45, %v1913_v39  ;;  %v1882_v39 = vmul.f32 %v10267_v7, %v10351_v57 }
 0x2ed   : > { %7756 = vmatmul.mubr.f32.gmra.mrb[2].mxu0 %v4284_v27  ;;  %2815 = vst [vmem:[#allocation2 + $0x120] sm:$0xff] %v8913_v58  ;;  %v2402_v51 = vmul.f32 %v10279_v22, %v2317_v44  ;;  %v4290_v27 = vld [vmem:[#allocation2 + $0x5a] sm:$0xff]  ;;  %8103 = vmatpush3.bf16.msra.mxu1 %v8100_v52  ;;  %v11607_v52 = vld [vmem:[#allocation64_spill] sm:$0xff] }
 0x2ee   : > { %7758 = vmatprep.mubr.f32.mxu0 %v4285_v26  ;;  %8239 = vmatpush3.bf16.msra.mxu0 %v8236_v11  ;;  %v2173_v11 = vadd.f32 %v2141_v12, %v1912_v8  ;;  %v8252_v26 = vpack.c.bf16 %v4631_v55, %v4630_v38  ;;  %v4635_v12 = vld [vmem:[#allocation8 + $0x378] sm:$0xff] }
 0x2ef   : > { %v2322_v47 = vpop.permute.xlu1 %2321  ;;  %8241 = vmatprep.subr.bf16.mxu0 %v8240_v0 }
 0x2f0   : > { %v10363_v53 = vpop.permute.xlu0 %1809  ;;  %v2434_v5 = vadd.f32 %v2402_v51, %v2173_v11  ;;  %v4296_v51 = vld [vmem:[#allocation2 + $0x8a] sm:$0xff] }
 0x2f1   : > { %7759 = vmatmul.mubr.f32.gmra.mrb[4].mxu0 %v4286_v3  ;;  %v4292_v3 = vld [vmem:[#allocation2 + $0x6a] sm:$0xff] }
 0x2f2   : > { %7761 = vmatprep.mubr.f32.mxu0 %v4287_v21  ;;  %8243 = vmatpush3.bf16.msra.mxu0 %v8240_v0  ;;  %v2403_v0 = vmul.f32 %v10279_v22, %v2322_v47  ;;  %v3396_v21 = vld [vmem:[#allocation8 + $0x100] sm:$0xff] }
 0x2f3   : > { %v10372_v13 = vpop.permute.xlu1 %2065  ;;  %8245 = vmatprep.subr.bf16.mxu0 %v8244_v14  ;;  %v10388_v10 = vpack.c.bf16 %v3397_v63, %v3396_v21 }
 0x2f4   : > { %v10377_v62 = vpop.permute.xlu0 %1553 }
 0x2f5   : > { %7762 = vmatmul.mubr.f32.gmra.mrb[6].mxu0 %v4288_v59  ;;  %8105 = vmatprep.subr.bf16.mxu1 %v10388_v10  ;;  %v8260_v59 = vpack.c.bf16 %v4635_v12, %v4634_v2 }
 0x2f6   : > { %7764 = vmatprep.mubr.f32.mxu0 %v4289_v9  ;;  %8247 = vmatpush3.bf16.msra.mxu0 %v8244_v14  ;;  %v2435_v14 = vadd.f32 %v2403_v0, %v2174_v49  ;;  %v1360_v9 = vmul.f32 %v10239_v37, %v10331_v30  ;;  %v1622_v30 = vmul.f32 %v10246_v54, %v10347_v16 }
 0x2f7   : > { %v10382_v29 = vpop.permute.xlu1 %1558  ;;  %8249 = vmatprep.subr.bf16.mxu0 %v8248_v4  ;;  %v2143_v0 = vmul.f32 %v10276_v28, %v10372_v13 }
 0x2f8   : > { %v2578_v44 = vpop.permute.xlu0 %2577  ;;  %v1392_v55 = vadd.f32 %v1360_v9, %v11607_v52  ;;  %v4926_v9 = vld [vmem:[#allocation8 + $0x380] sm:$0xff] }
 0x2f9   : > { %v2663_v15 = vmul.f32 %v10288_v17, %v2578_v44  ;;  %7765 = vmatmul.mubr.f32.gmra.mrb[8].mxu0 %v4290_v27 }
 0x2fa   : > { %7767 = vmatprep.mubr.f32.mxu0 %v4291_v60  ;;  %8251 = vmatpush3.bf16.msra.mxu0 %v8248_v4  ;;  %v1653_v50 = vadd.f32 %v1621_v36, %v1392_v55  ;;  %v4927_v36 = vld [vmem:[#allocation8 + $0x388] sm:$0xff] }
 0x2fb   : > { %v2695_v31 = vadd.f32 %v2663_v15, %v2434_v5  ;;  %v2583_v40 = vpop.permute.xlu1 %2582  ;;  %8253 = vmatprep.subr.bf16.mxu0 %v8252_v26  ;;  %v1883_v15 = vmul.f32 %v10267_v7, %v10363_v53 }
 0x2fc   : > { %v2664_v47 = vmul.f32 %v10288_v17, %v2583_v40  ;;  %v2071_v19 = vpop.permute.xlu0 %2070  ;;  %v1914_v57 = vadd.f32 %v1882_v39, %v1653_v50 }
 0x2fd   : > { %v2734_v1 = vadd.f32 %v10321_v61, %v2695_v31  ;;  %7768 = vmatmul.mubr.f32.gmra.mrb[10].mxu0 %v4292_v3  ;;  %v2144_v32 = vmul.f32 %v10276_v28, %v2071_v19 }
 0x2fe   : > { %v2696_v43 = vadd.f32 %v2664_v47, %v2435_v14  ;;  %7770 = vmatprep.mubr.f32.mxu0 %v4293_v35  ;;  %8255 = vmatpush3.bf16.msra.mxu0 %v8252_v26  ;;  %v11608_v26 = vld [vmem:[#allocation66_spill] sm:$0xff]  ;;  %v2175_v42 = vadd.f32 %v2143_v0, %v1914_v57 }
 0x2ff   : > { %v10390_v23 = vmax.f32 %v2734_v1, 0.0  ;;  %v10392_v41 = vpop.permute.xlu1 %1814  ;;  %8257 = vmatprep.subr.bf16.mxu0 %v8256_v20  ;;  %v1393_v5 = vadd.f32 %v1361_v25, %v11608_v26 }
 0x300   : > { %v2735_v56 = vadd.f32 %v10321_v61, %v2696_v43  ;;  %v10395_v46 = vpop.permute.xlu0 %1302 }
 0x301   : > { %2798 = vst [vmem:[#allocation2 + $0x98] sm:$0xff] %v10390_v23  ;;  %7771 = vmatmul.mubr.f32.gmra.mrb[12].mxu0 %v4294_v24  ;;  %v1654_v16 = vadd.f32 %v1622_v30, %v1393_v5  ;;  %v11609_v30 = vld [vmem:[#allocation29_spill] sm:$0xff]  ;;  %v11610_v5 = vld [vmem:[#allocation68_spill] sm:$0xff] }
 0x302   : > { %v10399_v4 = vmax.f32 %v2735_v56, 0.0  ;;  %7773 = vmatprep.mubr.f32.mxu0 %v4295_v18  ;;  %8259 = vmatpush3.bf16.msra.mxu0 %v8256_v20 }
 0x303   : > { %v10401_v58 = vpop.permute.xlu1 %1307  ;;  %8261 = vmatprep.subr.bf16.mxu0 %v8260_v59  ;;  %v1915_v31 = vadd.f32 %v1883_v15, %v1654_v16 }
 0x304   : > { %2799 = vst [vmem:[#allocation2 + $0xa0] sm:$0xff] %v10399_v4  ;;  %v2327_v8 = vpop.permute.xlu0 %2326 }
 0x305   : > { %7774 = vmatmul.mubr.f32.gmra.mrb[14].mxu0 %v4296_v51  ;;  %v2404_v49 = vmul.f32 %v10279_v22, %v2327_v8  ;;  %v2176_v3 = vadd.f32 %v2144_v32, %v1915_v31  ;;  %v1362_v51 = vmul.f32 %v10239_v37, %v10353_v34  ;;  %v1884_v34 = vmul.f32 %v10267_v7, %v10392_v41 }
 0x306   : > { %8263 = vmatpush3.bf16.msra.mxu0 %v8260_v59 }
 0x307   : > { %v2332_v45 = vpop.permute.xlu1 %2331  ;;  %v2436_v47 = vadd.f32 %v2404_v49, %v2175_v42  ;;  %v1394_v50 = vadd.f32 %v1362_v51, %v11609_v30 }
 0x308   : > { %v10410_v33 = vpop.permute.xlu0 %1819  ;;  %v2882_v38 = vld [vmem:[#allocation2 + $0x91] sm:$0xff]  ;;  %v2405_v40 = vmul.f32 %v10279_v22, %v2332_v45  ;;  %v1623_v45 = vmul.f32 %v10246_v54, %v10377_v62  ;;  %v1624_v62 = vmul.f32 %v10246_v54, %v10382_v29 }
 0x309   : > { %v4297_v11 = vld [vmem:[#allocation2 + $0x92] sm:$0xff]  ;;  %7379 = vmatprep.mubr.f32.mxu1 %v2882_v38  ;;  %v10449_v38 = vpack.c.bf16 %v4927_v36, %v4926_v9  ;;  %v1885_v57 = vmul.f32 %v10267_v7, %v10410_v33 }
 0x30a   : > { %7776 = vmatprep.mubr.f32.mxu0 %v4297_v11  ;;  %v2437_v35 = vadd.f32 %v2405_v40, %v2176_v3  ;;  %v1363_v11 = vmul.f32 %v10239_v37, %v10355_v6  ;;  %v1655_v0 = vadd.f32 %v1623_v45, %v1394_v50 }
 0x30b   : > { %v2076_v44 = vpop.permute.xlu1 %2075  ;;  %v2883_v48 = vld [vmem:[#allocation2 + $0x99] sm:$0xff]  ;;  %8265 = vmatprep.subr.bf16.mxu0 %v10449_v38 }
 0x30c   : > { %v4298_v27 = vld [vmem:[#allocation2 + $0x9a] sm:$0xff]  ;;  %v10422_v60 = vpop.permute.xlu0 %1563  ;;  %7380 = vmatmul.mubr.f32.gmra.mrb[18].mxu1 %v2883_v48  ;;  %v2145_v48 = vmul.f32 %v10276_v28, %v2076_v44  ;;  %v1395_v15 = vadd.f32 %v1363_v11, %v11610_v5  ;;  %v1916_v41 = vadd.f32 %v1884_v34, %v1655_v0 }
 0x30d   : > { %7777 = vmatmul.mubr.f32.gmra.mrb[16].mxu0 %v4298_v27  ;;  %v1625_v11 = vmul.f32 %v10246_v54, %v10422_v60 }
 0x30e   : > { %v1656_v16 = vadd.f32 %v1624_v62, %v1395_v15  ;;  %v2177_v42 = vadd.f32 %v2145_v48, %v1916_v41  ;;  %v11611_v62 = vld [vmem:[#allocation67_spill] sm:$0xff] }
 0x30f   : > { %v10426_v13 = vpop.permute.xlu1 %1568 }
 0x310   : > { %v2588_v14 = vpop.permute.xlu0 %2587  ;;  %v1917_v31 = vadd.f32 %v1885_v57, %v1656_v16 }
 0x311   : > { %v2665_v53 = vmul.f32 %v10288_v17, %v2588_v14 }
 0x313   : > { %v2697_v20 = vadd.f32 %v2665_v53, %v2436_v47  ;;  %v2593_v1 = vpop.permute.xlu1 %2592 }
 0x314   : > { %v2666_v21 = vmul.f32 %v10288_v17, %v2593_v1  ;;  %v2081_v63 = vpop.permute.xlu0 %2080 }
 0x315   : > { %v2736_v43 = vadd.f32 %v10321_v61, %v2697_v20  ;;  %v2146_v32 = vmul.f32 %v10276_v28, %v2081_v63 }
 0x316   : > { %v2698_v19 = vadd.f32 %v2666_v21, %v2437_v35 }
 0x317   : > { %v10432_v2 = vmax.f32 %v2736_v43, 0.0  ;;  %v10434_v12 = vpop.permute.xlu1 %1824  ;;  %v2178_v53 = vadd.f32 %v2146_v32, %v1917_v31 }
 0x318   : > { %v2737_v56 = vadd.f32 %v10321_v61, %v2698_v19  ;;  %v10437_v24 = vpop.permute.xlu0 %1312  ;;  %v1886_v48 = vmul.f32 %v10267_v7, %v10434_v12 }
 0x319   : > { %2800 = vst [vmem:[#allocation2 + $0xa8] sm:$0xff] %v10432_v2 }
 0x31a   : > { %v10440_v59 = vmax.f32 %v2737_v56, 0.0 }
 0x31b   : > { %v10442_v18 = vpop.permute.xlu1 %1317 }
 0x31c   : > { %2801 = vst [vmem:[#allocation2 + $0xb0] sm:$0xff] %v10440_v59  ;;  %v2337_v8 = vpop.permute.xlu0 %2336 }
 0x31d   : > { %v2406_v29 = vmul.f32 %v10279_v22, %v2337_v8 }
 0x31f   : > { %v2342_v25 = vpop.permute.xlu1 %2341  ;;  %v2438_v47 = vadd.f32 %v2406_v29, %v2177_v42 }
 0x320   : > { %v10453_v52 = vpop.permute.xlu0 %1829  ;;  %v2884_v55 = vld [vmem:[#allocation2 + $0xa1] sm:$0xff]  ;;  %v2407_v40 = vmul.f32 %v10279_v22, %v2342_v25  ;;  %v1364_v25 = vmul.f32 %v10239_v37, %v10395_v46  ;;  %v1626_v46 = vmul.f32 %v10246_v54, %v10426_v13 }
 0x321   : > { %v4299_v39 = vld [vmem:[#allocation2 + $0xa2] sm:$0xff]  ;;  %7382 = vmatprep.mubr.f32.mxu1 %v2884_v55  ;;  %v1887_v41 = vmul.f32 %v10267_v7, %v10453_v52 }
 0x322   : > { %7779 = vmatprep.mubr.f32.mxu0 %v4299_v39  ;;  %v2439_v1 = vadd.f32 %v2407_v40, %v2178_v53  ;;  %v1365_v39 = vmul.f32 %v10239_v37, %v10401_v58  ;;  %v1396_v0 = vadd.f32 %v1364_v25, %v11611_v62  ;;  %v11612_v58 = vld [vmem:[#allocation69_spill] sm:$0xff]  ;;  %v11613_v62 = vld [vmem:[#allocation31_spill] sm:$0xff] }
 0x323   : > { %v2086_v6 = vpop.permute.xlu1 %2085  ;;  %v2885_v27 = vld [vmem:[#allocation2 + $0xa9] sm:$0xff] }
 0x324   : > { %v4300_v26 = vld [vmem:[#allocation2 + $0xaa] sm:$0xff]  ;;  %v10465_v49 = vpop.permute.xlu0 %1573  ;;  %7383 = vmatmul.mubr.f32.gmra.mrb[20].mxu1 %v2885_v27  ;;  %v1657_v27 = vadd.f32 %v1625_v11, %v1396_v0  ;;  %v2147_v60 = vmul.f32 %v10276_v28, %v2086_v6  ;;  %v1397_v57 = vadd.f32 %v1365_v39, %v11612_v58 }
 0x325   : > { %7780 = vmatmul.mubr.f32.gmra.mrb[18].mxu0 %v4300_v26 }
 0x326   : > { %v1918_v12 = vadd.f32 %v1886_v48, %v1657_v27  ;;  %v1658_v32 = vadd.f32 %v1626_v46, %v1397_v57 }
 0x327   : > { %v10469_v44 = vpop.permute.xlu1 %1578 }
 0x328   : > { %v2598_v14 = vpop.permute.xlu0 %2597  ;;  %v2179_v42 = vadd.f32 %v2147_v60, %v1918_v12  ;;  %v1919_v31 = vadd.f32 %v1887_v41, %v1658_v32  ;;  %v1628_v46 = vmul.f32 %v10246_v54, %v10469_v44 }
 0x329   : > { %v2667_v33 = vmul.f32 %v10288_v17, %v2598_v14 }
 0x32b   : > { %v2699_v3 = vadd.f32 %v2667_v33, %v2438_v47  ;;  %v2603_v20 = vpop.permute.xlu1 %2602 }
 0x32c   : > { %v2668_v35 = vmul.f32 %v10288_v17, %v2603_v20  ;;  %v2091_v21 = vpop.permute.xlu0 %2090 }
 0x32d   : > { %v2738_v43 = vadd.f32 %v10321_v61, %v2699_v3  ;;  %v2148_v13 = vmul.f32 %v10276_v28, %v2091_v21 }
 0x32e   : > { %v2700_v63 = vadd.f32 %v2668_v35, %v2439_v1 }
 0x32f   : > { %v10475_v19 = vmax.f32 %v2738_v43, 0.0  ;;  %v1835_v56 = vpop.permute.xlu1 %1834  ;;  %v2180_v33 = vadd.f32 %v2148_v13, %v1919_v31 }
 0x330   : > { %v2739_v8 = vadd.f32 %v10321_v61, %v2700_v63  ;;  %v10478_v51 = vpop.permute.xlu0 %1322  ;;  %v1888_v48 = vmul.f32 %v10267_v7, %v1835_v56 }
 0x331   : > { %2802 = vst [vmem:[#allocation2 + $0xb8] sm:$0xff] %v10475_v19 }
 0x332   : > { %v10481_v9 = vmax.f32 %v2739_v8, 0.0 }
 0x333   : > { %v10483_v36 = vpop.permute.xlu1 %1327 }
 0x334   : > { %2803 = vst [vmem:[#allocation2 + $0xc0] sm:$0xff] %v10481_v9  ;;  %v2347_v45 = vpop.permute.xlu0 %2346 }
 0x335   : > { %v2408_v16 = vmul.f32 %v10279_v22, %v2347_v45  ;;  %v1366_v45 = vmul.f32 %v10239_v37, %v10437_v24 }
 0x337   : > { %v2352_v55 = vpop.permute.xlu1 %2351  ;;  %v2440_v47 = vadd.f32 %v2408_v16, %v2179_v42  ;;  %v1398_v0 = vadd.f32 %v1366_v45, %v11613_v62  ;;  %v8706_v62 = vld [vmem:[#allocation4 + $0x4] ss:$0 sm:$0xff] }
 0x338   : > { %v1840_v30 = vpop.permute.xlu0 %1839  ;;  %v2886_v50 = vld [vmem:[#allocation2 + $0xb1] sm:$0xff]  ;;  %v2409_v40 = vmul.f32 %v10279_v22, %v2352_v55  ;;  %v1627_v55 = vmul.f32 %v10246_v54, %v10465_v49  ;;  %v11614_v49 = vld [vmem:[#allocation70_spill] sm:$0xff] }
 0x339   : > { %v4301_v34 = vld [vmem:[#allocation2 + $0xb2] sm:$0xff]  ;;  %7385 = vmatprep.mubr.f32.mxu1 %v2886_v50  ;;  %v1367_v50 = vmul.f32 %v10239_v37, %v10442_v18 }
 0x33a   : > { %7782 = vmatprep.mubr.f32.mxu0 %v4301_v34  ;;  %v2441_v20 = vadd.f32 %v2409_v40, %v2180_v33  ;;  %v1659_v27 = vadd.f32 %v1627_v55, %v1398_v0 }
 0x33b   : > { %v2096_v26 = vpop.permute.xlu1 %2095  ;;  %v2887_v5 = vld [vmem:[#allocation2 + $0xb9] sm:$0xff] }
 0x33c   : > { %v4302_v15 = vld [vmem:[#allocation2 + $0xba] sm:$0xff]  ;;  %v10501_v29 = vpop.permute.xlu0 %1583  ;;  %7386 = vmatmul.mubr.f32.gmra.mrb[22].mxu1 %v2887_v5  ;;  %v2149_v60 = vmul.f32 %v10276_v28, %v2096_v26  ;;  %v1399_v5 = vadd.f32 %v1367_v50, %v11614_v49  ;;  %v1920_v18 = vadd.f32 %v1888_v48, %v1659_v27 }
 0x33d   : > { %7783 = vmatmul.mubr.f32.gmra.mrb[20].mxu0 %v4302_v15  ;;  %v1889_v15 = vmul.f32 %v10267_v7, %v1840_v30  ;;  %v1629_v0 = vmul.f32 %v8706_v62, %v10501_v29 }
 0x33e   : > { %v1660_v16 = vadd.f32 %v1628_v46, %v1399_v5  ;;  %v2181_v44 = vadd.f32 %v2149_v60, %v1920_v18 }
 0x33f   : > { %v10505_v6 = vpop.permute.xlu1 %1588 }
 0x340   : > { %v2608_v14 = vpop.permute.xlu0 %2607  ;;  %v1921_v32 = vadd.f32 %v1889_v15, %v1660_v16 }
 0x341   : > { %v2669_v52 = vmul.f32 %v10288_v17, %v2608_v14 }
 0x343   : > { %v2701_v53 = vadd.f32 %v2669_v52, %v2440_v47  ;;  %v2613_v3 = vpop.permute.xlu1 %2612 }
 0x344   : > { %v2670_v1 = vmul.f32 %v10288_v17, %v2613_v3  ;;  %v2101_v35 = vpop.permute.xlu0 %2100  ;;  %v1369_v3 = vmul.f32 %v10239_v37, %v10483_v36  ;;  %v11615_v37 = vld [vmem:[#allocation71_spill] sm:$0xff] }
 0x345   : > { %v2740_v43 = vadd.f32 %v10321_v61, %v2701_v53  ;;  %v2150_v26 = vmul.f32 %v10276_v28, %v2101_v35 }
 0x346   : > { %v2702_v21 = vadd.f32 %v2670_v1, %v2441_v20  ;;  %v1401_v36 = vadd.f32 %v1369_v3, %v11615_v37  ;;  %v8708_v3 = vld [vmem:[#allocation4 + $0x6] ss:$0 sm:$0xff] }
 0x347   : > { %v10511_v63 = vmax.f32 %v2740_v43, 0.0  ;;  %v1845_v8 = vpop.permute.xlu1 %1844  ;;  %v2182_v52 = vadd.f32 %v2150_v26, %v1921_v32  ;;  %v11617_v32 = vld [vmem:[#allocation19_spill] sm:$0xff] }
 0x348   : > { %v2741_v25 = vadd.f32 %v10321_v61, %v2702_v21  ;;  %v10516_v11 = vpop.permute.xlu0 %1332  ;;  %v8705_v21 = vld [vmem:[#allocation4 + $0x3] ss:$0 sm:$0xff] }
 0x349   : > { %2804 = vst [vmem:[#allocation2 + $0xc8] sm:$0xff] %v10511_v63  ;;  %v1368_v45 = vmul.f32 %v8705_v21, %v10478_v51  ;;  %v11616_v51 = vld [vmem:[#allocation18_spill] sm:$0xff]  ;;  %v1370_v15 = vmul.f32 %v8705_v21, %v10516_v11 }
 0x34a   : > { %v10521_v39 = vmax.f32 %v2741_v25, 0.0  ;;  %v1630_v25 = vmul.f32 %v10246_v54, %v10505_v6  ;;  %v1890_v54 = vmul.f32 %v10267_v7, %v1845_v8 }
 0x34b   : > { %v1850_v34 = vpop.permute.xlu1 %1849  ;;  %v1400_v60 = vadd.f32 %v1368_v45, %v11616_v51 }
 0x34c   : > { %2805 = vst [vmem:[#allocation2 + $0xd0] sm:$0xff] %v10521_v39  ;;  %v2357_v24 = vpop.permute.xlu0 %2356  ;;  %v1662_v6 = vadd.f32 %v1630_v25, %v1401_v36  ;;  %v8709_v36 = vld [vmem:[#allocation4 + $0x7] ss:$0 sm:$0xff] }
 0x34d   : > { %v2410_v57 = vmul.f32 %v10279_v22, %v2357_v24  ;;  %v1891_v24 = vmul.f32 %v10267_v7, %v1850_v34  ;;  %v1661_v29 = vadd.f32 %v1629_v0, %v1400_v60 }
 0x34f   : > { %v1594_v58 = vpop.permute.xlu1 %1593  ;;  %v2442_v31 = vadd.f32 %v2410_v57, %v2181_v44  ;;  %v1923_v57 = vadd.f32 %v1891_v24, %v1662_v6  ;;  %v1922_v16 = vadd.f32 %v1890_v54, %v1661_v29 }
 0x350   : > { %v2362_v41 = vpop.permute.xlu0 %2361  ;;  %v10534_v12 = vld [vmem:[#allocation2 + $0xc1] sm:$0xff]  ;;  %v1631_v44 = vmul.f32 %v8706_v62, %v1594_v58 }
 0x351   : > { %v10536_v56 = vld [vmem:[#allocation2 + $0xc2] sm:$0xff]  ;;  %7388 = vmatprep.mubr.f32.mxu1 %v10534_v12  ;;  %v2411_v40 = vmul.f32 %v10279_v22, %v2362_v41 }
 0x352   : > { %7785 = vmatprep.mubr.f32.mxu0 %v10536_v56 }
 0x353   : > { %v2618_v13 = vpop.permute.xlu1 %2617  ;;  %v10541_v30 = vld [vmem:[#allocation2 + $0xc9] sm:$0xff]  ;;  %v2443_v20 = vadd.f32 %v2411_v40, %v2182_v52 }
 0x354   : > { %v10543_v42 = vld [vmem:[#allocation2 + $0xca] sm:$0xff]  ;;  %v2671_v14 = vmul.f32 %v10288_v17, %v2618_v13  ;;  %v2106_v47 = vpop.permute.xlu0 %2105  ;;  %7389 = vmatmul.mubr.f32.gmra.mrb[24].mxu1 %v10541_v30  ;;  %v1402_v13 = vadd.f32 %v1370_v15, %v11617_v32 }
 0x355   : > { %7786 = vmatmul.mubr.f32.gmra.mrb[22].mxu0 %v10543_v42  ;;  %v2151_v18 = vmul.f32 %v10276_v28, %v2106_v47  ;;  %v8707_v40 = vld [vmem:[#allocation4 + $0x5] ss:$0 sm:$0xff] }
 0x356   : > { %v2703_v33 = vadd.f32 %v2671_v14, %v2442_v31  ;;  %v4312_v32 = vld [vmem:[#allocation2 + $0x10a] sm:$0xff] }
 0x357   : > { %v2623_v53 = vpop.permute.xlu1 %2622  ;;  %v2183_v31 = vadd.f32 %v2151_v18, %v1922_v16 }
 0x358   : > { %v2742_v1 = vadd.f32 %v10321_v61, %v2703_v33  ;;  %v2672_v35 = vmul.f32 %v10288_v17, %v2623_v53  ;;  %v2111_v43 = vpop.permute.xlu0 %2110 }
 0x359   : > { %v2152_v5 = vmul.f32 %v10276_v28, %v2111_v43 }
 0x35a   : > { %v10556_v55 = vmax.f32 %v2742_v1, 0.0  ;;  %v2704_v50 = vadd.f32 %v2672_v35, %v2443_v20 }
 0x35b   : > { %v2367_v48 = vpop.permute.xlu1 %2366  ;;  %v2184_v8 = vadd.f32 %v2152_v5, %v1923_v57 }
 0x35c   : > { %2806 = vst [vmem:[#allocation2 + $0xd8] sm:$0xff] %v10556_v55  ;;  %v2743_v46 = vadd.f32 %v10321_v61, %v2704_v50  ;;  %v1855_v27 = vpop.permute.xlu0 %1854  ;;  %v2412_v26 = vmul.f32 %v10279_v22, %v2367_v48 }
 0x35d   : > { %v1892_v14 = vmul.f32 %v8707_v40, %v1855_v27  ;;  %v8710_v27 = vld [vmem:[#allocation4 + $0x8] ss:$0 sm:$0xff] }
 0x35e   : > { %v10565_v49 = vmax.f32 %v2743_v46, 0.0  ;;  %v2444_v58 = vadd.f32 %v2412_v26, %v2183_v31  ;;  %v3398_v26 = vld [vmem:[#allocation8 + $0x110] sm:$0xff] }
 0x35f   : > { %v2116_v34 = vpop.permute.xlu1 %2115  ;;  %v2817_v31 = vld [vmem:[#allocation2 + $0x8] sm:$0xff]  ;;  %v10624_v40 = vld [vmem:[#allocation2 + $0x10] sm:$0xff] }
 0x360   : > { %2807 = vst [vmem:[#allocation2 + $0xe0] sm:$0xff] %v10565_v49  ;;  %v2372_v41 = vpop.permute.xlu0 %2371  ;;  %v2153_v20 = vmul.f32 %v8708_v3, %v2116_v34  ;;  %v10635_v3 = vld [vmem:[#allocation2 + $0x30] sm:$0xff] }
 0x361   : > { %v2413_v7 = vmul.f32 %v10279_v22, %v2372_v41  ;;  %v1663_v22 = vadd.f32 %v1631_v44, %v1402_v13 }
 0x363   : > { %v2633_v11 = vpop.permute.xlu1 %2632  ;;  %v10574_v52 = vld [vmem:[#allocation2 + $0xd1] sm:$0xff]  ;;  %v2445_v47 = vadd.f32 %v2413_v7, %v2184_v8  ;;  %v1924_v43 = vadd.f32 %v1892_v14, %v1663_v22  ;;  %v2816_v8 = vld [vmem:[#allocation2] sm:$0xff] }
 0x364   : > { %v10576_v28 = vld [vmem:[#allocation2 + $0xd2] sm:$0xff]  ;;  %v2674_v33 = vmul.f32 %v10288_v17, %v2633_v11  ;;  %v2628_v53 = vpop.permute.xlu0 %2627  ;;  %7391 = vmatprep.mubr.f32.mxu1 %v10574_v52  ;;  %v3400_v14 = vld [vmem:[#allocation8 + $0x120] sm:$0xff]  ;;  %v3401_v11 = vld [vmem:[#allocation8 + $0x128] sm:$0xff] }
 0x365   : > { %7788 = vmatprep.mubr.f32.mxu0 %v10576_v28  ;;  %v2673_v1 = vmul.f32 %v10288_v17, %v2628_v53  ;;  %v2185_v48 = vadd.f32 %v2153_v20, %v1924_v43  ;;  %v3399_v7 = vld [vmem:[#allocation8 + $0x118] sm:$0xff]  ;;  %v10628_v53 = vld [vmem:[#allocation2 + $0x20] sm:$0xff]  ;;  %v8112_v20 = vpack.c.bf16 %v3401_v11, %v3400_v14 }
 0x366   : > { %v2706_v35 = vadd.f32 %v2674_v33, %v2445_v47  ;;  %v8108_v13 = vpack.c.bf16 %v3399_v7, %v3398_v26  ;;  %v4928_v47 = vld [vmem:[#allocation8 + $0x390] sm:$0xff]  ;;  %v4929_v33 = vld [vmem:[#allocation8 + $0x398] sm:$0xff]  ;;  %v4930_v43 = vld [vmem:[#allocation8 + $0x3a0] sm:$0xff] }
 0x367   : > { %v2705_v21 = vadd.f32 %v2673_v1, %v2444_v58  ;;  %v10582_v45 = vld [vmem:[#allocation2 + $0xd9] sm:$0xff]  ;;  %v2638_v62 = vpop.permute.xlu1 %2637  ;;  %v10633_v58 = vld [vmem:[#allocation2 + $0x28] sm:$0xff] }
 0x368   : > { %v10584_v25 = vld [vmem:[#allocation2 + $0xda] sm:$0xff]  ;;  %v2745_v50 = vadd.f32 %v10321_v61, %v2706_v35  ;;  %v2377_v0 = vpop.permute.xlu0 %2376  ;;  %7392 = vmatmul.mubr.f32.gmra.mrb[26].mxu1 %v10582_v45  ;;  %v2675_v51 = vmul.f32 %v8710_v27, %v2638_v62  ;;  %v3402_v1 = vld [vmem:[#allocation8 + $0x130] sm:$0xff]  ;;  %v8268_v35 = vpack.c.bf16 %v4929_v33, %v4928_v47  ;;  %v4933_v27 = vld [vmem:[#allocation8 + $0x3b8] sm:$0xff] }
 0x369   : > { %7789 = vmatmul.mubr.f32.gmra.mrb[24].mxu0 %v10584_v25  ;;  %v2744_v37 = vadd.f32 %v10321_v61, %v2705_v21  ;;  %v2414_v17 = vmul.f32 %v8709_v36, %v2377_v0  ;;  %v10631_v22 = vld [vmem:[#allocation2 + $0x18] sm:$0xff]  ;;  %v4931_v21 = vld [vmem:[#allocation8 + $0x3a8] sm:$0xff]  ;;  %v4936_v47 = vld [vmem:[#allocation8 + $0x3d0] sm:$0xff] }
 0x36a   : > { %v10590_v24 = vmax.f32 %v2745_v50, 0.0  ;;  %v10642_v50 = vld [vmem:[#allocation2 + $0x38] sm:$0xff]  ;;  %v10644_v62 = vld [vmem:[#allocation2 + $0x40] sm:$0xff] }
 0x36b   : > { %v10592_v46 = vmax.f32 %v2744_v37, 0.0  ;;  %v2446_v60 = vadd.f32 %v2414_v17, %v2185_v48  ;;  %v3404_v48 = vld [vmem:[#allocation8 + $0x140] sm:$0xff]  ;;  %v8272_v37 = vpack.c.bf16 %v4931_v21, %v4930_v43  ;;  %v3405_v36 = vld [vmem:[#allocation8 + $0x148] sm:$0xff]  ;;  %v4932_v17 = vld [vmem:[#allocation8 + $0x3b0] sm:$0xff] }
 0x36c   : > { %2809 = vst [vmem:[#allocation2 + $0xf0] sm:$0xff] %v10590_v24  ;;  %v4934_v26 = vld [vmem:[#allocation8 + $0x3c0] sm:$0xff]  ;;  %v4935_v7 = vld [vmem:[#allocation8 + $0x3c8] sm:$0xff]  ;;  %v4937_v33 = vld [vmem:[#allocation8 + $0x3d8] sm:$0xff] }
 0x36d   : > { %2808 = vst [vmem:[#allocation2 + $0xe8] sm:$0xff] %v10592_v46  ;;  %v2707_v54 = vadd.f32 %v2675_v51, %v2446_v60  ;;  %v10652_v51 = vld [vmem:[#allocation2 + $0x50] sm:$0xff]  ;;  %v8120_v60 = vpack.c.bf16 %v3405_v36, %v3404_v48  ;;  %v8280_v14 = vpack.c.bf16 %v4935_v7, %v4934_v26  ;;  %v3409_v11 = vld [vmem:[#allocation8 + $0x168] sm:$0xff]  ;;  %v8284_v43 = vpack.c.bf16 %v4937_v33, %v4936_v47 }
 0x36e   : > { %v3411_v21 = vld [vmem:[#allocation8 + $0x178] sm:$0xff]  ;;  %v4939_v48 = vld [vmem:[#allocation8 + $0x3e8] sm:$0xff] }
 0x36f   : > { %v2746_v6 = vadd.f32 %v10321_v61, %v2707_v54  ;;  %v4311_v61 = vld [vmem:[#allocation2 + $0x102] sm:$0xff]  ;;  %v3406_v54 = vld [vmem:[#allocation8 + $0x150] sm:$0xff] }
 0x370   : > { %v10676_v36 = vld [vmem:[#allocation2 + $0x80] sm:$0xff]  ;;  %v10682_v26 = vld [vmem:[#allocation2 + $0x88] sm:$0xff] }
 0x371   : > { %v10597_v5 = vmax.f32 %v2746_v6, 0.0  ;;  %v8276_v6 = vpack.c.bf16 %v4933_v27, %v4932_v17  ;;  %v10727_v33 = vld [vmem:[#allocation2 + $0x22] sm:$0xff] }
 0x373   : > { %2810 = vst [vmem:[#allocation2 + $0xf8] sm:$0xff] %v10597_v5 }
 0x374   : > { %v10600_v29 = vld [vmem:[#allocation2 + $0xe1] sm:$0xff]  ;;  %v10604_v18 = vld [vmem:[#allocation2 + $0xe9] sm:$0xff] }
 0x375   : > { %v10602_v15 = vld [vmem:[#allocation2 + $0xe2] sm:$0xff]  ;;  %7394 = vmatprep.mubr.f32.mxu1 %v10600_v29  ;;  %v10608_v34 = vld [vmem:[#allocation2 + $0xea] sm:$0xff] }
 0x376   : > { %7791 = vmatprep.mubr.f32.mxu0 %v10602_v15  ;;  %7395 = vmatmul.mubr.f32.gmra.mrb[28].mxu1 %v10604_v18 }
 0x377   : > { %7792 = vmatmul.mubr.f32.gmra.mrb[26].mxu0 %v10608_v34 }
 0x37a   : > { %v10612_v57 = vld [vmem:[#allocation2 + $0xf1] sm:$0xff]  ;;  %v10616_v16 = vld [vmem:[#allocation2 + $0xf9] sm:$0xff] }
 0x37b   : > { %v10614_v41 = vld [vmem:[#allocation2 + $0xf2] sm:$0xff]  ;;  %7397 = vmatprep.mubr.f32.mxu1 %v10612_v57  ;;  %v10620_v44 = vld [vmem:[#allocation2 + $0xfa] sm:$0xff] }
 0x37c   : > { %7794 = vmatprep.mubr.f32.mxu0 %v10614_v41  ;;  %7398 = vmatmul.mubr.f32.gmra.mrb[30].mxu1 %v10616_v16 }
 0x37d   : > { %7795 = vmatmul.mubr.f32.gmra.mrb[28].mxu0 %v10620_v44  ;;  %7432 = vmatprep.mubr.f32.mxu1 %v2816_v8  ;;  %v10658_v8 = vld [vmem:[#allocation2 + $0x58] sm:$0xff] }
 0x37e   : > { %7797 = vmatprep.mubr.f32.mxu0 %v4311_v61  ;;  %v3407_v61 = vld [vmem:[#allocation8 + $0x158] sm:$0xff] }
 0x380   : > { %7433 = vmatmul.mubr.f32.vlgmr.msra.gmra.mrb[0].mxu1 %v2817_v31  ;;  %v3408_v31 = vld [vmem:[#allocation8 + $0x160] sm:$0xff] }
 0x381   : > { %7798 = vmatmul.mubr.f32.gmra.mrb[30].mxu0 %v4312_v32  ;;  %8107 = vmatpush3.bf16.msra.mxu1 %v10388_v10  ;;  %v3403_v10 = vld [vmem:[#allocation8 + $0x138] sm:$0xff]  ;;  %v10660_v32 = vld [vmem:[#allocation2 + $0x60] sm:$0xff] }
 0x382   : > { %7435 = vmatprep.mubr.f32.mxu1 %v10624_v40  ;;  %7832 = vmatprep.mubr.f32.mxu0 %v10628_v53  ;;  %v8116_v0 = vpack.c.bf16 %v3403_v10, %v3402_v1  ;;  %v10668_v1 = vld [vmem:[#allocation2 + $0x70] sm:$0xff] }
 0x383   : > { %8109 = vmatprep.subr.bf16.mxu1 %v8108_v13  ;;  %v3410_v10 = vld [vmem:[#allocation8 + $0x170] sm:$0xff] }
 0x384   : > { %7436 = vmatmul.mubr.f32.gmra.mrb[2].mxu1 %v10631_v22  ;;  %v8132_v17 = vpack.c.bf16 %v3411_v21, %v3410_v10  ;;  %v4895_v10 = vld [vmem:[#allocation2 + $0x31] sm:$0xff] }
 0x385   : > { %7833 = vmatmul.mubr.f32.vlgmr.msra.gmra.mrb[0].mxu0 %v10633_v58  ;;  %7438 = vmatprep.mubr.f32.mxu1 %v10628_v53  ;;  %v3708_v21 = vld [vmem:[#allocation8 + $0x1b0] sm:$0xff] }
 0x386   : > { %7835 = vmatprep.mubr.f32.mxu0 %v10635_v3  ;;  %8111 = vmatpush3.bf16.msra.mxu1 %v8108_v13  ;;  %v8124_v13 = vpack.c.bf16 %v3407_v61, %v3406_v54  ;;  %v3703_v54 = vld [vmem:[#allocation8 + $0x188] sm:$0xff]  ;;  %v4941_v61 = vld [vmem:[#allocation8 + $0x3f8] sm:$0xff] }
 0x387   : > { %8267 = vmatpush3.bf16.msra.mxu0 %v10449_v38  ;;  %8113 = vmatprep.subr.bf16.mxu1 %v8112_v20  ;;  %v10650_v38 = vld [vmem:[#allocation2 + $0x48] sm:$0xff] }
 0x388   : > { %8269 = vmatprep.subr.bf16.mxu0 %v8268_v35  ;;  %7439 = vmatmul.mubr.f32.gmra.mrb[4].mxu1 %v10633_v58 }
 0x389   : > { %7836 = vmatmul.mubr.f32.gmra.mrb[2].mxu0 %v10642_v50  ;;  %7441 = vmatprep.mubr.f32.mxu1 %v10635_v3 }
 0x38a   : > { %7838 = vmatprep.mubr.f32.mxu0 %v10644_v62  ;;  %8115 = vmatpush3.bf16.msra.mxu1 %v8112_v20  ;;  %v10666_v20 = vld [vmem:[#allocation2 + $0x68] sm:$0xff] }
 0x38b   : > { %8271 = vmatpush3.bf16.msra.mxu0 %v8268_v35  ;;  %8117 = vmatprep.subr.bf16.mxu1 %v8116_v0  ;;  %v8128_v35 = vpack.c.bf16 %v3409_v11, %v3408_v31  ;;  %v10686_v31 = vld [vmem:[#allocation2 + $0x90] sm:$0xff]  ;;  %v5233_v11 = vld [vmem:[#allocation8 + $0x408] sm:$0xff] }
 0x38c   : > { %8273 = vmatprep.subr.bf16.mxu0 %v8272_v37  ;;  %7442 = vmatmul.mubr.f32.gmra.mrb[6].mxu1 %v10642_v50 }
 0x38d   : > { %7839 = vmatmul.mubr.f32.gmra.mrb[4].mxu0 %v10650_v38  ;;  %7444 = vmatprep.mubr.f32.mxu1 %v10644_v62 }
 0x38e   : > { %7841 = vmatprep.mubr.f32.mxu0 %v10652_v51  ;;  %8119 = vmatpush3.bf16.msra.mxu1 %v8116_v0  ;;  %v4938_v0 = vld [vmem:[#allocation8 + $0x3e0] sm:$0xff] }
 0x38f   : > { %8275 = vmatpush3.bf16.msra.mxu0 %v8272_v37  ;;  %8121 = vmatprep.subr.bf16.mxu1 %v8120_v60  ;;  %v10674_v37 = vld [vmem:[#allocation2 + $0x78] sm:$0xff]  ;;  %v8288_v27 = vpack.c.bf16 %v4939_v48, %v4938_v0 }
 0x390   : > { %8277 = vmatprep.subr.bf16.mxu0 %v8276_v6  ;;  %7445 = vmatmul.mubr.f32.gmra.mrb[8].mxu1 %v10650_v38  ;;  %v3709_v48 = vld [vmem:[#allocation8 + $0x1b8] sm:$0xff] }
 0x391   : > { %7842 = vmatmul.mubr.f32.gmra.mrb[6].mxu0 %v10658_v8  ;;  %7447 = vmatprep.mubr.f32.mxu1 %v10652_v51 }
 0x392   : > { %7844 = vmatprep.mubr.f32.mxu0 %v10660_v32  ;;  %8123 = vmatpush3.bf16.msra.mxu1 %v8120_v60  ;;  %v3702_v60 = vld [vmem:[#allocation8 + $0x180] sm:$0xff] }
 0x393   : > { %8279 = vmatpush3.bf16.msra.mxu0 %v8276_v6  ;;  %8125 = vmatprep.subr.bf16.mxu1 %v8124_v13  ;;  %v4940_v6 = vld [vmem:[#allocation8 + $0x3f0] sm:$0xff]  ;;  %v8136_v7 = vpack.c.bf16 %v3703_v54, %v3702_v60  ;;  %v10732_v54 = vld [vmem:[#allocation2 + $0x32] sm:$0xff] }
 0x394   : > { %8281 = vmatprep.subr.bf16.mxu0 %v8280_v14  ;;  %7448 = vmatmul.mubr.f32.gmra.mrb[10].mxu1 %v10658_v8  ;;  %v10730_v60 = vld [vmem:[#allocation2 + $0x2a] sm:$0xff] }
 0x395   : > { %7845 = vmatmul.mubr.f32.gmra.mrb[8].mxu0 %v10666_v20  ;;  %7450 = vmatprep.mubr.f32.mxu1 %v10660_v32 }
 0x396   : > { %7847 = vmatprep.mubr.f32.mxu0 %v10668_v1  ;;  %8127 = vmatpush3.bf16.msra.mxu1 %v8124_v13  ;;  %v8292_v13 = vpack.c.bf16 %v4941_v61, %v4940_v6  ;;  %v4896_v6 = vld [vmem:[#allocation2 + $0x39] sm:$0xff]  ;;  %v4897_v61 = vld [vmem:[#allocation2 + $0x41] sm:$0xff] }
 0x397   : > { %8283 = vmatpush3.bf16.msra.mxu0 %v8280_v14  ;;  %8129 = vmatprep.subr.bf16.mxu1 %v8128_v35  ;;  %v5232_v14 = vld [vmem:[#allocation8 + $0x400] sm:$0xff] }
 0x398   : > { %8285 = vmatprep.subr.bf16.mxu0 %v8284_v43  ;;  %7451 = vmatmul.mubr.f32.gmra.mrb[12].mxu1 %v10666_v20  ;;  %v10690_v47 = vpack.c.bf16 %v5233_v11, %v5232_v14  ;;  %v3711_v11 = vld [vmem:[#allocation8 + $0x1c8] sm:$0xff] }
 0x399   : > { %7848 = vmatmul.mubr.f32.gmra.mrb[10].mxu0 %v10674_v37  ;;  %7453 = vmatprep.mubr.f32.mxu1 %v10668_v1 }
 0x39a   : > { %7850 = vmatprep.mubr.f32.mxu0 %v10676_v36  ;;  %8131 = vmatpush3.bf16.msra.mxu1 %v8128_v35  ;;  %v4894_v35 = vld [vmem:[#allocation2 + $0x29] sm:$0xff] }
 0x39b   : > { %8287 = vmatpush3.bf16.msra.mxu0 %v8284_v43  ;;  %8133 = vmatprep.subr.bf16.mxu1 %v8132_v17 }
 0x39c   : > { %8289 = vmatprep.subr.bf16.mxu0 %v8288_v27  ;;  %7454 = vmatmul.mubr.f32.gmra.mrb[14].mxu1 %v10674_v37 }
 0x39d   : > { %7851 = vmatmul.mubr.f32.gmra.mrb[12].mxu0 %v10682_v26  ;;  %7456 = vmatprep.mubr.f32.mxu1 %v10676_v36 }
 0x39e   : > { %7853 = vmatprep.mubr.f32.mxu0 %v10686_v31  ;;  %8135 = vmatpush3.bf16.msra.mxu1 %v8132_v17  ;;  %v5236_v17 = vld [vmem:[#allocation8 + $0x420] sm:$0xff] }
 0x39f   : > { %8291 = vmatpush3.bf16.msra.mxu0 %v8288_v27  ;;  %8137 = vmatprep.subr.bf16.mxu1 %v8136_v7  ;;  %v5237_v27 = vld [vmem:[#allocation8 + $0x428] sm:$0xff] }
 0x3a0   : > { %8293 = vmatprep.subr.bf16.mxu0 %v8292_v13  ;;  %7457 = vmatmul.mubr.f32.gmra.mrb[16].mxu1 %v10682_v26  ;;  %v8304_v14 = vpack.c.bf16 %v5237_v27, %v5236_v17  ;;  %v3715_v17 = vld [vmem:[#allocation8 + $0x1e8] sm:$0xff]  ;;  %v5242_v27 = vld [vmem:[#allocation8 + $0x450] sm:$0xff] }
 0x3a1   : > { %7854 = vmatmul.mubr.f32.gmra.mrb[14].mxu0 %v10390_v23  ;;  %7459 = vmatprep.mubr.f32.mxu1 %v10686_v31 }
 0x3a2   : > { %7856 = vmatprep.mubr.f32.mxu0 %v10399_v4 }
 0x3a3   : > { %8295 = vmatpush3.bf16.msra.mxu0 %v8292_v13  ;;  %v3710_v13 = vld [vmem:[#allocation8 + $0x1c0] sm:$0xff] }
 0x3a4   : > { %8297 = vmatprep.subr.bf16.mxu0 %v10690_v47  ;;  %7460 = vmatmul.mubr.f32.gmra.mrb[18].mxu1 %v10390_v23  ;;  %v10720_v23 = vld [vmem:[#allocation2 + $0x100] sm:$0xff] }
 0x3a5   : > { %7857 = vmatmul.mubr.f32.gmra.mrb[16].mxu0 %v10432_v2  ;;  %7462 = vmatprep.mubr.f32.mxu1 %v10399_v4  ;;  %v3704_v4 = vld [vmem:[#allocation8 + $0x190] sm:$0xff] }
 0x3a6   : > { %7859 = vmatprep.mubr.f32.mxu0 %v10440_v59 }
 0x3a8   : > { %7463 = vmatmul.mubr.f32.gmra.mrb[20].mxu1 %v10432_v2  ;;  %v3705_v2 = vld [vmem:[#allocation8 + $0x198] sm:$0xff] }
 0x3a9   : > { %7860 = vmatmul.mubr.f32.gmra.mrb[18].mxu0 %v10475_v19  ;;  %7465 = vmatprep.mubr.f32.mxu1 %v10440_v59  ;;  %v3363_v59 = vld [vmem:[#allocation2 + $0x2] sm:$0xff] }
 0x3aa   : > { %7862 = vmatprep.mubr.f32.mxu0 %v10481_v9 }
 0x3ac   : > { %7466 = vmatmul.mubr.f32.gmra.mrb[22].mxu1 %v10475_v19  ;;  %v8140_v19 = vpack.c.bf16 %v3705_v2, %v3704_v4  ;;  %v5238_v4 = vld [vmem:[#allocation8 + $0x430] sm:$0xff]  ;;  %v5239_v2 = vld [vmem:[#allocation8 + $0x438] sm:$0xff] }
 0x3ad   : > { %7863 = vmatmul.mubr.f32.gmra.mrb[20].mxu0 %v10511_v63  ;;  %7468 = vmatprep.mubr.f32.mxu1 %v10481_v9  ;;  %v3364_v9 = vld [vmem:[#allocation2 + $0xa] sm:$0xff] }
 0x3ae   : > { %7865 = vmatprep.mubr.f32.mxu0 %v10521_v39 }
 0x3b0   : > { %7469 = vmatmul.mubr.f32.gmra.mrb[24].mxu1 %v10511_v63  ;;  %v3365_v63 = vld [vmem:[#allocation2 + $0x12] sm:$0xff] }
 0x3b1   : > { %7866 = vmatmul.mubr.f32.gmra.mrb[22].mxu0 %v10556_v55  ;;  %7471 = vmatprep.mubr.f32.mxu1 %v10521_v39  ;;  %v3706_v39 = vld [vmem:[#allocation8 + $0x1a0] sm:$0xff] }
 0x3b2   : > { %7868 = vmatprep.mubr.f32.mxu0 %v10565_v49 }
 0x3b4   : > { %7472 = vmatmul.mubr.f32.gmra.mrb[26].mxu1 %v10556_v55  ;;  %v3707_v55 = vld [vmem:[#allocation8 + $0x1a8] sm:$0xff] }
 0x3b5   : > { %7869 = vmatmul.mubr.f32.gmra.mrb[24].mxu0 %v10592_v46  ;;  %7474 = vmatprep.mubr.f32.mxu1 %v10565_v49  ;;  %v5234_v49 = vld [vmem:[#allocation8 + $0x410] sm:$0xff]  ;;  %v8144_v43 = vpack.c.bf16 %v3707_v55, %v3706_v39  ;;  %v8308_v55 = vpack.c.bf16 %v5239_v2, %v5238_v4 }
 0x3b6   : > { %7871 = vmatprep.mubr.f32.mxu0 %v10590_v24  ;;  %v3712_v39 = vld [vmem:[#allocation8 + $0x1d0] sm:$0xff] }
 0x3b7   : > { %v3716_v4 = vld [vmem:[#allocation8 + $0x1f0] sm:$0xff] }
 0x3b8   : > { %7475 = vmatmul.mubr.f32.gmra.mrb[28].mxu1 %v10592_v46  ;;  %v4893_v46 = vld [vmem:[#allocation2 + $0x21] sm:$0xff] }
 0x3b9   : > { %7872 = vmatmul.mubr.f32.gmra.mrb[26].mxu0 %v10597_v5  ;;  %7477 = vmatprep.mubr.f32.mxu1 %v10590_v24  ;;  %v5235_v24 = vld [vmem:[#allocation8 + $0x418] sm:$0xff] }
 0x3ba   : > { %7874 = vmatprep.mubr.f32.mxu0 %v10720_v23  ;;  %v8300_v0 = vpack.c.bf16 %v5235_v24, %v5234_v49  ;;  %v3713_v49 = vld [vmem:[#allocation8 + $0x1d8] sm:$0xff]  ;;  %v5240_v24 = vld [vmem:[#allocation8 + $0x440] sm:$0xff] }
 0x3bc   : > { %7478 = vmatmul.mubr.f32.gmra.mrb[30].mxu1 %v10597_v5  ;;  %v3366_v5 = vld [vmem:[#allocation2 + $0x1a] sm:$0xff] }
 0x3bd   : > { %7875 = vmatmul.mubr.f32.gmra.mrb[28].mxu0 %v10720_v23  ;;  %7512 = vmatprep.mubr.f32.mxu1 %v3363_v59  ;;  %v10737_v59 = vld [vmem:[#allocation2 + $0x3a] sm:$0xff] }
 0x3be   : > { %7877 = vmatprep.mubr.f32.mxu0 %v10720_v23 }
 0x3c0   : > { %7513 = vmatmul.mubr.f32.vlgmr.msra.gmra.mrb[0].mxu1 %v3364_v9  ;;  %v4899_v9 = vld [vmem:[#allocation2 + $0x51] sm:$0xff] }
 0x3c1   : > { %7878 = vmatmul.mubr.f32.gmra.mrb[30].mxu0 %v10720_v23  ;;  %8139 = vmatpush3.bf16.msra.mxu1 %v8136_v7  ;;  %v8148_v7 = vpack.c.bf16 %v3709_v48, %v3708_v21  ;;  %v8156_v21 = vpack.c.bf16 %v3713_v49, %v3712_v39  ;;  %v5245_v39 = vld [vmem:[#allocation8 + $0x468] sm:$0xff]  ;;  %v10757_v49 = vld [vmem:[#allocation2 + $0x72] sm:$0xff] }
 0x3c2   : > { %7515 = vmatprep.mubr.f32.mxu1 %v3365_v63  ;;  %7912 = vmatprep.mubr.f32.mxu0 %v4893_v46  ;;  %v8152_v63 = vpack.c.bf16 %v3711_v11, %v3710_v13  ;;  %v5241_v46 = vld [vmem:[#allocation8 + $0x448] sm:$0xff] }
 0x3c3   : > { %8141 = vmatprep.subr.bf16.mxu1 %v8140_v19  ;;  %v8312_v48 = vpack.c.bf16 %v5241_v46, %v5240_v24  ;;  %v4902_v13 = vld [vmem:[#allocation2 + $0x69] sm:$0xff] }
 0x3c4   : > { %7516 = vmatmul.mubr.f32.gmra.mrb[2].mxu1 %v3366_v5  ;;  %v10743_v5 = vld [vmem:[#allocation2 + $0x4a] sm:$0xff] }
 0x3c5   : > { %7913 = vmatmul.mubr.f32.vlgmr.msra.gmra.mrb[0].mxu0 %v4894_v35  ;;  %7518 = vmatprep.mubr.f32.mxu1 %v10727_v33  ;;  %v10745_v35 = vld [vmem:[#allocation2 + $0x52] sm:$0xff] }
 0x3c6   : > { %7915 = vmatprep.mubr.f32.mxu0 %v4895_v10  ;;  %8143 = vmatpush3.bf16.msra.mxu1 %v8140_v19  ;;  %v10739_v19 = vld [vmem:[#allocation2 + $0x42] sm:$0xff]  ;;  %v4900_v10 = vld [vmem:[#allocation2 + $0x59] sm:$0xff] }
 0x3c7   : > { %8299 = vmatpush3.bf16.msra.mxu0 %v10690_v47  ;;  %8145 = vmatprep.subr.bf16.mxu1 %v8144_v43  ;;  %v4898_v47 = vld [vmem:[#allocation2 + $0x49] sm:$0xff] }
 0x3c8   : > { %8301 = vmatprep.subr.bf16.mxu0 %v8300_v0  ;;  %7519 = vmatmul.mubr.f32.gmra.mrb[4].mxu1 %v10730_v60 }
 0x3c9   : > { %7916 = vmatmul.mubr.f32.gmra.mrb[2].mxu0 %v4896_v6  ;;  %7521 = vmatprep.mubr.f32.mxu1 %v10732_v54  ;;  %v5243_v6 = vld [vmem:[#allocation8 + $0x458] sm:$0xff] }
 0x3ca   : > { %7918 = vmatprep.mubr.f32.mxu0 %v4897_v61  ;;  %8147 = vmatpush3.bf16.msra.mxu1 %v8144_v43  ;;  %v4901_v43 = vld [vmem:[#allocation2 + $0x61] sm:$0xff]  ;;  %v8316_v2 = vpack.c.bf16 %v5243_v6, %v5242_v27  ;;  %v10766_v6 = vld [vmem:[#allocation2 + $0x91] sm:$0xff] }
 0x3cb   : > { %8303 = vmatpush3.bf16.msra.mxu0 %v8300_v0  ;;  %8149 = vmatprep.subr.bf16.mxu1 %v8148_v7  ;;  %v3714_v0 = vld [vmem:[#allocation8 + $0x1e0] sm:$0xff]  ;;  %v10764_v27 = vld [vmem:[#allocation2 + $0x82] sm:$0xff] }
 0x3cc   : > { %8305 = vmatprep.subr.bf16.mxu0 %v8304_v14  ;;  %7522 = vmatmul.mubr.f32.gmra.mrb[6].mxu1 %v10737_v59  ;;  %v10749_v61 = vld [vmem:[#allocation2 + $0x5a] sm:$0xff]  ;;  %v8160_v11 = vpack.c.bf16 %v3715_v17, %v3714_v0  ;;  %v5247_v0 = vld [vmem:[#allocation8 + $0x478] sm:$0xff] }
 0x3cd   : > { %7919 = vmatmul.mubr.f32.gmra.mrb[4].mxu0 %v4898_v47  ;;  %7524 = vmatprep.mubr.f32.mxu1 %v10739_v19  ;;  %v3717_v47 = vld [vmem:[#allocation8 + $0x1f8] sm:$0xff] }
 0x3ce   : > { %7921 = vmatprep.mubr.f32.mxu0 %v4899_v9  ;;  %8151 = vmatpush3.bf16.msra.mxu1 %v8148_v7  ;;  %v10751_v7 = vld [vmem:[#allocation2 + $0x62] sm:$0xff]  ;;  %v5244_v9 = vld [vmem:[#allocation8 + $0x460] sm:$0xff]  ;;  %v8164_v24 = vpack.c.bf16 %v3717_v47, %v3716_v4  ;;  %v10777_v4 = vld [vmem:[#allocation2 + $0x92] sm:$0xff] }
 0x3cf   : > { %8307 = vmatpush3.bf16.msra.mxu0 %v8304_v14  ;;  %8153 = vmatprep.subr.bf16.mxu1 %v8152_v63  ;;  %v4903_v14 = vld [vmem:[#allocation2 + $0x71] sm:$0xff]  ;;  %v8320_v46 = vpack.c.bf16 %v5245_v39, %v5244_v9  ;;  %v10783_v47 = vld [vmem:[#allocation2 + $0x9a] sm:$0xff]  ;;  %v10785_v9 = vld [vmem:[#allocation2 + $0xa9] sm:$0xff] }
 0x3d0   : > { %8309 = vmatprep.subr.bf16.mxu0 %v8308_v55  ;;  %7525 = vmatmul.mubr.f32.gmra.mrb[8].mxu1 %v10743_v5  ;;  %v10789_v39 = vld [vmem:[#allocation2 + $0xa2] sm:$0xff] }
 0x3d1   : > { %7922 = vmatmul.mubr.f32.gmra.mrb[6].mxu0 %v4900_v10  ;;  %7527 = vmatprep.mubr.f32.mxu1 %v10745_v35  ;;  %v4905_v10 = vld [vmem:[#allocation2 + $0x81] sm:$0xff] }
 0x3d2   : > { %7924 = vmatprep.mubr.f32.mxu0 %v4901_v43  ;;  %8155 = vmatpush3.bf16.msra.mxu1 %v8152_v63  ;;  %v10755_v63 = vld [vmem:[#allocation2 + $0x6a] sm:$0xff] }
 0x3d3   : > { %8311 = vmatpush3.bf16.msra.mxu0 %v8308_v55  ;;  %8157 = vmatprep.subr.bf16.mxu1 %v8156_v21  ;;  %v4904_v55 = vld [vmem:[#allocation2 + $0x79] sm:$0xff]  ;;  %v5246_v43 = vld [vmem:[#allocation8 + $0x470] sm:$0xff] }
 0x3d4   : > { %8313 = vmatprep.subr.bf16.mxu0 %v8312_v48  ;;  %7528 = vmatmul.mubr.f32.gmra.mrb[10].mxu1 %v10749_v61  ;;  %v8324_v17 = vpack.c.bf16 %v5247_v0, %v5246_v43  ;;  %v10805_v43 = vld [vmem:[#allocation2 + $0xba] sm:$0xff] }
 0x3d5   : > { %7925 = vmatmul.mubr.f32.gmra.mrb[8].mxu0 %v4902_v13  ;;  %7530 = vmatprep.mubr.f32.mxu1 %v10751_v7  ;;  %v10770_v13 = vld [vmem:[#allocation2 + $0x8a] sm:$0xff] }
 0x3d6   : > { %7927 = vmatprep.mubr.f32.mxu0 %v4903_v14  ;;  %8159 = vmatpush3.bf16.msra.mxu1 %v8156_v21  ;;  %v10761_v21 = vld [vmem:[#allocation2 + $0x7a] sm:$0xff] }
 0x3d7   : > { %8315 = vmatpush3.bf16.msra.mxu0 %v8312_v48  ;;  %8161 = vmatprep.subr.bf16.mxu1 %v8160_v11  ;;  %v4906_v48 = vld [vmem:[#allocation2 + $0x89] sm:$0xff]  ;;  %v10772_v14 = vld [vmem:[#allocation2 + $0x99] sm:$0xff] }
 0x3d8   : > { %8317 = vmatprep.subr.bf16.mxu0 %v8316_v2  ;;  %7531 = vmatmul.mubr.f32.gmra.mrb[12].mxu1 %v10755_v63 }
 0x3d9   : > { %7928 = vmatmul.mubr.f32.gmra.mrb[10].mxu0 %v4904_v55  ;;  %7533 = vmatprep.mubr.f32.mxu1 %v10757_v49  ;;  %v10791_v55 = vld [vmem:[#allocation2 + $0xb1] sm:$0xff] }
 0x3da   : > { %7930 = vmatprep.mubr.f32.mxu0 %v4905_v10  ;;  %8163 = vmatpush3.bf16.msra.mxu1 %v8160_v11  ;;  %v11618_v11 = vld [vmem:[#allocation44_spill] sm:$0xff] }
 0x3db   : > { %8319 = vmatpush3.bf16.msra.mxu0 %v8316_v2  ;;  %8165 = vmatprep.subr.bf16.mxu1 %v8164_v24  ;;  %v10779_v2 = vld [vmem:[#allocation2 + $0xa1] sm:$0xff]  ;;  %v10801_v10 = vld [vmem:[#allocation2 + $0xb2] sm:$0xff] }
 0x3dc   : > { %8321 = vmatprep.subr.bf16.mxu0 %v8320_v46  ;;  %7534 = vmatmul.mubr.f32.gmra.mrb[14].mxu1 %v10761_v21 }
 0x3dd   : > { %7931 = vmatmul.mubr.f32.gmra.mrb[12].mxu0 %v4906_v48  ;;  %7536 = vmatprep.mubr.f32.mxu1 %v10764_v27 }
 0x3de   : > { %7933 = vmatprep.mubr.f32.mxu0 %v10766_v6  ;;  %8167 = vmatpush3.bf16.msra.mxu1 %v8164_v24  ;;  %v10795_v24 = vld [vmem:[#allocation2 + $0xaa] sm:$0xff] }
 0x3df   : > { %8323 = vmatpush3.bf16.msra.mxu0 %v8320_v46  ;;  %8328 = vmatprep.subr.bf16.mxu1 %v11618_v11  ;;  %v10797_v46 = vld [vmem:[#allocation2 + $0xb9] sm:$0xff] }
 0x3e0   : > { %8325 = vmatprep.subr.bf16.mxu0 %v8324_v17  ;;  %7537 = vmatmul.mubr.f32.gmra.mrb[16].mxu1 %v10770_v13 }
 0x3e1   : > { %7934 = vmatmul.mubr.f32.gmra.mrb[14].mxu0 %v10772_v14  ;;  %7539 = vmatprep.mubr.f32.mxu1 %v10777_v4 }
 0x3e2   : > { %7936 = vmatprep.mubr.f32.mxu0 %v10779_v2 }
 0x3e3   : > { %8327 = vmatpush3.bf16.msra.mxu0 %v8324_v17  ;;  %v10891_v17 = vld [vmem:[#allocation9] ss:$0 sm:$0xff] }
 0x3e4   : > { %7540 = vmatmul.mubr.f32.gmra.mrb[18].mxu1 %v10783_v47 }
 0x3e5   : > { %7937 = vmatmul.mubr.f32.gmra.mrb[16].mxu0 %v10785_v9  ;;  %7542 = vmatprep.mubr.f32.mxu1 %v10789_v39 }
 0x3e6   : > { %7939 = vmatprep.mubr.f32.mxu0 %v10791_v55 }
 0x3e8   : > { %7543 = vmatmul.mubr.f32.gmra.mrb[20].mxu1 %v10795_v24 }
 0x3e9   : > { %7940 = vmatmul.mubr.f32.gmra.mrb[18].mxu0 %v10797_v46  ;;  %7545 = vmatprep.mubr.f32.mxu1 %v10801_v10 }
 0x3ea   : > { %7942 = vmatprep.mubr.f32.mxu0 %v10534_v12  ;;  %v10819_v12 = vld [vmem:[#allocation2 + $0x101] sm:$0xff] }
 0x3ec   : > { %7546 = vmatmul.mubr.f32.gmra.mrb[22].mxu1 %v10805_v43 }
 0x3ed   : > { %7943 = vmatmul.mubr.f32.gmra.mrb[20].mxu0 %v10541_v30  ;;  %7548 = vmatprep.mubr.f32.mxu1 %v10536_v56  ;;  %v10825_v56 = vld [vmem:[#allocation2 + $0x109] sm:$0xff]  ;;  %v4923_v30 = vld [vmem:[#allocation2 + $0x111] sm:$0xff] }
 0x3ee   : > { %7945 = vmatprep.mubr.f32.mxu0 %v10574_v52  ;;  %v11619_v52 = vld [vmem:[#allocation45_spill] sm:$0xff] }
 0x3f0   : > { %7549 = vmatmul.mubr.f32.gmra.mrb[24].mxu1 %v10543_v42  ;;  %v4924_v42 = vld [vmem:[#allocation2 + $0x119] sm:$0xff] }
 0x3f1   : > { %7946 = vmatmul.mubr.f32.gmra.mrb[22].mxu0 %v10582_v45  ;;  %7551 = vmatprep.mubr.f32.mxu1 %v10576_v28  ;;  %v11620_v28 = vld [vmem:[#allocation46_spill] sm:$0xff]  ;;  %v11621_v45 = vld [vmem:[#allocation47_spill] sm:$0xff] }
 0x3f2   : > { %7948 = vmatprep.mubr.f32.mxu0 %v10600_v29  ;;  %v11623_v29 = vld [vmem:[#allocation53_spill] sm:$0xff] }
 0x3f4   : > { %7552 = vmatmul.mubr.f32.gmra.mrb[26].mxu1 %v10584_v25  ;;  %v11622_v25 = vld [vmem:[#allocation50_spill] sm:$0xff] }
 0x3f5   : > { %7949 = vmatmul.mubr.f32.gmra.mrb[24].mxu0 %v10604_v18  ;;  %7554 = vmatprep.mubr.f32.mxu1 %v10602_v15  ;;  %v11624_v15 = vld [vmem:[#allocation56_spill] sm:$0xff]  ;;  %v11625_v18 = vld [vmem:[#allocation59_spill] sm:$0xff] }
 0x3f6   : > { %7951 = vmatprep.mubr.f32.mxu0 %v10612_v57  ;;  %v3687_v57 = vld [vmem:[#allocation2 + $0xa0] sm:$0xff] }
 0x3f8   : > { %7555 = vmatmul.mubr.f32.gmra.mrb[28].mxu1 %v10608_v34  ;;  %v3686_v34 = vld [vmem:[#allocation2 + $0x98] sm:$0xff] }
 0x3f9   : > { %7952 = vmatmul.mubr.f32.gmra.mrb[26].mxu0 %v10616_v16  ;;  %7557 = vmatprep.mubr.f32.mxu1 %v10614_v41  ;;  %v3688_v41 = vld [vmem:[#allocation2 + $0xa8] sm:$0xff]  ;;  %v3689_v16 = vld [vmem:[#allocation2 + $0xb0] sm:$0xff] }
 0x3fa   : > { %7954 = vmatprep.mubr.f32.mxu0 %v10819_v12 }
 0x3fc   : > { %7558 = vmatmul.mubr.f32.gmra.mrb[30].mxu1 %v10620_v44  ;;  %v3690_v44 = vld [vmem:[#allocation2 + $0xb8] sm:$0xff] }
 0x3fd   : > { %7955 = vmatmul.mubr.f32.gmra.mrb[28].mxu0 %v10825_v56  ;;  %7592 = vmatprep.mubr.f32.mxu1 %v10624_v40  ;;  %v3691_v40 = vld [vmem:[#allocation2 + $0xc0] sm:$0xff] }
 0x3fe   : > { %7957 = vmatprep.mubr.f32.mxu0 %v4923_v30  ;;  %v6516_v30 = vld [vmem:[#allocation11 + $0x808] sm:$0xff] }
 0x400   : > { %7593 = vmatmul.mubr.f32.vlgmr.msra.gmra.mrb[0].mxu1 %v10631_v22  ;;  %v3692_v22 = vld [vmem:[#allocation2 + $0xc8] sm:$0xff] }
 0x401   : > { %7958 = vmatmul.mubr.f32.gmra.mrb[30].mxu0 %v4924_v42  ;;  %8336 = vmatpush3.bf16.msra.mxu1 %v11618_v11  ;;  %v6625_v42 = vld [vmem:[#allocation11 + $0x908] sm:$0xff] }
 0x402   : > { %7595 = vmatprep.mubr.f32.mxu1 %v10628_v53  ;;  %7992 = vmatprep.mubr.f32.mxu0 %v10727_v33  ;;  %v5219_v53 = vld [vmem:[#allocation2 + $0xc2] sm:$0xff]  ;;  %v5228_v33 = vld [vmem:[#allocation2 + $0x10a] sm:$0xff] }
 0x403   : > { %8329 = vmatprep.subr.bf16.mxu1 %v11619_v52 }
 0x404   : > { %7596 = vmatmul.mubr.f32.gmra.mrb[2].mxu1 %v10633_v58  ;;  %v5220_v58 = vld [vmem:[#allocation2 + $0xca] sm:$0xff] }
 0x405   : > { %7993 = vmatmul.mubr.f32.vlgmr.msra.gmra.mrb[0].mxu0 %v10730_v60  ;;  %7598 = vmatprep.mubr.f32.mxu1 %v10635_v3  ;;  %v3693_v3 = vld [vmem:[#allocation2 + $0xd0] sm:$0xff] }
 0x406   : > { %7995 = vmatprep.mubr.f32.mxu0 %v10732_v54  ;;  %8337 = vmatpush3.bf16.msra.mxu1 %v11619_v52  ;;  %v5229_v60 = vld [vmem:[#allocation2 + $0x112] sm:$0xff]  ;;  %v5230_v54 = vld [vmem:[#allocation2 + $0x11a] sm:$0xff] }
 0x407   : > { %8330 = vmatprep.subr.bf16.mxu1 %v11620_v28 }
 0x408   : > { %7599 = vmatmul.mubr.f32.gmra.mrb[4].mxu1 %v10642_v50  ;;  %v5221_v50 = vld [vmem:[#allocation2 + $0xd2] sm:$0xff] }
 0x409   : > { %7996 = vmatmul.mubr.f32.gmra.mrb[2].mxu0 %v10737_v59  ;;  %7601 = vmatprep.mubr.f32.mxu1 %v10644_v62  ;;  %v3694_v62 = vld [vmem:[#allocation2 + $0xd8] sm:$0xff]  ;;  %v3997_v59 = vld [vmem:[#allocation2 + $0xc1] sm:$0xff] }
 0x40a   : > { %7998 = vmatprep.mubr.f32.mxu0 %v10739_v19  ;;  %8338 = vmatpush3.bf16.msra.mxu1 %v11620_v28  ;;  %v3998_v19 = vld [vmem:[#allocation2 + $0xc9] sm:$0xff] }
 0x40b   : > { %8331 = vmatprep.subr.bf16.mxu1 %v11621_v45 }
 0x40c   : > { %7602 = vmatmul.mubr.f32.gmra.mrb[6].mxu1 %v10650_v38  ;;  %v5222_v38 = vld [vmem:[#allocation2 + $0xda] sm:$0xff] }
 0x40d   : > { %7999 = vmatmul.mubr.f32.gmra.mrb[4].mxu0 %v10743_v5  ;;  %7604 = vmatprep.mubr.f32.mxu1 %v10652_v51  ;;  %v3695_v51 = vld [vmem:[#allocation2 + $0xe0] sm:$0xff] }
 0x40e   : > { %8001 = vmatprep.mubr.f32.mxu0 %v10745_v35  ;;  %8339 = vmatpush3.bf16.msra.mxu1 %v11621_v45  ;;  %v4000_v5 = vld [vmem:[#allocation2 + $0xd9] sm:$0xff]  ;;  %v4001_v35 = vld [vmem:[#allocation2 + $0xe1] sm:$0xff] }
 0x40f   : > { %8332 = vmatprep.subr.bf16.mxu1 %v11622_v25 }
 0x410   : > { %7605 = vmatmul.mubr.f32.gmra.mrb[8].mxu1 %v10658_v8  ;;  %v5223_v8 = vld [vmem:[#allocation2 + $0xe2] sm:$0xff] }
 0x411   : > { %8002 = vmatmul.mubr.f32.gmra.mrb[6].mxu0 %v10749_v61  ;;  %7607 = vmatprep.mubr.f32.mxu1 %v10660_v32  ;;  %v3696_v32 = vld [vmem:[#allocation2 + $0xe8] sm:$0xff] }
 0x412   : > { %8004 = vmatprep.mubr.f32.mxu0 %v10751_v7  ;;  %8340 = vmatpush3.bf16.msra.mxu1 %v11622_v25  ;;  %v4002_v61 = vld [vmem:[#allocation2 + $0xe9] sm:$0xff]  ;;  %v4003_v7 = vld [vmem:[#allocation2 + $0xf1] sm:$0xff] }
 0x413   : > { %8333 = vmatprep.subr.bf16.mxu1 %v11623_v29 }
 0x414   : > { %7608 = vmatmul.mubr.f32.gmra.mrb[10].mxu1 %v10666_v20  ;;  %v5224_v20 = vld [vmem:[#allocation2 + $0xea] sm:$0xff] }
 0x415   : > { %8005 = vmatmul.mubr.f32.gmra.mrb[8].mxu0 %v10755_v63  ;;  %7610 = vmatprep.mubr.f32.mxu1 %v10668_v1  ;;  %v3697_v1 = vld [vmem:[#allocation2 + $0xf0] sm:$0xff]  ;;  %v4004_v63 = vld [vmem:[#allocation2 + $0xf9] sm:$0xff] }
 0x416   : > { %8007 = vmatprep.mubr.f32.mxu0 %v10757_v49  ;;  %8341 = vmatpush3.bf16.msra.mxu1 %v11623_v29  ;;  %v5643_v29 = vld [vmem:[#allocation11] sm:$0xff] }
 0x417   : > { %8334 = vmatprep.subr.bf16.mxu1 %v11624_v15 }
 0x418   : > { %7611 = vmatmul.mubr.f32.gmra.mrb[12].mxu1 %v10674_v37  ;;  %v5225_v37 = vld [vmem:[#allocation2 + $0xf2] sm:$0xff] }
 0x419   : > { %8008 = vmatmul.mubr.f32.gmra.mrb[10].mxu0 %v10761_v21  ;;  %7613 = vmatprep.mubr.f32.mxu1 %v10676_v36  ;;  %v5227_v36 = vld [vmem:[#allocation2 + $0x102] sm:$0xff] }
 0x41a   : > { %8010 = vmatprep.mubr.f32.mxu0 %v10764_v27  ;;  %8342 = vmatpush3.bf16.msra.mxu1 %v11624_v15  ;;  %v5752_v15 = vld [vmem:[#allocation11 + $0x100] sm:$0xff] }
 0x41b   : > { %8335 = vmatprep.subr.bf16.mxu1 %v11625_v18 }
 0x41c   : > { %7614 = vmatmul.mubr.f32.gmra.mrb[14].mxu1 %v10682_v26  ;;  %v3698_v26 = vld [vmem:[#allocation2 + $0xf8] sm:$0xff] }
 0x41d   : > { %8011 = vmatmul.mubr.f32.gmra.mrb[12].mxu0 %v10770_v13  ;;  %7616 = vmatprep.mubr.f32.mxu1 %v10686_v31  ;;  %v5226_v31 = vld [vmem:[#allocation2 + $0xfa] sm:$0xff] }
 0x41e   : > { %8013 = vmatprep.mubr.f32.mxu0 %v10777_v4  ;;  %8343 = vmatpush3.bf16.msra.mxu1 %v11625_v18  ;;  %v5861_v18 = vld [vmem:[#allocation11 + $0x200] sm:$0xff] }
 0x420   : > { %7617 = vmatmul.mubr.f32.gmra.mrb[16].mxu1 %v3686_v34 }
 0x421   : > { %8014 = vmatmul.mubr.f32.gmra.mrb[14].mxu0 %v10783_v47  ;;  %7619 = vmatprep.mubr.f32.mxu1 %v3687_v57  ;;  %v5862_v47 = vld [vmem:[#allocation11 + $0x208] sm:$0xff] }
 0x422   : > { %8016 = vmatprep.mubr.f32.mxu0 %v10789_v39  ;;  %v6080_v39 = vld [vmem:[#allocation11 + $0x408] sm:$0xff] }
 0x424   : > { %7620 = vmatmul.mubr.f32.gmra.mrb[18].mxu1 %v3688_v41 }
 0x425   : > { %8017 = vmatmul.mubr.f32.gmra.mrb[16].mxu0 %v10795_v24  ;;  %7622 = vmatprep.mubr.f32.mxu1 %v3689_v16  ;;  %v6298_v24 = vld [vmem:[#allocation11 + $0x608] sm:$0xff] }
 0x426   : > { %8019 = vmatprep.mubr.f32.mxu0 %v10801_v10 }
 0x428   : > { %7623 = vmatmul.mubr.f32.gmra.mrb[20].mxu1 %v3690_v44 }
 0x429   : > { %8020 = vmatmul.mubr.f32.gmra.mrb[18].mxu0 %v10805_v43  ;;  %7625 = vmatprep.mubr.f32.mxu1 %v3691_v40  ;;  %v5970_v40 = vld [vmem:[#allocation11 + $0x300] sm:$0xff] }
 0x42a   : > { %8022 = vmatprep.mubr.f32.mxu0 %v5219_v53  ;;  %v6079_v53 = vld [vmem:[#allocation11 + $0x400] sm:$0xff] }
 0x42c   : > { %7626 = vmatmul.mubr.f32.gmra.mrb[22].mxu1 %v3692_v22  ;;  %v6188_v22 = vld [vmem:[#allocation11 + $0x500] sm:$0xff] }
 0x42d   : > { %8023 = vmatmul.mubr.f32.gmra.mrb[20].mxu0 %v5220_v58  ;;  %7628 = vmatprep.mubr.f32.mxu1 %v3693_v3 }
 0x42e   : > { %8025 = vmatprep.mubr.f32.mxu0 %v5221_v50 }
 0x430   : > { %7629 = vmatmul.mubr.f32.gmra.mrb[24].mxu1 %v3694_v62 }
 0x431   : > { %8026 = vmatmul.mubr.f32.gmra.mrb[22].mxu0 %v5222_v38  ;;  %7631 = vmatprep.mubr.f32.mxu1 %v3695_v51  ;;  %v6297_v38 = vld [vmem:[#allocation11 + $0x600] sm:$0xff] }
 0x432   : > { %8028 = vmatprep.mubr.f32.mxu0 %v5223_v8  ;;  %v6406_v51 = vld [vmem:[#allocation11 + $0x700] sm:$0xff] }
 0x434   : > { %7632 = vmatmul.mubr.f32.gmra.mrb[26].mxu1 %v3696_v32 }
 0x435   : > { %8029 = vmatmul.mubr.f32.gmra.mrb[24].mxu0 %v5224_v20  ;;  %7634 = vmatprep.mubr.f32.mxu1 %v3697_v1 }
 0x436   : > { %8031 = vmatprep.mubr.f32.mxu0 %v5225_v37 }
 0x438   : > { %7635 = vmatmul.mubr.f32.gmra.mrb[28].mxu1 %v3698_v26 }
 0x439   : > { %8032 = vmatmul.mubr.f32.gmra.mrb[26].mxu0 %v5226_v31  ;;  %7637 = vmatprep.mubr.f32.mxu1 %v10720_v23 }
 0x43a   : > { %8034 = vmatprep.mubr.f32.mxu0 %v5227_v36 }
 0x43c   : > { %7638 = vmatmul.mubr.f32.gmra.mrb[30].mxu1 %v10720_v23  ;;  %v3999_v23 = vld [vmem:[#allocation2 + $0xd1] sm:$0xff] }
 0x43d   : > { %8035 = vmatmul.mubr.f32.gmra.mrb[28].mxu0 %v5228_v33  ;;  %7696 = vmatprep.mubr.f32.mxu1 %v10766_v6 }
 0x43e   : > { %8037 = vmatprep.mubr.f32.mxu0 %v5229_v60 }
 0x440   : > { %7697 = vmatmul.mubr.f32.vlgmr.msra.gmra.mrb[16].mxu1 %v10772_v14  ;;  %v5644_v14 = vld [vmem:[#allocation11 + $0x8] sm:$0xff] }
 0x441   : > { %8038 = vmatmul.mubr.f32.gmra.mrb[30].mxu0 %v5230_v54  ;;  %7699 = vmatprep.mubr.f32.mxu1 %v10779_v2  ;;  %v5753_v2 = vld [vmem:[#allocation11 + $0x108] sm:$0xff] }
 0x444   : > { %7700 = vmatmul.mubr.f32.gmra.mrb[18].mxu1 %v10785_v9  ;;  %v5971_v9 = vld [vmem:[#allocation11 + $0x308] sm:$0xff] }
 0x445   : > { %7702 = vmatprep.mubr.f32.mxu1 %v10791_v55  ;;  %v6189_v55 = vld [vmem:[#allocation11 + $0x508] sm:$0xff] }
 0x448   : > { %7703 = vmatmul.mubr.f32.gmra.mrb[20].mxu1 %v10797_v46 }
 0x449   : > { %7705 = vmatprep.mubr.f32.mxu1 %v3997_v59 }
 0x44c   : > { %7706 = vmatmul.mubr.f32.gmra.mrb[22].mxu1 %v3998_v19  ;;  %v6515_v19 = vld [vmem:[#allocation11 + $0x800] sm:$0xff] }
 0x44d   : > { %7708 = vmatprep.mubr.f32.mxu1 %v3999_v23  ;;  %v6624_v23 = vld [vmem:[#allocation11 + $0x900] sm:$0xff] }
 0x450   : > { %7709 = vmatmul.mubr.f32.gmra.mrb[24].mxu1 %v4000_v5 }
 0x451   : > { %7711 = vmatprep.mubr.f32.mxu1 %v4001_v35 }
 0x454   : > { %7712 = vmatmul.mubr.f32.gmra.mrb[26].mxu1 %v4002_v61 }
 0x455   : > { %7714 = vmatprep.mubr.f32.mxu1 %v4003_v7 }
 0x458   : > { %7715 = vmatmul.mubr.f32.gmra.mrb[28].mxu1 %v4004_v63 }
 0x459   : > { %7717 = vmatprep.mubr.f32.mxu1 %v10819_v12 }
 0x45c   : > { %7718 = vmatmul.mubr.f32.gmra.mrb[30].mxu1 %v10825_v56  ;;  %v6407_v56 = vld [vmem:[#allocation11 + $0x708] sm:$0xff] }
 0x4d3   : > { %v7594_v49 = vpop.f32.mrb[0].mxu1 }
 0x4d4   : > { %v3784_v0 = vpop.f32.mrb[1].mxu1 }
 0x4d7   : > { %v7597_v21 = vpop.f32.mrb[2].mxu1 }
 0x4d8   : > { %v7994_v48 = vpop.f32.mrb[0].mxu0  ;;  %v3794_v6 = vpop.f32.mrb[3].mxu1 }
 0x4d9   : > { %v8344_v27 = vadd.f32 %v7994_v48, %v7594_v49  ;;  %v5314_v13 = vpop.f32.mrb[1].mxu0 }
 0x4da   : > { %v8345_v11 = vadd.f32 %v5314_v13, %v3784_v0 }
 0x4db   : > { %v5513_v4 = vadd.f32 %v8344_v27, %v10891_v17  ;;  %v7600_v10 = vpop.f32.mrb[4].mxu1 }
 0x4dc   : > { %v5512_v46 = vadd.f32 %v8345_v11, %v10891_v17  ;;  %v7997_v43 = vpop.f32.mrb[2].mxu0  ;;  %v3804_v28 = vpop.f32.mrb[5].mxu1 }
 0x4dd   : > { %v5545_v12 = vmax.f32 %v5513_v4, 0.0  ;;  %v8346_v52 = vadd.f32 %v7997_v43, %v7597_v21  ;;  %v5324_v45 = vpop.f32.mrb[3].mxu0  ;;  %v5646_v43 = vld [vmem:[#allocation11 + $0x18] sm:$0xff] }
 0x4de   : > { %v5544_v25 = vmax.f32 %v5512_v46, 0.0  ;;  %v8347_v34 = vadd.f32 %v5324_v45, %v3794_v6  ;;  %v5864_v45 = vld [vmem:[#allocation11 + $0x218] sm:$0xff] }
 0x4df   : > { %v5676_v57 = vmul.f32 %v5644_v14, %v5545_v12  ;;  %v5785_v41 = vmul.f32 %v5753_v2, %v5545_v12  ;;  %v5894_v16 = vmul.f32 %v5862_v47, %v5545_v12  ;;  %v6003_v44 = vmul.f32 %v5971_v9, %v5545_v12  ;;  %v7603_v8 = vpop.f32.mrb[6].mxu1 }
 0x4e0   : > { %v6112_v58 = vmul.f32 %v6080_v39, %v5545_v12  ;;  %v6221_v3 = vmul.f32 %v6189_v55, %v5545_v12  ;;  %v6330_v50 = vmul.f32 %v6298_v24, %v5545_v12  ;;  %v6439_v62 = vmul.f32 %v6407_v56, %v5545_v12  ;;  %v8000_v32 = vpop.f32.mrb[4].mxu0  ;;  %v3814_v26 = vpop.f32.mrb[7].mxu1 }
 0x4e1   : > { %v6548_v20 = vmul.f32 %v6516_v30, %v5545_v12  ;;  %v6657_v1 = vmul.f32 %v6625_v42, %v5545_v12  ;;  %v5675_v37 = vmul.f32 %v5643_v29, %v5544_v25  ;;  %v5784_v36 = vmul.f32 %v5752_v15, %v5544_v25  ;;  %v5334_v31 = vpop.f32.mrb[5].mxu0  ;;  %v5755_v12 = vld [vmem:[#allocation11 + $0x118] sm:$0xff]  ;;  %v5645_v15 = vld [vmem:[#allocation11 + $0x10] sm:$0xff] }
 0x4e2   : > { %v5893_v33 = vmul.f32 %v5861_v18, %v5544_v25  ;;  %v6002_v60 = vmul.f32 %v5970_v40, %v5544_v25  ;;  %v6111_v54 = vmul.f32 %v6079_v53, %v5544_v25  ;;  %v6220_v59 = vmul.f32 %v6188_v22, %v5544_v25  ;;  %v5863_v18 = vld [vmem:[#allocation11 + $0x210] sm:$0xff] }
 0x4e3   : > { %v5707_v5 = vadd.f32 %v5676_v57, %v5675_v37  ;;  %v5816_v35 = vadd.f32 %v5785_v41, %v5784_v36  ;;  %v6329_v61 = vmul.f32 %v6297_v38, %v5544_v25  ;;  %v6438_v7 = vmul.f32 %v6406_v51, %v5544_v25  ;;  %v7606_v48 = vpop.f32.mrb[8].mxu1  ;;  %v6190_v40 = vld [vmem:[#allocation11 + $0x510] sm:$0xff] }
 0x4e4   : > { %v5925_v63 = vadd.f32 %v5894_v16, %v5893_v33  ;;  %v6034_v49 = vadd.f32 %v6003_v44, %v6002_v60  ;;  %v6143_v0 = vadd.f32 %v6112_v58, %v6111_v54  ;;  %v6252_v21 = vadd.f32 %v6221_v3, %v6220_v59  ;;  %v8003_v27 = vpop.f32.mrb[6].mxu0  ;;  %v10895_v4 = vpop.f32.mrb[9].mxu1  ;;  %v5972_v16 = vld [vmem:[#allocation11 + $0x310] sm:$0xff] }
 0x4e5   : > { %v6361_v6 = vadd.f32 %v6330_v50, %v6329_v61  ;;  %v6470_v13 = vadd.f32 %v6439_v62, %v6438_v7  ;;  %v6547_v14 = vmul.f32 %v6515_v19, %v5544_v25  ;;  %v6656_v11 = vmul.f32 %v6624_v23, %v5544_v25  ;;  %v5344_v2 = vpop.f32.mrb[7].mxu0  ;;  %v5973_v25 = vld [vmem:[#allocation11 + $0x318] sm:$0xff]  ;;  %v6081_v44 = vld [vmem:[#allocation11 + $0x410] sm:$0xff] }
 0x4e6   : > { %v5515_v47 = vadd.f32 %v8346_v52, %v10891_v17  ;;  %v5514_v9 = vadd.f32 %v8347_v34, %v10891_v17  ;;  %v10899_v39 = vadd.f32 %v8000_v32, %v7600_v10  ;;  %v8349_v55 = vadd.f32 %v5334_v31, %v3804_v28  ;;  %v5754_v28 = vld [vmem:[#allocation11 + $0x110] sm:$0xff] }
 0x4e7   : > { %v10901_v24 = vadd.f32 %v6548_v20, %v6547_v14  ;;  %v10903_v46 = vadd.f32 %v6657_v1, %v6656_v11  ;;  %v10905_v56 = vadd.f32 %v8003_v27, %v7603_v8  ;;  %v10907_v30 = vadd.f32 %v5344_v2, %v3814_v26  ;;  %v10911_v29 = vpop.f32.mrb[10].mxu1  ;;  %v6299_v58 = vld [vmem:[#allocation11 + $0x610] sm:$0xff]  ;;  %v6082_v11 = vld [vmem:[#allocation11 + $0x418] sm:$0xff] }
 0x4e8   : > { %v10909_v42 = vmax.f32 %v5515_v47, 0.0  ;;  %v5546_v52 = vmax.f32 %v5514_v9, 0.0  ;;  %v8006_v10 = vpop.f32.mrb[8].mxu0  ;;  %v10915_v57 = vpop.f32.mrb[11].mxu1  ;;  %v6408_v3 = vld [vmem:[#allocation11 + $0x710] sm:$0xff]  ;;  %v5516_v50 = vadd.f32 %v8349_v55, %v10891_v17  ;;  %v6191_v2 = vld [vmem:[#allocation11 + $0x518] sm:$0xff] }
 0x4e9   : > { %v10913_v34 = vadd.f32 %v8006_v10, %v7606_v48  ;;  %v10917_v41 = vpop.f32.mrb[9].mxu0  ;;  %v6517_v31 = vld [vmem:[#allocation11 + $0x810] sm:$0xff]  ;;  %v6409_v10 = vld [vmem:[#allocation11 + $0x718] sm:$0xff] }
 0x4ea   : > { %v5678_v53 = vmul.f32 %v5646_v43, %v10909_v42  ;;  %v5787_v22 = vmul.f32 %v5755_v12, %v10909_v42  ;;  %v5896_v62 = vmul.f32 %v5864_v45, %v10909_v42  ;;  %v6005_v38 = vmul.f32 %v5973_v25, %v10909_v42  ;;  %v6626_v33 = vld [vmem:[#allocation11 + $0x910] sm:$0xff]  ;;  %v6300_v25 = vld [vmem:[#allocation11 + $0x618] sm:$0xff] }
 0x4eb   : > { %v5677_v51 = vmul.f32 %v5645_v15, %v5546_v52  ;;  %v5786_v8 = vmul.f32 %v5754_v28, %v5546_v52  ;;  %v10924_v32 = vpop.f32.mrb[12].mxu1  ;;  %v5895_v1 = vmul.f32 %v5863_v18, %v5546_v52  ;;  %v6004_v37 = vmul.f32 %v5972_v16, %v5546_v52 }
 0x4ec   : > { %v10926_v20 = vpop.f32.mrb[10].mxu0  ;;  %v6113_v36 = vmul.f32 %v6081_v44, %v5546_v52  ;;  %v6222_v26 = vmul.f32 %v6190_v40, %v5546_v52  ;;  %v10928_v60 = vpop.f32.mrb[13].mxu1  ;;  %v6331_v23 = vmul.f32 %v6299_v58, %v5546_v52  ;;  %v6440_v61 = vmul.f32 %v6408_v3, %v5546_v52  ;;  %v5865_v44 = vld [vmem:[#allocation11 + $0x220] sm:$0xff] }
 0x4ed   : > { %v10930_v54 = vpop.f32.mrb[11].mxu0  ;;  %v5708_v59 = vadd.f32 %v5707_v5, %v5677_v51  ;;  %v5817_v19 = vadd.f32 %v5816_v35, %v5786_v8  ;;  %v5926_v7 = vadd.f32 %v5925_v63, %v5895_v1  ;;  %v6035_v48 = vadd.f32 %v6034_v49, %v6004_v37  ;;  %v6518_v5 = vld [vmem:[#allocation11 + $0x818] sm:$0xff]  ;;  %v5974_v40 = vld [vmem:[#allocation11 + $0x320] sm:$0xff] }
 0x4ee   : > { %v6144_v27 = vadd.f32 %v6143_v0, %v6113_v36  ;;  %v6253_v14 = vadd.f32 %v6252_v21, %v6222_v26  ;;  %v6362_v47 = vadd.f32 %v6361_v6, %v6331_v23  ;;  %v6471_v9 = vadd.f32 %v6470_v13, %v6440_v61  ;;  %v6627_v0 = vld [vmem:[#allocation11 + $0x918] sm:$0xff]  ;;  %v5647_v13 = vld [vmem:[#allocation11 + $0x20] sm:$0xff] }
 0x4ef   : > { %v6549_v55 = vmul.f32 %v6517_v31, %v5546_v52  ;;  %v6658_v43 = vmul.f32 %v6626_v33, %v5546_v52  ;;  %v10932_v12 = vpop.f32.mrb[14].mxu1  ;;  %v5548_v35 = vmax.f32 %v5516_v50, 0.0  ;;  %v5709_v15 = vadd.f32 %v5708_v59, %v5678_v53  ;;  %v5756_v52 = vld [vmem:[#allocation11 + $0x120] sm:$0xff] }
 0x4f0   : > { %v10934_v45 = vpop.f32.mrb[12].mxu0  ;;  %v5818_v28 = vadd.f32 %v5817_v19, %v5787_v22  ;;  %v10936_v63 = vpop.f32.mrb[15].mxu1  ;;  %v5927_v18 = vadd.f32 %v5926_v7, %v5896_v62  ;;  %v6036_v16 = vadd.f32 %v6035_v48, %v6005_v38  ;;  %v6083_v58 = vld [vmem:[#allocation11 + $0x420] sm:$0xff]  ;;  %v6114_v3 = vmul.f32 %v6082_v11, %v10909_v42 }
 0x4f1   : > { %v10938_v49 = vpop.f32.mrb[13].mxu0  ;;  %v6580_v21 = vadd.f32 %v10901_v24, %v6549_v55  ;;  %v6689_v6 = vadd.f32 %v10903_v46, %v6658_v43  ;;  %v6223_v53 = vmul.f32 %v6191_v2, %v10909_v42  ;;  %v6332_v22 = vmul.f32 %v6300_v25, %v10909_v42  ;;  %v6192_v51 = vld [vmem:[#allocation11 + $0x520] sm:$0xff] }
 0x4f2   : > { %v6441_v50 = vmul.f32 %v6409_v10, %v10909_v42  ;;  %v6550_v24 = vmul.f32 %v6518_v5, %v10909_v42  ;;  %v6659_v46 = vmul.f32 %v6627_v0, %v10909_v42  ;;  %v5679_v1 = vmul.f32 %v5647_v13, %v5548_v35  ;;  %v6301_v38 = vld [vmem:[#allocation11 + $0x620] sm:$0xff] }
 0x4f3   : > { %v5788_v62 = vmul.f32 %v5756_v52, %v5548_v35  ;;  %v5897_v36 = vmul.f32 %v5865_v44, %v5548_v35  ;;  %v6006_v26 = vmul.f32 %v5974_v40, %v5548_v35  ;;  %v6115_v31 = vmul.f32 %v6083_v58, %v5548_v35  ;;  %v6410_v59 = vld [vmem:[#allocation11 + $0x720] sm:$0xff] }
 0x4f4   : > { %v8015_v8 = vpop.f32.mrb[14].mxu0  ;;  %v6145_v33 = vadd.f32 %v6144_v27, %v6114_v3  ;;  %v10948_v19 = vadd.f32 %v5709_v15, %v5679_v1  ;;  %v6224_v61 = vmul.f32 %v6192_v51, %v5548_v35  ;;  %v6254_v7 = vadd.f32 %v6253_v14, %v6223_v53  ;;  %v6519_v48 = vld [vmem:[#allocation11 + $0x820] sm:$0xff] }
 0x4f5   : > { %v5384_v37 = vpop.f32.mrb[15].mxu0  ;;  %v5819_v23 = vadd.f32 %v5818_v28, %v5788_v62  ;;  %v6628_v11 = vld [vmem:[#allocation11 + $0x920] sm:$0xff]  ;;  %v10950_v2 = vadd.f32 %v5927_v18, %v5897_v36  ;;  %v10952_v55 = vadd.f32 %v6036_v16, %v6006_v26  ;;  %v6333_v43 = vmul.f32 %v6301_v38, %v5548_v35  ;;  %v5759_v36 = vld [vmem:[#allocation11 + $0x138] sm:$0xff] }
 0x4f6   : > { %v10954_v42 = vadd.f32 %v6145_v33, %v6115_v31  ;;  %v10958_v10 = vadd.f32 %v6254_v7, %v6224_v61  ;;  %v6363_v27 = vadd.f32 %v6362_v47, %v6332_v22  ;;  %v6442_v5 = vmul.f32 %v6410_v59, %v5548_v35  ;;  %v5757_v22 = vld [vmem:[#allocation11 + $0x128] sm:$0xff] }
 0x4f7   : > { %v6472_v15 = vadd.f32 %v6471_v9, %v6441_v50  ;;  %v6551_v28 = vmul.f32 %v6519_v48, %v5548_v35  ;;  %v6581_v14 = vadd.f32 %v6580_v21, %v6550_v24  ;;  %v6660_v13 = vmul.f32 %v6628_v11, %v5548_v35  ;;  %v5761_v59 = vld [vmem:[#allocation11 + $0x148] sm:$0xff]  ;;  %v5762_v11 = vld [vmem:[#allocation11 + $0x150] sm:$0xff] }
 0x4f8   : > { %v10956_v25 = vpop.f32.mrb[16].mxu0  ;;  %11626 = vst [vmem:[#allocation32_spill] sm:$0xff] %v10958_v10  ;;  %v6690_v52 = vadd.f32 %v6689_v6, %v6659_v46  ;;  %v5517_v18 = vadd.f32 %v10899_v39, %v10891_v17  ;;  %v10964_v16 = vadd.f32 %v6363_v27, %v6333_v43  ;;  %v5518_v47 = vadd.f32 %v10907_v30, %v10891_v17  ;;  %v5758_v30 = vld [vmem:[#allocation11 + $0x130] sm:$0xff]  ;;  %v5866_v48 = vld [vmem:[#allocation11 + $0x228] sm:$0xff] }
 0x4f9   : > { %v10960_v0 = vpop.f32.mrb[17].mxu0  ;;  %v10966_v44 = vadd.f32 %v6472_v15, %v6442_v5  ;;  %v10968_v40 = vadd.f32 %v6581_v14, %v6551_v28  ;;  %v8353_v9 = vadd.f32 %v10917_v41, %v10895_v4  ;;  %v5519_v35 = vadd.f32 %v10905_v56, %v10891_v17  ;;  %v6084_v27 = vld [vmem:[#allocation11 + $0x428] sm:$0xff]  ;;  %v5650_v5 = vld [vmem:[#allocation11 + $0x38] sm:$0xff]  ;;  %v6085_v28 = vld [vmem:[#allocation11 + $0x430] sm:$0xff] }
 0x4fa   : > { %v10970_v58 = vadd.f32 %v6690_v52, %v6660_v13  ;;  %v10982_v6 = vmax.f32 %v5517_v18, 0.0  ;;  %v10984_v3 = vmax.f32 %v5518_v47, 0.0  ;;  %v5521_v4 = vadd.f32 %v10913_v34, %v10891_v17  ;;  %v5867_v13 = vld [vmem:[#allocation11 + $0x230] sm:$0xff] }
 0x4fb   : > { %11627 = vst [vmem:[#allocation34_spill] sm:$0xff] %v10966_v44  ;;  %v10988_v50 = vmax.f32 %v5519_v35, 0.0  ;;  %v5520_v41 = vadd.f32 %v8353_v9, %v10891_v17  ;;  %v8354_v56 = vadd.f32 %v10926_v20, %v10911_v29  ;;  %v8355_v24 = vadd.f32 %v10930_v54, %v10915_v57  ;;  %v5651_v35 = vld [vmem:[#allocation11 + $0x40] sm:$0xff]  ;;  %v6412_v44 = vld [vmem:[#allocation11 + $0x730] sm:$0xff] }
 0x4fc   : > { %11628 = vst [vmem:[#allocation36_spill] sm:$0xff] %v10970_v58  ;;  %v10976_v21 = vpop.f32.mrb[18].mxu0  ;;  %11629 = vst [vmem:[#allocation35_spill] sm:$0xff] %v10984_v3  ;;  %v8356_v46 = vadd.f32 %v10934_v45, %v10924_v32  ;;  %v8357_v1 = vadd.f32 %v10938_v49, %v10928_v60  ;;  %v8358_v62 = vadd.f32 %v8015_v8, %v10932_v12  ;;  %v5760_v32 = vld [vmem:[#allocation11 + $0x140] sm:$0xff]  ;;  %v5648_v60 = vld [vmem:[#allocation11 + $0x28] sm:$0xff] }
 0x4fd   : > { %v10980_v39 = vpop.f32.mrb[19].mxu0  ;;  %v8359_v38 = vadd.f32 %v5384_v37, %v10936_v63  ;;  %v5789_v34 = vmul.f32 %v5757_v22, %v10982_v6  ;;  %v5790_v26 = vmul.f32 %v5758_v30, %v10984_v3  ;;  %v11007_v31 = vmax.f32 %v5520_v41, 0.0  ;;  %v5649_v45 = vld [vmem:[#allocation11 + $0x30] sm:$0xff] }
 0x4fe   : > { %v5522_v29 = vadd.f32 %v8355_v24, %v10891_v17  ;;  %v5791_v12 = vmul.f32 %v5759_v36, %v10988_v50  ;;  %v11015_v63 = vmax.f32 %v5521_v4, 0.0  ;;  %v5523_v49 = vadd.f32 %v8354_v56, %v10891_v17  ;;  %v5763_v36 = vld [vmem:[#allocation11 + $0x158] sm:$0xff] }
 0x4ff   : > { %v5820_v54 = vadd.f32 %v5819_v23, %v5789_v34  ;;  %v5524_v37 = vadd.f32 %v8357_v1, %v10891_v17  ;;  %v5792_v61 = vmul.f32 %v5760_v32, %v11007_v31  ;;  %v5680_v43 = vmul.f32 %v5648_v60, %v10982_v6  ;;  %v6086_v32 = vld [vmem:[#allocation11 + $0x438] sm:$0xff] }
 0x500   : > { %v10986_v53 = vpop.f32.mrb[20].mxu0  ;;  %v11018_v8 = vmax.f32 %v5522_v29, 0.0  ;;  %v5681_v15 = vmul.f32 %v5649_v45, %v10984_v3  ;;  %v11028_v52 = vmax.f32 %v5523_v49, 0.0  ;;  %v5525_v18 = vadd.f32 %v8356_v46, %v10891_v17  ;;  %v6302_v29 = vld [vmem:[#allocation11 + $0x628] sm:$0xff] }
 0x501   : > { %v10990_v51 = vpop.f32.mrb[21].mxu0  ;;  %v5821_v7 = vadd.f32 %v5820_v54, %v5790_v26  ;;  %v5526_v47 = vadd.f32 %v8359_v38, %v10891_v17  ;;  %v5793_v9 = vmul.f32 %v5761_v59, %v11015_v63  ;;  %v11033_v22 = vmax.f32 %v5524_v37, 0.0  ;;  %v5764_v26 = vld [vmem:[#allocation11 + $0x160] sm:$0xff] }
 0x502   : > { %v5794_v4 = vmul.f32 %v5762_v11, %v11018_v8  ;;  %v5711_v56 = vadd.f32 %v10948_v19, %v5680_v43  ;;  %v5898_v24 = vmul.f32 %v5866_v48, %v10982_v6  ;;  %v6116_v1 = vmul.f32 %v6084_v27, %v10982_v6  ;;  %v5868_v48 = vld [vmem:[#allocation11 + $0x238] sm:$0xff]  ;;  %v5765_v43 = vld [vmem:[#allocation11 + $0x168] sm:$0xff] }
 0x503   : > { %v5822_v14 = vadd.f32 %v5821_v7, %v5791_v12  ;;  %v5682_v46 = vmul.f32 %v5650_v5, %v10988_v50  ;;  %v6117_v38 = vmul.f32 %v6085_v28, %v10984_v3  ;;  %v5899_v54 = vmul.f32 %v5867_v13, %v10984_v3  ;;  %v5652_v12 = vld [vmem:[#allocation11 + $0x48] sm:$0xff] }
 0x504   : > { %v11010_v57 = vpop.f32.mrb[22].mxu0  ;;  %v5683_v19 = vmul.f32 %v5651_v35, %v11007_v31  ;;  %v5712_v45 = vadd.f32 %v5711_v56, %v5681_v15  ;;  %v11047_v49 = vmax.f32 %v5525_v18, 0.0  ;;  %v5527_v37 = vadd.f32 %v8358_v62, %v10891_v17  ;;  %v5766_v18 = vld [vmem:[#allocation11 + $0x170] sm:$0xff]  ;;  %v5655_v56 = vld [vmem:[#allocation11 + $0x60] sm:$0xff] }
 0x505   : > { %v11012_v20 = vpop.f32.mrb[23].mxu0  ;;  %v5823_v41 = vadd.f32 %v5822_v14, %v5792_v61  ;;  %v11050_v59 = vmax.f32 %v5526_v47, 0.0  ;;  %v5653_v61 = vld [vmem:[#allocation11 + $0x50] sm:$0xff]  ;;  %v6147_v7 = vadd.f32 %v10954_v42, %v6116_v1  ;;  %v5795_v27 = vmul.f32 %v5763_v36, %v11028_v52 }
 0x506   : > { %v5796_v5 = vmul.f32 %v5764_v26, %v11033_v22  ;;  %v5713_v14 = vadd.f32 %v5712_v45, %v5682_v46  ;;  %v6334_v15 = vmul.f32 %v6302_v29, %v10982_v6  ;;  %v6118_v13 = vmul.f32 %v6086_v32, %v10988_v50 }
 0x507   : > { %v5824_v60 = vadd.f32 %v5823_v41, %v5793_v9  ;;  %v5684_v47 = vmul.f32 %v5652_v12, %v11015_v63  ;;  %v6148_v42 = vadd.f32 %v6147_v7, %v6117_v38  ;;  %v6303_v9 = vld [vmem:[#allocation11 + $0x630] sm:$0xff]  ;;  %v5654_v41 = vld [vmem:[#allocation11 + $0x58] sm:$0xff]  ;;  %v5685_v1 = vmul.f32 %v5653_v61, %v11018_v8 }
 0x508   : > { %v11021_v33 = vpop.f32.mrb[24].mxu0  ;;  %v5714_v36 = vadd.f32 %v5713_v14, %v5683_v19  ;;  %v5900_v46 = vmul.f32 %v5868_v48, %v10988_v50  ;;  %v11065_v26 = vmax.f32 %v5527_v37, 0.0  ;;  %v5797_v29 = vmul.f32 %v5765_v43, %v11047_v49  ;;  %v5767_v37 = vld [vmem:[#allocation11 + $0x178] sm:$0xff] }
 0x509   : > { %v11024_v23 = vpop.f32.mrb[25].mxu0  ;;  %v5825_v28 = vadd.f32 %v5824_v60, %v5794_v4  ;;  %v5929_v4 = vadd.f32 %v10950_v2, %v5898_v24  ;;  %v11068_v32 = vadd.f32 %v6148_v42, %v6118_v13  ;;  %v5798_v38 = vmul.f32 %v5766_v18, %v11050_v59  ;;  %v5656_v13 = vld [vmem:[#allocation11 + $0x68] sm:$0xff] }
 0x50a   : > { %v5715_v7 = vadd.f32 %v5714_v36, %v5684_v47  ;;  %v6335_v19 = vmul.f32 %v6303_v9, %v10984_v3  ;;  %v5686_v48 = vmul.f32 %v5654_v41, %v11028_v52  ;;  %v5687_v43 = vmul.f32 %v5655_v56, %v11033_v22  ;;  %v5657_v47 = vld [vmem:[#allocation11 + $0x70] sm:$0xff] }
 0x50b   : > { %v5826_v35 = vadd.f32 %v5825_v28, %v5795_v27  ;;  %v5930_v27 = vadd.f32 %v5929_v4, %v5899_v54 }
 0x50c   : > { %v11035_v30 = vpop.f32.mrb[26].mxu0  ;;  %v5716_v18 = vadd.f32 %v5715_v7, %v5685_v1  ;;  %v5768_v1 = vld [vmem:[#allocation11 + $0x180] sm:$0xff] }
 0x50d   : > { %v11043_v34 = vpop.f32.mrb[27].mxu0  ;;  %v5827_v45 = vadd.f32 %v5826_v35, %v5796_v5  ;;  %v11080_v5 = vadd.f32 %v5930_v27, %v5900_v46  ;;  %v5799_v35 = vmul.f32 %v5767_v37, %v11065_v26  ;;  %v5688_v46 = vmul.f32 %v5656_v13, %v11047_v49 }
 0x50e   : > { %v5717_v36 = vadd.f32 %v5716_v18, %v5686_v48  ;;  %v5658_v48 = vld [vmem:[#allocation11 + $0x78] sm:$0xff]  ;;  %v5770_v18 = vld [vmem:[#allocation11 + $0x190] sm:$0xff] }
 0x50f   : > { %v5828_v14 = vadd.f32 %v5827_v45, %v5797_v29  ;;  %v5689_v45 = vmul.f32 %v5657_v47, %v11050_v59 }
 0x510   : > { %v11053_v11 = vpop.f32.mrb[28].mxu0  ;;  %v5718_v7 = vadd.f32 %v5717_v36, %v5687_v43  ;;  %v5771_v36 = vld [vmem:[#allocation11 + $0x198] sm:$0xff] }
 0x511   : > { %v11059_v62 = vpop.f32.mrb[29].mxu0  ;;  %v5829_v41 = vadd.f32 %v5828_v14, %v5798_v38  ;;  %v6087_v38 = vld [vmem:[#allocation11 + $0x440] sm:$0xff] }
 0x512   : > { %v6119_v47 = vmul.f32 %v6087_v38, %v11007_v31 }
 0x513   : > { %v7698_v60 = vpop.f32.mrb[16].mxu1  ;;  %v5830_v37 = vadd.f32 %v5829_v41, %v5799_v35 }
 0x514   : > { %v11070_v12 = vpop.f32.mrb[30].mxu0  ;;  %v8360_v2 = vadd.f32 %v10956_v25, %v7698_v60  ;;  %v4170_v24 = vpop.f32.mrb[17].mxu1  ;;  %v6365_v25 = vadd.f32 %v10964_v16, %v6334_v15  ;;  %v5769_v15 = vld [vmem:[#allocation11 + $0x188] sm:$0xff] }
 0x515   : > { %v11075_v61 = vpop.f32.mrb[31].mxu0  ;;  %v8361_v28 = vadd.f32 %v10960_v0, %v4170_v24 }
 0x516   : > { %v5529_v54 = vadd.f32 %v8360_v2, %v10891_v17  ;;  %v11090_v29 = vadd.f32 %v6365_v25, %v6335_v19  ;;  %v5659_v19 = vld [vmem:[#allocation11 + $0x80] sm:$0xff] }
 0x517   : > { %v5528_v42 = vadd.f32 %v8361_v28, %v10891_v17  ;;  %v7701_v9 = vpop.f32.mrb[18].mxu1  ;;  %v5719_v28 = vadd.f32 %v5718_v7, %v5688_v46  ;;  %v5661_v7 = vld [vmem:[#allocation11 + $0x90] sm:$0xff] }
 0x518   : > { %v11086_v56 = vmax.f32 %v5529_v54, 0.0  ;;  %v8362_v0 = vadd.f32 %v10976_v21, %v7701_v9  ;;  %v4180_v4 = vpop.f32.mrb[19].mxu1  ;;  %v6088_v54 = vld [vmem:[#allocation11 + $0x448] sm:$0xff] }
 0x519   : > { %v11092_v60 = vmax.f32 %v5528_v42, 0.0  ;;  %v8363_v16 = vadd.f32 %v10980_v39, %v4180_v4  ;;  %v5720_v35 = vadd.f32 %v5719_v28, %v5689_v45  ;;  %v6120_v38 = vmul.f32 %v6088_v54, %v11015_v63  ;;  %v5773_v28 = vld [vmem:[#allocation11 + $0x1a8] sm:$0xff] }
 0x51a   : > { %v5531_v27 = vadd.f32 %v8362_v0, %v10891_v17  ;;  %v5801_v43 = vmul.f32 %v5769_v15, %v11086_v56  ;;  %v5690_v0 = vmul.f32 %v5658_v48, %v11065_v26  ;;  %v5660_v15 = vld [vmem:[#allocation11 + $0x88] sm:$0xff] }
 0x51b   : > { %v5530_v2 = vadd.f32 %v8363_v16, %v10891_v17  ;;  %v7704_v21 = vpop.f32.mrb[20].mxu1  ;;  %v5800_v24 = vmul.f32 %v5768_v1, %v11092_v60 }
 0x51c   : > { %v11099_v14 = vmax.f32 %v5531_v27, 0.0  ;;  %v8364_v39 = vadd.f32 %v10986_v53, %v7704_v21  ;;  %v4190_v13 = vpop.f32.mrb[21].mxu1  ;;  %v5691_v53 = vmul.f32 %v5659_v19, %v11092_v60  ;;  %v5721_v21 = vadd.f32 %v5720_v35, %v5690_v0  ;;  %v5662_v35 = vld [vmem:[#allocation11 + $0x98] sm:$0xff] }
 0x51d   : > { %v11104_v25 = vmax.f32 %v5530_v2, 0.0  ;;  %v8365_v42 = vadd.f32 %v10990_v51, %v4190_v13  ;;  %v5831_v9 = vadd.f32 %v5830_v37, %v5800_v24  ;;  %v5772_v2 = vld [vmem:[#allocation11 + $0x1a0] sm:$0xff]  ;;  %v6089_v24 = vld [vmem:[#allocation11 + $0x450] sm:$0xff]  ;;  %v6150_v37 = vadd.f32 %v11068_v32, %v6119_v47 }
 0x51e   : > { %v5533_v41 = vadd.f32 %v8364_v39, %v10891_v17  ;;  %v5803_v39 = vmul.f32 %v5771_v36, %v11099_v14  ;;  %v5722_v54 = vadd.f32 %v5721_v21, %v5691_v53  ;;  %v5775_v21 = vld [vmem:[#allocation11 + $0x1b8] sm:$0xff] }
 0x51f   : > { %v5532_v4 = vadd.f32 %v8365_v42, %v10891_v17  ;;  %v7707_v1 = vpop.f32.mrb[22].mxu1  ;;  %v5802_v46 = vmul.f32 %v5770_v18, %v11104_v25  ;;  %v5832_v16 = vadd.f32 %v5831_v9, %v5801_v43  ;;  %v5692_v43 = vmul.f32 %v5660_v15, %v11086_v56 }
 0x520   : > { %v11113_v51 = vmax.f32 %v5533_v41, 0.0  ;;  %v8366_v45 = vadd.f32 %v11010_v57, %v7707_v1  ;;  %v4200_v27 = vpop.f32.mrb[23].mxu1  ;;  %v5693_v57 = vmul.f32 %v5661_v7, %v11104_v25  ;;  %v5663_v41 = vld [vmem:[#allocation11 + $0xa0] sm:$0xff]  ;;  %v6151_v15 = vadd.f32 %v6150_v37, %v6120_v38 }
 0x521   : > { %v11117_v48 = vmax.f32 %v5532_v4, 0.0  ;;  %v8367_v19 = vadd.f32 %v11012_v20, %v4200_v27  ;;  %v5833_v13 = vadd.f32 %v5832_v16, %v5802_v46  ;;  %v6121_v20 = vmul.f32 %v6089_v24, %v11018_v8  ;;  %v5774_v4 = vld [vmem:[#allocation11 + $0x1b0] sm:$0xff]  ;;  %v6090_v16 = vld [vmem:[#allocation11 + $0x458] sm:$0xff] }
 0x522   : > { %v5535_v18 = vadd.f32 %v8366_v45, %v10891_v17  ;;  %v5805_v1 = vmul.f32 %v5773_v28, %v11113_v51  ;;  %v5723_v46 = vadd.f32 %v5722_v54, %v5692_v43  ;;  %v5694_v24 = vmul.f32 %v5662_v35, %v11099_v14 }
 0x523   : > { %v5534_v42 = vadd.f32 %v8367_v19, %v10891_v17  ;;  %v7710_v9 = vpop.f32.mrb[24].mxu1  ;;  %v5804_v32 = vmul.f32 %v5772_v2, %v11117_v48  ;;  %v5834_v47 = vadd.f32 %v5833_v13, %v5803_v39  ;;  %v5664_v13 = vld [vmem:[#allocation11 + $0xa8] sm:$0xff]  ;;  %v6122_v43 = vmul.f32 %v6090_v16, %v11028_v52 }
 0x524   : > { %v8368_v36 = vadd.f32 %v11021_v33, %v7710_v9  ;;  %v4210_v0 = vpop.f32.mrb[25].mxu1  ;;  %v11129_v53 = vmax.f32 %v5535_v18, 0.0  ;;  %v5695_v33 = vmul.f32 %v5663_v41, %v11117_v48  ;;  %v5724_v19 = vadd.f32 %v5723_v46, %v5693_v57  ;;  %v5665_v18 = vld [vmem:[#allocation11 + $0xb0] sm:$0xff]  ;;  %v5776_v9 = vld [vmem:[#allocation11 + $0x1c0] sm:$0xff] }
 0x525   : > { %v11131_v7 = vmax.f32 %v5534_v42, 0.0  ;;  %v8369_v45 = vadd.f32 %v11024_v23, %v4210_v0  ;;  %v5835_v27 = vadd.f32 %v5834_v47, %v5804_v32  ;;  %v6091_v47 = vld [vmem:[#allocation11 + $0x460] sm:$0xff]  ;;  %v6152_v35 = vadd.f32 %v6151_v15, %v6121_v20 }
 0x526   : > { %v5537_v2 = vadd.f32 %v8368_v36, %v10891_v17  ;;  %v5725_v32 = vadd.f32 %v5724_v19, %v5694_v24  ;;  %v5777_v36 = vld [vmem:[#allocation11 + $0x1c8] sm:$0xff]  ;;  %v5807_v0 = vmul.f32 %v5775_v21, %v11129_v53  ;;  %v5696_v46 = vmul.f32 %v5664_v13, %v11113_v51  ;;  %v5667_v24 = vld [vmem:[#allocation11 + $0xc0] sm:$0xff] }
 0x527   : > { %v5536_v28 = vadd.f32 %v8369_v45, %v10891_v17  ;;  %v7713_v39 = vpop.f32.mrb[26].mxu1  ;;  %v5806_v38 = vmul.f32 %v5774_v4, %v11131_v7  ;;  %v5836_v37 = vadd.f32 %v5835_v27, %v5805_v1  ;;  %v5697_v16 = vmul.f32 %v5665_v18, %v11131_v7 }
 0x528   : > { %v11140_v23 = vmax.f32 %v5537_v2, 0.0  ;;  %v8370_v54 = vadd.f32 %v11035_v30, %v7713_v39  ;;  %v4220_v42 = vpop.f32.mrb[27].mxu1  ;;  %v5726_v30 = vadd.f32 %v5725_v32, %v5695_v33  ;;  %v5666_v2 = vld [vmem:[#allocation11 + $0xb8] sm:$0xff] }
 0x529   : > { %v11143_v57 = vmax.f32 %v5536_v28, 0.0  ;;  %v8371_v41 = vadd.f32 %v11043_v34, %v4220_v42  ;;  %v5837_v4 = vadd.f32 %v5836_v37, %v5806_v38  ;;  %v6123_v34 = vmul.f32 %v6091_v47, %v11033_v22  ;;  %v5778_v28 = vld [vmem:[#allocation11 + $0x1d0] sm:$0xff] }
 0x52a   : > { %v5539_v1 = vadd.f32 %v8370_v54, %v10891_v17  ;;  %v5809_v39 = vmul.f32 %v5777_v36, %v11140_v23  ;;  %v5727_v38 = vadd.f32 %v5726_v30, %v5696_v46  ;;  %v6153_v37 = vadd.f32 %v6152_v35, %v6122_v43  ;;  %v5780_v30 = vld [vmem:[#allocation11 + $0x1e0] sm:$0xff] }
 0x52b   : > { %v5538_v45 = vadd.f32 %v8371_v41, %v10891_v17  ;;  %v7716_v27 = vpop.f32.mrb[28].mxu1  ;;  %v5808_v20 = vmul.f32 %v5776_v9, %v11143_v57  ;;  %v5838_v15 = vadd.f32 %v5837_v4, %v5807_v0  ;;  %v5779_v9 = vld [vmem:[#allocation11 + $0x1d8] sm:$0xff]  ;;  %v5698_v32 = vmul.f32 %v5666_v2, %v11129_v53  ;;  %v5668_v0 = vld [vmem:[#allocation11 + $0xc8] sm:$0xff]  ;;  %v5669_v4 = vld [vmem:[#allocation11 + $0xd0] sm:$0xff] }
 0x52c   : > { %v8372_v21 = vadd.f32 %v11053_v11, %v7716_v27  ;;  %v4230_v19 = vpop.f32.mrb[29].mxu1  ;;  %v11155_v13 = vmax.f32 %v5539_v1, 0.0  ;;  %v5699_v11 = vmul.f32 %v5667_v24, %v11143_v57  ;;  %v5728_v47 = vadd.f32 %v5727_v38, %v5697_v16  ;;  %v6092_v27 = vld [vmem:[#allocation11 + $0x468] sm:$0xff] }
 0x52d   : > { %v11157_v33 = vmax.f32 %v5538_v45, 0.0  ;;  %v8373_v18 = vadd.f32 %v11059_v62, %v4230_v19  ;;  %v5839_v54 = vadd.f32 %v5838_v15, %v5808_v20  ;;  %v6154_v20 = vadd.f32 %v6153_v37, %v6123_v34  ;;  %v5781_v2 = vld [vmem:[#allocation11 + $0x1e8] sm:$0xff]  ;;  %v6093_v19 = vld [vmem:[#allocation11 + $0x470] sm:$0xff] }
 0x52e   : > { %v5541_v42 = vadd.f32 %v8372_v21, %v10891_v17  ;;  %v5729_v45 = vadd.f32 %v5728_v47, %v5698_v32  ;;  %v5811_v24 = vmul.f32 %v5779_v9, %v11155_v13  ;;  %v5700_v38 = vmul.f32 %v5668_v0, %v11140_v23  ;;  %v5782_v9 = vld [vmem:[#allocation11 + $0x1f0] sm:$0xff]  ;;  %v6094_v0 = vld [vmem:[#allocation11 + $0x478] sm:$0xff] }
 0x52f   : > { %v5540_v41 = vadd.f32 %v8373_v18, %v10891_v17  ;;  %v7719_v36 = vpop.f32.mrb[30].mxu1  ;;  %v5810_v43 = vmul.f32 %v5778_v28, %v11157_v33  ;;  %v5840_v35 = vadd.f32 %v5839_v54, %v5809_v39  ;;  %v5869_v28 = vld [vmem:[#allocation11 + $0x240] sm:$0xff]  ;;  %v6124_v32 = vmul.f32 %v6092_v27, %v11047_v49 }
 0x530   : > { %v11165_v1 = vmax.f32 %v5541_v42, 0.0  ;;  %v8374_v62 = vadd.f32 %v11070_v12, %v7719_v36  ;;  %v4240_v46 = vpop.f32.mrb[31].mxu1  ;;  %v5701_v12 = vmul.f32 %v5669_v4, %v11157_v33  ;;  %v5730_v18 = vadd.f32 %v5729_v45, %v5699_v11  ;;  %v5670_v42 = vld [vmem:[#allocation11 + $0xd8] sm:$0xff]  ;;  %v6095_v4 = vld [vmem:[#allocation11 + $0x480] sm:$0xff] }
 0x531   : > { %v11168_v15 = vmax.f32 %v5540_v41, 0.0  ;;  %v8375_v16 = vadd.f32 %v11075_v61, %v4240_v46  ;;  %v5841_v21 = vadd.f32 %v5840_v35, %v5810_v43  ;;  %v5671_v61 = vld [vmem:[#allocation11 + $0xe0] sm:$0xff]  ;;  %v6125_v36 = vmul.f32 %v6093_v19, %v11050_v59  ;;  %v5783_v46 = vld [vmem:[#allocation11 + $0x1f8] sm:$0xff] }
 0x532   : > { %v5543_v39 = vadd.f32 %v8374_v62, %v10891_v17  ;;  %v5813_v47 = vmul.f32 %v5781_v2, %v11165_v1  ;;  %v5731_v41 = vadd.f32 %v5730_v18, %v5700_v38  ;;  %v5901_v43 = vmul.f32 %v5869_v28, %v11007_v31  ;;  %v5870_v18 = vld [vmem:[#allocation11 + $0x248] sm:$0xff] }
 0x533   : > { %v5542_v54 = vadd.f32 %v8375_v16, %v10891_v17  ;;  %v5812_v34 = vmul.f32 %v5780_v30, %v11168_v15  ;;  %v5842_v37 = vadd.f32 %v5841_v21, %v5811_v24  ;;  %v6155_v62 = vadd.f32 %v6154_v20, %v6124_v32  ;;  %v5672_v24 = vld [vmem:[#allocation11 + $0xe8] sm:$0xff]  ;;  %v5673_v21 = vld [vmem:[#allocation11 + $0xf0] sm:$0xff] }
 0x534   : > { %v11181_v35 = vmax.f32 %v5543_v39, 0.0  ;;  %v5702_v30 = vmul.f32 %v5670_v42, %v11155_v13  ;;  %v5703_v45 = vmul.f32 %v5671_v61, %v11168_v15  ;;  %v5732_v27 = vadd.f32 %v5731_v41, %v5701_v12  ;;  %v6097_v42 = vld [vmem:[#allocation11 + $0x490] sm:$0xff]  ;;  %v5975_v41 = vld [vmem:[#allocation11 + $0x328] sm:$0xff] }
 0x535   : > { %v11183_v11 = vmax.f32 %v5542_v54, 0.0  ;;  %v5843_v17 = vadd.f32 %v5842_v37, %v5812_v34  ;;  %v6126_v28 = vmul.f32 %v6094_v0, %v11065_v26  ;;  %v6127_v39 = vmul.f32 %v6095_v4, %v11092_v60  ;;  %v5871_v54 = vld [vmem:[#allocation11 + $0x250] sm:$0xff]  ;;  %v6096_v37 = vld [vmem:[#allocation11 + $0x488] sm:$0xff]  ;;  %v5674_v0 = vld [vmem:[#allocation11 + $0xf8] sm:$0xff] }
 0x536   : > { %v5733_v19 = vadd.f32 %v5732_v27, %v5702_v30  ;;  %v6156_v38 = vadd.f32 %v6155_v62, %v6125_v36  ;;  %v5815_v20 = vmul.f32 %v5783_v46, %v11181_v35  ;;  %v5932_v12 = vadd.f32 %v11080_v5, %v5901_v43  ;;  %v6193_v62 = vld [vmem:[#allocation11 + $0x528] sm:$0xff]  ;;  %v5872_v43 = vld [vmem:[#allocation11 + $0x258] sm:$0xff] }
 0x537   : > { %v5814_v16 = vmul.f32 %v5782_v9, %v11183_v11  ;;  %v5844_v2 = vadd.f32 %v5843_v17, %v5813_v47  ;;  %v5704_v61 = vmul.f32 %v5672_v24, %v11165_v1  ;;  %v5705_v32 = vmul.f32 %v5673_v21, %v11183_v11 }
 0x538   : > { %v5734_v9 = vadd.f32 %v5733_v19, %v5703_v45  ;;  %v6157_v47 = vadd.f32 %v6156_v38, %v6126_v28  ;;  %v5902_v36 = vmul.f32 %v5870_v18, %v11015_v63  ;;  %v5903_v4 = vmul.f32 %v5871_v54, %v11018_v8  ;;  %v6099_v45 = vld [vmem:[#allocation11 + $0x4a0] sm:$0xff]  ;;  %v6411_v19 = vld [vmem:[#allocation11 + $0x728] sm:$0xff] }
 0x539   : > { %v5845_v34 = vadd.f32 %v5844_v2, %v5814_v16  ;;  %v6128_v30 = vmul.f32 %v6096_v37, %v11086_v56  ;;  %v6129_v27 = vmul.f32 %v6097_v42, %v11104_v25  ;;  %v5873_v16 = vld [vmem:[#allocation11 + $0x260] sm:$0xff]  ;;  %v6098_v2 = vld [vmem:[#allocation11 + $0x498] sm:$0xff]  ;;  %v11199_v21 = vmul.f32 %v5975_v41, %v10982_v6  ;;  %v6520_v28 = vld [vmem:[#allocation11 + $0x828] sm:$0xff] }
 0x53a   : > { %v5735_v46 = vadd.f32 %v5734_v9, %v5704_v61  ;;  %v6158_v5 = vadd.f32 %v6157_v47, %v6127_v39  ;;  %v5933_v24 = vadd.f32 %v5932_v12, %v5902_v36  ;;  %v6629_v38 = vld [vmem:[#allocation11 + $0x928] sm:$0xff]  ;;  %v5706_v18 = vmul.f32 %v5674_v0, %v11181_v35  ;;  %v5977_v39 = vld [vmem:[#allocation11 + $0x338] sm:$0xff]  ;;  %v6305_v9 = vld [vmem:[#allocation11 + $0x640] sm:$0xff] }
 0x53b   : > { %v5846_v17 = vadd.f32 %v5845_v34, %v5815_v20  ;;  %v11203_v34 = vmul.f32 %v6193_v62, %v10982_v6  ;;  %v6304_v37 = vld [vmem:[#allocation11 + $0x638] sm:$0xff]  ;;  %v5904_v42 = vmul.f32 %v5872_v43, %v11028_v52  ;;  %v5905_v61 = vmul.f32 %v5873_v16, %v11033_v22  ;;  %v6101_v43 = vld [vmem:[#allocation11 + $0x4b0] sm:$0xff] }
 0x53c   : > { %v5736_v54 = vadd.f32 %v5735_v46, %v5705_v32  ;;  %v6159_v20 = vadd.f32 %v6158_v5, %v6128_v30  ;;  %v5934_v12 = vadd.f32 %v5933_v24, %v5903_v4  ;;  %v6195_v47 = vld [vmem:[#allocation11 + $0x538] sm:$0xff]  ;;  %v6131_v36 = vmul.f32 %v6099_v45, %v11117_v48  ;;  %v5874_v32 = vld [vmem:[#allocation11 + $0x268] sm:$0xff]  ;;  %v5875_v46 = vld [vmem:[#allocation11 + $0x270] sm:$0xff] }
 0x53d   : > { %5847 = vadd.xlane.f32.xlu1 %v5846_v17  ;;  %11630 = vst [vmem:[#allocation20_spill] sm:$0xff] %v11203_v34  ;;  %v6130_v17 = vmul.f32 %v6098_v2, %v11099_v14  ;;  %v11210_v62 = vmul.f32 %v6411_v19, %v10982_v6  ;;  %v11213_v30 = vmul.f32 %v6520_v28, %v10982_v6  ;;  %v6100_v4 = vld [vmem:[#allocation11 + $0x4a8] sm:$0xff]  ;;  %v6522_v45 = vld [vmem:[#allocation11 + $0x838] sm:$0xff] }
 0x53e   : > { %v5737_v41 = vadd.f32 %v5736_v54, %v5706_v18  ;;  %v6160_v0 = vadd.f32 %v6159_v20, %v6129_v27  ;;  %v11216_v5 = vmul.f32 %v6629_v38, %v10982_v6  ;;  %v5935_v16 = vadd.f32 %v5934_v12, %v5904_v42  ;;  %v6413_v27 = vld [vmem:[#allocation11 + $0x738] sm:$0xff]  ;;  %v6306_v42 = vld [vmem:[#allocation11 + $0x648] sm:$0xff]  ;;  %v5976_v12 = vld [vmem:[#allocation11 + $0x330] sm:$0xff] }
 0x53f   : > { %11631 = vst [vmem:[#allocation21_spill] sm:$0xff] %v11210_v62  ;;  %v11219_v24 = vmul.f32 %v5977_v39, %v10988_v50  ;;  %v6336_v2 = vmul.f32 %v6304_v37, %v10988_v50  ;;  %v6631_v18 = vld [vmem:[#allocation11 + $0x938] sm:$0xff]  ;;  %v6337_v54 = vmul.f32 %v6305_v9, %v11007_v31  ;;  %v11224_v28 = vmul.f32 %v6195_v47, %v10988_v50  ;;  %v6307_v39 = vld [vmem:[#allocation11 + $0x650] sm:$0xff] }
 0x540   : > { %11632 = vst [vmem:[#allocation37_spill] sm:$0xff] %v11216_v5  ;;  %5738 = vadd.xlane.f32.xlu0 %v5737_v41  ;;  %v6161_v19 = vadd.f32 %v6160_v0, %v6130_v17  ;;  %v5906_v6 = vmul.f32 %v5874_v32, %v11047_v49  ;;  %v5907_v38 = vmul.f32 %v5875_v46, %v11050_v59  ;;  %v5876_v41 = vld [vmem:[#allocation11 + $0x278] sm:$0xff]  ;;  %v5877_v17 = vld [vmem:[#allocation11 + $0x280] sm:$0xff] }
 0x541   : > { %11633 = vst [vmem:[#allocation22_spill] sm:$0xff] %v11224_v28  ;;  %v5936_v20 = vadd.f32 %v5935_v16, %v5905_v61  ;;  %v6132_v37 = vmul.f32 %v6100_v4, %v11113_v51  ;;  %v6133_v58 = vmul.f32 %v6101_v43, %v11131_v7  ;;  %v6367_v9 = vadd.f32 %v11090_v29, %v6336_v2  ;;  %v6102_v32 = vld [vmem:[#allocation11 + $0x4b8] sm:$0xff]  ;;  %v6103_v46 = vld [vmem:[#allocation11 + $0x4c0] sm:$0xff]  ;;  %v6194_v4 = vld [vmem:[#allocation11 + $0x530] sm:$0xff] }
 0x542   : > { %v6162_v5 = vadd.f32 %v6161_v19, %v6131_v36  ;;  %v11232_v47 = vmul.f32 %v6413_v27, %v10988_v50  ;;  %v11235_v0 = vmul.f32 %v6522_v45, %v10988_v50  ;;  %v11238_v61 = vmul.f32 %v6631_v18, %v10988_v50  ;;  %v6521_v43 = vld [vmem:[#allocation11 + $0x830] sm:$0xff]  ;;  %v6308_v18 = vld [vmem:[#allocation11 + $0x658] sm:$0xff] }
 0x543   : > { %v5937_v16 = vadd.f32 %v5936_v20, %v5906_v6  ;;  %v6338_v19 = vmul.f32 %v6306_v42, %v11015_v63  ;;  %v6339_v29 = vmul.f32 %v6307_v39, %v11018_v8  ;;  %v6368_v2 = vadd.f32 %v6367_v9, %v6337_v54  ;;  %v6310_v42 = vld [vmem:[#allocation11 + $0x668] sm:$0xff] }
 0x544   : > { %11634 = vst [vmem:[#allocation23_spill] sm:$0xff] %v11232_v47  ;;  %11635 = vst [vmem:[#allocation38_spill] sm:$0xff] %v11238_v61  ;;  %v6163_v36 = vadd.f32 %v6162_v5, %v6132_v37  ;;  %v6008_v27 = vmul.f32 %v5976_v12, %v10984_v3  ;;  %v5908_v45 = vmul.f32 %v5876_v41, %v11065_v26  ;;  %v6309_v61 = vld [vmem:[#allocation11 + $0x660] sm:$0xff]  ;;  %v5878_v5 = vld [vmem:[#allocation11 + $0x288] sm:$0xff] }
 0x545   : > { %v5909_v47 = vmul.f32 %v5877_v17, %v11092_v60  ;;  %v5938_v50 = vadd.f32 %v5937_v16, %v5907_v38  ;;  %v6134_v6 = vmul.f32 %v6102_v32, %v11129_v53  ;;  %v6135_v20 = vmul.f32 %v6103_v46, %v11143_v57  ;;  %v5879_v37 = vld [vmem:[#allocation11 + $0x290] sm:$0xff]  ;;  %v6104_v38 = vld [vmem:[#allocation11 + $0x4c8] sm:$0xff]  ;;  %v6312_v46 = vld [vmem:[#allocation11 + $0x678] sm:$0xff] }
 0x546   : > { %v6164_v62 = vadd.f32 %v6163_v36, %v6133_v58  ;;  %v6369_v28 = vadd.f32 %v6368_v2, %v6338_v19  ;;  %v11248_v54 = vmul.f32 %v6194_v4, %v10984_v3  ;;  %v11251_v39 = vmul.f32 %v6412_v44, %v10984_v3  ;;  %v6105_v41 = vld [vmem:[#allocation11 + $0x4d0] sm:$0xff]  ;;  %v6106_v19 = vld [vmem:[#allocation11 + $0x4d8] sm:$0xff] }
 0x547   : > { %v11254_v12 = vmul.f32 %v6521_v43, %v10984_v3  ;;  %v5939_v17 = vadd.f32 %v5938_v50, %v5908_v45  ;;  %v6311_v32 = vld [vmem:[#allocation11 + $0x670] sm:$0xff]  ;;  %v6340_v58 = vmul.f32 %v6308_v18, %v11028_v52  ;;  %v6341_v16 = vmul.f32 %v6309_v61, %v11033_v22  ;;  %v5880_v4 = vld [vmem:[#allocation11 + $0x298] sm:$0xff]  ;;  %v5881_v50 = vld [vmem:[#allocation11 + $0x2a0] sm:$0xff] }
 0x548   : > { %11636 = vst [vmem:[#allocation40_spill] sm:$0xff] %v11248_v54  ;;  %11637 = vst [vmem:[#allocation25_spill] sm:$0xff] %v11251_v39  ;;  %v6165_v9 = vadd.f32 %v6164_v62, %v6134_v6  ;;  %v6370_v36 = vadd.f32 %v6369_v28, %v6339_v29  ;;  %v5910_v2 = vmul.f32 %v5878_v5, %v11086_v56  ;;  %v5978_v18 = vld [vmem:[#allocation11 + $0x340] sm:$0xff]  ;;  %v6108_v61 = vld [vmem:[#allocation11 + $0x4e8] sm:$0xff] }
 0x549   : > { %v5911_v44 = vmul.f32 %v5879_v37, %v11104_v25  ;;  %v5940_v39 = vadd.f32 %v5939_v17, %v5909_v47  ;;  %v6342_v43 = vmul.f32 %v6310_v42, %v11047_v49  ;;  %v6136_v3 = vmul.f32 %v6104_v38, %v11140_v23  ;;  %v6107_v54 = vld [vmem:[#allocation11 + $0x4e0] sm:$0xff]  ;;  %v6110_v37 = vld [vmem:[#allocation11 + $0x4f8] sm:$0xff]  ;;  %v5882_v17 = vld [vmem:[#allocation11 + $0x2a8] sm:$0xff] }
 0x54a   : > { %v6137_v62 = vmul.f32 %v6105_v41, %v11157_v33  ;;  %v6166_v45 = vadd.f32 %v6165_v9, %v6135_v20  ;;  %v6371_v6 = vadd.f32 %v6370_v36, %v6340_v58  ;;  %v6343_v29 = vmul.f32 %v6311_v32, %v11050_v59  ;;  %v5883_v9 = vld [vmem:[#allocation11 + $0x2b0] sm:$0xff] }
 0x54b   : > { %v5941_v28 = vadd.f32 %v5940_v39, %v5910_v2  ;;  %v6344_v5 = vmul.f32 %v6312_v46, %v11065_v26  ;;  %v6038_v47 = vadd.f32 %v10952_v55, %v11199_v21  ;;  %v6138_v42 = vmul.f32 %v6106_v19, %v11155_v13  ;;  %v6313_v39 = vld [vmem:[#allocation11 + $0x680] sm:$0xff]  ;;  %v5979_v19 = vld [vmem:[#allocation11 + $0x348] sm:$0xff] }
 0x54c   : > { %v6167_v38 = vadd.f32 %v6166_v45, %v6136_v3  ;;  %v5912_v20 = vmul.f32 %v5880_v4, %v11099_v14  ;;  %v6372_v41 = vadd.f32 %v6371_v6, %v6341_v16  ;;  %v5913_v58 = vmul.f32 %v5881_v50, %v11117_v48  ;;  %v5980_v3 = vld [vmem:[#allocation11 + $0x350] sm:$0xff]  ;;  %v5884_v16 = vld [vmem:[#allocation11 + $0x2b8] sm:$0xff] }
 0x54d   : > { %v5942_v36 = vadd.f32 %v5941_v28, %v5911_v44  ;;  %v6010_v32 = vmul.f32 %v5978_v18, %v11007_v31  ;;  %v6039_v2 = vadd.f32 %v6038_v47, %v6008_v27  ;;  %v6139_v46 = vmul.f32 %v6107_v54, %v11168_v15  ;;  %v6109_v45 = vld [vmem:[#allocation11 + $0x4f0] sm:$0xff]  ;;  %v5885_v18 = vld [vmem:[#allocation11 + $0x2c0] sm:$0xff]  ;;  %v5886_v27 = vld [vmem:[#allocation11 + $0x2c8] sm:$0xff] }
 0x54e   : > { %v6140_v55 = vmul.f32 %v6108_v61, %v11165_v1  ;;  %v6168_v21 = vadd.f32 %v6167_v38, %v6137_v62  ;;  %v6373_v10 = vadd.f32 %v6372_v41, %v6342_v43  ;;  %v6142_v4 = vmul.f32 %v6110_v37, %v11181_v35  ;;  %v6314_v47 = vld [vmem:[#allocation11 + $0x688] sm:$0xff]  ;;  %v6315_v38 = vld [vmem:[#allocation11 + $0x690] sm:$0xff] }
 0x54f   : > { %v5914_v6 = vmul.f32 %v5882_v17, %v11113_v51  ;;  %v5943_v50 = vadd.f32 %v5942_v36, %v5912_v20  ;;  %v6040_v44 = vadd.f32 %v6039_v2, %v11219_v24  ;;  %v5915_v54 = vmul.f32 %v5883_v9, %v11131_v7  ;;  %v5981_v36 = vld [vmem:[#allocation11 + $0x358] sm:$0xff]  ;;  %v5982_v2 = vld [vmem:[#allocation11 + $0x360] sm:$0xff]  ;;  %v5887_v9 = vld [vmem:[#allocation11 + $0x2d0] sm:$0xff] }
 0x550   : > { %v6169_v28 = vadd.f32 %v6168_v21, %v6138_v42  ;;  %v6345_v61 = vmul.f32 %v6313_v39, %v11092_v60  ;;  %v6374_v62 = vadd.f32 %v6373_v10, %v6343_v29  ;;  %v6011_v41 = vmul.f32 %v5979_v19, %v11015_v63  ;;  %v5888_v21 = vld [vmem:[#allocation11 + $0x2d8] sm:$0xff] }
 0x551   : > { %v5944_v43 = vadd.f32 %v5943_v50, %v5913_v58  ;;  %v6012_v37 = vmul.f32 %v5980_v3, %v11018_v8  ;;  %v6041_v34 = vadd.f32 %v6040_v44, %v6010_v32  ;;  %v6141_v17 = vmul.f32 %v6109_v45, %v11183_v11  ;;  %v5889_v50 = vld [vmem:[#allocation11 + $0x2e0] sm:$0xff]  ;;  %v6316_v3 = vld [vmem:[#allocation11 + $0x698] sm:$0xff] }
 0x552   : > { %v6170_v20 = vadd.f32 %v6169_v28, %v6139_v46  ;;  %v5916_v24 = vmul.f32 %v5884_v16, %v11129_v53  ;;  %v6375_v42 = vadd.f32 %v6374_v62, %v6344_v5  ;;  %v5917_v10 = vmul.f32 %v5885_v18, %v11143_v57  ;;  %v6317_v5 = vld [vmem:[#allocation11 + $0x6a0] sm:$0xff] }
 0x553   : > { %v5918_v29 = vmul.f32 %v5886_v27, %v11140_v23  ;;  %v5945_v58 = vadd.f32 %v5944_v43, %v5914_v6  ;;  %v6042_v39 = vadd.f32 %v6041_v34, %v6011_v41  ;;  %v6346_v32 = vmul.f32 %v6314_v47, %v11086_v56  ;;  %v5983_v6 = vld [vmem:[#allocation11 + $0x368] sm:$0xff]  ;;  %v5984_v43 = vld [vmem:[#allocation11 + $0x370] sm:$0xff] }
 0x554   : > { %v6171_v19 = vadd.f32 %v6170_v20, %v6140_v55  ;;  %v6347_v46 = vmul.f32 %v6315_v38, %v11104_v25  ;;  %v6376_v45 = vadd.f32 %v6375_v42, %v6345_v61  ;;  %v6013_v44 = vmul.f32 %v5981_v36, %v11028_v52  ;;  %v5890_v41 = vld [vmem:[#allocation11 + $0x2e8] sm:$0xff]  ;;  %v6523_v20 = vld [vmem:[#allocation11 + $0x840] sm:$0xff]  ;;  %v5891_v36 = vld [vmem:[#allocation11 + $0x2f0] sm:$0xff] }
 0x555   : > { %v5946_v16 = vadd.f32 %v5945_v58, %v5915_v54  ;;  %v6014_v28 = vmul.f32 %v5982_v2, %v11033_v22  ;;  %v6043_v62 = vadd.f32 %v6042_v39, %v6012_v37  ;;  %v5919_v27 = vmul.f32 %v5887_v9, %v11157_v33  ;;  %v5892_v2 = vld [vmem:[#allocation11 + $0x2f8] sm:$0xff]  ;;  %v6318_v58 = vld [vmem:[#allocation11 + $0x6a8] sm:$0xff]  ;;  %v6319_v39 = vld [vmem:[#allocation11 + $0x6b0] sm:$0xff] }
 0x556   : > { %v6172_v18 = vadd.f32 %v6171_v19, %v6141_v17  ;;  %v5920_v34 = vmul.f32 %v5888_v21, %v11155_v13  ;;  %v6377_v55 = vadd.f32 %v6376_v45, %v6346_v32  ;;  %v5921_v47 = vmul.f32 %v5889_v50, %v11168_v15  ;;  %v5985_v32 = vld [vmem:[#allocation11 + $0x378] sm:$0xff]  ;;  %v5986_v45 = vld [vmem:[#allocation11 + $0x380] sm:$0xff] }
 0x557   : > { %v5947_v38 = vadd.f32 %v5946_v16, %v5916_v24  ;;  %v6348_v54 = vmul.f32 %v6316_v3, %v11099_v14  ;;  %v6044_v61 = vadd.f32 %v6043_v62, %v6013_v44  ;;  %v6349_v37 = vmul.f32 %v6317_v5, %v11117_v48  ;;  %v6524_v44 = vld [vmem:[#allocation11 + $0x848] sm:$0xff]  ;;  %v6525_v62 = vld [vmem:[#allocation11 + $0x850] sm:$0xff] }
 0x558   : > { %v6173_v42 = vadd.f32 %v6172_v18, %v6142_v4  ;;  %v6378_v17 = vadd.f32 %v6377_v55, %v6347_v46  ;;  %v6583_v9 = vadd.f32 %v10968_v40, %v11213_v30  ;;  %v6015_v19 = vmul.f32 %v5983_v6, %v11047_v49  ;;  %v6321_v18 = vld [vmem:[#allocation11 + $0x6c0] sm:$0xff] }
 0x559   : > { %v5948_v21 = vadd.f32 %v5947_v38, %v5917_v10  ;;  %v6016_v24 = vmul.f32 %v5984_v43, %v11050_v59  ;;  %v6045_v50 = vadd.f32 %v6044_v61, %v6014_v28  ;;  %v5922_v3 = vmul.f32 %v5890_v41, %v11165_v1  ;;  %v6320_v28 = vld [vmem:[#allocation11 + $0x6b8] sm:$0xff] }
 0x55a   : > { %6174 = vadd.xlane.f32.xlu1 %v6173_v42  ;;  %v6379_v4 = vadd.f32 %v6378_v17, %v6348_v54  ;;  %v6555_v16 = vmul.f32 %v6523_v20, %v11007_v31  ;;  %v6584_v46 = vadd.f32 %v6583_v9, %v11254_v12  ;;  %v5923_v40 = vmul.f32 %v5891_v36, %v11183_v11  ;;  %v6322_v12 = vld [vmem:[#allocation11 + $0x6c8] sm:$0xff]  ;;  %v6323_v54 = vld [vmem:[#allocation11 + $0x6d0] sm:$0xff] }
 0x55b   : > { %v11302_v30 = vmul.f32 %v5892_v2, %v11181_v35  ;;  %v5949_v10 = vadd.f32 %v5948_v21, %v5918_v29  ;;  %v6046_v5 = vadd.f32 %v6045_v50, %v6015_v19  ;;  %v6350_v55 = vmul.f32 %v6318_v58, %v11113_v51  ;;  %v5987_v36 = vld [vmem:[#allocation11 + $0x388] sm:$0xff]  ;;  %v5988_v2 = vld [vmem:[#allocation11 + $0x390] sm:$0xff]  ;;  %v6527_v19 = vld [vmem:[#allocation11 + $0x860] sm:$0xff] }
 0x55c   : > { %v6351_v6 = vmul.f32 %v6319_v39, %v11131_v7  ;;  %v6380_v43 = vadd.f32 %v6379_v4, %v6349_v37  ;;  %v6585_v41 = vadd.f32 %v6584_v46, %v11235_v0  ;;  %v6017_v61 = vmul.f32 %v5985_v32, %v11065_v26  ;;  %v6526_v39 = vld [vmem:[#allocation11 + $0x858] sm:$0xff] }
 0x55d   : > { %v5950_v38 = vadd.f32 %v5949_v10, %v5919_v27  ;;  %v6018_v20 = vmul.f32 %v5986_v45, %v11092_v60  ;;  %v6047_v29 = vadd.f32 %v6046_v5, %v6016_v24  ;;  %v6556_v17 = vmul.f32 %v6524_v44, %v11015_v63  ;;  %v6324_v50 = vld [vmem:[#allocation11 + $0x6d8] sm:$0xff]  ;;  %v5990_v5 = vld [vmem:[#allocation11 + $0x3a0] sm:$0xff] }
 0x55e   : > { %v6381_v42 = vadd.f32 %v6380_v43, %v6350_v55  ;;  %v6557_v9 = vmul.f32 %v6525_v62, %v11018_v8  ;;  %v6586_v21 = vadd.f32 %v6585_v41, %v6555_v16  ;;  %v6352_v37 = vmul.f32 %v6320_v28, %v11129_v53  ;;  %v5989_v45 = vld [vmem:[#allocation11 + $0x398] sm:$0xff]  ;;  %v6528_v28 = vld [vmem:[#allocation11 + $0x868] sm:$0xff] }
 0x55f   : > { %v5951_v58 = vadd.f32 %v5950_v38, %v5920_v34  ;;  %v6353_v0 = vmul.f32 %v6321_v18, %v11143_v57  ;;  %v6048_v27 = vadd.f32 %v6047_v29, %v6017_v61  ;;  %v6354_v4 = vmul.f32 %v6322_v12, %v11140_v23  ;;  %v6529_v18 = vld [vmem:[#allocation11 + $0x870] sm:$0xff]  ;;  %v6325_v61 = vld [vmem:[#allocation11 + $0x6e0] sm:$0xff] }
 0x560   : > { %v6355_v24 = vmul.f32 %v6323_v54, %v11157_v33  ;;  %v6382_v32 = vadd.f32 %v6381_v42, %v6351_v6  ;;  %v6587_v46 = vadd.f32 %v6586_v21, %v6556_v17  ;;  %v6019_v16 = vmul.f32 %v5987_v36, %v11086_v56  ;;  %v6196_v54 = vld [vmem:[#allocation11 + $0x540] sm:$0xff]  ;;  %v5991_v42 = vld [vmem:[#allocation11 + $0x3a8] sm:$0xff]  ;;  %v11639_v17 = vld [vmem:[#allocation32_spill] sm:$0xff] }
 0x561   : > { %v5952_v10 = vadd.f32 %v5951_v58, %v5921_v47  ;;  %v6020_v34 = vmul.f32 %v5988_v2, %v11104_v25  ;;  %v6049_v44 = vadd.f32 %v6048_v27, %v6018_v20  ;;  %v6558_v55 = vmul.f32 %v6526_v39, %v11028_v52  ;;  %v11638_v2 = vld [vmem:[#allocation20_spill] sm:$0xff] }
 0x562   : > { %v6383_v62 = vadd.f32 %v6382_v32, %v6352_v37  ;;  %v6559_v43 = vmul.f32 %v6527_v19, %v11033_v22  ;;  %v6588_v41 = vadd.f32 %v6587_v46, %v6557_v9  ;;  %v6356_v6 = vmul.f32 %v6324_v50, %v11155_v13  ;;  %v5992_v37 = vld [vmem:[#allocation11 + $0x3b0] sm:$0xff]  ;;  %v6530_v19 = vld [vmem:[#allocation11 + $0x878] sm:$0xff]  ;;  %v6531_v50 = vld [vmem:[#allocation11 + $0x880] sm:$0xff] }
 0x563   : > { %v5953_v38 = vadd.f32 %v5952_v10, %v5922_v3  ;;  %v6021_v12 = vmul.f32 %v5989_v45, %v11099_v14  ;;  %v6050_v47 = vadd.f32 %v6049_v44, %v6019_v16  ;;  %v6022_v20 = vmul.f32 %v5990_v5, %v11117_v48  ;;  %v6197_v45 = vld [vmem:[#allocation11 + $0x548] sm:$0xff]  ;;  %v11640_v46 = vld [vmem:[#allocation40_spill] sm:$0xff] }
 0x564   : > { %v6384_v29 = vadd.f32 %v6383_v62, %v6353_v0  ;;  %v6589_v36 = vadd.f32 %v6588_v41, %v6558_v55  ;;  %v6256_v21 = vadd.f32 %v11639_v17, %v11638_v2  ;;  %v6560_v3 = vmul.f32 %v6528_v28, %v11047_v49  ;;  %v6198_v44 = vld [vmem:[#allocation11 + $0x550] sm:$0xff]  ;;  %v6326_v62 = vld [vmem:[#allocation11 + $0x6e8] sm:$0xff] }
 0x565   : > { %v5954_v58 = vadd.f32 %v5953_v38, %v5923_v40  ;;  %v6051_v27 = vadd.f32 %v6050_v47, %v6020_v34  ;;  %v6561_v9 = vmul.f32 %v6529_v18, %v11050_v59  ;;  %v6228_v0 = vmul.f32 %v6196_v54, %v11007_v31  ;;  %v6327_v28 = vld [vmem:[#allocation11 + $0x6f0] sm:$0xff]  ;;  %v11641_v41 = vld [vmem:[#allocation22_spill] sm:$0xff] }
 0x566   : > { %v6385_v39 = vadd.f32 %v6384_v29, %v6354_v4  ;;  %v6590_v32 = vadd.f32 %v6589_v36, %v6559_v43  ;;  %v6257_v10 = vadd.f32 %v6256_v21, %v11640_v46  ;;  %v6357_v16 = vmul.f32 %v6325_v61, %v11168_v15  ;;  %v5993_v4 = vld [vmem:[#allocation11 + $0x3b8] sm:$0xff]  ;;  %v5994_v47 = vld [vmem:[#allocation11 + $0x3c0] sm:$0xff]  ;;  %v6533_v36 = vld [vmem:[#allocation11 + $0x890] sm:$0xff] }
 0x567   : > { %v5955_v5 = vadd.f32 %v5954_v58, %v11302_v30  ;;  %v6023_v40 = vmul.f32 %v5991_v42, %v11113_v51  ;;  %v6052_v34 = vadd.f32 %v6051_v27, %v6021_v12  ;;  %v6024_v55 = vmul.f32 %v5992_v37, %v11131_v7  ;;  %v6532_v42 = vld [vmem:[#allocation11 + $0x888] sm:$0xff] }
 0x568   : > { %v6386_v18 = vadd.f32 %v6385_v39, %v6355_v24  ;;  %v6591_v43 = vadd.f32 %v6590_v32, %v6560_v3  ;;  %v6258_v38 = vadd.f32 %v6257_v10, %v11641_v41  ;;  %v6562_v30 = vmul.f32 %v6530_v19, %v11065_v26  ;;  %v6199_v24 = vld [vmem:[#allocation11 + $0x558] sm:$0xff]  ;;  %v6200_v3 = vld [vmem:[#allocation11 + $0x560] sm:$0xff]  ;;  %v5996_v32 = vld [vmem:[#allocation11 + $0x3d0] sm:$0xff] }
 0x569   : > { %5956 = vadd.xlane.f32.xlu0 %v5955_v5  ;;  %v6053_v54 = vadd.f32 %v6052_v34, %v6022_v20  ;;  %v6563_v61 = vmul.f32 %v6531_v50, %v11092_v60  ;;  %v6229_v29 = vmul.f32 %v6197_v45, %v11015_v63  ;;  %v6230_v17 = vmul.f32 %v6198_v44, %v11018_v8  ;;  %v6328_v39 = vld [vmem:[#allocation11 + $0x6f8] sm:$0xff]  ;;  %v5995_v50 = vld [vmem:[#allocation11 + $0x3c8] sm:$0xff] }
 0x56a   : > { %v6387_v12 = vadd.f32 %v6386_v18, %v6356_v6  ;;  %v6592_v2 = vadd.f32 %v6591_v43, %v6561_v9  ;;  %v6259_v21 = vadd.f32 %v6258_v38, %v6228_v0  ;;  %v6358_v58 = vmul.f32 %v6326_v62, %v11165_v1  ;;  %v6534_v10 = vld [vmem:[#allocation11 + $0x898] sm:$0xff]  ;;  %v6535_v62 = vld [vmem:[#allocation11 + $0x8a0] sm:$0xff]  ;;  %v6202_v38 = vld [vmem:[#allocation11 + $0x570] sm:$0xff] }
 0x56b   : > { %v6359_v37 = vmul.f32 %v6327_v28, %v11183_v11  ;;  %v6025_v20 = vmul.f32 %v5993_v4, %v11129_v53  ;;  %v6054_v27 = vadd.f32 %v6053_v54, %v6023_v40  ;;  %v6026_v6 = vmul.f32 %v5994_v47, %v11143_v57  ;;  %v6201_v28 = vld [vmem:[#allocation11 + $0x568] sm:$0xff]  ;;  %v6630_v47 = vld [vmem:[#allocation11 + $0x930] sm:$0xff] }
 0x56c   : > { %v6388_v19 = vadd.f32 %v6387_v12, %v6357_v16  ;;  %v6593_v45 = vadd.f32 %v6592_v2, %v6562_v30  ;;  %v6260_v9 = vadd.f32 %v6259_v21, %v6229_v29  ;;  %v6564_v0 = vmul.f32 %v6532_v42, %v11086_v56  ;;  %v6414_v42 = vld [vmem:[#allocation11 + $0x740] sm:$0xff] }
 0x56d   : > { %v6055_v46 = vadd.f32 %v6054_v27, %v6024_v55  ;;  %v6565_v5 = vmul.f32 %v6533_v36, %v11104_v25  ;;  %v6231_v34 = vmul.f32 %v6199_v24, %v11028_v52  ;;  %v6232_v16 = vmul.f32 %v6200_v3, %v11033_v22  ;;  %v5998_v36 = vld [vmem:[#allocation11 + $0x3e0] sm:$0xff] }
 0x56e   : > { %v6389_v44 = vadd.f32 %v6388_v19, %v6358_v58  ;;  %v6594_v40 = vadd.f32 %v6593_v45, %v6563_v61  ;;  %v6261_v18 = vadd.f32 %v6260_v9, %v6230_v17  ;;  %v6360_v4 = vmul.f32 %v6328_v39, %v11181_v35  ;;  %v5997_v61 = vld [vmem:[#allocation11 + $0x3d8] sm:$0xff]  ;;  %v11643_v58 = vld [vmem:[#allocation34_spill] sm:$0xff]  ;;  %v6537_v39 = vld [vmem:[#allocation11 + $0x8b0] sm:$0xff] }
 0x56f   : > { %v6027_v43 = vmul.f32 %v5995_v50, %v11140_v23  ;;  %v6028_v55 = vmul.f32 %v5996_v32, %v11157_v33  ;;  %v6056_v41 = vadd.f32 %v6055_v46, %v6025_v20  ;;  %v6566_v30 = vmul.f32 %v6534_v10, %v11099_v14  ;;  %v11642_v21 = vld [vmem:[#allocation21_spill] sm:$0xff]  ;;  %v6536_v20 = vld [vmem:[#allocation11 + $0x8a8] sm:$0xff] }
 0x570   : > { %v6390_v54 = vadd.f32 %v6389_v44, %v6359_v37  ;;  %v6595_v29 = vadd.f32 %v6594_v40, %v6564_v0  ;;  %v6262_v12 = vadd.f32 %v6261_v18, %v6231_v34  ;;  %v6567_v24 = vmul.f32 %v6535_v62, %v11117_v48  ;;  %v11644_v32 = vld [vmem:[#allocation35_spill] sm:$0xff]  ;;  %v6203_v46 = vld [vmem:[#allocation11 + $0x578] sm:$0xff] }
 0x571   : > { %v6057_v2 = vadd.f32 %v6056_v41, %v6026_v6  ;;  %v6233_v17 = vmul.f32 %v6201_v28, %v11047_v49  ;;  %v6474_v27 = vadd.f32 %v11643_v58, %v11642_v21  ;;  %v6234_v37 = vmul.f32 %v6202_v38, %v11050_v59  ;;  %v6204_v6 = vld [vmem:[#allocation11 + $0x580] sm:$0xff]  ;;  %v6415_v28 = vld [vmem:[#allocation11 + $0x748] sm:$0xff]  ;;  %v6416_v18 = vld [vmem:[#allocation11 + $0x750] sm:$0xff] }
 0x572   : > { %v6391_v3 = vadd.f32 %v6390_v54, %v6360_v4  ;;  %v6596_v19 = vadd.f32 %v6595_v29, %v6565_v5  ;;  %v6263_v50 = vadd.f32 %v6262_v12, %v6232_v16  ;;  %v11355_v45 = vmul.f32 %v6630_v47, %v11644_v32  ;;  %v11645_v0 = vld [vmem:[#allocation25_spill] sm:$0xff]  ;;  %v5999_v16 = vld [vmem:[#allocation11 + $0x3e8] sm:$0xff]  ;;  %v6000_v4 = vld [vmem:[#allocation11 + $0x3f0] sm:$0xff] }
 0x573   : > { %v6058_v9 = vadd.f32 %v6057_v2, %v6027_v43  ;;  %v6446_v10 = vmul.f32 %v6414_v42, %v11007_v31  ;;  %v6475_v34 = vadd.f32 %v6474_v27, %v11645_v0  ;;  %v6029_v44 = vmul.f32 %v5997_v61, %v11155_v13  ;;  %v11646_v47 = vld [vmem:[#allocation23_spill] sm:$0xff]  ;;  %v6538_v29 = vld [vmem:[#allocation11 + $0x8b8] sm:$0xff]  ;;  %v6539_v12 = vld [vmem:[#allocation11 + $0x8c0] sm:$0xff] }
 0x574   : > { %6392 = vadd.xlane.f32.xlu1 %v6391_v3  ;;  %v6030_v62 = vmul.f32 %v5998_v36, %v11168_v15  ;;  %v6597_v40 = vadd.f32 %v6596_v19, %v6566_v30  ;;  %v6264_v5 = vadd.f32 %v6263_v50, %v6233_v17  ;;  %v6568_v43 = vmul.f32 %v6536_v20, %v11113_v51  ;;  %v6205_v17 = vld [vmem:[#allocation11 + $0x588] sm:$0xff]  ;;  %v6206_v21 = vld [vmem:[#allocation11 + $0x590] sm:$0xff]  ;;  %v6418_v50 = vld [vmem:[#allocation11 + $0x760] sm:$0xff] }
 0x575   : > { %v6059_v41 = vadd.f32 %v6058_v9, %v6028_v55  ;;  %v6569_v38 = vmul.f32 %v6537_v39, %v11131_v7  ;;  %v6476_v54 = vadd.f32 %v6475_v34, %v11646_v47  ;;  %v6235_v61 = vmul.f32 %v6203_v46, %v11065_v26  ;;  %v6001_v32 = vld [vmem:[#allocation11 + $0x3f8] sm:$0xff]  ;;  %v6540_v46 = vld [vmem:[#allocation11 + $0x8c8] sm:$0xff]  ;;  %v6541_v34 = vld [vmem:[#allocation11 + $0x8d0] sm:$0xff] }
 0x576   : > { %v6598_v42 = vadd.f32 %v6597_v40, %v6567_v24  ;;  %v6236_v36 = vmul.f32 %v6204_v6, %v11092_v60  ;;  %v6265_v30 = vadd.f32 %v6264_v5, %v6234_v37  ;;  %v6447_v58 = vmul.f32 %v6415_v28, %v11015_v63  ;;  %v6417_v24 = vld [vmem:[#allocation11 + $0x758] sm:$0xff] }
 0x577   : > { %v6060_v2 = vadd.f32 %v6059_v41, %v6029_v44  ;;  %v6448_v55 = vmul.f32 %v6416_v18, %v11018_v8  ;;  %v6477_v27 = vadd.f32 %v6476_v54, %v6446_v10  ;;  %v6031_v3 = vmul.f32 %v5999_v16, %v11165_v1  ;;  %v6207_v40 = vld [vmem:[#allocation11 + $0x598] sm:$0xff]  ;;  %v6208_v16 = vld [vmem:[#allocation11 + $0x5a0] sm:$0xff] }
 0x578   : > { %v6032_v20 = vmul.f32 %v6000_v4, %v11183_v11  ;;  %v6599_v39 = vadd.f32 %v6598_v42, %v6568_v43  ;;  %v6266_v19 = vadd.f32 %v6265_v30, %v6235_v61  ;;  %v6570_v37 = vmul.f32 %v6538_v29, %v11129_v53 }
 0x579   : > { %v6061_v9 = vadd.f32 %v6060_v2, %v6030_v62  ;;  %v6571_v6 = vmul.f32 %v6539_v12, %v11143_v57  ;;  %v6478_v0 = vadd.f32 %v6477_v27, %v6447_v58  ;;  %v6237_v10 = vmul.f32 %v6205_v17, %v11086_v56  ;;  %v6420_v12 = vld [vmem:[#allocation11 + $0x770] sm:$0xff]  ;;  %v6632_v2 = vld [vmem:[#allocation11 + $0x940] sm:$0xff]  ;;  %v6542_v17 = vld [vmem:[#allocation11 + $0x8d8] sm:$0xff] }
 0x57a   : > { %v6600_v44 = vadd.f32 %v6599_v39, %v6569_v38  ;;  %v6238_v5 = vmul.f32 %v6206_v21, %v11104_v25  ;;  %v6267_v28 = vadd.f32 %v6266_v19, %v6236_v36  ;;  %v6449_v4 = vmul.f32 %v6417_v24, %v11028_v52  ;;  %v6419_v38 = vld [vmem:[#allocation11 + $0x768] sm:$0xff]  ;;  %v6543_v21 = vld [vmem:[#allocation11 + $0x8e0] sm:$0xff]  ;;  %v11648_v19 = vld [vmem:[#allocation36_spill] sm:$0xff] }
 0x57b   : > { %v6062_v18 = vadd.f32 %v6061_v9, %v6031_v3  ;;  %v6450_v62 = vmul.f32 %v6418_v50, %v11033_v22  ;;  %v6479_v41 = vadd.f32 %v6478_v0, %v6448_v55  ;;  %v6033_v43 = vmul.f32 %v6001_v32, %v11181_v35  ;;  %v6209_v27 = vld [vmem:[#allocation11 + $0x5a8] sm:$0xff]  ;;  %v11647_v39 = vld [vmem:[#allocation37_spill] sm:$0xff]  ;;  %v6210_v32 = vld [vmem:[#allocation11 + $0x5b0] sm:$0xff] }
 0x57c   : > { %v6572_v47 = vmul.f32 %v6540_v46, %v11140_v23  ;;  %v6601_v54 = vadd.f32 %v6600_v44, %v6570_v37  ;;  %v6268_v29 = vadd.f32 %v6267_v28, %v6237_v10  ;;  %v6573_v61 = vmul.f32 %v6541_v34, %v11157_v33  ;;  %v6421_v34 = vld [vmem:[#allocation11 + $0x778] sm:$0xff]  ;;  %v6422_v44 = vld [vmem:[#allocation11 + $0x780] sm:$0xff] }
 0x57d   : > { %v6063_v42 = vadd.f32 %v6062_v18, %v6032_v20  ;;  %v6239_v36 = vmul.f32 %v6207_v40, %v11099_v14  ;;  %v6480_v30 = vadd.f32 %v6479_v41, %v6449_v4  ;;  %v6240_v55 = vmul.f32 %v6208_v16, %v11117_v48  ;;  %v6633_v40 = vld [vmem:[#allocation11 + $0x948] sm:$0xff]  ;;  %v6634_v4 = vld [vmem:[#allocation11 + $0x950] sm:$0xff] }
 0x57e   : > { %v6602_v58 = vadd.f32 %v6601_v54, %v6571_v6  ;;  %v6269_v3 = vadd.f32 %v6268_v29, %v6238_v5  ;;  %v6692_v24 = vadd.f32 %v11648_v19, %v11647_v39  ;;  %v6451_v20 = vmul.f32 %v6419_v38, %v11047_v49  ;;  %v6544_v41 = vld [vmem:[#allocation11 + $0x8e8] sm:$0xff] }
 0x57f   : > { %v6064_v50 = vadd.f32 %v6063_v42, %v6033_v43  ;;  %v6452_v9 = vmul.f32 %v6420_v12, %v11050_v59  ;;  %v6481_v46 = vadd.f32 %v6480_v30, %v6450_v62  ;;  %v6664_v6 = vmul.f32 %v6632_v2, %v11007_v31  ;;  %v6545_v62 = vld [vmem:[#allocation11 + $0x8f0] sm:$0xff]  ;;  %v11649_v38 = vld [vmem:[#allocation38_spill] sm:$0xff] }
 0x580   : > { %v6603_v37 = vadd.f32 %v6602_v58, %v6572_v47  ;;  %v6270_v0 = vadd.f32 %v6269_v3, %v6239_v36  ;;  %v6693_v10 = vadd.f32 %v6692_v24, %v11355_v45  ;;  %v6574_v5 = vmul.f32 %v6542_v17, %v11155_v13  ;;  %v6211_v47 = vld [vmem:[#allocation11 + $0x5b8] sm:$0xff]  ;;  %v6212_v12 = vld [vmem:[#allocation11 + $0x5c0] sm:$0xff]  ;;  %v6424_v58 = vld [vmem:[#allocation11 + $0x790] sm:$0xff] }
 0x581   : > { %6065 = vadd.xlane.f32.xlu0 %v6064_v50  ;;  %v6575_v28 = vmul.f32 %v6543_v21, %v11168_v15  ;;  %v6241_v18 = vmul.f32 %v6209_v27, %v11113_v51  ;;  %v6482_v16 = vadd.f32 %v6481_v46, %v6451_v20  ;;  %v6242_v54 = vmul.f32 %v6210_v32, %v11131_v7  ;;  %v6423_v21 = vld [vmem:[#allocation11 + $0x788] sm:$0xff]  ;;  %v6635_v27 = vld [vmem:[#allocation11 + $0x958] sm:$0xff]  ;;  %v6636_v50 = vld [vmem:[#allocation11 + $0x960] sm:$0xff] }
 0x582   : > { %v6604_v43 = vadd.f32 %v6603_v37, %v6573_v61  ;;  %v6271_v29 = vadd.f32 %v6270_v0, %v6240_v55  ;;  %v6694_v31 = vadd.f32 %v6693_v10, %v11649_v38  ;;  %v6453_v45 = vmul.f32 %v6421_v34, %v11065_v26  ;;  %v6546_v32 = vld [vmem:[#allocation11 + $0x8f8] sm:$0xff]  ;;  %v6214_v0 = vld [vmem:[#allocation11 + $0x5d0] sm:$0xff] }
 0x583   : > { %v6454_v42 = vmul.f32 %v6422_v44, %v11092_v60  ;;  %v6483_v36 = vadd.f32 %v6482_v16, %v6452_v9  ;;  %v6665_v30 = vmul.f32 %v6633_v40, %v11015_v63  ;;  %v6666_v61 = vmul.f32 %v6634_v4, %v11018_v8  ;;  %v6213_v9 = vld [vmem:[#allocation11 + $0x5c8] sm:$0xff] }
 0x584   : > { %v6605_v2 = vadd.f32 %v6604_v43, %v6574_v5  ;;  %v6272_v17 = vadd.f32 %v6271_v29, %v6241_v18  ;;  %v6695_v3 = vadd.f32 %v6694_v31, %v6664_v6  ;;  %v6576_v55 = vmul.f32 %v6544_v41, %v11165_v1  ;;  %v6425_v5 = vld [vmem:[#allocation11 + $0x798] sm:$0xff]  ;;  %v6426_v18 = vld [vmem:[#allocation11 + $0x7a0] sm:$0xff]  ;;  %v6637_v16 = vld [vmem:[#allocation11 + $0x968] sm:$0xff] }
 0x585   : > { %v6577_v39 = vmul.f32 %v6545_v62, %v11183_v11  ;;  %v6243_v19 = vmul.f32 %v6211_v47, %v11129_v53  ;;  %v6484_v24 = vadd.f32 %v6483_v36, %v6453_v45  ;;  %v6244_v63 = vmul.f32 %v6212_v12, %v11143_v57  ;;  %v6638_v47 = vld [vmem:[#allocation11 + $0x970] sm:$0xff]  ;;  %v6216_v12 = vld [vmem:[#allocation11 + $0x5e0] sm:$0xff] }
 0x586   : > { %v6606_v20 = vadd.f32 %v6605_v2, %v6575_v28  ;;  %v6273_v46 = vadd.f32 %v6272_v17, %v6242_v54  ;;  %v6696_v37 = vadd.f32 %v6695_v3, %v6665_v30  ;;  %v6455_v34 = vmul.f32 %v6423_v21, %v11086_v56  ;;  %v6427_v17 = vld [vmem:[#allocation11 + $0x7a8] sm:$0xff]  ;;  %v6428_v21 = vld [vmem:[#allocation11 + $0x7b0] sm:$0xff]  ;;  %v6639_v3 = vld [vmem:[#allocation11 + $0x978] sm:$0xff] }
 0x587   : > { %v6456_v8 = vmul.f32 %v6424_v58, %v11104_v25  ;;  %v6485_v44 = vadd.f32 %v6484_v24, %v6454_v42  ;;  %v6667_v40 = vmul.f32 %v6635_v27, %v11028_v52  ;;  %v6668_v28 = vmul.f32 %v6636_v50, %v11033_v22  ;;  %v6215_v52 = vld [vmem:[#allocation11 + $0x5d8] sm:$0xff] }
 0x588   : > { %v6607_v6 = vadd.f32 %v6606_v20, %v6576_v55  ;;  %v6274_v10 = vadd.f32 %v6273_v46, %v6243_v19  ;;  %v6697_v4 = vadd.f32 %v6696_v37, %v6666_v61  ;;  %v6578_v41 = vmul.f32 %v6546_v32, %v11181_v35  ;;  %v6640_v55 = vld [vmem:[#allocation11 + $0x980] sm:$0xff]  ;;  %v6217_v32 = vld [vmem:[#allocation11 + $0x5e8] sm:$0xff]  ;;  %v6218_v20 = vld [vmem:[#allocation11 + $0x5f0] sm:$0xff] }
 0x589   : > { %v6245_v62 = vmul.f32 %v6213_v9, %v11140_v23  ;;  %v6486_v43 = vadd.f32 %v6485_v44, %v6455_v34  ;;  %v6246_v29 = vmul.f32 %v6214_v0, %v11157_v33  ;;  %v6457_v45 = vmul.f32 %v6425_v5, %v11099_v14  ;;  %v6430_v37 = vld [vmem:[#allocation11 + $0x7c0] sm:$0xff] }
 0x58a   : > { %v6608_v54 = vadd.f32 %v6607_v6, %v6577_v39  ;;  %v6275_v38 = vadd.f32 %v6274_v10, %v6244_v63  ;;  %v6698_v31 = vadd.f32 %v6697_v4, %v6667_v40  ;;  %v6458_v42 = vmul.f32 %v6426_v18, %v11117_v48  ;;  %v6641_v40 = vld [vmem:[#allocation11 + $0x988] sm:$0xff]  ;;  %v6642_v6 = vld [vmem:[#allocation11 + $0x990] sm:$0xff] }
 0x58b   : > { %v6487_v36 = vadd.f32 %v6486_v43, %v6456_v8  ;;  %v6669_v22 = vmul.f32 %v6637_v16, %v11047_v49  ;;  %v6670_v58 = vmul.f32 %v6638_v47, %v11050_v59  ;;  %v6247_v39 = vmul.f32 %v6215_v52, %v11155_v13  ;;  %v6429_v59 = vld [vmem:[#allocation11 + $0x7b8] sm:$0xff]  ;;  %v6432_v47 = vld [vmem:[#allocation11 + $0x7d0] sm:$0xff]  ;;  %v6644_v52 = vld [vmem:[#allocation11 + $0x9a0] sm:$0xff] }
 0x58c   : > { %v6609_v30 = vadd.f32 %v6608_v54, %v6578_v41  ;;  %v6276_v2 = vadd.f32 %v6275_v38, %v6245_v62  ;;  %v6699_v27 = vadd.f32 %v6698_v31, %v6668_v28  ;;  %v6248_v19 = vmul.f32 %v6216_v12, %v11168_v15  ;;  %v6219_v28 = vld [vmem:[#allocation11 + $0x5f8] sm:$0xff] }
 0x58d   : > { %v6488_v61 = vadd.f32 %v6487_v36, %v6457_v45  ;;  %v6459_v49 = vmul.f32 %v6427_v17, %v11113_v51  ;;  %v6460_v9 = vmul.f32 %v6428_v21, %v11131_v7  ;;  %v6671_v0 = vmul.f32 %v6639_v3, %v11065_v26  ;;  %v6431_v26 = vld [vmem:[#allocation11 + $0x7c8] sm:$0xff]  ;;  %v6643_v31 = vld [vmem:[#allocation11 + $0x998] sm:$0xff]  ;;  %v6434_v21 = vld [vmem:[#allocation11 + $0x7e0] sm:$0xff] }
 0x58e   : > { %6610 = vadd.xlane.f32.xlu1 %v6609_v30  ;;  %v6277_v24 = vadd.f32 %v6276_v2, %v6246_v29  ;;  %v6700_v50 = vadd.f32 %v6699_v27, %v6669_v22  ;;  %v6672_v34 = vmul.f32 %v6640_v55, %v11092_v60  ;;  %v6249_v10 = vmul.f32 %v6217_v32, %v11165_v1  ;;  %v6433_v17 = vld [vmem:[#allocation11 + $0x7d8] sm:$0xff]  ;;  %v6646_v3 = vld [vmem:[#allocation11 + $0x9b0] sm:$0xff] }
 0x58f   : > { %v6489_v63 = vadd.f32 %v6488_v61, %v6458_v42  ;;  %v6250_v5 = vmul.f32 %v6218_v20, %v11183_v11  ;;  %v6461_v4 = vmul.f32 %v6429_v59, %v11129_v53  ;;  %v6462_v41 = vmul.f32 %v6430_v37, %v11143_v57  ;;  %v6645_v61 = vld [vmem:[#allocation11 + $0x9a8] sm:$0xff]  ;;  %v6436_v32 = vld [vmem:[#allocation11 + $0x7f0] sm:$0xff] }
 0x590   : > { %v6278_v46 = vadd.f32 %v6277_v24, %v6247_v39  ;;  %v6701_v8 = vadd.f32 %v6700_v50, %v6670_v58  ;;  %v6673_v60 = vmul.f32 %v6641_v40, %v11086_v56  ;;  %v6674_v54 = vmul.f32 %v6642_v6, %v11104_v25  ;;  %v6435_v50 = vld [vmem:[#allocation11 + $0x7e8] sm:$0xff] }
 0x591   : > { %v6490_v44 = vadd.f32 %v6489_v63, %v6459_v49  ;;  %v6251_v12 = vmul.f32 %v6219_v28, %v11181_v35  ;;  %v6463_v36 = vmul.f32 %v6431_v26, %v11140_v23  ;;  %v6464_v22 = vmul.f32 %v6432_v47, %v11157_v33  ;;  %v6648_v63 = vld [vmem:[#allocation11 + $0x9c0] sm:$0xff] }
 0x592   : > { %v6279_v18 = vadd.f32 %v6278_v46, %v6248_v19  ;;  %v6702_v16 = vadd.f32 %v6701_v8, %v6671_v0  ;;  %v6675_v56 = vmul.f32 %v6643_v31, %v11099_v14  ;;  %v6676_v25 = vmul.f32 %v6644_v52, %v11117_v48  ;;  %v6647_v48 = vld [vmem:[#allocation11 + $0x9b8] sm:$0xff] }
 0x593   : > { %v6491_v62 = vadd.f32 %v6490_v44, %v6460_v9  ;;  %v6465_v39 = vmul.f32 %v6433_v17, %v11155_v13  ;;  %v6466_v19 = vmul.f32 %v6434_v21, %v11168_v15  ;;  %v6677_v20 = vmul.f32 %v6645_v61, %v11113_v51  ;;  %v6649_v51 = vld [vmem:[#allocation11 + $0x9c8] sm:$0xff] }
 0x594   : > { %v6280_v43 = vadd.f32 %v6279_v18, %v6249_v10  ;;  %v6703_v29 = vadd.f32 %v6702_v16, %v6672_v34  ;;  %v6678_v49 = vmul.f32 %v6646_v3, %v11131_v7  ;;  %v6467_v59 = vmul.f32 %v6435_v50, %v11165_v1  ;;  %v6437_v34 = vld [vmem:[#allocation11 + $0x7f8] sm:$0xff]  ;;  %v6650_v10 = vld [vmem:[#allocation11 + $0x9d0] sm:$0xff] }
 0x595   : > { %v6492_v38 = vadd.f32 %v6491_v62, %v6461_v4  ;;  %v6468_v37 = vmul.f32 %v6436_v32, %v11183_v11  ;;  %v6679_v8 = vmul.f32 %v6647_v48, %v11129_v53  ;;  %v6680_v44 = vmul.f32 %v6648_v63, %v11143_v57  ;;  %v6651_v62 = vld [vmem:[#allocation11 + $0x9d8] sm:$0xff] }
 0x596   : > { %v6281_v45 = vadd.f32 %v6280_v43, %v6250_v5  ;;  %v6704_v42 = vadd.f32 %v6703_v29, %v6673_v60  ;;  %v6469_v5 = vmul.f32 %v6437_v34, %v11181_v35  ;;  %v6681_v16 = vmul.f32 %v6649_v51, %v11140_v23  ;;  %v6652_v43 = vld [vmem:[#allocation11 + $0x9e0] sm:$0xff]  ;;  %v6653_v60 = vld [vmem:[#allocation11 + $0x9e8] sm:$0xff] }
 0x597   : > { %v6493_v30 = vadd.f32 %v6492_v38, %v6462_v41  ;;  %v6682_v28 = vmul.f32 %v6650_v10, %v11157_v33  ;;  %v6683_v53 = vmul.f32 %v6651_v62, %v11155_v13  ;;  %v6684_v57 = vmul.f32 %v6652_v43, %v11168_v15  ;;  %v6655_v33 = vld [vmem:[#allocation11 + $0x9f8] sm:$0xff] }
 0x598   : > { %v6282_v2 = vadd.f32 %v6281_v45, %v6251_v12  ;;  %v6705_v58 = vadd.f32 %v6704_v42, %v6674_v54  ;;  %v6654_v54 = vld [vmem:[#allocation11 + $0x9f0] sm:$0xff]  ;;  %v6685_v38 = vmul.f32 %v6653_v60, %v11165_v1  ;;  %v6687_v12 = vmul.f32 %v6655_v33, %v11181_v35 }
 0x599   : > { %v6494_v27 = vadd.f32 %v6493_v30, %v6463_v36  ;;  %v6686_v23 = vmul.f32 %v6654_v54, %v11183_v11 }
 0x59a   : > { %6283 = vadd.xlane.f32.xlu0 %v6282_v2  ;;  %v6706_v55 = vadd.f32 %v6705_v58, %v6675_v56 }
 0x59b   : > { %v6495_v24 = vadd.f32 %v6494_v27, %v6464_v22 }
 0x59c   : > { %v6707_v14 = vadd.f32 %v6706_v55, %v6676_v25 }
 0x59d   : > { %v6496_v9 = vadd.f32 %v6495_v24, %v6465_v39 }
 0x59e   : > { %v6708_v46 = vadd.f32 %v6707_v14, %v6677_v20 }
 0x59f   : > { %v6497_v0 = vadd.f32 %v6496_v9, %v6466_v19 }
 0x5a0   : > { %v6709_v40 = vadd.f32 %v6708_v46, %v6678_v49 }
 0x5a1   : > { %v6498_v6 = vadd.f32 %v6497_v0, %v6467_v59 }
 0x5a2   : > { %v6710_v7 = vadd.f32 %v6709_v40, %v6679_v8 }
 0x5a3   : > { %v6499_v18 = vadd.f32 %v6498_v6, %v6468_v37 }
 0x5a4   : > { %v6711_v4 = vadd.f32 %v6710_v7, %v6680_v44 }
 0x5a5   : > { %v6500_v41 = vadd.f32 %v6499_v18, %v6469_v5 }
 0x5a6   : > { %v6712_v26 = vadd.f32 %v6711_v4, %v6681_v16 }
 0x5a7   : > { %6501 = vadd.xlane.f32.xlu0 %v6500_v41 }
 0x5a8   : > { %v6713_v47 = vadd.f32 %v6712_v26, %v6682_v28 }
 0x5aa   : > { %v6714_v29 = vadd.f32 %v6713_v47, %v6683_v53 }
 0x5ac   : > { %v6715_v31 = vadd.f32 %v6714_v29, %v6684_v57 }
 0x5ae   : > { %v6716_v52 = vadd.f32 %v6715_v31, %v6685_v38 }
 0x5b0   : > { %v6717_v45 = vadd.f32 %v6716_v52, %v6686_v23 }
 0x5b2   : > { %v6718_v42 = vadd.f32 %v6717_v45, %v6687_v12 }
 0x5b4   : > { %6719 = vadd.xlane.f32.xlu0 %v6718_v42 }
 0x5ca   : > { %v5848_v36 = vpop.xlane.xlu1 %5847 }
 0x5cb   : > { %v5849_v13 = vrot.slane %v5848_v36, 4 }
 0x5cd   : > { %v5850_v22 = vadd.f32 %v5849_v13, %v5848_v36  ;;  %v5739_v30 = vpop.xlane.xlu0 %5738 }
 0x5ce   : > { %v5740_v2 = vrot.slane %v5739_v30, 4 }
 0x5cf   : > { %v5851_v15 = vrot.slane %v5850_v22, 2 }
 0x5d0   : > { %v5741_v21 = vadd.f32 %v5740_v2, %v5739_v30 }
 0x5d1   : > { %v5852_v17 = vadd.f32 %v5851_v15, %v5850_v22 }
 0x5d2   : > { %v5742_v56 = vrot.slane %v5741_v21, 2 }
 0x5d3   : > { %v5853_v1 = vrot.slane %v5852_v17, 1 }
 0x5d4   : > { %v5743_v25 = vadd.f32 %v5742_v56, %v5741_v21 }
 0x5d5   : > { %v5854_v58 = vadd.f32 %v5853_v1, %v5852_v17  ;;  %v5608_v17 = vlaneseq  ;;  %v5610_v1 = vld [vmem:[#allocation12] sm:$0x1] }
 0x5d6   : > { %v5744_v11 = vrot.slane %v5743_v25, 1 }
 0x5d7   : > { %v5609_v21 = vand.u32 127, %v5608_v17 }
 0x5d8   : > { %v5745_v27 = vadd.f32 %v5744_v11, %v5743_v25 }
 0x5d9   : > { %vm5747_vm0 = vcmp.eq.s32.totalorder %v5609_v21, 0  ;;  %vm5856_vm1 = vcmp.eq.s32.totalorder %v5609_v21, 1  ;;  %vm5965_vm2 = vcmp.eq.s32.totalorder %v5609_v21, 2  ;;  %vm6074_vm3 = vcmp.eq.s32.totalorder %v5609_v21, 3 }
 0x5da   : > { %8601 = vpush %v5745_v27  ;;  %vm6183_vm4 = vcmp.eq.s32.totalorder %v5609_v21, 4  ;;  %vm6292_vm5 = vcmp.eq.s32.totalorder %v5609_v21, 5  ;;  %vm6401_vm6 = vcmp.eq.s32.totalorder %v5609_v21, 6  ;;  %vm6510_vm7 = vcmp.eq.s32.totalorder %v5609_v21, 7 }
 0x5db   : > { %8603 = vpush %v5854_v58  ;;  %vm6619_vm8 = vcmp.eq.s32.totalorder %v5609_v21, 8  ;;  %vm6728_vm9 = vcmp.eq.s32.totalorder %v5609_v21, 9 }
 0x5e7   : > { %v6175_v50 = vpop.xlane.xlu1 %6174 }
 0x5e8   : > { %v6176_v32 = vrot.slane %v6175_v50, 4 }
 0x5ea   : > { %v6177_v20 = vadd.f32 %v6176_v32, %v6175_v50 }
 0x5ec   : > { %v6178_v49 = vrot.slane %v6177_v20, 2 }
 0x5ee   : > { %v6179_v63 = vadd.f32 %v6178_v49, %v6177_v20 }
 0x5f0   : > { %v6180_v37 = vrot.slane %v6179_v63, 1 }
 0x5f2   : > { %v6181_v8 = vadd.f32 %v6180_v37, %v6179_v63 }
 0x5f6   : > { %v5957_v35 = vpop.xlane.xlu0 %5956 }
 0x5f7   : > { %v5958_v61 = vrot.slane %v5957_v35, 4 }
 0x5f9   : > { %v5959_v3 = vadd.f32 %v5958_v61, %v5957_v35 }
 0x5fb   : > { %v5960_v55 = vrot.slane %v5959_v3, 2 }
 0x5fd   : > { %v5961_v39 = vadd.f32 %v5960_v55, %v5959_v3 }
 0x5ff   : > { %v5962_v19 = vrot.slane %v5961_v39, 1 }
 0x601   : > { %v5963_v24 = vadd.f32 %v5962_v19, %v5961_v39  ;;  %v6393_v44 = vpop.xlane.xlu1 %6392 }
 0x602   : > { %v6394_v40 = vrot.slane %v6393_v44, 4 }
 0x603   : > { %8605 = vpush %v5963_v24 }
 0x604   : > { %v6395_v6 = vadd.f32 %v6394_v40, %v6393_v44 }
 0x606   : > { %v6396_v51 = vrot.slane %v6395_v6, 2 }
 0x608   : > { %v6397_v16 = vadd.f32 %v6396_v51, %v6395_v6 }
 0x60a   : > { %v6398_v62 = vrot.slane %v6397_v16, 1 }
 0x60b   : > { %s8602_s20 = spop %8601 }
 0x60c   : > { %v6399_v57 = vadd.f32 %v6398_v62, %v6397_v16  ;;  %v5748_v56 = vstv %s8602_s20  ;;  %s8604_s21 = spop %8603 }
 0x60d   : > { %v5749_v25 = vsel %vm5747_vm0, %v5748_v56, 0.0  ;;  %v5857_v58 = vstv %s8604_s21 }
 0x60e   : > { %v6066_v14 = vpop.xlane.xlu0 %6065  ;;  %v5750_v11 = vadd.f32 %v5749_v25, %v5610_v1  ;;  %v5858_v35 = vsel %vm5856_vm1, %v5857_v58, 0.0 }
 0x60f   : > { %v6067_v9 = vrot.slane %v6066_v14, 4 }
 0x610   : > { %v5859_v61 = vadd.f32 %v5858_v35, %v5750_v11 }
 0x611   : > { %v6068_v48 = vadd.f32 %v6067_v9, %v6066_v14 }
 0x613   : > { %v6069_v46 = vrot.slane %v6068_v48, 2 }
 0x615   : > { %v6070_v59 = vadd.f32 %v6069_v46, %v6068_v48 }
 0x617   : > { %v6071_v0 = vrot.slane %v6070_v59, 1 }
 0x619   : > { %v6072_v34 = vadd.f32 %v6071_v0, %v6070_v59 }
 0x61b   : > { %8607 = vpush %v6072_v34  ;;  %v6611_v5 = vpop.xlane.xlu1 %6610 }
 0x61c   : > { %8609 = vpush %v6181_v8  ;;  %v6612_v28 = vrot.slane %v6611_v5, 4  ;;  %v6733_v8 = vshrl.u32 %v5608_v17, 7 }
 0x61e   : > { %v6613_v43 = vadd.f32 %v6612_v28, %v6611_v5  ;;  %v6738_v51 = vsub.s32 0, %v6733_v8  ;;  %vm6734_vm10 = vcmp.eq.s32.totalorder %v6733_v8, 0 }
 0x620   : > { %v6614_v47 = vrot.slane %v6613_v43, 2 }
 0x622   : > { %v6615_v38 = vadd.f32 %v6614_v47, %v6613_v43 }
 0x624   : > { %v6616_v33 = vrot.slane %v6615_v38, 1 }
 0x626   : > { %v6617_v45 = vadd.f32 %v6616_v33, %v6615_v38 }
 0x627   : > { %v6284_v10 = vpop.xlane.xlu0 %6283 }
 0x628   : > { %v6285_v7 = vrot.slane %v6284_v10, 4 }
 0x62a   : > { %v6286_v18 = vadd.f32 %v6285_v7, %v6284_v10 }
 0x62c   : > { %v6287_v4 = vrot.slane %v6286_v18, 2 }
 0x62e   : > { %v6288_v41 = vadd.f32 %v6287_v4, %v6286_v18 }
 0x630   : > { %v6289_v26 = vrot.slane %v6288_v41, 1 }
 0x632   : > { %v6290_v53 = vadd.f32 %v6289_v26, %v6288_v41 }
 0x634   : > { %v6502_v60 = vpop.xlane.xlu0 %6501  ;;  %8611 = vpush %v6290_v53  ;;  %s8606_s22 = spop %8605 }
 0x635   : > { %v6503_v54 = vrot.slane %v6502_v60, 4  ;;  %8613 = vpush %v6399_v57  ;;  %v5966_v27 = vstv %s8606_s22 }
 0x636   : > { %v5967_v55 = vsel %vm5965_vm2, %v5966_v27, 0.0 }
 0x637   : > { %v6504_v29 = vadd.f32 %v6503_v54, %v6502_v60  ;;  %v5968_v19 = vadd.f32 %v5967_v55, %v5859_v61 }
 0x639   : > { %v6505_v23 = vrot.slane %v6504_v29, 2 }
 0x63b   : > { %v6506_v31 = vadd.f32 %v6505_v23, %v6504_v29 }
 0x63d   : > { %v6507_v52 = vrot.slane %v6506_v31, 1 }
 0x63f   : > { %v6508_v12 = vadd.f32 %v6507_v52, %v6506_v31 }
 0x641   : > { %v6720_v42 = vpop.xlane.xlu0 %6719  ;;  %8615 = vpush %v6508_v12 }
 0x642   : > { %v6721_v36 = vrot.slane %v6720_v42, 4  ;;  %8617 = vpush %v6617_v45 }
 0x644   : > { %v6722_v13 = vadd.f32 %v6721_v36, %v6720_v42 }
 0x646   : > { %v6723_v22 = vrot.slane %v6722_v13, 2 }
 0x648   : > { %v6724_v15 = vadd.f32 %v6723_v22, %v6722_v13 }
 0x64a   : > { %v6725_v30 = vrot.slane %v6724_v15, 1 }
 0x64c   : > { %v6726_v2 = vadd.f32 %v6725_v30, %v6724_v15  ;;  %s8608_s12 = spop %8607 }
 0x64d   : > { %v6075_v3 = vstv %s8608_s12  ;;  %s8610_s23 = spop %8609 }
 0x64e   : > { %8619 = vpush %v6726_v2  ;;  %v6076_v39 = vsel %vm6074_vm3, %v6075_v3, 0.0  ;;  %v6184_v50 = vstv %s8610_s23 }
 0x64f   : > { %v6077_v24 = vadd.f32 %v6076_v39, %v5968_v19  ;;  %v6185_v20 = vsel %vm6183_vm4, %v6184_v50, 0.0 }
 0x651   : > { %v6186_v49 = vadd.f32 %v6185_v20, %v6077_v24 }
 0x665   : > { %s8612_s25 = spop %8611 }
 0x666   : > { %v6293_v32 = vstv %s8612_s25  ;;  %s8614_s9 = spop %8613 }
 0x667   : > { %v6294_v14 = vsel %vm6292_vm5, %v6293_v32, 0.0  ;;  %v6402_v48 = vstv %s8614_s9 }
 0x668   : > { %v6295_v9 = vadd.f32 %v6294_v14, %v6186_v49  ;;  %v6403_v46 = vsel %vm6401_vm6, %v6402_v48, 0.0 }
 0x66a   : > { %v6404_v59 = vadd.f32 %v6403_v46, %v6295_v9 }
 0x672   : > { %s8616_s29 = spop %8615 }
 0x673   : > { %v6511_v63 = vstv %s8616_s29  ;;  %s8618_s8 = spop %8617 }
 0x674   : > { %v6512_v37 = vsel %vm6510_vm7, %v6511_v63, 0.0  ;;  %v6620_v34 = vstv %s8618_s8 }
 0x675   : > { %v6513_v0 = vadd.f32 %v6512_v37, %v6404_v59  ;;  %v6621_v44 = vsel %vm6619_vm8, %v6620_v34, 0.0 }
 0x677   : > { %v6622_v40 = vadd.f32 %v6621_v44, %v6513_v0 }
 0x67f   : > { %s8620_s30 = spop %8619 }
 0x680   : > { %v6729_v6 = vstv %s8620_s30 }
 0x681   : > { %v6730_v10 = vsel %vm6728_vm9, %v6729_v6, 0.0 }
 0x682   : > { %v6731_v7 = vadd.f32 %v6730_v10, %v6622_v40 }
 0x684   : > { %v6739_v5 = vrot.slane %v6731_v7, %v6738_v51 }
 0x686   : > { %v6741_v18 = vsel %vm6734_vm10, %v6739_v5, 0.0 }
 0x687   : > { %6742 = vst [vmem:[%s358_s19] sm:$0xff] %v6741_v18 }
 0x688 PF: > { %s21_s24 = sadd.s32 1, %s8902_s24  }
 0x689   : > { %p18_p9 = scmp.ge.s32.totalorder %s21_s24, 4  }
 0x68b   :  { %20 = sbr.rel (!%p18_p9) target bundleno = 4 (0x4), region = 120 }
 0x692   :  { %6762 = vsyncpa [#allocation5], 1 }
 0x693   :  { %6764 = vsyncpa [#allocation5 + $0x1], 1 }
 0x694   :  { %6765 = vsyncpa [#allocation7], 1 }
 0x695   :  { %6766 = vsyncpa [#allocation10], 1 }
 0x696   :  { %6767 = vsyncpa [#allocation13], 1 }

</bundles_post_ra>
